<compile_context>
chip_gen: v7x
topology: tpu7x:2x2x1
jax: 0.10.0
libtpu: 0.0.40
codegen_flags: <defaults>
</compile_context>

<pallas_src>
import functools

import jax
import jax.numpy as jnp
import numpy as np
from jax.experimental import pallas as pl
from jax.experimental.pallas import tpu as pltpu


def _dgt_kernel(x_ref, adj_ref, oneh_ref,
                Wp_ref, bp_ref,
                Wq_ref, bq_ref, Wk_ref, bk_ref, Wv_ref, bv_ref,
                Ws_ref, bs_ref, wba_ref, wbr_ref,
                g1_ref, b1_ref, Wf1_ref, bf1_ref, Wf2_ref, bf2_ref,
                g2_ref, b2_ref,
                Wg1_ref, bg1_ref, wg2_ref, bg2_ref,
                Wo1_ref, bo1_ref, Wo2_ref, bo2_ref,
                out_ref, x_state, *, hidden, heads, softmax_bf16):
    f32 = jnp.float32
    bf16 = jnp.bfloat16
    NEG = f32(-1e30)
    EPS = f32(1e-5)
    D = hidden

    l = pl.program_id(0)
    n_layers = pl.num_programs(0)

    def mm(a, b):      # a[M,K] @ b[K,N]        (bf16 operands, f32 accumulation)
        return jax.lax.dot_general(a, b, (((1,), (0,)), ((), ())),
                                   preferred_element_type=jnp.float32)

    def mm_rt(a, b):   # a[M,K] @ b[N,K]^T -> [M,N]   (q_i . k_j)
        return jax.lax.dot_general(a, b, (((1,), (1,)), ((), ())),
                                   preferred_element_type=jnp.float32)

    def mm_lt(a, b):   # a[K,M]^T @ b[K,N] -> [M,N]
        return jax.lax.dot_general(a, b, (((0,), (0,)), ((), ())),
                                   preferred_element_type=jnp.float32)

    def erf(v):
        # Abramowitz & Stegun 7.1.26, |err| <= 1.5e-7 (f32 stand-in for torch's erf GELU)
        a1, a2, a3, a4, a5, p = (0.254829592, -0.284496736, 1.421413741,
                                 -1.453152027, 1.061405429, 0.3275911)
        av = jnp.abs(v)
        t = 1.0 / (1.0 + p * av)
        poly = ((((a5 * t + a4) * t + a3) * t + a2) * t + a1) * t
        y = 1.0 - poly * jnp.exp(-av * av)
        return jnp.where(v >= 0, y, -y)

    def gelu(v):       # exact (erf-based) GELU, matching F.gelu / nn.GELU() defaults
        return 0.5 * v * (1.0 + erf(v * f32(0.7071067811865476)))

    def layer_norm(v, gamma, beta):
        mu = jnp.mean(v, axis=-1, keepdims=True)
        var = jnp.mean((v - mu) ** 2, axis=-1, keepdims=True)
        return (v - mu) * jax.lax.rsqrt(var + EPS) * gamma + beta

    # ---- input projection (first grid step only) ----
    @pl.when(l == 0)
    def _():
        x0 = x_ref[...].astype(bf16)
        x_state[...] = mm(x0, Wp_ref[...]) + bp_ref[...]          # [N, D] f32

    # ---- transformer block l (the per-layer refs hold the l-th slice) ----
    x = x_state[...]                                              # [N, D] f32
    xb = x.astype(bf16)
    adj = adj_ref[...]                                            # [N_dst, N_src] bf16 multiplicities
    scale = f32(1.0 / float(np.sqrt(hidden)))

    # fused lane-dense Q/K/V projections: one [N,D]@[D,H*D] MXU pass each; 1/sqrt(d)
    # folded into q once for all heads.
    q_all = (mm(xb, Wq_ref[0]) + bq_ref[0]) * scale               # [N, H*D] f32
    k_all = mm(xb, Wk_ref[0]) + bk_ref[0]
    v_all = mm(xb, Wv_ref[0]) + bv_ref[0]

    acc = jnp.zeros(x.shape, f32)
    for h in range(heads):
        sl = slice(h * D, (h + 1) * D)                            # static per-head lane slice
        s = mm_rt(q_all[:, sl].astype(bf16), k_all[:, sl].astype(bf16))   # [N_dst, N_src] f32
        # No mask/select: exp(s - rowmax) * adj zeroes non-edges.  Row max includes
        # non-edge scores; safe unless edge scores trail it by > ~88 (exp underflow).
        s = s - jnp.max(s, axis=-1, keepdims=True)
        if softmax_bf16:
            # v6e/v7x: bf16 VPU/EUP path for the N^2 numerator; max/denominator stay f32.
            e = jnp.exp(s.astype(bf16)) * adj
            denom = jnp.maximum(jnp.sum(e, axis=-1, keepdims=True, dtype=f32), f32(1e-30))
            p = e * pl.reciprocal(denom, approx=True).astype(bf16)
        else:
            # v5e and older: no bf16 VPU/EUP -> keep the numerator in f32.
            e = jnp.exp(s) * adj                                  # f32 * bf16 -> f32
            denom = jnp.maximum(jnp.sum(e, axis=-1, keepdims=True), f32(1e-30))
            p = (e * pl.reciprocal(denom, approx=True)).astype(bf16)
        acc = acc + mm(p, v_all[:, sl].astype(bf16))              # sum_j alpha_ij * v_j
    attn = acc * f32(1.0 / heads)                                 # concat=False -> mean over heads

    # root weight + beta gate (TransformerConv beta=True) via lane-reduces (no 1-wide matmuls)
    x_r = mm(xb, Ws_ref[0]) + bs_ref[0]
    beta_logit = (jnp.sum(attn * wba_ref[0], axis=-1, keepdims=True)
                  + jnp.sum(x_r * wbr_ref[0], axis=-1, keepdims=True))
    beta = jax.nn.sigmoid(beta_logit)
    h_conv = beta * x_r + (1.0 - beta) * attn

    x = layer_norm(gelu(h_conv) + x, g1_ref[0], b1_ref[0])
    f = gelu(mm(x.astype(bf16), Wf1_ref[0]) + bf1_ref[0])
    f = mm(f.astype(bf16), Wf2_ref[0]) + bf2_ref[0]
    x = layer_norm(f + x, g2_ref[0], b2_ref[0])
    x_state[...] = x

    # ---- AttentionalAggregation pooling + output MLP (last grid step only) ----
    @pl.when(l == n_layers - 1)
    def _():
        xb_out = x.astype(bf16)
        gate_h = jax.nn.relu(mm(xb_out, Wg1_ref[...]) + bg1_ref[...])
        gate = jnp.sum(gate_h * wg2_ref[...], axis=-1, keepdims=True) + bg2_ref[...]   # [N, 1]
        oneh = oneh_ref[...].astype(f32)                          # [N, G] membership (bf16 exact)
        sg = jnp.where(oneh > 0, gate, NEG)
        sg = sg - jnp.max(sg, axis=0, keepdims=True)
        eg = jnp.exp(sg) * oneh
        dg = jnp.maximum(jnp.sum(eg, axis=0, keepdims=True), f32(1e-30))
        alpha = (eg * pl.reciprocal(dg, approx=True)).astype(bf16)
        pooled = mm_lt(alpha, xb_out)                             # [G, D]
        o = gelu(mm(pooled.astype(bf16), Wo1_ref[...]) + bo1_ref[...])
        out_ref[...] = mm(o.astype(bf16), Wo2_ref[...]) + bo2_ref[...]                 # [G, 2]


def _padded_vmem_bytes(shape, dtype):
    """Lane (128) / sublane (8 x dtype-packing) padded VMEM footprint of one buffer."""
    itemsize = jnp.dtype(dtype).itemsize
    pack = max(1, 4 // itemsize)
    dims = list(shape)
    if not dims:
        dims = [1, 1]
    elif len(dims) == 1:
        dims = [1, dims[0]]
    lanes = -(-int(dims[-1]) // 128) * 128
    subl = -(-int(dims[-2]) // (8 * pack)) * (8 * pack)
    lead = 1
    for d in dims[:-2]:
        lead *= int(d)
    return lead * subl * lanes * itemsize


def deep_graph_transformer(x, edge_index, batch, params, *,
                           num_graphs, hidden, heads, layers):
    """Dense-ify the graph structure, re-layout params, run the forward in one pallas_call."""
    N = x.shape[0]
    D, H, L = hidden, heads, layers
    bf16 = jnp.bfloat16

    src, dst = edge_index[0], edge_index[1]
    # adj[i, j] = number of edges j -> i (PyG source_to_target flow).  Built directly in
    # bf16: exact for small integer multiplicities, halves the N^2 HBM scatter traffic.
    adj = jnp.zeros((N, N), bf16).at[dst, src].add(jnp.ones((), bf16))
    oneh = jax.nn.one_hot(batch, num_graphs, dtype=bf16)                   # [N, G]

    (Wp, bp, Wq, bq, Wk, bk, Wv, bv, Ws, bs, Wb,
     g1, b1, Wf1, bf1, Wf2, bf2, g2, b2,
     Wg1, bg1, Wg2, bg2, Wo1, bo1, Wo2, bo2) = params

    # beta_logit = attn@Wb[:D] + x_r@Wb[D:2D] + (attn-x_r)@Wb[2D:]
    #            = attn . (Wb[:D]+Wb[2D:]) + x_r . (Wb[D:2D]-Wb[2D:])
    wba = (Wb[:, :D, 0] + Wb[:, 2 * D:, 0])[:, None, :]                    # [L, 1, D]
    wbr = (Wb[:, D:2 * D, 0] - Wb[:, 2 * D:, 0])[:, None, :]               # [L, 1, D]
    wg2 = Wg2.T                                                            # [1, D] lane-reduce row

    inputs = [x.astype(jnp.float32), adj, oneh,
              Wp.astype(bf16), bp,
              Wq.astype(bf16), bq, Wk.astype(bf16), bk, Wv.astype(bf16), bv,
              Ws.astype(bf16), bs, wba, wbr,
              g1, b1, Wf1.astype(bf16), bf1, Wf2.astype(bf16), bf2, g2, b2,
              Wg1.astype(bf16), bg1, wg2, bg2,
              Wo1.astype(bf16), bo1, Wo2.astype(bf16), bo2]

    N_CONST_HEAD = 5      # x, adj, oneh, Wp, bp
    N_LAYER = 18          # per-layer stacks (leading dim = layers), streamed by the grid
    const_head = inputs[:N_CONST_HEAD]
    layer_inputs = inputs[N_CONST_HEAD:N_CONST_HEAD + N_LAYER]
    const_tail = inputs[N_CONST_HEAD + N_LAYER:]

    def const_spec(a, single_buffer):
        zeros = (0,) * a.ndim
        idx = lambda l, _z=zeros: _z
        shape = tuple(a.shape)
        if single_buffer:
            try:
                # Block index never changes over the layer grid -> one buffer is enough.
                return pl.BlockSpec(shape, idx, pipeline_mode=pl.Buffered(1))
            except (TypeError, AttributeError):
                pass
        return pl.BlockSpec(shape, idx)

    def layer_spec(a):    # one layer slice per grid step -> auto double-buffered from HBM
        tail = (0,) * (a.ndim - 1)
        return pl.BlockSpec((1,) + tuple(a.shape[1:]), lambda l, _t=tail: (l,) + _t)

    # ---- VMEM budget: padded residency, one layer slice x 2 buffers, N^2 temporaries ----
    resident = sum(_padded_vmem_bytes(a.shape, a.dtype) for a in const_head + const_tail)
    resident += sum(2 * _padded_vmem_bytes(a.shape[1:], a.dtype) for a in layer_inputs)
    resident += _padded_vmem_bytes((N, D), jnp.float32)                    # x_state scratch
    resident += 2 * _padded_vmem_bytes((num_graphs, 2), jnp.float32)       # output block
    n_sub = -(-N // 8) * 8
    n_lane = -(-N // 128) * 128
    hd_lane = -(-(H * D) // 128) * 128
    scratch_budget = 4 * n_sub * n_lane * 4 + 4 * n_sub * hd_lane * 4      # s/e/p + q/k/v temps

    try:
        phys_vmem = int(pltpu.get_tpu_info().vmem_capacity_bytes)
    except Exception:
        phys_vmem = 64 * 1024 * 1024                                       # conservative (v7x)
    ceiling = int(phys_vmem * 4 // 5)      # ~80%: headroom for Mosaic internal scratch
    vmem_limit = max(16 << 20, min(ceiling, resident + scratch_budget + (4 << 20)))

    # bf16 softmax numerator only where the VPU/EUP have bf16 paths (v6e / v7x).
    try:
        kind = jax.devices()[0].device_kind.lower()
    except Exception:
        kind = ""
    softmax_bf16 = any(tag in kind for tag in ("v6", "v7", "7x"))

    out_shape = jax.ShapeDtypeStruct((num_graphs, 2), jnp.float32)
    out_spec = pl.BlockSpec((num_graphs, 2), lambda l: (0, 0))
    kernel = functools.partial(_dgt_kernel, hidden=D, heads=H, softmax_bf16=softmax_bf16)

    def run(single_buffer_consts):
        in_specs = ([const_spec(a, single_buffer_consts) for a in const_head]
                    + [layer_spec(a) for a in layer_inputs]
                    + [const_spec(a, single_buffer_consts) for a in const_tail])
        grid_spec = pltpu.PrefetchScalarGridSpec(
            num_scalar_prefetch=0,
            grid=(L,),
            in_specs=in_specs,
            out_specs=out_spec,
            scratch_shapes=[pltpu.VMEM((N, D), jnp.float32)],   # persistent node features
        )
        return pl.pallas_call(
            kernel,
            out_shape=out_shape,
            grid_spec=grid_spec,
            compiler_params=pltpu.CompilerParams(
                dimension_semantics=("arbitrary",),             # x_{l+1} depends on x_l
                vmem_limit_bytes=int(vmem_limit)),
        )(*inputs)

    try:
        return run(True)
    except Exception:
        # pipeline_mode=pl.Buffered(1) not supported on this jax/Mosaic build ->
        # fall back to default double buffering (identical kernel body / semantics).
        return run(False)


def init_params(key, in_dim, hidden, heads, layers):
    keys = iter(jax.random.split(key, 256))

    def W(fi, fo):
        return jax.random.normal(next(keys), (fi, fo), jnp.float32) / np.sqrt(fi).astype(np.float32)

    def b(fo):
        return jax.random.normal(next(keys), (1, fo), jnp.float32) * 0.02

    p = [W(in_dim, hidden), b(hidden)]                                   # input_proj
    Wq, bq, Wk, bk, Wv, bv = [], [], [], [], [], []
    Ws, bs, Wb = [], [], []
    g1, b1, Wf1, bf1, Wf2, bf2, g2, b2 = [], [], [], [], [], [], [], []
    for _ in range(layers):
        Wq.append(W(hidden, heads * hidden)); bq.append(b(heads * hidden))
        Wk.append(W(hidden, heads * hidden)); bk.append(b(heads * hidden))
        Wv.append(W(hidden, heads * hidden)); bv.append(b(heads * hidden))
        Ws.append(W(hidden, hidden)); bs.append(b(hidden))
        Wb.append(W(3 * hidden, 1))                                      # lin_beta (no bias)
        g1.append(jnp.ones((1, hidden), jnp.float32)); b1.append(jnp.zeros((1, hidden), jnp.float32))
        Wf1.append(W(hidden, 2 * hidden)); bf1.append(b(2 * hidden))
        Wf2.append(W(2 * hidden, hidden)); bf2.append(b(hidden))
        g2.append(jnp.ones((1, hidden), jnp.float32)); b2.append(jnp.zeros((1, hidden), jnp.float32))
    st = lambda xs: jnp.stack(xs, axis=0)
    p += [st(Wq), st(bq), st(Wk), st(bk), st(Wv), st(bv),
          st(Ws), st(bs), st(Wb),
          st(g1), st(b1), st(Wf1), st(bf1), st(Wf2), st(bf2), st(g2), st(b2)]
    p += [W(hidden, hidden), b(hidden), W(hidden, 1), b(1)]              # pool gate_nn
    p += [W(hidden, hidden), b(hidden), W(hidden, 2), b(2)]              # mlp_out
    return p


if __name__ == "__main__":
    IN_DIM, HIDDEN, HEADS, LAYERS = 4, 32, 4, 2
    N_PER_G, G = 8, 2
    N = N_PER_G * G

    key = jax.random.PRNGKey(0)
    kx, kp = jax.random.split(key)
    x = jax.random.normal(kx, (N, IN_DIM), jnp.float32)

    # deterministic bidirectional chain within each graph
    src, dst = [], []
    for g in range(G):
        base = g * N_PER_G
        for i in range(N_PER_G - 1):
            src += [base + i, base + i + 1]
            dst += [base + i + 1, base + i]
    edge_index = jnp.array([src, dst], dtype=jnp.int32)        # [2, E]
    batch = jnp.array(sum(([g] * N_PER_G for g in range(G)), []), dtype=jnp.int32)

    params = init_params(kp, IN_DIM, HIDDEN, HEADS, LAYERS)

    out = deep_graph_transformer(x, edge_index, batch, params,
                                 num_graphs=G, hidden=HIDDEN, heads=HEADS, layers=LAYERS)
    out = jax.block_until_ready(out)
    assert out.shape == (G, 2) and bool(jnp.all(jnp.isfinite(out)))
    print("KERNEL_OK")
</pallas_src>

<mosaic_0001>
module attributes {stable_mosaic.version = 11 : i64} {
  func.func @_dgt_kernel(%arg0: i32, %arg1: memref<16x4xf32, #tpu.memory_space<vmem>>, %arg2: memref<16x16xbf16, #tpu.memory_space<vmem>>, %arg3: memref<16x2xbf16, #tpu.memory_space<vmem>>, %arg4: memref<4x32xbf16, #tpu.memory_space<vmem>>, %arg5: memref<1x32xf32, #tpu.memory_space<vmem>>, %arg6: memref<1x32x128xbf16, #tpu.memory_space<vmem>>, %arg7: memref<1x1x128xf32, #tpu.memory_space<vmem>>, %arg8: memref<1x32x128xbf16, #tpu.memory_space<vmem>>, %arg9: memref<1x1x128xf32, #tpu.memory_space<vmem>>, %arg10: memref<1x32x128xbf16, #tpu.memory_space<vmem>>, %arg11: memref<1x1x128xf32, #tpu.memory_space<vmem>>, %arg12: memref<1x32x32xbf16, #tpu.memory_space<vmem>>, %arg13: memref<1x1x32xf32, #tpu.memory_space<vmem>>, %arg14: memref<1x1x32xf32, #tpu.memory_space<vmem>>, %arg15: memref<1x1x32xf32, #tpu.memory_space<vmem>>, %arg16: memref<1x1x32xf32, #tpu.memory_space<vmem>>, %arg17: memref<1x1x32xf32, #tpu.memory_space<vmem>>, %arg18: memref<1x32x64xbf16, #tpu.memory_space<vmem>>, %arg19: memref<1x1x64xf32, #tpu.memory_space<vmem>>, %arg20: memref<1x64x32xbf16, #tpu.memory_space<vmem>>, %arg21: memref<1x1x32xf32, #tpu.memory_space<vmem>>, %arg22: memref<1x1x32xf32, #tpu.memory_space<vmem>>, %arg23: memref<1x1x32xf32, #tpu.memory_space<vmem>>, %arg24: memref<32x32xbf16, #tpu.memory_space<vmem>>, %arg25: memref<1x32xf32, #tpu.memory_space<vmem>>, %arg26: memref<1x32xf32, #tpu.memory_space<vmem>>, %arg27: memref<1x1xf32, #tpu.memory_space<vmem>>, %arg28: memref<32x32xbf16, #tpu.memory_space<vmem>>, %arg29: memref<1x32xf32, #tpu.memory_space<vmem>>, %arg30: memref<32x2xbf16, #tpu.memory_space<vmem>>, %arg31: memref<1x2xf32, #tpu.memory_space<vmem>>, %arg32: memref<2x2xf32, #tpu.memory_space<vmem>>, %arg33: memref<16x32xf32, #tpu.memory_space<vmem>>) attributes {dimension_semantics = [#tpu.dimension_semantics<arbitrary>], iteration_bounds = array<i64: 2>, scalar_prefetch = 0 : i64, scratch_operands = 1 : i64, tpu.core_type = #tpu.core_type<tc>, window_params = [{pipeline_mode = #tpu.pipeline_mode<synchronous>, transform_indices = @transform_0, window_bounds = array<i64: 16, 4>}, {pipeline_mode = #tpu.pipeline_mode<synchronous>, transform_indices = @transform_1, window_bounds = array<i64: 16, 16>}, {pipeline_mode = #tpu.pipeline_mode<synchronous>, transform_indices = @transform_2, window_bounds = array<i64: 16, 2>}, {pipeline_mode = #tpu.pipeline_mode<synchronous>, transform_indices = @transform_3, window_bounds = array<i64: 4, 32>}, {pipeline_mode = #tpu.pipeline_mode<synchronous>, transform_indices = @transform_4, window_bounds = array<i64: 1, 32>}, {transform_indices = @transform_5, window_bounds = array<i64: 1, 32, 128>}, {transform_indices = @transform_6, window_bounds = array<i64: 1, 1, 128>}, {transform_indices = @transform_7, window_bounds = array<i64: 1, 32, 128>}, {transform_indices = @transform_8, window_bounds = array<i64: 1, 1, 128>}, {transform_indices = @transform_9, window_bounds = array<i64: 1, 32, 128>}, {transform_indices = @transform_10, window_bounds = array<i64: 1, 1, 128>}, {transform_indices = @transform_11, window_bounds = array<i64: 1, 32, 32>}, {transform_indices = @transform_12, window_bounds = array<i64: 1, 1, 32>}, {transform_indices = @transform_13, window_bounds = array<i64: 1, 1, 32>}, {transform_indices = @transform_14, window_bounds = array<i64: 1, 1, 32>}, {transform_indices = @transform_15, window_bounds = array<i64: 1, 1, 32>}, {transform_indices = @transform_16, window_bounds = array<i64: 1, 1, 32>}, {transform_indices = @transform_17, window_bounds = array<i64: 1, 32, 64>}, {transform_indices = @transform_18, window_bounds = array<i64: 1, 1, 64>}, {transform_indices = @transform_19, window_bounds = array<i64: 1, 64, 32>}, {transform_indices = @transform_20, window_bounds = array<i64: 1, 1, 32>}, {transform_indices = @transform_21, window_bounds = array<i64: 1, 1, 32>}, {transform_indices = @transform_22, window_bounds = array<i64: 1, 1, 32>}, {pipeline_mode = #tpu.pipeline_mode<synchronous>, transform_indices = @transform_23, window_bounds = array<i64: 32, 32>}, {pipeline_mode = #tpu.pipeline_mode<synchronous>, transform_indices = @transform_24, window_bounds = array<i64: 1, 32>}, {pipeline_mode = #tpu.pipeline_mode<synchronous>, transform_indices = @transform_25, window_bounds = array<i64: 1, 32>}, {pipeline_mode = #tpu.pipeline_mode<synchronous>, transform_indices = @transform_26, window_bounds = array<i64: 1, 1>}, {pipeline_mode = #tpu.pipeline_mode<synchronous>, transform_indices = @transform_27, window_bounds = array<i64: 32, 32>}, {pipeline_mode = #tpu.pipeline_mode<synchronous>, transform_indices = @transform_28, window_bounds = array<i64: 1, 32>}, {pipeline_mode = #tpu.pipeline_mode<synchronous>, transform_indices = @transform_29, window_bounds = array<i64: 32, 2>}, {pipeline_mode = #tpu.pipeline_mode<synchronous>, transform_indices = @transform_30, window_bounds = array<i64: 1, 2>}, {pipeline_mode = #tpu.pipeline_mode<synchronous>, transform_indices = @transform_31, window_bounds = array<i64: 2, 2>}]} {
    %c0_i32 = arith.constant 0 : i32
    %0 = arith.cmpi eq, %arg0, %c0_i32 : i32
    %1 = arith.extui %0 : i1 to i32
    %c0_i32_0 = arith.constant 0 : i32
    %2 = arith.cmpi ne, %1, %c0_i32_0 : i32
    scf.if %2 {
      %c0_134 = arith.constant 0 : index
      %c0_135 = arith.constant 0 : index
      %314 = vector.load %arg1[%c0_134, %c0_135] : memref<16x4xf32, #tpu.memory_space<vmem>>, vector<16x4xf32>
      %315 = arith.truncf %314 : vector<16x4xf32> to vector<16x4xbf16>
      %c0_136 = arith.constant 0 : index
      %c0_137 = arith.constant 0 : index
      %316 = vector.load %arg4[%c0_136, %c0_137] : memref<4x32xbf16, #tpu.memory_space<vmem>>, vector<4x32xbf16>
      %cst_138 = arith.constant dense<0.000000e+00> : vector<16x32xf32>
      %317 = tpu.matmul %315, %316, %cst_138 {dimension_numbers = #tpu.dot_dimension_numbers<[1], [0], [0], [1], [0, 0, 1, 1], [], []>} : vector<16x4xbf16>, vector<4x32xbf16>, vector<16x32xf32> -> vector<16x32xf32>
      %c0_139 = arith.constant 0 : index
      %c0_140 = arith.constant 0 : index
      %318 = vector.load %arg5[%c0_139, %c0_140] : memref<1x32xf32, #tpu.memory_space<vmem>>, vector<1x32xf32>
      %319 = vector.broadcast %318 : vector<1x32xf32> to vector<16x32xf32>
      %320 = arith.addf %317, %319 : vector<16x32xf32>
      %c0_141 = arith.constant 0 : index
      %c0_142 = arith.constant 0 : index
      %321 = vector.load %arg33[%c0_141, %c0_142] : memref<16x32xf32, #tpu.memory_space<vmem>>, vector<16x32xf32>
      tpu.vector_store %arg33[%c0_141, %c0_142], %320 {strides = array<i32>} : memref<16x32xf32, #tpu.memory_space<vmem>>, vector<16x32xf32>,
    } else {
    }
    %c0 = arith.constant 0 : index
    %c0_1 = arith.constant 0 : index
    %3 = vector.load %arg33[%c0, %c0_1] : memref<16x32xf32, #tpu.memory_space<vmem>>, vector<16x32xf32>
    %4 = arith.truncf %3 : vector<16x32xf32> to vector<16x32xbf16>
    %c0_2 = arith.constant 0 : index
    %c0_3 = arith.constant 0 : index
    %5 = vector.load %arg2[%c0_2, %c0_3] : memref<16x16xbf16, #tpu.memory_space<vmem>>, vector<16x16xbf16>
    %c0_4 = arith.constant 0 : index
    %c0_5 = arith.constant 0 : index
    %c0_6 = arith.constant 0 : index
    %6 = vector.load %arg6[%c0_4, %c0_5, %c0_6] : memref<1x32x128xbf16, #tpu.memory_space<vmem>>, vector<1x32x128xbf16>
    %7 = vector.shape_cast %6 : vector<1x32x128xbf16> to vector<32x128xbf16>
    %cst = arith.constant dense<0.000000e+00> : vector<16x128xf32>
    %8 = tpu.matmul %4, %7, %cst {dimension_numbers = #tpu.dot_dimension_numbers<[1], [0], [0], [1], [0, 0, 1, 1], [], []>} : vector<16x32xbf16>, vector<32x128xbf16>, vector<16x128xf32> -> vector<16x128xf32>
    %c0_7 = arith.constant 0 : index
    %c0_8 = arith.constant 0 : index
    %c0_9 = arith.constant 0 : index
    %9 = vector.load %arg7[%c0_7, %c0_8, %c0_9] : memref<1x1x128xf32, #tpu.memory_space<vmem>>, vector<1x1x128xf32>
    %10 = vector.shape_cast %9 : vector<1x1x128xf32> to vector<1x128xf32>
    %11 = vector.broadcast %10 : vector<1x128xf32> to vector<16x128xf32>
    %12 = arith.addf %8, %11 : vector<16x128xf32>
    %cst_10 = arith.constant 0.176776692 : f32
    %13 = vector.broadcast %cst_10 : f32 to vector<16x128xf32>
    %14 = arith.mulf %12, %13 : vector<16x128xf32>
    %c0_11 = arith.constant 0 : index
    %c0_12 = arith.constant 0 : index
    %c0_13 = arith.constant 0 : index
    %15 = vector.load %arg8[%c0_11, %c0_12, %c0_13] : memref<1x32x128xbf16, #tpu.memory_space<vmem>>, vector<1x32x128xbf16>
    %16 = vector.shape_cast %15 : vector<1x32x128xbf16> to vector<32x128xbf16>
    %cst_14 = arith.constant dense<0.000000e+00> : vector<16x128xf32>
    %17 = tpu.matmul %4, %16, %cst_14 {dimension_numbers = #tpu.dot_dimension_numbers<[1], [0], [0], [1], [0, 0, 1, 1], [], []>} : vector<16x32xbf16>, vector<32x128xbf16>, vector<16x128xf32> -> vector<16x128xf32>
    %c0_15 = arith.constant 0 : index
    %c0_16 = arith.constant 0 : index
    %c0_17 = arith.constant 0 : index
    %18 = vector.load %arg9[%c0_15, %c0_16, %c0_17] : memref<1x1x128xf32, #tpu.memory_space<vmem>>, vector<1x1x128xf32>
    %19 = vector.shape_cast %18 : vector<1x1x128xf32> to vector<1x128xf32>
    %20 = vector.broadcast %19 : vector<1x128xf32> to vector<16x128xf32>
    %21 = arith.addf %17, %20 : vector<16x128xf32>
    %c0_18 = arith.constant 0 : index
    %c0_19 = arith.constant 0 : index
    %c0_20 = arith.constant 0 : index
    %22 = vector.load %arg10[%c0_18, %c0_19, %c0_20] : memref<1x32x128xbf16, #tpu.memory_space<vmem>>, vector<1x32x128xbf16>
    %23 = vector.shape_cast %22 : vector<1x32x128xbf16> to vector<32x128xbf16>
    %cst_21 = arith.constant dense<0.000000e+00> : vector<16x128xf32>
    %24 = tpu.matmul %4, %23, %cst_21 {dimension_numbers = #tpu.dot_dimension_numbers<[1], [0], [0], [1], [0, 0, 1, 1], [], []>} : vector<16x32xbf16>, vector<32x128xbf16>, vector<16x128xf32> -> vector<16x128xf32>
    %c0_22 = arith.constant 0 : index
    %c0_23 = arith.constant 0 : index
    %c0_24 = arith.constant 0 : index
    %25 = vector.load %arg11[%c0_22, %c0_23, %c0_24] : memref<1x1x128xf32, #tpu.memory_space<vmem>>, vector<1x1x128xf32>
    %26 = vector.shape_cast %25 : vector<1x1x128xf32> to vector<1x128xf32>
    %27 = vector.broadcast %26 : vector<1x128xf32> to vector<16x128xf32>
    %28 = arith.addf %24, %27 : vector<16x128xf32>
    %cst_25 = arith.constant 0.000000e+00 : f32
    %29 = vector.broadcast %cst_25 : f32 to vector<16x32xf32>
    %30 = vector.extract_strided_slice %14 {offsets = [0, 0], sizes = [16, 32], strides = [1, 1]} : vector<16x128xf32> to vector<16x32xf32>
    %31 = arith.truncf %30 : vector<16x32xf32> to vector<16x32xbf16>
    %32 = vector.extract_strided_slice %21 {offsets = [0, 0], sizes = [16, 32], strides = [1, 1]} : vector<16x128xf32> to vector<16x32xf32>
    %33 = arith.truncf %32 : vector<16x32xf32> to vector<16x32xbf16>
    %cst_26 = arith.constant dense<0.000000e+00> : vector<16x16xf32>
    %34 = tpu.matmul %31, %33, %cst_26 {dimension_numbers = #tpu.dot_dimension_numbers<[1], [1], [0], [0], [0, 0, 1, 0], [], []>} : vector<16x32xbf16>, vector<16x32xbf16>, vector<16x16xf32> -> vector<16x16xf32>
    %cst_27 = arith.constant dense<0xFF800000> : vector<16xf32>
    %35 = vector.multi_reduction <maximumf>, %34, %cst_27 [1] : vector<16x16xf32> to vector<16xf32>
    %36 = vector.shape_cast %35 : vector<16xf32> to vector<16x1xf32>
    %37 = vector.broadcast %36 : vector<16x1xf32> to vector<16x16xf32>
    %38 = arith.subf %34, %37 : vector<16x16xf32>
    %39 = math.exp %38 : vector<16x16xf32>
    %40 = arith.extf %5 : vector<16x16xbf16> to vector<16x16xf32>
    %41 = arith.mulf %39, %40 : vector<16x16xf32>
    %cst_28 = arith.constant dense<0.000000e+00> : vector<16xf32>
    %42 = vector.multi_reduction <add>, %41, %cst_28 [1] : vector<16x16xf32> to vector<16xf32>
    %43 = vector.shape_cast %42 : vector<16xf32> to vector<16x1xf32>
    %cst_29 = arith.constant 1.000000e-30 : f32
    %44 = vector.broadcast %cst_29 : f32 to vector<16x1xf32>
    %45 = arith.maximumf %43, %44 : vector<16x1xf32>
    %46 = tpu.reciprocal %45 {approx = true} : vector<16x1xf32> -> vector<16x1xf32>
    %47 = vector.broadcast %46 : vector<16x1xf32> to vector<16x16xf32>
    %48 = arith.mulf %41, %47 : vector<16x16xf32>
    %49 = arith.truncf %48 : vector<16x16xf32> to vector<16x16xbf16>
    %50 = vector.extract_strided_slice %28 {offsets = [0, 0], sizes = [16, 32], strides = [1, 1]} : vector<16x128xf32> to vector<16x32xf32>
    %51 = arith.truncf %50 : vector<16x32xf32> to vector<16x32xbf16>
    %cst_30 = arith.constant dense<0.000000e+00> : vector<16x32xf32>
    %52 = tpu.matmul %49, %51, %cst_30 {dimension_numbers = #tpu.dot_dimension_numbers<[1], [0], [0], [1], [0, 0, 1, 1], [], []>} : vector<16x16xbf16>, vector<16x32xbf16>, vector<16x32xf32> -> vector<16x32xf32>
    %53 = arith.addf %29, %52 : vector<16x32xf32>
    %54 = vector.extract_strided_slice %14 {offsets = [0, 32], sizes = [16, 32], strides = [1, 1]} : vector<16x128xf32> to vector<16x32xf32>
    %55 = arith.truncf %54 : vector<16x32xf32> to vector<16x32xbf16>
    %56 = vector.extract_strided_slice %21 {offsets = [0, 32], sizes = [16, 32], strides = [1, 1]} : vector<16x128xf32> to vector<16x32xf32>
    %57 = arith.truncf %56 : vector<16x32xf32> to vector<16x32xbf16>
    %cst_31 = arith.constant dense<0.000000e+00> : vector<16x16xf32>
    %58 = tpu.matmul %55, %57, %cst_31 {dimension_numbers = #tpu.dot_dimension_numbers<[1], [1], [0], [0], [0, 0, 1, 0], [], []>} : vector<16x32xbf16>, vector<16x32xbf16>, vector<16x16xf32> -> vector<16x16xf32>
    %cst_32 = arith.constant dense<0xFF800000> : vector<16xf32>
    %59 = vector.multi_reduction <maximumf>, %58, %cst_32 [1] : vector<16x16xf32> to vector<16xf32>
    %60 = vector.shape_cast %59 : vector<16xf32> to vector<16x1xf32>
    %61 = vector.broadcast %60 : vector<16x1xf32> to vector<16x16xf32>
    %62 = arith.subf %58, %61 : vector<16x16xf32>
    %63 = math.exp %62 : vector<16x16xf32>
    %64 = arith.extf %5 : vector<16x16xbf16> to vector<16x16xf32>
    %65 = arith.mulf %63, %64 : vector<16x16xf32>
    %cst_33 = arith.constant dense<0.000000e+00> : vector<16xf32>
    %66 = vector.multi_reduction <add>, %65, %cst_33 [1] : vector<16x16xf32> to vector<16xf32>
    %67 = vector.shape_cast %66 : vector<16xf32> to vector<16x1xf32>
    %cst_34 = arith.constant 1.000000e-30 : f32
    %68 = vector.broadcast %cst_34 : f32 to vector<16x1xf32>
    %69 = arith.maximumf %67, %68 : vector<16x1xf32>
    %70 = tpu.reciprocal %69 {approx = true} : vector<16x1xf32> -> vector<16x1xf32>
    %71 = vector.broadcast %70 : vector<16x1xf32> to vector<16x16xf32>
    %72 = arith.mulf %65, %71 : vector<16x16xf32>
    %73 = arith.truncf %72 : vector<16x16xf32> to vector<16x16xbf16>
    %74 = vector.extract_strided_slice %28 {offsets = [0, 32], sizes = [16, 32], strides = [1, 1]} : vector<16x128xf32> to vector<16x32xf32>
    %75 = arith.truncf %74 : vector<16x32xf32> to vector<16x32xbf16>
    %cst_35 = arith.constant dense<0.000000e+00> : vector<16x32xf32>
    %76 = tpu.matmul %73, %75, %cst_35 {dimension_numbers = #tpu.dot_dimension_numbers<[1], [0], [0], [1], [0, 0, 1, 1], [], []>} : vector<16x16xbf16>, vector<16x32xbf16>, vector<16x32xf32> -> vector<16x32xf32>
    %77 = arith.addf %53, %76 : vector<16x32xf32>
    %78 = vector.extract_strided_slice %14 {offsets = [0, 64], sizes = [16, 32], strides = [1, 1]} : vector<16x128xf32> to vector<16x32xf32>
    %79 = arith.truncf %78 : vector<16x32xf32> to vector<16x32xbf16>
    %80 = vector.extract_strided_slice %21 {offsets = [0, 64], sizes = [16, 32], strides = [1, 1]} : vector<16x128xf32> to vector<16x32xf32>
    %81 = arith.truncf %80 : vector<16x32xf32> to vector<16x32xbf16>
    %cst_36 = arith.constant dense<0.000000e+00> : vector<16x16xf32>
    %82 = tpu.matmul %79, %81, %cst_36 {dimension_numbers = #tpu.dot_dimension_numbers<[1], [1], [0], [0], [0, 0, 1, 0], [], []>} : vector<16x32xbf16>, vector<16x32xbf16>, vector<16x16xf32> -> vector<16x16xf32>
    %cst_37 = arith.constant dense<0xFF800000> : vector<16xf32>
    %83 = vector.multi_reduction <maximumf>, %82, %cst_37 [1] : vector<16x16xf32> to vector<16xf32>
    %84 = vector.shape_cast %83 : vector<16xf32> to vector<16x1xf32>
    %85 = vector.broadcast %84 : vector<16x1xf32> to vector<16x16xf32>
    %86 = arith.subf %82, %85 : vector<16x16xf32>
    %87 = math.exp %86 : vector<16x16xf32>
    %88 = arith.extf %5 : vector<16x16xbf16> to vector<16x16xf32>
    %89 = arith.mulf %87, %88 : vector<16x16xf32>
    %cst_38 = arith.constant dense<0.000000e+00> : vector<16xf32>
    %90 = vector.multi_reduction <add>, %89, %cst_38 [1] : vector<16x16xf32> to vector<16xf32>
    %91 = vector.shape_cast %90 : vector<16xf32> to vector<16x1xf32>
    %cst_39 = arith.constant 1.000000e-30 : f32
    %92 = vector.broadcast %cst_39 : f32 to vector<16x1xf32>
    %93 = arith.maximumf %91, %92 : vector<16x1xf32>
    %94 = tpu.reciprocal %93 {approx = true} : vector<16x1xf32> -> vector<16x1xf32>
    %95 = vector.broadcast %94 : vector<16x1xf32> to vector<16x16xf32>
    %96 = arith.mulf %89, %95 : vector<16x16xf32>
    %97 = arith.truncf %96 : vector<16x16xf32> to vector<16x16xbf16>
    %98 = vector.extract_strided_slice %28 {offsets = [0, 64], sizes = [16, 32], strides = [1, 1]} : vector<16x128xf32> to vector<16x32xf32>
    %99 = arith.truncf %98 : vector<16x32xf32> to vector<16x32xbf16>
    %cst_40 = arith.constant dense<0.000000e+00> : vector<16x32xf32>
    %100 = tpu.matmul %97, %99, %cst_40 {dimension_numbers = #tpu.dot_dimension_numbers<[1], [0], [0], [1], [0, 0, 1, 1], [], []>} : vector<16x16xbf16>, vector<16x32xbf16>, vector<16x32xf32> -> vector<16x32xf32>
    %101 = arith.addf %77, %100 : vector<16x32xf32>
    %102 = vector.extract_strided_slice %14 {offsets = [0, 96], sizes = [16, 32], strides = [1, 1]} : vector<16x128xf32> to vector<16x32xf32>
    %103 = arith.truncf %102 : vector<16x32xf32> to vector<16x32xbf16>
    %104 = vector.extract_strided_slice %21 {offsets = [0, 96], sizes = [16, 32], strides = [1, 1]} : vector<16x128xf32> to vector<16x32xf32>
    %105 = arith.truncf %104 : vector<16x32xf32> to vector<16x32xbf16>
    %cst_41 = arith.constant dense<0.000000e+00> : vector<16x16xf32>
    %106 = tpu.matmul %103, %105, %cst_41 {dimension_numbers = #tpu.dot_dimension_numbers<[1], [1], [0], [0], [0, 0, 1, 0], [], []>} : vector<16x32xbf16>, vector<16x32xbf16>, vector<16x16xf32> -> vector<16x16xf32>
    %cst_42 = arith.constant dense<0xFF800000> : vector<16xf32>
    %107 = vector.multi_reduction <maximumf>, %106, %cst_42 [1] : vector<16x16xf32> to vector<16xf32>
    %108 = vector.shape_cast %107 : vector<16xf32> to vector<16x1xf32>
    %109 = vector.broadcast %108 : vector<16x1xf32> to vector<16x16xf32>
    %110 = arith.subf %106, %109 : vector<16x16xf32>
    %111 = math.exp %110 : vector<16x16xf32>
    %112 = arith.extf %5 : vector<16x16xbf16> to vector<16x16xf32>
    %113 = arith.mulf %111, %112 : vector<16x16xf32>
    %cst_43 = arith.constant dense<0.000000e+00> : vector<16xf32>
    %114 = vector.multi_reduction <add>, %113, %cst_43 [1] : vector<16x16xf32> to vector<16xf32>
    %115 = vector.shape_cast %114 : vector<16xf32> to vector<16x1xf32>
    %cst_44 = arith.constant 1.000000e-30 : f32
    %116 = vector.broadcast %cst_44 : f32 to vector<16x1xf32>
    %117 = arith.maximumf %115, %116 : vector<16x1xf32>
    %118 = tpu.reciprocal %117 {approx = true} : vector<16x1xf32> -> vector<16x1xf32>
    %119 = vector.broadcast %118 : vector<16x1xf32> to vector<16x16xf32>
    %120 = arith.mulf %113, %119 : vector<16x16xf32>
    %121 = arith.truncf %120 : vector<16x16xf32> to vector<16x16xbf16>
    %122 = vector.extract_strided_slice %28 {offsets = [0, 96], sizes = [16, 32], strides = [1, 1]} : vector<16x128xf32> to vector<16x32xf32>
    %123 = arith.truncf %122 : vector<16x32xf32> to vector<16x32xbf16>
    %cst_45 = arith.constant dense<0.000000e+00> : vector<16x32xf32>
    %124 = tpu.matmul %121, %123, %cst_45 {dimension_numbers = #tpu.dot_dimension_numbers<[1], [0], [0], [1], [0, 0, 1, 1], [], []>} : vector<16x16xbf16>, vector<16x32xbf16>, vector<16x32xf32> -> vector<16x32xf32>
    %125 = arith.addf %101, %124 : vector<16x32xf32>
    %cst_46 = arith.constant 2.500000e-01 : f32
    %126 = vector.broadcast %cst_46 : f32 to vector<16x32xf32>
    %127 = arith.mulf %125, %126 : vector<16x32xf32>
    %c0_47 = arith.constant 0 : index
    %c0_48 = arith.constant 0 : index
    %c0_49 = arith.constant 0 : index
    %128 = vector.load %arg12[%c0_47, %c0_48, %c0_49] : memref<1x32x32xbf16, #tpu.memory_space<vmem>>, vector<1x32x32xbf16>
    %129 = vector.shape_cast %128 : vector<1x32x32xbf16> to vector<32x32xbf16>
    %cst_50 = arith.constant dense<0.000000e+00> : vector<16x32xf32>
    %130 = tpu.matmul %4, %129, %cst_50 {dimension_numbers = #tpu.dot_dimension_numbers<[1], [0], [0], [1], [0, 0, 1, 1], [], []>} : vector<16x32xbf16>, vector<32x32xbf16>, vector<16x32xf32> -> vector<16x32xf32>
    %c0_51 = arith.constant 0 : index
    %c0_52 = arith.constant 0 : index
    %c0_53 = arith.constant 0 : index
    %131 = vector.load %arg13[%c0_51, %c0_52, %c0_53] : memref<1x1x32xf32, #tpu.memory_space<vmem>>, vector<1x1x32xf32>
    %132 = vector.shape_cast %131 : vector<1x1x32xf32> to vector<1x32xf32>
    %133 = vector.broadcast %132 : vector<1x32xf32> to vector<16x32xf32>
    %134 = arith.addf %130, %133 : vector<16x32xf32>
    %c0_54 = arith.constant 0 : index
    %c0_55 = arith.constant 0 : index
    %c0_56 = arith.constant 0 : index
    %135 = vector.load %arg14[%c0_54, %c0_55, %c0_56] : memref<1x1x32xf32, #tpu.memory_space<vmem>>, vector<1x1x32xf32>
    %136 = vector.shape_cast %135 : vector<1x1x32xf32> to vector<1x32xf32>
    %137 = vector.broadcast %136 : vector<1x32xf32> to vector<16x32xf32>
    %138 = arith.mulf %127, %137 : vector<16x32xf32>
    %cst_57 = arith.constant dense<0.000000e+00> : vector<16xf32>
    %139 = vector.multi_reduction <add>, %138, %cst_57 [1] : vector<16x32xf32> to vector<16xf32>
    %140 = vector.shape_cast %139 : vector<16xf32> to vector<16x1xf32>
    %c0_58 = arith.constant 0 : index
    %c0_59 = arith.constant 0 : index
    %c0_60 = arith.constant 0 : index
    %141 = vector.load %arg15[%c0_58, %c0_59, %c0_60] : memref<1x1x32xf32, #tpu.memory_space<vmem>>, vector<1x1x32xf32>
    %142 = vector.shape_cast %141 : vector<1x1x32xf32> to vector<1x32xf32>
    %143 = vector.broadcast %142 : vector<1x32xf32> to vector<16x32xf32>
    %144 = arith.mulf %134, %143 : vector<16x32xf32>
    %cst_61 = arith.constant dense<0.000000e+00> : vector<16xf32>
    %145 = vector.multi_reduction <add>, %144, %cst_61 [1] : vector<16x32xf32> to vector<16xf32>
    %146 = vector.shape_cast %145 : vector<16xf32> to vector<16x1xf32>
    %147 = arith.addf %140, %146 : vector<16x1xf32>
    %148 = arith.negf %147 : vector<16x1xf32>
    %149 = math.exp %148 : vector<16x1xf32>
    %cst_62 = arith.constant 1.000000e+00 : f32
    %150 = vector.broadcast %cst_62 : f32 to vector<16x1xf32>
    %151 = arith.addf %150, %149 : vector<16x1xf32>
    %152 = arith.divf %150, %151 : vector<16x1xf32>
    %153 = vector.broadcast %152 : vector<16x1xf32> to vector<16x32xf32>
    %154 = arith.mulf %153, %134 : vector<16x32xf32>
    %cst_63 = arith.constant 1.000000e+00 : f32
    %155 = vector.broadcast %cst_63 : f32 to vector<16x1xf32>
    %156 = arith.subf %155, %152 : vector<16x1xf32>
    %157 = vector.broadcast %156 : vector<16x1xf32> to vector<16x32xf32>
    %158 = arith.mulf %157, %127 : vector<16x32xf32>
    %159 = arith.addf %154, %158 : vector<16x32xf32>
    %cst_64 = arith.constant 5.000000e-01 : f32
    %160 = vector.broadcast %cst_64 : f32 to vector<16x32xf32>
    %161 = arith.mulf %160, %159 : vector<16x32xf32>
    %cst_65 = arith.constant 0.707106769 : f32
    %162 = vector.broadcast %cst_65 : f32 to vector<16x32xf32>
    %163 = arith.mulf %159, %162 : vector<16x32xf32>
    %164 = math.absf %163 : vector<16x32xf32>
    %cst_66 = arith.constant 0.327591091 : f32
    %165 = vector.broadcast %cst_66 : f32 to vector<16x32xf32>
    %166 = arith.mulf %165, %164 : vector<16x32xf32>
    %cst_67 = arith.constant 1.000000e+00 : f32
    %167 = vector.broadcast %cst_67 : f32 to vector<16x32xf32>
    %168 = arith.addf %167, %166 : vector<16x32xf32>
    %cst_68 = arith.constant 1.000000e+00 : f32
    %169 = vector.broadcast %cst_68 : f32 to vector<16x32xf32>
    %170 = arith.divf %169, %168 : vector<16x32xf32>
    %cst_69 = arith.constant 1.06140542 : f32
    %171 = vector.broadcast %cst_69 : f32 to vector<16x32xf32>
    %172 = arith.mulf %171, %170 : vector<16x32xf32>
    %cst_70 = arith.constant -1.45315206 : f32
    %173 = vector.broadcast %cst_70 : f32 to vector<16x32xf32>
    %174 = arith.addf %172, %173 : vector<16x32xf32>
    %175 = arith.mulf %174, %170 : vector<16x32xf32>
    %cst_71 = arith.constant 1.42141378 : f32
    %176 = vector.broadcast %cst_71 : f32 to vector<16x32xf32>
    %177 = arith.addf %175, %176 : vector<16x32xf32>
    %178 = arith.mulf %177, %170 : vector<16x32xf32>
    %cst_72 = arith.constant -0.284496725 : f32
    %179 = vector.broadcast %cst_72 : f32 to vector<16x32xf32>
    %180 = arith.addf %178, %179 : vector<16x32xf32>
    %181 = arith.mulf %180, %170 : vector<16x32xf32>
    %cst_73 = arith.constant 0.254829586 : f32
    %182 = vector.broadcast %cst_73 : f32 to vector<16x32xf32>
    %183 = arith.addf %181, %182 : vector<16x32xf32>
    %184 = arith.mulf %183, %170 : vector<16x32xf32>
    %cst_74 = arith.constant 0.000000e+00 : f32
    %185 = vector.broadcast %cst_74 : f32 to vector<16x32xf32>
    %186 = arith.subf %185, %164 : vector<16x32xf32>
    %187 = arith.mulf %186, %164 : vector<16x32xf32>
    %188 = math.exp %187 : vector<16x32xf32>
    %189 = arith.mulf %184, %188 : vector<16x32xf32>
    %cst_75 = arith.constant 1.000000e+00 : f32
    %190 = vector.broadcast %cst_75 : f32 to vector<16x32xf32>
    %191 = arith.subf %190, %189 : vector<16x32xf32>
    %cst_76 = arith.constant 0.000000e+00 : f32
    %192 = vector.broadcast %cst_76 : f32 to vector<16x32xf32>
    %193 = arith.cmpf oge, %163, %192 : vector<16x32xf32>
    %cst_77 = arith.constant 0.000000e+00 : f32
    %194 = vector.broadcast %cst_77 : f32 to vector<16x32xf32>
    %195 = arith.subf %194, %191 : vector<16x32xf32>
    %196 = arith.select %193, %191, %195 : vector<16x32xi1>, vector<16x32xf32>
    %cst_78 = arith.constant 1.000000e+00 : f32
    %197 = vector.broadcast %cst_78 : f32 to vector<16x32xf32>
    %198 = arith.addf %197, %196 : vector<16x32xf32>
    %199 = arith.mulf %161, %198 : vector<16x32xf32>
    %200 = arith.addf %199, %3 : vector<16x32xf32>
    %c0_79 = arith.constant 0 : index
    %c0_80 = arith.constant 0 : index
    %c0_81 = arith.constant 0 : index
    %201 = vector.load %arg16[%c0_79, %c0_80, %c0_81] : memref<1x1x32xf32, #tpu.memory_space<vmem>>, vector<1x1x32xf32>
    %202 = vector.shape_cast %201 : vector<1x1x32xf32> to vector<1x32xf32>
    %c0_82 = arith.constant 0 : index
    %c0_83 = arith.constant 0 : index
    %c0_84 = arith.constant 0 : index
    %203 = vector.load %arg17[%c0_82, %c0_83, %c0_84] : memref<1x1x32xf32, #tpu.memory_space<vmem>>, vector<1x1x32xf32>
    %204 = vector.shape_cast %203 : vector<1x1x32xf32> to vector<1x32xf32>
    %cst_85 = arith.constant dense<0.000000e+00> : vector<16xf32>
    %205 = vector.multi_reduction <add>, %200, %cst_85 [1] : vector<16x32xf32> to vector<16xf32>
    %206 = vector.shape_cast %205 : vector<16xf32> to vector<16x1xf32>
    %cst_86 = arith.constant 3.200000e+01 : f32
    %207 = vector.broadcast %cst_86 : f32 to vector<16x1xf32>
    %208 = arith.divf %206, %207 : vector<16x1xf32>
    %209 = vector.broadcast %208 : vector<16x1xf32> to vector<16x32xf32>
    %210 = arith.subf %200, %209 : vector<16x32xf32>
    %211 = arith.mulf %210, %210 : vector<16x32xf32>
    %cst_87 = arith.constant dense<0.000000e+00> : vector<16xf32>
    %212 = vector.multi_reduction <add>, %211, %cst_87 [1] : vector<16x32xf32> to vector<16xf32>
    %213 = vector.shape_cast %212 : vector<16xf32> to vector<16x1xf32>
    %cst_88 = arith.constant 3.200000e+01 : f32
    %214 = vector.broadcast %cst_88 : f32 to vector<16x1xf32>
    %215 = arith.divf %213, %214 : vector<16x1xf32>
    %216 = vector.broadcast %208 : vector<16x1xf32> to vector<16x32xf32>
    %217 = arith.subf %200, %216 : vector<16x32xf32>
    %cst_89 = arith.constant 9.99999974E-6 : f32
    %218 = vector.broadcast %cst_89 : f32 to vector<16x1xf32>
    %219 = arith.addf %215, %218 : vector<16x1xf32>
    %220 = math.rsqrt %219 : vector<16x1xf32>
    %221 = vector.broadcast %220 : vector<16x1xf32> to vector<16x32xf32>
    %222 = arith.mulf %217, %221 : vector<16x32xf32>
    %223 = vector.broadcast %202 : vector<1x32xf32> to vector<16x32xf32>
    %224 = arith.mulf %222, %223 : vector<16x32xf32>
    %225 = vector.broadcast %204 : vector<1x32xf32> to vector<16x32xf32>
    %226 = arith.addf %224, %225 : vector<16x32xf32>
    %227 = arith.truncf %226 : vector<16x32xf32> to vector<16x32xbf16>
    %c0_90 = arith.constant 0 : index
    %c0_91 = arith.constant 0 : index
    %c0_92 = arith.constant 0 : index
    %228 = vector.load %arg18[%c0_90, %c0_91, %c0_92] : memref<1x32x64xbf16, #tpu.memory_space<vmem>>, vector<1x32x64xbf16>
    %229 = vector.shape_cast %228 : vector<1x32x64xbf16> to vector<32x64xbf16>
    %cst_93 = arith.constant dense<0.000000e+00> : vector<16x64xf32>
    %230 = tpu.matmul %227, %229, %cst_93 {dimension_numbers = #tpu.dot_dimension_numbers<[1], [0], [0], [1], [0, 0, 1, 1], [], []>} : vector<16x32xbf16>, vector<32x64xbf16>, vector<16x64xf32> -> vector<16x64xf32>
    %c0_94 = arith.constant 0 : index
    %c0_95 = arith.constant 0 : index
    %c0_96 = arith.constant 0 : index
    %231 = vector.load %arg19[%c0_94, %c0_95, %c0_96] : memref<1x1x64xf32, #tpu.memory_space<vmem>>, vector<1x1x64xf32>
    %232 = vector.shape_cast %231 : vector<1x1x64xf32> to vector<1x64xf32>
    %233 = vector.broadcast %232 : vector<1x64xf32> to vector<16x64xf32>
    %234 = arith.addf %230, %233 : vector<16x64xf32>
    %cst_97 = arith.constant 5.000000e-01 : f32
    %235 = vector.broadcast %cst_97 : f32 to vector<16x64xf32>
    %236 = arith.mulf %235, %234 : vector<16x64xf32>
    %cst_98 = arith.constant 0.707106769 : f32
    %237 = vector.broadcast %cst_98 : f32 to vector<16x64xf32>
    %238 = arith.mulf %234, %237 : vector<16x64xf32>
    %239 = math.absf %238 : vector<16x64xf32>
    %cst_99 = arith.constant 0.327591091 : f32
    %240 = vector.broadcast %cst_99 : f32 to vector<16x64xf32>
    %241 = arith.mulf %240, %239 : vector<16x64xf32>
    %cst_100 = arith.constant 1.000000e+00 : f32
    %242 = vector.broadcast %cst_100 : f32 to vector<16x64xf32>
    %243 = arith.addf %242, %241 : vector<16x64xf32>
    %cst_101 = arith.constant 1.000000e+00 : f32
    %244 = vector.broadcast %cst_101 : f32 to vector<16x64xf32>
    %245 = arith.divf %244, %243 : vector<16x64xf32>
    %cst_102 = arith.constant 1.06140542 : f32
    %246 = vector.broadcast %cst_102 : f32 to vector<16x64xf32>
    %247 = arith.mulf %246, %245 : vector<16x64xf32>
    %cst_103 = arith.constant -1.45315206 : f32
    %248 = vector.broadcast %cst_103 : f32 to vector<16x64xf32>
    %249 = arith.addf %247, %248 : vector<16x64xf32>
    %250 = arith.mulf %249, %245 : vector<16x64xf32>
    %cst_104 = arith.constant 1.42141378 : f32
    %251 = vector.broadcast %cst_104 : f32 to vector<16x64xf32>
    %252 = arith.addf %250, %251 : vector<16x64xf32>
    %253 = arith.mulf %252, %245 : vector<16x64xf32>
    %cst_105 = arith.constant -0.284496725 : f32
    %254 = vector.broadcast %cst_105 : f32 to vector<16x64xf32>
    %255 = arith.addf %253, %254 : vector<16x64xf32>
    %256 = arith.mulf %255, %245 : vector<16x64xf32>
    %cst_106 = arith.constant 0.254829586 : f32
    %257 = vector.broadcast %cst_106 : f32 to vector<16x64xf32>
    %258 = arith.addf %256, %257 : vector<16x64xf32>
    %259 = arith.mulf %258, %245 : vector<16x64xf32>
    %cst_107 = arith.constant 0.000000e+00 : f32
    %260 = vector.broadcast %cst_107 : f32 to vector<16x64xf32>
    %261 = arith.subf %260, %239 : vector<16x64xf32>
    %262 = arith.mulf %261, %239 : vector<16x64xf32>
    %263 = math.exp %262 : vector<16x64xf32>
    %264 = arith.mulf %259, %263 : vector<16x64xf32>
    %cst_108 = arith.constant 1.000000e+00 : f32
    %265 = vector.broadcast %cst_108 : f32 to vector<16x64xf32>
    %266 = arith.subf %265, %264 : vector<16x64xf32>
    %cst_109 = arith.constant 0.000000e+00 : f32
    %267 = vector.broadcast %cst_109 : f32 to vector<16x64xf32>
    %268 = arith.cmpf oge, %238, %267 : vector<16x64xf32>
    %cst_110 = arith.constant 0.000000e+00 : f32
    %269 = vector.broadcast %cst_110 : f32 to vector<16x64xf32>
    %270 = arith.subf %269, %266 : vector<16x64xf32>
    %271 = arith.select %268, %266, %270 : vector<16x64xi1>, vector<16x64xf32>
    %cst_111 = arith.constant 1.000000e+00 : f32
    %272 = vector.broadcast %cst_111 : f32 to vector<16x64xf32>
    %273 = arith.addf %272, %271 : vector<16x64xf32>
    %274 = arith.mulf %236, %273 : vector<16x64xf32>
    %275 = arith.truncf %274 : vector<16x64xf32> to vector<16x64xbf16>
    %c0_112 = arith.constant 0 : index
    %c0_113 = arith.constant 0 : index
    %c0_114 = arith.constant 0 : index
    %276 = vector.load %arg20[%c0_112, %c0_113, %c0_114] : memref<1x64x32xbf16, #tpu.memory_space<vmem>>, vector<1x64x32xbf16>
    %277 = vector.shape_cast %276 : vector<1x64x32xbf16> to vector<64x32xbf16>
    %cst_115 = arith.constant dense<0.000000e+00> : vector<16x32xf32>
    %278 = tpu.matmul %275, %277, %cst_115 {dimension_numbers = #tpu.dot_dimension_numbers<[1], [0], [0], [1], [0, 0, 1, 1], [], []>} : vector<16x64xbf16>, vector<64x32xbf16>, vector<16x32xf32> -> vector<16x32xf32>
    %c0_116 = arith.constant 0 : index
    %c0_117 = arith.constant 0 : index
    %c0_118 = arith.constant 0 : index
    %279 = vector.load %arg21[%c0_116, %c0_117, %c0_118] : memref<1x1x32xf32, #tpu.memory_space<vmem>>, vector<1x1x32xf32>
    %280 = vector.shape_cast %279 : vector<1x1x32xf32> to vector<1x32xf32>
    %281 = vector.broadcast %280 : vector<1x32xf32> to vector<16x32xf32>
    %282 = arith.addf %278, %281 : vector<16x32xf32>
    %283 = arith.addf %282, %226 : vector<16x32xf32>
    %c0_119 = arith.constant 0 : index
    %c0_120 = arith.constant 0 : index
    %c0_121 = arith.constant 0 : index
    %284 = vector.load %arg22[%c0_119, %c0_120, %c0_121] : memref<1x1x32xf32, #tpu.memory_space<vmem>>, vector<1x1x32xf32>
    %285 = vector.shape_cast %284 : vector<1x1x32xf32> to vector<1x32xf32>
    %c0_122 = arith.constant 0 : index
    %c0_123 = arith.constant 0 : index
    %c0_124 = arith.constant 0 : index
    %286 = vector.load %arg23[%c0_122, %c0_123, %c0_124] : memref<1x1x32xf32, #tpu.memory_space<vmem>>, vector<1x1x32xf32>
    %287 = vector.shape_cast %286 : vector<1x1x32xf32> to vector<1x32xf32>
    %cst_125 = arith.constant dense<0.000000e+00> : vector<16xf32>
    %288 = vector.multi_reduction <add>, %283, %cst_125 [1] : vector<16x32xf32> to vector<16xf32>
    %289 = vector.shape_cast %288 : vector<16xf32> to vector<16x1xf32>
    %cst_126 = arith.constant 3.200000e+01 : f32
    %290 = vector.broadcast %cst_126 : f32 to vector<16x1xf32>
    %291 = arith.divf %289, %290 : vector<16x1xf32>
    %292 = vector.broadcast %291 : vector<16x1xf32> to vector<16x32xf32>
    %293 = arith.subf %283, %292 : vector<16x32xf32>
    %294 = arith.mulf %293, %293 : vector<16x32xf32>
    %cst_127 = arith.constant dense<0.000000e+00> : vector<16xf32>
    %295 = vector.multi_reduction <add>, %294, %cst_127 [1] : vector<16x32xf32> to vector<16xf32>
    %296 = vector.shape_cast %295 : vector<16xf32> to vector<16x1xf32>
    %cst_128 = arith.constant 3.200000e+01 : f32
    %297 = vector.broadcast %cst_128 : f32 to vector<16x1xf32>
    %298 = arith.divf %296, %297 : vector<16x1xf32>
    %299 = vector.broadcast %291 : vector<16x1xf32> to vector<16x32xf32>
    %300 = arith.subf %283, %299 : vector<16x32xf32>
    %cst_129 = arith.constant 9.99999974E-6 : f32
    %301 = vector.broadcast %cst_129 : f32 to vector<16x1xf32>
    %302 = arith.addf %298, %301 : vector<16x1xf32>
    %303 = math.rsqrt %302 : vector<16x1xf32>
    %304 = vector.broadcast %303 : vector<16x1xf32> to vector<16x32xf32>
    %305 = arith.mulf %300, %304 : vector<16x32xf32>
    %306 = vector.broadcast %285 : vector<1x32xf32> to vector<16x32xf32>
    %307 = arith.mulf %305, %306 : vector<16x32xf32>
    %308 = vector.broadcast %287 : vector<1x32xf32> to vector<16x32xf32>
    %309 = arith.addf %307, %308 : vector<16x32xf32>
    %c0_130 = arith.constant 0 : index
    %c0_131 = arith.constant 0 : index
    %310 = vector.load %arg33[%c0_130, %c0_131] : memref<16x32xf32, #tpu.memory_space<vmem>>, vector<16x32xf32>
    tpu.vector_store %arg33[%c0_130, %c0_131], %309 {strides = array<i32>} : memref<16x32xf32, #tpu.memory_space<vmem>>, vector<16x32xf32>,
    %c1_i32 = arith.constant 1 : i32
    %311 = arith.cmpi eq, %arg0, %c1_i32 : i32
    %312 = arith.extui %311 : i1 to i32
    %cst_132 = arith.constant -1.000000e+30 : f32
    %c0_i32_133 = arith.constant 0 : i32
    %313 = arith.cmpi ne, %312, %c0_i32_133 : i32
    scf.if %313 {
      %314 = arith.truncf %309 : vector<16x32xf32> to vector<16x32xbf16>
      %c0_134 = arith.constant 0 : index
      %c0_135 = arith.constant 0 : index
      %315 = vector.load %arg24[%c0_134, %c0_135] : memref<32x32xbf16, #tpu.memory_space<vmem>>, vector<32x32xbf16>
      %cst_136 = arith.constant dense<0.000000e+00> : vector<16x32xf32>
      %316 = tpu.matmul %314, %315, %cst_136 {dimension_numbers = #tpu.dot_dimension_numbers<[1], [0], [0], [1], [0, 0, 1, 1], [], []>} : vector<16x32xbf16>, vector<32x32xbf16>, vector<16x32xf32> -> vector<16x32xf32>
      %c0_137 = arith.constant 0 : index
      %c0_138 = arith.constant 0 : index
      %317 = vector.load %arg25[%c0_137, %c0_138] : memref<1x32xf32, #tpu.memory_space<vmem>>, vector<1x32xf32>
      %318 = vector.broadcast %317 : vector<1x32xf32> to vector<16x32xf32>
      %319 = arith.addf %316, %318 : vector<16x32xf32>
      %cst_139 = arith.constant 0.000000e+00 : f32
      %320 = vector.broadcast %cst_139 : f32 to vector<16x32xf32>
      %321 = arith.maximumf %319, %320 : vector<16x32xf32>
      %c0_140 = arith.constant 0 : index
      %c0_141 = arith.constant 0 : index
      %322 = vector.load %arg26[%c0_140, %c0_141] : memref<1x32xf32, #tpu.memory_space<vmem>>, vector<1x32xf32>
      %323 = vector.broadcast %322 : vector<1x32xf32> to vector<16x32xf32>
      %324 = arith.mulf %321, %323 : vector<16x32xf32>
      %cst_142 = arith.constant dense<0.000000e+00> : vector<16xf32>
      %325 = vector.multi_reduction <add>, %324, %cst_142 [1] : vector<16x32xf32> to vector<16xf32>
      %326 = vector.shape_cast %325 : vector<16xf32> to vector<16x1xf32>
      %c0_143 = arith.constant 0 : index
      %c0_144 = arith.constant 0 : index
      %327 = vector.load %arg27[%c0_143, %c0_144] : memref<1x1xf32, #tpu.memory_space<vmem>>, vector<1x1xf32>
      %328 = vector.broadcast %327 : vector<1x1xf32> to vector<16x1xf32>
      %329 = arith.addf %326, %328 : vector<16x1xf32>
      %c0_145 = arith.constant 0 : index
      %c0_146 = arith.constant 0 : index
      %330 = vector.load %arg3[%c0_145, %c0_146] : memref<16x2xbf16, #tpu.memory_space<vmem>>, vector<16x2xbf16>
      %331 = arith.extf %330 : vector<16x2xbf16> to vector<16x2xf32>
      %cst_147 = arith.constant 0.000000e+00 : f32
      %332 = vector.broadcast %cst_147 : f32 to vector<16x2xf32>
      %333 = arith.cmpf ogt, %331, %332 : vector<16x2xf32>
      %334 = vector.shape_cast %329 : vector<16x1xf32> to vector<16x1xf32>
      %335 = vector.broadcast %334 : vector<16x1xf32> to vector<16x2xf32>
      %336 = vector.broadcast %cst_132 : f32 to vector<16x2xf32>
      %337 = arith.select %333, %335, %336 : vector<16x2xi1>, vector<16x2xf32>
      %cst_148 = arith.constant dense<0xFF800000> : vector<2xf32>
      %338 = vector.multi_reduction <maximumf>, %337, %cst_148 [0] : vector<16x2xf32> to vector<2xf32>
      %339 = vector.shape_cast %338 : vector<2xf32> to vector<1x2xf32>
      %340 = vector.broadcast %339 : vector<1x2xf32> to vector<16x2xf32>
      %341 = arith.subf %337, %340 : vector<16x2xf32>
      %342 = math.exp %341 : vector<16x2xf32>
      %343 = arith.mulf %342, %331 : vector<16x2xf32>
      %cst_149 = arith.constant dense<0.000000e+00> : vector<2xf32>
      %344 = vector.multi_reduction <add>, %343, %cst_149 [0] : vector<16x2xf32> to vector<2xf32>
      %345 = vector.shape_cast %344 : vector<2xf32> to vector<1x2xf32>
      %cst_150 = arith.constant 1.000000e-30 : f32
      %346 = vector.broadcast %cst_150 : f32 to vector<1x2xf32>
      %347 = arith.maximumf %345, %346 : vector<1x2xf32>
      %348 = tpu.reciprocal %347 {approx = true} : vector<1x2xf32> -> vector<1x2xf32>
      %349 = vector.broadcast %348 : vector<1x2xf32> to vector<16x2xf32>
      %350 = arith.mulf %343, %349 : vector<16x2xf32>
      %351 = arith.truncf %350 : vector<16x2xf32> to vector<16x2xbf16>
      %cst_151 = arith.constant dense<0.000000e+00> : vector<2x32xf32>
      %352 = tpu.matmul %351, %314, %cst_151 {dimension_numbers = #tpu.dot_dimension_numbers<[0], [0], [1], [1], [0, 1, 1, 1], [], []>} : vector<16x2xbf16>, vector<16x32xbf16>, vector<2x32xf32> -> vector<2x32xf32>
      %353 = arith.truncf %352 : vector<2x32xf32> to vector<2x32xbf16>
      %c0_152 = arith.constant 0 : index
      %c0_153 = arith.constant 0 : index
      %354 = vector.load %arg28[%c0_152, %c0_153] : memref<32x32xbf16, #tpu.memory_space<vmem>>, vector<32x32xbf16>
      %cst_154 = arith.constant dense<0.000000e+00> : vector<2x32xf32>
      %355 = tpu.matmul %353, %354, %cst_154 {dimension_numbers = #tpu.dot_dimension_numbers<[1], [0], [0], [1], [0, 0, 1, 1], [], []>} : vector<2x32xbf16>, vector<32x32xbf16>, vector<2x32xf32> -> vector<2x32xf32>
      %c0_155 = arith.constant 0 : index
      %c0_156 = arith.constant 0 : index
      %356 = vector.load %arg29[%c0_155, %c0_156] : memref<1x32xf32, #tpu.memory_space<vmem>>, vector<1x32xf32>
      %357 = vector.broadcast %356 : vector<1x32xf32> to vector<2x32xf32>
      %358 = arith.addf %355, %357 : vector<2x32xf32>
      %cst_157 = arith.constant 5.000000e-01 : f32
      %359 = vector.broadcast %cst_157 : f32 to vector<2x32xf32>
      %360 = arith.mulf %359, %358 : vector<2x32xf32>
      %cst_158 = arith.constant 0.707106769 : f32
      %361 = vector.broadcast %cst_158 : f32 to vector<2x32xf32>
      %362 = arith.mulf %358, %361 : vector<2x32xf32>
      %363 = math.absf %362 : vector<2x32xf32>
      %cst_159 = arith.constant 0.327591091 : f32
      %364 = vector.broadcast %cst_159 : f32 to vector<2x32xf32>
      %365 = arith.mulf %364, %363 : vector<2x32xf32>
      %cst_160 = arith.constant 1.000000e+00 : f32
      %366 = vector.broadcast %cst_160 : f32 to vector<2x32xf32>
      %367 = arith.addf %366, %365 : vector<2x32xf32>
      %cst_161 = arith.constant 1.000000e+00 : f32
      %368 = vector.broadcast %cst_161 : f32 to vector<2x32xf32>
      %369 = arith.divf %368, %367 : vector<2x32xf32>
      %cst_162 = arith.constant 1.06140542 : f32
      %370 = vector.broadcast %cst_162 : f32 to vector<2x32xf32>
      %371 = arith.mulf %370, %369 : vector<2x32xf32>
      %cst_163 = arith.constant -1.45315206 : f32
      %372 = vector.broadcast %cst_163 : f32 to vector<2x32xf32>
      %373 = arith.addf %371, %372 : vector<2x32xf32>
      %374 = arith.mulf %373, %369 : vector<2x32xf32>
      %cst_164 = arith.constant 1.42141378 : f32
      %375 = vector.broadcast %cst_164 : f32 to vector<2x32xf32>
      %376 = arith.addf %374, %375 : vector<2x32xf32>
      %377 = arith.mulf %376, %369 : vector<2x32xf32>
      %cst_165 = arith.constant -0.284496725 : f32
      %378 = vector.broadcast %cst_165 : f32 to vector<2x32xf32>
      %379 = arith.addf %377, %378 : vector<2x32xf32>
      %380 = arith.mulf %379, %369 : vector<2x32xf32>
      %cst_166 = arith.constant 0.254829586 : f32
      %381 = vector.broadcast %cst_166 : f32 to vector<2x32xf32>
      %382 = arith.addf %380, %381 : vector<2x32xf32>
      %383 = arith.mulf %382, %369 : vector<2x32xf32>
      %cst_167 = arith.constant 0.000000e+00 : f32
      %384 = vector.broadcast %cst_167 : f32 to vector<2x32xf32>
      %385 = arith.subf %384, %363 : vector<2x32xf32>
      %386 = arith.mulf %385, %363 : vector<2x32xf32>
      %387 = math.exp %386 : vector<2x32xf32>
      %388 = arith.mulf %383, %387 : vector<2x32xf32>
      %cst_168 = arith.constant 1.000000e+00 : f32
      %389 = vector.broadcast %cst_168 : f32 to vector<2x32xf32>
      %390 = arith.subf %389, %388 : vector<2x32xf32>
      %cst_169 = arith.constant 0.000000e+00 : f32
      %391 = vector.broadcast %cst_169 : f32 to vector<2x32xf32>
      %392 = arith.cmpf oge, %362, %391 : vector<2x32xf32>
      %cst_170 = arith.constant 0.000000e+00 : f32
      %393 = vector.broadcast %cst_170 : f32 to vector<2x32xf32>
      %394 = arith.subf %393, %390 : vector<2x32xf32>
      %395 = arith.select %392, %390, %394 : vector<2x32xi1>, vector<2x32xf32>
      %cst_171 = arith.constant 1.000000e+00 : f32
      %396 = vector.broadcast %cst_171 : f32 to vector<2x32xf32>
      %397 = arith.addf %396, %395 : vector<2x32xf32>
      %398 = arith.mulf %360, %397 : vector<2x32xf32>
      %399 = arith.truncf %398 : vector<2x32xf32> to vector<2x32xbf16>
      %c0_172 = arith.constant 0 : index
      %c0_173 = arith.constant 0 : index
      %400 = vector.load %arg30[%c0_172, %c0_173] : memref<32x2xbf16, #tpu.memory_space<vmem>>, vector<32x2xbf16>
      %cst_174 = arith.constant dense<0.000000e+00> : vector<2x2xf32>
      %401 = tpu.matmul %399, %400, %cst_174 {dimension_numbers = #tpu.dot_dimension_numbers<[1], [0], [0], [1], [0, 0, 1, 1], [], []>} : vector<2x32xbf16>, vector<32x2xbf16>, vector<2x2xf32> -> vector<2x2xf32>
      %c0_175 = arith.constant 0 : index
      %c0_176 = arith.constant 0 : index
      %402 = vector.load %arg31[%c0_175, %c0_176] : memref<1x2xf32, #tpu.memory_space<vmem>>, vector<1x2xf32>
      %403 = vector.broadcast %402 : vector<1x2xf32> to vector<2x2xf32>
      %404 = arith.addf %401, %403 : vector<2x2xf32>
      %c0_177 = arith.constant 0 : index
      %c0_178 = arith.constant 0 : index
      %405 = vector.load %arg32[%c0_177, %c0_178] : memref<2x2xf32, #tpu.memory_space<vmem>>, vector<2x2xf32>
      tpu.vector_store %arg32[%c0_177, %c0_178], %404 {strides = array<i32>} : memref<2x2xf32, #tpu.memory_space<vmem>>, vector<2x2xf32>,
    } else {
    }
    return
  }
  func.func @transform_0(%arg0: i32) -> (i32, i32) {
    %c0_i32 = arith.constant 0 : i32
    %c0_i32_0 = arith.constant 0 : i32
    %c0_i32_1 = arith.constant 0 : i32
    return %c0_i32, %c0_i32_0 : i32, i32
  }
  func.func @transform_1(%arg0: i32) -> (i32, i32) {
    %c0_i32 = arith.constant 0 : i32
    %c0_i32_0 = arith.constant 0 : i32
    %c0_i32_1 = arith.constant 0 : i32
    return %c0_i32, %c0_i32_0 : i32, i32
  }
  func.func @transform_2(%arg0: i32) -> (i32, i32) {
    %c0_i32 = arith.constant 0 : i32
    %c0_i32_0 = arith.constant 0 : i32
    %c0_i32_1 = arith.constant 0 : i32
    return %c0_i32, %c0_i32_0 : i32, i32
  }
  func.func @transform_3(%arg0: i32) -> (i32, i32) {
    %c0_i32 = arith.constant 0 : i32
    %c0_i32_0 = arith.constant 0 : i32
    %c0_i32_1 = arith.constant 0 : i32
    return %c0_i32, %c0_i32_0 : i32, i32
  }
  func.func @transform_4(%arg0: i32) -> (i32, i32) {
    %c0_i32 = arith.constant 0 : i32
    %c0_i32_0 = arith.constant 0 : i32
    %c0_i32_1 = arith.constant 0 : i32
    return %c0_i32, %c0_i32_0 : i32, i32
  }
  func.func @transform_5(%arg0: i32) -> (i32, i32, i32) {
    %c0_i32 = arith.constant 0 : i32
    %c0_i32_0 = arith.constant 0 : i32
    %c0_i32_1 = arith.constant 0 : i32
    return %arg0, %c0_i32, %c0_i32_0 : i32, i32, i32
  }
  func.func @transform_6(%arg0: i32) -> (i32, i32, i32) {
    %c0_i32 = arith.constant 0 : i32
    %c0_i32_0 = arith.constant 0 : i32
    %c0_i32_1 = arith.constant 0 : i32
    return %arg0, %c0_i32, %c0_i32_0 : i32, i32, i32
  }
  func.func @transform_7(%arg0: i32) -> (i32, i32, i32) {
    %c0_i32 = arith.constant 0 : i32
    %c0_i32_0 = arith.constant 0 : i32
    %c0_i32_1 = arith.constant 0 : i32
    return %arg0, %c0_i32, %c0_i32_0 : i32, i32, i32
  }
  func.func @transform_8(%arg0: i32) -> (i32, i32, i32) {
    %c0_i32 = arith.constant 0 : i32
    %c0_i32_0 = arith.constant 0 : i32
    %c0_i32_1 = arith.constant 0 : i32
    return %arg0, %c0_i32, %c0_i32_0 : i32, i32, i32
  }
  func.func @transform_9(%arg0: i32) -> (i32, i32, i32) {
    %c0_i32 = arith.constant 0 : i32
    %c0_i32_0 = arith.constant 0 : i32
    %c0_i32_1 = arith.constant 0 : i32
    return %arg0, %c0_i32, %c0_i32_0 : i32, i32, i32
  }
  func.func @transform_10(%arg0: i32) -> (i32, i32, i32) {
    %c0_i32 = arith.constant 0 : i32
    %c0_i32_0 = arith.constant 0 : i32
    %c0_i32_1 = arith.constant 0 : i32
    return %arg0, %c0_i32, %c0_i32_0 : i32, i32, i32
  }
  func.func @transform_11(%arg0: i32) -> (i32, i32, i32) {
    %c0_i32 = arith.constant 0 : i32
    %c0_i32_0 = arith.constant 0 : i32
    %c0_i32_1 = arith.constant 0 : i32
    return %arg0, %c0_i32, %c0_i32_0 : i32, i32, i32
  }
  func.func @transform_12(%arg0: i32) -> (i32, i32, i32) {
    %c0_i32 = arith.constant 0 : i32
    %c0_i32_0 = arith.constant 0 : i32
    %c0_i32_1 = arith.constant 0 : i32
    return %arg0, %c0_i32, %c0_i32_0 : i32, i32, i32
  }
  func.func @transform_13(%arg0: i32) -> (i32, i32, i32) {
    %c0_i32 = arith.constant 0 : i32
    %c0_i32_0 = arith.constant 0 : i32
    %c0_i32_1 = arith.constant 0 : i32
    return %arg0, %c0_i32, %c0_i32_0 : i32, i32, i32
  }
  func.func @transform_14(%arg0: i32) -> (i32, i32, i32) {
    %c0_i32 = arith.constant 0 : i32
    %c0_i32_0 = arith.constant 0 : i32
    %c0_i32_1 = arith.constant 0 : i32
    return %arg0, %c0_i32, %c0_i32_0 : i32, i32, i32
  }
  func.func @transform_15(%arg0: i32) -> (i32, i32, i32) {
    %c0_i32 = arith.constant 0 : i32
    %c0_i32_0 = arith.constant 0 : i32
    %c0_i32_1 = arith.constant 0 : i32
    return %arg0, %c0_i32, %c0_i32_0 : i32, i32, i32
  }
  func.func @transform_16(%arg0: i32) -> (i32, i32, i32) {
    %c0_i32 = arith.constant 0 : i32
    %c0_i32_0 = arith.constant 0 : i32
    %c0_i32_1 = arith.constant 0 : i32
    return %arg0, %c0_i32, %c0_i32_0 : i32, i32, i32
  }
  func.func @transform_17(%arg0: i32) -> (i32, i32, i32) {
    %c0_i32 = arith.constant 0 : i32
    %c0_i32_0 = arith.constant 0 : i32
    %c0_i32_1 = arith.constant 0 : i32
    return %arg0, %c0_i32, %c0_i32_0 : i32, i32, i32
  }
  func.func @transform_18(%arg0: i32) -> (i32, i32, i32) {
    %c0_i32 = arith.constant 0 : i32
    %c0_i32_0 = arith.constant 0 : i32
    %c0_i32_1 = arith.constant 0 : i32
    return %arg0, %c0_i32, %c0_i32_0 : i32, i32, i32
  }
  func.func @transform_19(%arg0: i32) -> (i32, i32, i32) {
    %c0_i32 = arith.constant 0 : i32
    %c0_i32_0 = arith.constant 0 : i32
    %c0_i32_1 = arith.constant 0 : i32
    return %arg0, %c0_i32, %c0_i32_0 : i32, i32, i32
  }
  func.func @transform_20(%arg0: i32) -> (i32, i32, i32) {
    %c0_i32 = arith.constant 0 : i32
    %c0_i32_0 = arith.constant 0 : i32
    %c0_i32_1 = arith.constant 0 : i32
    return %arg0, %c0_i32, %c0_i32_0 : i32, i32, i32
  }
  func.func @transform_21(%arg0: i32) -> (i32, i32, i32) {
    %c0_i32 = arith.constant 0 : i32
    %c0_i32_0 = arith.constant 0 : i32
    %c0_i32_1 = arith.constant 0 : i32
    return %arg0, %c0_i32, %c0_i32_0 : i32, i32, i32
  }
  func.func @transform_22(%arg0: i32) -> (i32, i32, i32) {
    %c0_i32 = arith.constant 0 : i32
    %c0_i32_0 = arith.constant 0 : i32
    %c0_i32_1 = arith.constant 0 : i32
    return %arg0, %c0_i32, %c0_i32_0 : i32, i32, i32
  }
  func.func @transform_23(%arg0: i32) -> (i32, i32) {
    %c0_i32 = arith.constant 0 : i32
    %c0_i32_0 = arith.constant 0 : i32
    %c0_i32_1 = arith.constant 0 : i32
    return %c0_i32, %c0_i32_0 : i32, i32
  }
  func.func @transform_24(%arg0: i32) -> (i32, i32) {
    %c0_i32 = arith.constant 0 : i32
    %c0_i32_0 = arith.constant 0 : i32
    %c0_i32_1 = arith.constant 0 : i32
    return %c0_i32, %c0_i32_0 : i32, i32
  }
  func.func @transform_25(%arg0: i32) -> (i32, i32) {
    %c0_i32 = arith.constant 0 : i32
    %c0_i32_0 = arith.constant 0 : i32
    %c0_i32_1 = arith.constant 0 : i32
    return %c0_i32, %c0_i32_0 : i32, i32
  }
  func.func @transform_26(%arg0: i32) -> (i32, i32) {
    %c0_i32 = arith.constant 0 : i32
    %c0_i32_0 = arith.constant 0 : i32
    %c0_i32_1 = arith.constant 0 : i32
    return %c0_i32, %c0_i32_0 : i32, i32
  }
  func.func @transform_27(%arg0: i32) -> (i32, i32) {
    %c0_i32 = arith.constant 0 : i32
    %c0_i32_0 = arith.constant 0 : i32
    %c0_i32_1 = arith.constant 0 : i32
    return %c0_i32, %c0_i32_0 : i32, i32
  }
  func.func @transform_28(%arg0: i32) -> (i32, i32) {
    %c0_i32 = arith.constant 0 : i32
    %c0_i32_0 = arith.constant 0 : i32
    %c0_i32_1 = arith.constant 0 : i32
    return %c0_i32, %c0_i32_0 : i32, i32
  }
  func.func @transform_29(%arg0: i32) -> (i32, i32) {
    %c0_i32 = arith.constant 0 : i32
    %c0_i32_0 = arith.constant 0 : i32
    %c0_i32_1 = arith.constant 0 : i32
    return %c0_i32, %c0_i32_0 : i32, i32
  }
  func.func @transform_30(%arg0: i32) -> (i32, i32) {
    %c0_i32 = arith.constant 0 : i32
    %c0_i32_0 = arith.constant 0 : i32
    %c0_i32_1 = arith.constant 0 : i32
    return %c0_i32, %c0_i32_0 : i32, i32
  }
  func.func @transform_31(%arg0: i32) -> (i32, i32) {
    %c0_i32 = arith.constant 0 : i32
    %c0_i32_0 = arith.constant 0 : i32
    %c0_i32_1 = arith.constant 0 : i32
    return %c0_i32, %c0_i32_0 : i32, i32
  }
}

module attributes {stable_mosaic.version = 11 : i64} {
  func.func @_dgt_kernel(%arg0: i32, %arg1: memref<16x4xf32, #tpu.memory_space<vmem>>, %arg2: memref<16x16xbf16, #tpu.memory_space<vmem>>, %arg3: memref<16x2xbf16, #tpu.memory_space<vmem>>, %arg4: memref<4x32xbf16, #tpu.memory_space<vmem>>, %arg5: memref<1x32xf32, #tpu.memory_space<vmem>>, %arg6: memref<1x32x128xbf16, #tpu.memory_space<vmem>>, %arg7: memref<1x1x128xf32, #tpu.memory_space<vmem>>, %arg8: memref<1x32x128xbf16, #tpu.memory_space<vmem>>, %arg9: memref<1x1x128xf32, #tpu.memory_space<vmem>>, %arg10: memref<1x32x128xbf16, #tpu.memory_space<vmem>>, %arg11: memref<1x1x128xf32, #tpu.memory_space<vmem>>, %arg12: memref<1x32x32xbf16, #tpu.memory_space<vmem>>, %arg13: memref<1x1x32xf32, #tpu.memory_space<vmem>>, %arg14: memref<1x1x32xf32, #tpu.memory_space<vmem>>, %arg15: memref<1x1x32xf32, #tpu.memory_space<vmem>>, %arg16: memref<1x1x32xf32, #tpu.memory_space<vmem>>, %arg17: memref<1x1x32xf32, #tpu.memory_space<vmem>>, %arg18: memref<1x32x64xbf16, #tpu.memory_space<vmem>>, %arg19: memref<1x1x64xf32, #tpu.memory_space<vmem>>, %arg20: memref<1x64x32xbf16, #tpu.memory_space<vmem>>, %arg21: memref<1x1x32xf32, #tpu.memory_space<vmem>>, %arg22: memref<1x1x32xf32, #tpu.memory_space<vmem>>, %arg23: memref<1x1x32xf32, #tpu.memory_space<vmem>>, %arg24: memref<32x32xbf16, #tpu.memory_space<vmem>>, %arg25: memref<1x32xf32, #tpu.memory_space<vmem>>, %arg26: memref<1x32xf32, #tpu.memory_space<vmem>>, %arg27: memref<1x1xf32, #tpu.memory_space<vmem>>, %arg28: memref<32x32xbf16, #tpu.memory_space<vmem>>, %arg29: memref<1x32xf32, #tpu.memory_space<vmem>>, %arg30: memref<32x2xbf16, #tpu.memory_space<vmem>>, %arg31: memref<1x2xf32, #tpu.memory_space<vmem>>, %arg32: memref<2x2xf32, #tpu.memory_space<vmem>>, %arg33: memref<16x32xf32, #tpu.memory_space<vmem>>) attributes {dimension_semantics = [#tpu.dimension_semantics<arbitrary>], iteration_bounds = array<i64: 2>, scalar_prefetch = 0 : i64, scratch_operands = 1 : i64, tpu.core_type = #tpu.core_type<tc>, window_params = [{pipeline_mode = #tpu.pipeline_mode<synchronous>, transform_indices = @transform_0, window_bounds = array<i64: 16, 4>}, {pipeline_mode = #tpu.pipeline_mode<synchronous>, transform_indices = @transform_1, window_bounds = array<i64: 16, 16>}, {pipeline_mode = #tpu.pipeline_mode<synchronous>, transform_indices = @transform_2, window_bounds = array<i64: 16, 2>}, {pipeline_mode = #tpu.pipeline_mode<synchronous>, transform_indices = @transform_3, window_bounds = array<i64: 4, 32>}, {pipeline_mode = #tpu.pipeline_mode<synchronous>, transform_indices = @transform_4, window_bounds = array<i64: 1, 32>}, {transform_indices = @transform_5, window_bounds = array<i64: 1, 32, 128>}, {transform_indices = @transform_6, window_bounds = array<i64: 1, 1, 128>}, {transform_indices = @transform_7, window_bounds = array<i64: 1, 32, 128>}, {transform_indices = @transform_8, window_bounds = array<i64: 1, 1, 128>}, {transform_indices = @transform_9, window_bounds = array<i64: 1, 32, 128>}, {transform_indices = @transform_10, window_bounds = array<i64: 1, 1, 128>}, {transform_indices = @transform_11, window_bounds = array<i64: 1, 32, 32>}, {transform_indices = @transform_12, window_bounds = array<i64: 1, 1, 32>}, {transform_indices = @transform_13, window_bounds = array<i64: 1, 1, 32>}, {transform_indices = @transform_14, window_bounds = array<i64: 1, 1, 32>}, {transform_indices = @transform_15, window_bounds = array<i64: 1, 1, 32>}, {transform_indices = @transform_16, window_bounds = array<i64: 1, 1, 32>}, {transform_indices = @transform_17, window_bounds = array<i64: 1, 32, 64>}, {transform_indices = @transform_18, window_bounds = array<i64: 1, 1, 64>}, {transform_indices = @transform_19, window_bounds = array<i64: 1, 64, 32>}, {transform_indices = @transform_20, window_bounds = array<i64: 1, 1, 32>}, {transform_indices = @transform_21, window_bounds = array<i64: 1, 1, 32>}, {transform_indices = @transform_22, window_bounds = array<i64: 1, 1, 32>}, {pipeline_mode = #tpu.pipeline_mode<synchronous>, transform_indices = @transform_23, window_bounds = array<i64: 32, 32>}, {pipeline_mode = #tpu.pipeline_mode<synchronous>, transform_indices = @transform_24, window_bounds = array<i64: 1, 32>}, {pipeline_mode = #tpu.pipeline_mode<synchronous>, transform_indices = @transform_25, window_bounds = array<i64: 1, 32>}, {pipeline_mode = #tpu.pipeline_mode<synchronous>, transform_indices = @transform_26, window_bounds = array<i64: 1, 1>}, {pipeline_mode = #tpu.pipeline_mode<synchronous>, transform_indices = @transform_27, window_bounds = array<i64: 32, 32>}, {pipeline_mode = #tpu.pipeline_mode<synchronous>, transform_indices = @transform_28, window_bounds = array<i64: 1, 32>}, {pipeline_mode = #tpu.pipeline_mode<synchronous>, transform_indices = @transform_29, window_bounds = array<i64: 32, 2>}, {pipeline_mode = #tpu.pipeline_mode<synchronous>, transform_indices = @transform_30, window_bounds = array<i64: 1, 2>}, {pipeline_mode = #tpu.pipeline_mode<synchronous>, transform_indices = @transform_31, window_bounds = array<i64: 2, 2>}]} {
    %c0_i32 = arith.constant 0 : i32
    %0 = arith.cmpi eq, %arg0, %c0_i32 : i32
    %1 = arith.extui %0 : i1 to i32
    %c0_i32_0 = arith.constant 0 : i32
    %2 = arith.cmpi ne, %1, %c0_i32_0 : i32
    scf.if %2 {
      %c0_134 = arith.constant 0 : index
      %c0_135 = arith.constant 0 : index
      %314 = vector.load %arg1[%c0_134, %c0_135] : memref<16x4xf32, #tpu.memory_space<vmem>>, vector<16x4xf32>
      %315 = arith.truncf %314 : vector<16x4xf32> to vector<16x4xbf16>
      %c0_136 = arith.constant 0 : index
      %c0_137 = arith.constant 0 : index
      %316 = vector.load %arg4[%c0_136, %c0_137] : memref<4x32xbf16, #tpu.memory_space<vmem>>, vector<4x32xbf16>
      %cst_138 = arith.constant dense<0.000000e+00> : vector<16x32xf32>
      %317 = tpu.matmul %315, %316, %cst_138 {dimension_numbers = #tpu.dot_dimension_numbers<[1], [0], [0], [1], [0, 0, 1, 1], [], []>} : vector<16x4xbf16>, vector<4x32xbf16>, vector<16x32xf32> -> vector<16x32xf32>
      %c0_139 = arith.constant 0 : index
      %c0_140 = arith.constant 0 : index
      %318 = vector.load %arg5[%c0_139, %c0_140] : memref<1x32xf32, #tpu.memory_space<vmem>>, vector<1x32xf32>
      %319 = vector.broadcast %318 : vector<1x32xf32> to vector<16x32xf32>
      %320 = arith.addf %317, %319 : vector<16x32xf32>
      %c0_141 = arith.constant 0 : index
      %c0_142 = arith.constant 0 : index
      %321 = vector.load %arg33[%c0_141, %c0_142] : memref<16x32xf32, #tpu.memory_space<vmem>>, vector<16x32xf32>
      tpu.vector_store %arg33[%c0_141, %c0_142], %320 {strides = array<i32>} : memref<16x32xf32, #tpu.memory_space<vmem>>, vector<16x32xf32>,
    } else {
    }
    %c0 = arith.constant 0 : index
    %c0_1 = arith.constant 0 : index
    %3 = vector.load %arg33[%c0, %c0_1] : memref<16x32xf32, #tpu.memory_space<vmem>>, vector<16x32xf32>
    %4 = arith.truncf %3 : vector<16x32xf32> to vector<16x32xbf16>
    %c0_2 = arith.constant 0 : index
    %c0_3 = arith.constant 0 : index
    %5 = vector.load %arg2[%c0_2, %c0_3] : memref<16x16xbf16, #tpu.memory_space<vmem>>, vector<16x16xbf16>
    %c0_4 = arith.constant 0 : index
    %c0_5 = arith.constant 0 : index
    %c0_6 = arith.constant 0 : index
    %6 = vector.load %arg6[%c0_4, %c0_5, %c0_6] : memref<1x32x128xbf16, #tpu.memory_space<vmem>>, vector<1x32x128xbf16>
    %7 = vector.shape_cast %6 : vector<1x32x128xbf16> to vector<32x128xbf16>
    %cst = arith.constant dense<0.000000e+00> : vector<16x128xf32>
    %8 = tpu.matmul %4, %7, %cst {dimension_numbers = #tpu.dot_dimension_numbers<[1], [0], [0], [1], [0, 0, 1, 1], [], []>} : vector<16x32xbf16>, vector<32x128xbf16>, vector<16x128xf32> -> vector<16x128xf32>
    %c0_7 = arith.constant 0 : index
    %c0_8 = arith.constant 0 : index
    %c0_9 = arith.constant 0 : index
    %9 = vector.load %arg7[%c0_7, %c0_8, %c0_9] : memref<1x1x128xf32, #tpu.memory_space<vmem>>, vector<1x1x128xf32>
    %10 = vector.shape_cast %9 : vector<1x1x128xf32> to vector<1x128xf32>
    %11 = vector.broadcast %10 : vector<1x128xf32> to vector<16x128xf32>
    %12 = arith.addf %8, %11 : vector<16x128xf32>
    %cst_10 = arith.constant 0.176776692 : f32
    %13 = vector.broadcast %cst_10 : f32 to vector<16x128xf32>
    %14 = arith.mulf %12, %13 : vector<16x128xf32>
    %c0_11 = arith.constant 0 : index
    %c0_12 = arith.constant 0 : index
    %c0_13 = arith.constant 0 : index
    %15 = vector.load %arg8[%c0_11, %c0_12, %c0_13] : memref<1x32x128xbf16, #tpu.memory_space<vmem>>, vector<1x32x128xbf16>
    %16 = vector.shape_cast %15 : vector<1x32x128xbf16> to vector<32x128xbf16>
    %cst_14 = arith.constant dense<0.000000e+00> : vector<16x128xf32>
    %17 = tpu.matmul %4, %16, %cst_14 {dimension_numbers = #tpu.dot_dimension_numbers<[1], [0], [0], [1], [0, 0, 1, 1], [], []>} : vector<16x32xbf16>, vector<32x128xbf16>, vector<16x128xf32> -> vector<16x128xf32>
    %c0_15 = arith.constant 0 : index
    %c0_16 = arith.constant 0 : index
    %c0_17 = arith.constant 0 : index
    %18 = vector.load %arg9[%c0_15, %c0_16, %c0_17] : memref<1x1x128xf32, #tpu.memory_space<vmem>>, vector<1x1x128xf32>
    %19 = vector.shape_cast %18 : vector<1x1x128xf32> to vector<1x128xf32>
    %20 = vector.broadcast %19 : vector<1x128xf32> to vector<16x128xf32>
    %21 = arith.addf %17, %20 : vector<16x128xf32>
    %c0_18 = arith.constant 0 : index
    %c0_19 = arith.constant 0 : index
    %c0_20 = arith.constant 0 : index
    %22 = vector.load %arg10[%c0_18, %c0_19, %c0_20] : memref<1x32x128xbf16, #tpu.memory_space<vmem>>, vector<1x32x128xbf16>
    %23 = vector.shape_cast %22 : vector<1x32x128xbf16> to vector<32x128xbf16>
    %cst_21 = arith.constant dense<0.000000e+00> : vector<16x128xf32>
    %24 = tpu.matmul %4, %23, %cst_21 {dimension_numbers = #tpu.dot_dimension_numbers<[1], [0], [0], [1], [0, 0, 1, 1], [], []>} : vector<16x32xbf16>, vector<32x128xbf16>, vector<16x128xf32> -> vector<16x128xf32>
    %c0_22 = arith.constant 0 : index
    %c0_23 = arith.constant 0 : index
    %c0_24 = arith.constant 0 : index
    %25 = vector.load %arg11[%c0_22, %c0_23, %c0_24] : memref<1x1x128xf32, #tpu.memory_space<vmem>>, vector<1x1x128xf32>
    %26 = vector.shape_cast %25 : vector<1x1x128xf32> to vector<1x128xf32>
    %27 = vector.broadcast %26 : vector<1x128xf32> to vector<16x128xf32>
    %28 = arith.addf %24, %27 : vector<16x128xf32>
    %cst_25 = arith.constant 0.000000e+00 : f32
    %29 = vector.broadcast %cst_25 : f32 to vector<16x32xf32>
    %30 = vector.extract_strided_slice %14 {offsets = [0, 0], sizes = [16, 32], strides = [1, 1]} : vector<16x128xf32> to vector<16x32xf32>
    %31 = arith.truncf %30 : vector<16x32xf32> to vector<16x32xbf16>
    %32 = vector.extract_strided_slice %21 {offsets = [0, 0], sizes = [16, 32], strides = [1, 1]} : vector<16x128xf32> to vector<16x32xf32>
    %33 = arith.truncf %32 : vector<16x32xf32> to vector<16x32xbf16>
    %cst_26 = arith.constant dense<0.000000e+00> : vector<16x16xf32>
    %34 = tpu.matmul %31, %33, %cst_26 {dimension_numbers = #tpu.dot_dimension_numbers<[1], [1], [0], [0], [0, 0, 1, 0], [], []>} : vector<16x32xbf16>, vector<16x32xbf16>, vector<16x16xf32> -> vector<16x16xf32>
    %cst_27 = arith.constant dense<0xFF800000> : vector<16xf32>
    %35 = vector.multi_reduction <maximumf>, %34, %cst_27 [1] : vector<16x16xf32> to vector<16xf32>
    %36 = vector.shape_cast %35 : vector<16xf32> to vector<16x1xf32>
    %37 = vector.broadcast %36 : vector<16x1xf32> to vector<16x16xf32>
    %38 = arith.subf %34, %37 : vector<16x16xf32>
    %39 = math.exp %38 : vector<16x16xf32>
    %40 = arith.extf %5 : vector<16x16xbf16> to vector<16x16xf32>
    %41 = arith.mulf %39, %40 : vector<16x16xf32>
    %cst_28 = arith.constant dense<0.000000e+00> : vector<16xf32>
    %42 = vector.multi_reduction <add>, %41, %cst_28 [1] : vector<16x16xf32> to vector<16xf32>
    %43 = vector.shape_cast %42 : vector<16xf32> to vector<16x1xf32>
    %cst_29 = arith.constant 1.000000e-30 : f32
    %44 = vector.broadcast %cst_29 : f32 to vector<16x1xf32>
    %45 = arith.maximumf %43, %44 : vector<16x1xf32>
    %46 = tpu.reciprocal %45 {approx = true} : vector<16x1xf32> -> vector<16x1xf32>
    %47 = vector.broadcast %46 : vector<16x1xf32> to vector<16x16xf32>
    %48 = arith.mulf %41, %47 : vector<16x16xf32>
    %49 = arith.truncf %48 : vector<16x16xf32> to vector<16x16xbf16>
    %50 = vector.extract_strided_slice %28 {offsets = [0, 0], sizes = [16, 32], strides = [1, 1]} : vector<16x128xf32> to vector<16x32xf32>
    %51 = arith.truncf %50 : vector<16x32xf32> to vector<16x32xbf16>
    %cst_30 = arith.constant dense<0.000000e+00> : vector<16x32xf32>
    %52 = tpu.matmul %49, %51, %cst_30 {dimension_numbers = #tpu.dot_dimension_numbers<[1], [0], [0], [1], [0, 0, 1, 1], [], []>} : vector<16x16xbf16>, vector<16x32xbf16>, vector<16x32xf32> -> vector<16x32xf32>
    %53 = arith.addf %29, %52 : vector<16x32xf32>
    %54 = vector.extract_strided_slice %14 {offsets = [0, 32], sizes = [16, 32], strides = [1, 1]} : vector<16x128xf32> to vector<16x32xf32>
    %55 = arith.truncf %54 : vector<16x32xf32> to vector<16x32xbf16>
    %56 = vector.extract_strided_slice %21 {offsets = [0, 32], sizes = [16, 32], strides = [1, 1]} : vector<16x128xf32> to vector<16x32xf32>
    %57 = arith.truncf %56 : vector<16x32xf32> to vector<16x32xbf16>
    %cst_31 = arith.constant dense<0.000000e+00> : vector<16x16xf32>
    %58 = tpu.matmul %55, %57, %cst_31 {dimension_numbers = #tpu.dot_dimension_numbers<[1], [1], [0], [0], [0, 0, 1, 0], [], []>} : vector<16x32xbf16>, vector<16x32xbf16>, vector<16x16xf32> -> vector<16x16xf32>
    %cst_32 = arith.constant dense<0xFF800000> : vector<16xf32>
    %59 = vector.multi_reduction <maximumf>, %58, %cst_32 [1] : vector<16x16xf32> to vector<16xf32>
    %60 = vector.shape_cast %59 : vector<16xf32> to vector<16x1xf32>
    %61 = vector.broadcast %60 : vector<16x1xf32> to vector<16x16xf32>
    %62 = arith.subf %58, %61 : vector<16x16xf32>
    %63 = math.exp %62 : vector<16x16xf32>
    %64 = arith.extf %5 : vector<16x16xbf16> to vector<16x16xf32>
    %65 = arith.mulf %63, %64 : vector<16x16xf32>
    %cst_33 = arith.constant dense<0.000000e+00> : vector<16xf32>
    %66 = vector.multi_reduction <add>, %65, %cst_33 [1] : vector<16x16xf32> to vector<16xf32>
    %67 = vector.shape_cast %66 : vector<16xf32> to vector<16x1xf32>
    %cst_34 = arith.constant 1.000000e-30 : f32
    %68 = vector.broadcast %cst_34 : f32 to vector<16x1xf32>
    %69 = arith.maximumf %67, %68 : vector<16x1xf32>
    %70 = tpu.reciprocal %69 {approx = true} : vector<16x1xf32> -> vector<16x1xf32>
    %71 = vector.broadcast %70 : vector<16x1xf32> to vector<16x16xf32>
    %72 = arith.mulf %65, %71 : vector<16x16xf32>
    %73 = arith.truncf %72 : vector<16x16xf32> to vector<16x16xbf16>
    %74 = vector.extract_strided_slice %28 {offsets = [0, 32], sizes = [16, 32], strides = [1, 1]} : vector<16x128xf32> to vector<16x32xf32>
    %75 = arith.truncf %74 : vector<16x32xf32> to vector<16x32xbf16>
    %cst_35 = arith.constant dense<0.000000e+00> : vector<16x32xf32>
    %76 = tpu.matmul %73, %75, %cst_35 {dimension_numbers = #tpu.dot_dimension_numbers<[1], [0], [0], [1], [0, 0, 1, 1], [], []>} : vector<16x16xbf16>, vector<16x32xbf16>, vector<16x32xf32> -> vector<16x32xf32>
    %77 = arith.addf %53, %76 : vector<16x32xf32>
    %78 = vector.extract_strided_slice %14 {offsets = [0, 64], sizes = [16, 32], strides = [1, 1]} : vector<16x128xf32> to vector<16x32xf32>
    %79 = arith.truncf %78 : vector<16x32xf32> to vector<16x32xbf16>
    %80 = vector.extract_strided_slice %21 {offsets = [0, 64], sizes = [16, 32], strides = [1, 1]} : vector<16x128xf32> to vector<16x32xf32>
    %81 = arith.truncf %80 : vector<16x32xf32> to vector<16x32xbf16>
    %cst_36 = arith.constant dense<0.000000e+00> : vector<16x16xf32>
    %82 = tpu.matmul %79, %81, %cst_36 {dimension_numbers = #tpu.dot_dimension_numbers<[1], [1], [0], [0], [0, 0, 1, 0], [], []>} : vector<16x32xbf16>, vector<16x32xbf16>, vector<16x16xf32> -> vector<16x16xf32>
    %cst_37 = arith.constant dense<0xFF800000> : vector<16xf32>
    %83 = vector.multi_reduction <maximumf>, %82, %cst_37 [1] : vector<16x16xf32> to vector<16xf32>
    %84 = vector.shape_cast %83 : vector<16xf32> to vector<16x1xf32>
    %85 = vector.broadcast %84 : vector<16x1xf32> to vector<16x16xf32>
    %86 = arith.subf %82, %85 : vector<16x16xf32>
    %87 = math.exp %86 : vector<16x16xf32>
    %88 = arith.extf %5 : vector<16x16xbf16> to vector<16x16xf32>
    %89 = arith.mulf %87, %88 : vector<16x16xf32>
    %cst_38 = arith.constant dense<0.000000e+00> : vector<16xf32>
    %90 = vector.multi_reduction <add>, %89, %cst_38 [1] : vector<16x16xf32> to vector<16xf32>
    %91 = vector.shape_cast %90 : vector<16xf32> to vector<16x1xf32>
    %cst_39 = arith.constant 1.000000e-30 : f32
    %92 = vector.broadcast %cst_39 : f32 to vector<16x1xf32>
    %93 = arith.maximumf %91, %92 : vector<16x1xf32>
    %94 = tpu.reciprocal %93 {approx = true} : vector<16x1xf32> -> vector<16x1xf32>
    %95 = vector.broadcast %94 : vector<16x1xf32> to vector<16x16xf32>
    %96 = arith.mulf %89, %95 : vector<16x16xf32>
    %97 = arith.truncf %96 : vector<16x16xf32> to vector<16x16xbf16>
    %98 = vector.extract_strided_slice %28 {offsets = [0, 64], sizes = [16, 32], strides = [1, 1]} : vector<16x128xf32> to vector<16x32xf32>
    %99 = arith.truncf %98 : vector<16x32xf32> to vector<16x32xbf16>
    %cst_40 = arith.constant dense<0.000000e+00> : vector<16x32xf32>
    %100 = tpu.matmul %97, %99, %cst_40 {dimension_numbers = #tpu.dot_dimension_numbers<[1], [0], [0], [1], [0, 0, 1, 1], [], []>} : vector<16x16xbf16>, vector<16x32xbf16>, vector<16x32xf32> -> vector<16x32xf32>
    %101 = arith.addf %77, %100 : vector<16x32xf32>
    %102 = vector.extract_strided_slice %14 {offsets = [0, 96], sizes = [16, 32], strides = [1, 1]} : vector<16x128xf32> to vector<16x32xf32>
    %103 = arith.truncf %102 : vector<16x32xf32> to vector<16x32xbf16>
    %104 = vector.extract_strided_slice %21 {offsets = [0, 96], sizes = [16, 32], strides = [1, 1]} : vector<16x128xf32> to vector<16x32xf32>
    %105 = arith.truncf %104 : vector<16x32xf32> to vector<16x32xbf16>
    %cst_41 = arith.constant dense<0.000000e+00> : vector<16x16xf32>
    %106 = tpu.matmul %103, %105, %cst_41 {dimension_numbers = #tpu.dot_dimension_numbers<[1], [1], [0], [0], [0, 0, 1, 0], [], []>} : vector<16x32xbf16>, vector<16x32xbf16>, vector<16x16xf32> -> vector<16x16xf32>
    %cst_42 = arith.constant dense<0xFF800000> : vector<16xf32>
    %107 = vector.multi_reduction <maximumf>, %106, %cst_42 [1] : vector<16x16xf32> to vector<16xf32>
    %108 = vector.shape_cast %107 : vector<16xf32> to vector<16x1xf32>
    %109 = vector.broadcast %108 : vector<16x1xf32> to vector<16x16xf32>
    %110 = arith.subf %106, %109 : vector<16x16xf32>
    %111 = math.exp %110 : vector<16x16xf32>
    %112 = arith.extf %5 : vector<16x16xbf16> to vector<16x16xf32>
    %113 = arith.mulf %111, %112 : vector<16x16xf32>
    %cst_43 = arith.constant dense<0.000000e+00> : vector<16xf32>
    %114 = vector.multi_reduction <add>, %113, %cst_43 [1] : vector<16x16xf32> to vector<16xf32>
    %115 = vector.shape_cast %114 : vector<16xf32> to vector<16x1xf32>
    %cst_44 = arith.constant 1.000000e-30 : f32
    %116 = vector.broadcast %cst_44 : f32 to vector<16x1xf32>
    %117 = arith.maximumf %115, %116 : vector<16x1xf32>
    %118 = tpu.reciprocal %117 {approx = true} : vector<16x1xf32> -> vector<16x1xf32>
    %119 = vector.broadcast %118 : vector<16x1xf32> to vector<16x16xf32>
    %120 = arith.mulf %113, %119 : vector<16x16xf32>
    %121 = arith.truncf %120 : vector<16x16xf32> to vector<16x16xbf16>
    %122 = vector.extract_strided_slice %28 {offsets = [0, 96], sizes = [16, 32], strides = [1, 1]} : vector<16x128xf32> to vector<16x32xf32>
    %123 = arith.truncf %122 : vector<16x32xf32> to vector<16x32xbf16>
    %cst_45 = arith.constant dense<0.000000e+00> : vector<16x32xf32>
    %124 = tpu.matmul %121, %123, %cst_45 {dimension_numbers = #tpu.dot_dimension_numbers<[1], [0], [0], [1], [0, 0, 1, 1], [], []>} : vector<16x16xbf16>, vector<16x32xbf16>, vector<16x32xf32> -> vector<16x32xf32>
    %125 = arith.addf %101, %124 : vector<16x32xf32>
    %cst_46 = arith.constant 2.500000e-01 : f32
    %126 = vector.broadcast %cst_46 : f32 to vector<16x32xf32>
    %127 = arith.mulf %125, %126 : vector<16x32xf32>
    %c0_47 = arith.constant 0 : index
    %c0_48 = arith.constant 0 : index
    %c0_49 = arith.constant 0 : index
    %128 = vector.load %arg12[%c0_47, %c0_48, %c0_49] : memref<1x32x32xbf16, #tpu.memory_space<vmem>>, vector<1x32x32xbf16>
    %129 = vector.shape_cast %128 : vector<1x32x32xbf16> to vector<32x32xbf16>
    %cst_50 = arith.constant dense<0.000000e+00> : vector<16x32xf32>
    %130 = tpu.matmul %4, %129, %cst_50 {dimension_numbers = #tpu.dot_dimension_numbers<[1], [0], [0], [1], [0, 0, 1, 1], [], []>} : vector<16x32xbf16>, vector<32x32xbf16>, vector<16x32xf32> -> vector<16x32xf32>
    %c0_51 = arith.constant 0 : index
    %c0_52 = arith.constant 0 : index
    %c0_53 = arith.constant 0 : index
    %131 = vector.load %arg13[%c0_51, %c0_52, %c0_53] : memref<1x1x32xf32, #tpu.memory_space<vmem>>, vector<1x1x32xf32>
    %132 = vector.shape_cast %131 : vector<1x1x32xf32> to vector<1x32xf32>
    %133 = vector.broadcast %132 : vector<1x32xf32> to vector<16x32xf32>
    %134 = arith.addf %130, %133 : vector<16x32xf32>
    %c0_54 = arith.constant 0 : index
    %c0_55 = arith.constant 0 : index
    %c0_56 = arith.constant 0 : index
    %135 = vector.load %arg14[%c0_54, %c0_55, %c0_56] : memref<1x1x32xf32, #tpu.memory_space<vmem>>, vector<1x1x32xf32>
    %136 = vector.shape_cast %135 : vector<1x1x32xf32> to vector<1x32xf32>
    %137 = vector.broadcast %136 : vector<1x32xf32> to vector<16x32xf32>
    %138 = arith.mulf %127, %137 : vector<16x32xf32>
    %cst_57 = arith.constant dense<0.000000e+00> : vector<16xf32>
    %139 = vector.multi_reduction <add>, %138, %cst_57 [1] : vector<16x32xf32> to vector<16xf32>
    %140 = vector.shape_cast %139 : vector<16xf32> to vector<16x1xf32>
    %c0_58 = arith.constant 0 : index
    %c0_59 = arith.constant 0 : index
    %c0_60 = arith.constant 0 : index
    %141 = vector.load %arg15[%c0_58, %c0_59, %c0_60] : memref<1x1x32xf32, #tpu.memory_space<vmem>>, vector<1x1x32xf32>
    %142 = vector.shape_cast %141 : vector<1x1x32xf32> to vector<1x32xf32>
    %143 = vector.broadcast %142 : vector<1x32xf32> to vector<16x32xf32>
    %144 = arith.mulf %134, %143 : vector<16x32xf32>
    %cst_61 = arith.constant dense<0.000000e+00> : vector<16xf32>
    %145 = vector.multi_reduction <add>, %144, %cst_61 [1] : vector<16x32xf32> to vector<16xf32>
    %146 = vector.shape_cast %145 : vector<16xf32> to vector<16x1xf32>
    %147 = arith.addf %140, %146 : vector<16x1xf32>
    %148 = arith.negf %147 : vector<16x1xf32>
    %149 = math.exp %148 : vector<16x1xf32>
    %cst_62 = arith.constant 1.000000e+00 : f32
    %150 = vector.broadcast %cst_62 : f32 to vector<16x1xf32>
    %151 = arith.addf %150, %149 : vector<16x1xf32>
    %152 = arith.divf %150, %151 : vector<16x1xf32>
    %153 = vector.broadcast %152 : vector<16x1xf32> to vector<16x32xf32>
    %154 = arith.mulf %153, %134 : vector<16x32xf32>
    %cst_63 = arith.constant 1.000000e+00 : f32
    %155 = vector.broadcast %cst_63 : f32 to vector<16x1xf32>
    %156 = arith.subf %155, %152 : vector<16x1xf32>
    %157 = vector.broadcast %156 : vector<16x1xf32> to vector<16x32xf32>
    %158 = arith.mulf %157, %127 : vector<16x32xf32>
    %159 = arith.addf %154, %158 : vector<16x32xf32>
    %cst_64 = arith.constant 5.000000e-01 : f32
    %160 = vector.broadcast %cst_64 : f32 to vector<16x32xf32>
    %161 = arith.mulf %160, %159 : vector<16x32xf32>
    %cst_65 = arith.constant 0.707106769 : f32
    %162 = vector.broadcast %cst_65 : f32 to vector<16x32xf32>
    %163 = arith.mulf %159, %162 : vector<16x32xf32>
    %164 = math.absf %163 : vector<16x32xf32>
    %cst_66 = arith.constant 0.327591091 : f32
    %165 = vector.broadcast %cst_66 : f32 to vector<16x32xf32>
    %166 = arith.mulf %165, %164 : vector<16x32xf32>
    %cst_67 = arith.constant 1.000000e+00 : f32
    %167 = vector.broadcast %cst_67 : f32 to vector<16x32xf32>
    %168 = arith.addf %167, %166 : vector<16x32xf32>
    %cst_68 = arith.constant 1.000000e+00 : f32
    %169 = vector.broadcast %cst_68 : f32 to vector<16x32xf32>
    %170 = arith.divf %169, %168 : vector<16x32xf32>
    %cst_69 = arith.constant 1.06140542 : f32
    %171 = vector.broadcast %cst_69 : f32 to vector<16x32xf32>
    %172 = arith.mulf %171, %170 : vector<16x32xf32>
    %cst_70 = arith.constant -1.45315206 : f32
    %173 = vector.broadcast %cst_70 : f32 to vector<16x32xf32>
    %174 = arith.addf %172, %173 : vector<16x32xf32>
    %175 = arith.mulf %174, %170 : vector<16x32xf32>
    %cst_71 = arith.constant 1.42141378 : f32
    %176 = vector.broadcast %cst_71 : f32 to vector<16x32xf32>
    %177 = arith.addf %175, %176 : vector<16x32xf32>
    %178 = arith.mulf %177, %170 : vector<16x32xf32>
    %cst_72 = arith.constant -0.284496725 : f32
    %179 = vector.broadcast %cst_72 : f32 to vector<16x32xf32>
    %180 = arith.addf %178, %179 : vector<16x32xf32>
    %181 = arith.mulf %180, %170 : vector<16x32xf32>
    %cst_73 = arith.constant 0.254829586 : f32
    %182 = vector.broadcast %cst_73 : f32 to vector<16x32xf32>
    %183 = arith.addf %181, %182 : vector<16x32xf32>
    %184 = arith.mulf %183, %170 : vector<16x32xf32>
    %cst_74 = arith.constant 0.000000e+00 : f32
    %185 = vector.broadcast %cst_74 : f32 to vector<16x32xf32>
    %186 = arith.subf %185, %164 : vector<16x32xf32>
    %187 = arith.mulf %186, %164 : vector<16x32xf32>
    %188 = math.exp %187 : vector<16x32xf32>
    %189 = arith.mulf %184, %188 : vector<16x32xf32>
    %cst_75 = arith.constant 1.000000e+00 : f32
    %190 = vector.broadcast %cst_75 : f32 to vector<16x32xf32>
    %191 = arith.subf %190, %189 : vector<16x32xf32>
    %cst_76 = arith.constant 0.000000e+00 : f32
    %192 = vector.broadcast %cst_76 : f32 to vector<16x32xf32>
    %193 = arith.cmpf oge, %163, %192 : vector<16x32xf32>
    %cst_77 = arith.constant 0.000000e+00 : f32
    %194 = vector.broadcast %cst_77 : f32 to vector<16x32xf32>
    %195 = arith.subf %194, %191 : vector<16x32xf32>
    %196 = arith.select %193, %191, %195 : vector<16x32xi1>, vector<16x32xf32>
    %cst_78 = arith.constant 1.000000e+00 : f32
    %197 = vector.broadcast %cst_78 : f32 to vector<16x32xf32>
    %198 = arith.addf %197, %196 : vector<16x32xf32>
    %199 = arith.mulf %161, %198 : vector<16x32xf32>
    %200 = arith.addf %199, %3 : vector<16x32xf32>
    %c0_79 = arith.constant 0 : index
    %c0_80 = arith.constant 0 : index
    %c0_81 = arith.constant 0 : index
    %201 = vector.load %arg16[%c0_79, %c0_80, %c0_81] : memref<1x1x32xf32, #tpu.memory_space<vmem>>, vector<1x1x32xf32>
    %202 = vector.shape_cast %201 : vector<1x1x32xf32> to vector<1x32xf32>
    %c0_82 = arith.constant 0 : index
    %c0_83 = arith.constant 0 : index
    %c0_84 = arith.constant 0 : index
    %203 = vector.load %arg17[%c0_82, %c0_83, %c0_84] : memref<1x1x32xf32, #tpu.memory_space<vmem>>, vector<1x1x32xf32>
    %204 = vector.shape_cast %203 : vector<1x1x32xf32> to vector<1x32xf32>
    %cst_85 = arith.constant dense<0.000000e+00> : vector<16xf32>
    %205 = vector.multi_reduction <add>, %200, %cst_85 [1] : vector<16x32xf32> to vector<16xf32>
    %206 = vector.shape_cast %205 : vector<16xf32> to vector<16x1xf32>
    %cst_86 = arith.constant 3.200000e+01 : f32
    %207 = vector.broadcast %cst_86 : f32 to vector<16x1xf32>
    %208 = arith.divf %206, %207 : vector<16x1xf32>
    %209 = vector.broadcast %208 : vector<16x1xf32> to vector<16x32xf32>
    %210 = arith.subf %200, %209 : vector<16x32xf32>
    %211 = arith.mulf %210, %210 : vector<16x32xf32>
    %cst_87 = arith.constant dense<0.000000e+00> : vector<16xf32>
    %212 = vector.multi_reduction <add>, %211, %cst_87 [1] : vector<16x32xf32> to vector<16xf32>
    %213 = vector.shape_cast %212 : vector<16xf32> to vector<16x1xf32>
    %cst_88 = arith.constant 3.200000e+01 : f32
    %214 = vector.broadcast %cst_88 : f32 to vector<16x1xf32>
    %215 = arith.divf %213, %214 : vector<16x1xf32>
    %216 = vector.broadcast %208 : vector<16x1xf32> to vector<16x32xf32>
    %217 = arith.subf %200, %216 : vector<16x32xf32>
    %cst_89 = arith.constant 9.99999974E-6 : f32
    %218 = vector.broadcast %cst_89 : f32 to vector<16x1xf32>
    %219 = arith.addf %215, %218 : vector<16x1xf32>
    %220 = math.rsqrt %219 : vector<16x1xf32>
    %221 = vector.broadcast %220 : vector<16x1xf32> to vector<16x32xf32>
    %222 = arith.mulf %217, %221 : vector<16x32xf32>
    %223 = vector.broadcast %202 : vector<1x32xf32> to vector<16x32xf32>
    %224 = arith.mulf %222, %223 : vector<16x32xf32>
    %225 = vector.broadcast %204 : vector<1x32xf32> to vector<16x32xf32>
    %226 = arith.addf %224, %225 : vector<16x32xf32>
    %227 = arith.truncf %226 : vector<16x32xf32> to vector<16x32xbf16>
    %c0_90 = arith.constant 0 : index
    %c0_91 = arith.constant 0 : index
    %c0_92 = arith.constant 0 : index
    %228 = vector.load %arg18[%c0_90, %c0_91, %c0_92] : memref<1x32x64xbf16, #tpu.memory_space<vmem>>, vector<1x32x64xbf16>
    %229 = vector.shape_cast %228 : vector<1x32x64xbf16> to vector<32x64xbf16>
    %cst_93 = arith.constant dense<0.000000e+00> : vector<16x64xf32>
    %230 = tpu.matmul %227, %229, %cst_93 {dimension_numbers = #tpu.dot_dimension_numbers<[1], [0], [0], [1], [0, 0, 1, 1], [], []>} : vector<16x32xbf16>, vector<32x64xbf16>, vector<16x64xf32> -> vector<16x64xf32>
    %c0_94 = arith.constant 0 : index
    %c0_95 = arith.constant 0 : index
    %c0_96 = arith.constant 0 : index
    %231 = vector.load %arg19[%c0_94, %c0_95, %c0_96] : memref<1x1x64xf32, #tpu.memory_space<vmem>>, vector<1x1x64xf32>
    %232 = vector.shape_cast %231 : vector<1x1x64xf32> to vector<1x64xf32>
    %233 = vector.broadcast %232 : vector<1x64xf32> to vector<16x64xf32>
    %234 = arith.addf %230, %233 : vector<16x64xf32>
    %cst_97 = arith.constant 5.000000e-01 : f32
    %235 = vector.broadcast %cst_97 : f32 to vector<16x64xf32>
    %236 = arith.mulf %235, %234 : vector<16x64xf32>
    %cst_98 = arith.constant 0.707106769 : f32
    %237 = vector.broadcast %cst_98 : f32 to vector<16x64xf32>
    %238 = arith.mulf %234, %237 : vector<16x64xf32>
    %239 = math.absf %238 : vector<16x64xf32>
    %cst_99 = arith.constant 0.327591091 : f32
    %240 = vector.broadcast %cst_99 : f32 to vector<16x64xf32>
    %241 = arith.mulf %240, %239 : vector<16x64xf32>
    %cst_100 = arith.constant 1.000000e+00 : f32
    %242 = vector.broadcast %cst_100 : f32 to vector<16x64xf32>
    %243 = arith.addf %242, %241 : vector<16x64xf32>
    %cst_101 = arith.constant 1.000000e+00 : f32
    %244 = vector.broadcast %cst_101 : f32 to vector<16x64xf32>
    %245 = arith.divf %244, %243 : vector<16x64xf32>
    %cst_102 = arith.constant 1.06140542 : f32
    %246 = vector.broadcast %cst_102 : f32 to vector<16x64xf32>
    %247 = arith.mulf %246, %245 : vector<16x64xf32>
    %cst_103 = arith.constant -1.45315206 : f32
    %248 = vector.broadcast %cst_103 : f32 to vector<16x64xf32>
    %249 = arith.addf %247, %248 : vector<16x64xf32>
    %250 = arith.mulf %249, %245 : vector<16x64xf32>
    %cst_104 = arith.constant 1.42141378 : f32
    %251 = vector.broadcast %cst_104 : f32 to vector<16x64xf32>
    %252 = arith.addf %250, %251 : vector<16x64xf32>
    %253 = arith.mulf %252, %245 : vector<16x64xf32>
    %cst_105 = arith.constant -0.284496725 : f32
    %254 = vector.broadcast %cst_105 : f32 to vector<16x64xf32>
    %255 = arith.addf %253, %254 : vector<16x64xf32>
    %256 = arith.mulf %255, %245 : vector<16x64xf32>
    %cst_106 = arith.constant 0.254829586 : f32
    %257 = vector.broadcast %cst_106 : f32 to vector<16x64xf32>
    %258 = arith.addf %256, %257 : vector<16x64xf32>
    %259 = arith.mulf %258, %245 : vector<16x64xf32>
    %cst_107 = arith.constant 0.000000e+00 : f32
    %260 = vector.broadcast %cst_107 : f32 to vector<16x64xf32>
    %261 = arith.subf %260, %239 : vector<16x64xf32>
    %262 = arith.mulf %261, %239 : vector<16x64xf32>
    %263 = math.exp %262 : vector<16x64xf32>
    %264 = arith.mulf %259, %263 : vector<16x64xf32>
    %cst_108 = arith.constant 1.000000e+00 : f32
    %265 = vector.broadcast %cst_108 : f32 to vector<16x64xf32>
    %266 = arith.subf %265, %264 : vector<16x64xf32>
    %cst_109 = arith.constant 0.000000e+00 : f32
    %267 = vector.broadcast %cst_109 : f32 to vector<16x64xf32>
    %268 = arith.cmpf oge, %238, %267 : vector<16x64xf32>
    %cst_110 = arith.constant 0.000000e+00 : f32
    %269 = vector.broadcast %cst_110 : f32 to vector<16x64xf32>
    %270 = arith.subf %269, %266 : vector<16x64xf32>
    %271 = arith.select %268, %266, %270 : vector<16x64xi1>, vector<16x64xf32>
    %cst_111 = arith.constant 1.000000e+00 : f32
    %272 = vector.broadcast %cst_111 : f32 to vector<16x64xf32>
    %273 = arith.addf %272, %271 : vector<16x64xf32>
    %274 = arith.mulf %236, %273 : vector<16x64xf32>
    %275 = arith.truncf %274 : vector<16x64xf32> to vector<16x64xbf16>
    %c0_112 = arith.constant 0 : index
    %c0_113 = arith.constant 0 : index
    %c0_114 = arith.constant 0 : index
    %276 = vector.load %arg20[%c0_112, %c0_113, %c0_114] : memref<1x64x32xbf16, #tpu.memory_space<vmem>>, vector<1x64x32xbf16>
    %277 = vector.shape_cast %276 : vector<1x64x32xbf16> to vector<64x32xbf16>
    %cst_115 = arith.constant dense<0.000000e+00> : vector<16x32xf32>
    %278 = tpu.matmul %275, %277, %cst_115 {dimension_numbers = #tpu.dot_dimension_numbers<[1], [0], [0], [1], [0, 0, 1, 1], [], []>} : vector<16x64xbf16>, vector<64x32xbf16>, vector<16x32xf32> -> vector<16x32xf32>
    %c0_116 = arith.constant 0 : index
    %c0_117 = arith.constant 0 : index
    %c0_118 = arith.constant 0 : index
    %279 = vector.load %arg21[%c0_116, %c0_117, %c0_118] : memref<1x1x32xf32, #tpu.memory_space<vmem>>, vector<1x1x32xf32>
    %280 = vector.shape_cast %279 : vector<1x1x32xf32> to vector<1x32xf32>
    %281 = vector.broadcast %280 : vector<1x32xf32> to vector<16x32xf32>
    %282 = arith.addf %278, %281 : vector<16x32xf32>
    %283 = arith.addf %282, %226 : vector<16x32xf32>
    %c0_119 = arith.constant 0 : index
    %c0_120 = arith.constant 0 : index
    %c0_121 = arith.constant 0 : index
    %284 = vector.load %arg22[%c0_119, %c0_120, %c0_121] : memref<1x1x32xf32, #tpu.memory_space<vmem>>, vector<1x1x32xf32>
    %285 = vector.shape_cast %284 : vector<1x1x32xf32> to vector<1x32xf32>
    %c0_122 = arith.constant 0 : index
    %c0_123 = arith.constant 0 : index
    %c0_124 = arith.constant 0 : index
    %286 = vector.load %arg23[%c0_122, %c0_123, %c0_124] : memref<1x1x32xf32, #tpu.memory_space<vmem>>, vector<1x1x32xf32>
    %287 = vector.shape_cast %286 : vector<1x1x32xf32> to vector<1x32xf32>
    %cst_125 = arith.constant dense<0.000000e+00> : vector<16xf32>
    %288 = vector.multi_reduction <add>, %283, %cst_125 [1] : vector<16x32xf32> to vector<16xf32>
    %289 = vector.shape_cast %288 : vector<16xf32> to vector<16x1xf32>
    %cst_126 = arith.constant 3.200000e+01 : f32
    %290 = vector.broadcast %cst_126 : f32 to vector<16x1xf32>
    %291 = arith.divf %289, %290 : vector<16x1xf32>
    %292 = vector.broadcast %291 : vector<16x1xf32> to vector<16x32xf32>
    %293 = arith.subf %283, %292 : vector<16x32xf32>
    %294 = arith.mulf %293, %293 : vector<16x32xf32>
    %cst_127 = arith.constant dense<0.000000e+00> : vector<16xf32>
    %295 = vector.multi_reduction <add>, %294, %cst_127 [1] : vector<16x32xf32> to vector<16xf32>
    %296 = vector.shape_cast %295 : vector<16xf32> to vector<16x1xf32>
    %cst_128 = arith.constant 3.200000e+01 : f32
    %297 = vector.broadcast %cst_128 : f32 to vector<16x1xf32>
    %298 = arith.divf %296, %297 : vector<16x1xf32>
    %299 = vector.broadcast %291 : vector<16x1xf32> to vector<16x32xf32>
    %300 = arith.subf %283, %299 : vector<16x32xf32>
    %cst_129 = arith.constant 9.99999974E-6 : f32
    %301 = vector.broadcast %cst_129 : f32 to vector<16x1xf32>
    %302 = arith.addf %298, %301 : vector<16x1xf32>
    %303 = math.rsqrt %302 : vector<16x1xf32>
    %304 = vector.broadcast %303 : vector<16x1xf32> to vector<16x32xf32>
    %305 = arith.mulf %300, %304 : vector<16x32xf32>
    %306 = vector.broadcast %285 : vector<1x32xf32> to vector<16x32xf32>
    %307 = arith.mulf %305, %306 : vector<16x32xf32>
    %308 = vector.broadcast %287 : vector<1x32xf32> to vector<16x32xf32>
    %309 = arith.addf %307, %308 : vector<16x32xf32>
    %c0_130 = arith.constant 0 : index
    %c0_131 = arith.constant 0 : index
    %310 = vector.load %arg33[%c0_130, %c0_131] : memref<16x32xf32, #tpu.memory_space<vmem>>, vector<16x32xf32>
    tpu.vector_store %arg33[%c0_130, %c0_131], %309 {strides = array<i32>} : memref<16x32xf32, #tpu.memory_space<vmem>>, vector<16x32xf32>,
    %c1_i32 = arith.constant 1 : i32
    %311 = arith.cmpi eq, %arg0, %c1_i32 : i32
    %312 = arith.extui %311 : i1 to i32
    %cst_132 = arith.constant -1.000000e+30 : f32
    %c0_i32_133 = arith.constant 0 : i32
    %313 = arith.cmpi ne, %312, %c0_i32_133 : i32
    scf.if %313 {
      %314 = arith.truncf %309 : vector<16x32xf32> to vector<16x32xbf16>
      %c0_134 = arith.constant 0 : index
      %c0_135 = arith.constant 0 : index
      %315 = vector.load %arg24[%c0_134, %c0_135] : memref<32x32xbf16, #tpu.memory_space<vmem>>, vector<32x32xbf16>
      %cst_136 = arith.constant dense<0.000000e+00> : vector<16x32xf32>
      %316 = tpu.matmul %314, %315, %cst_136 {dimension_numbers = #tpu.dot_dimension_numbers<[1], [0], [0], [1], [0, 0, 1, 1], [], []>} : vector<16x32xbf16>, vector<32x32xbf16>, vector<16x32xf32> -> vector<16x32xf32>
      %c0_137 = arith.constant 0 : index
      %c0_138 = arith.constant 0 : index
      %317 = vector.load %arg25[%c0_137, %c0_138] : memref<1x32xf32, #tpu.memory_space<vmem>>, vector<1x32xf32>
      %318 = vector.broadcast %317 : vector<1x32xf32> to vector<16x32xf32>
      %319 = arith.addf %316, %318 : vector<16x32xf32>
      %cst_139 = arith.constant 0.000000e+00 : f32
      %320 = vector.broadcast %cst_139 : f32 to vector<16x32xf32>
      %321 = arith.maximumf %319, %320 : vector<16x32xf32>
      %c0_140 = arith.constant 0 : index
      %c0_141 = arith.constant 0 : index
      %322 = vector.load %arg26[%c0_140, %c0_141] : memref<1x32xf32, #tpu.memory_space<vmem>>, vector<1x32xf32>
      %323 = vector.broadcast %322 : vector<1x32xf32> to vector<16x32xf32>
      %324 = arith.mulf %321, %323 : vector<16x32xf32>
      %cst_142 = arith.constant dense<0.000000e+00> : vector<16xf32>
      %325 = vector.multi_reduction <add>, %324, %cst_142 [1] : vector<16x32xf32> to vector<16xf32>
      %326 = vector.shape_cast %325 : vector<16xf32> to vector<16x1xf32>
      %c0_143 = arith.constant 0 : index
      %c0_144 = arith.constant 0 : index
      %327 = vector.load %arg27[%c0_143, %c0_144] : memref<1x1xf32, #tpu.memory_space<vmem>>, vector<1x1xf32>
      %328 = vector.broadcast %327 : vector<1x1xf32> to vector<16x1xf32>
      %329 = arith.addf %326, %328 : vector<16x1xf32>
      %c0_145 = arith.constant 0 : index
      %c0_146 = arith.constant 0 : index
      %330 = vector.load %arg3[%c0_145, %c0_146] : memref<16x2xbf16, #tpu.memory_space<vmem>>, vector<16x2xbf16>
      %331 = arith.extf %330 : vector<16x2xbf16> to vector<16x2xf32>
      %cst_147 = arith.constant 0.000000e+00 : f32
      %332 = vector.broadcast %cst_147 : f32 to vector<16x2xf32>
      %333 = arith.cmpf ogt, %331, %332 : vector<16x2xf32>
      %334 = vector.shape_cast %329 : vector<16x1xf32> to vector<16x1xf32>
      %335 = vector.broadcast %334 : vector<16x1xf32> to vector<16x2xf32>
      %336 = vector.broadcast %cst_132 : f32 to vector<16x2xf32>
      %337 = arith.select %333, %335, %336 : vector<16x2xi1>, vector<16x2xf32>
      %cst_148 = arith.constant dense<0xFF800000> : vector<2xf32>
      %338 = vector.multi_reduction <maximumf>, %337, %cst_148 [0] : vector<16x2xf32> to vector<2xf32>
      %339 = vector.shape_cast %338 : vector<2xf32> to vector<1x2xf32>
      %340 = vector.broadcast %339 : vector<1x2xf32> to vector<16x2xf32>
      %341 = arith.subf %337, %340 : vector<16x2xf32>
      %342 = math.exp %341 : vector<16x2xf32>
      %343 = arith.mulf %342, %331 : vector<16x2xf32>
      %cst_149 = arith.constant dense<0.000000e+00> : vector<2xf32>
      %344 = vector.multi_reduction <add>, %343, %cst_149 [0] : vector<16x2xf32> to vector<2xf32>
      %345 = vector.shape_cast %344 : vector<2xf32> to vector<1x2xf32>
      %cst_150 = arith.constant 1.000000e-30 : f32
      %346 = vector.broadcast %cst_150 : f32 to vector<1x2xf32>
      %347 = arith.maximumf %345, %346 : vector<1x2xf32>
      %348 = tpu.reciprocal %347 {approx = true} : vector<1x2xf32> -> vector<1x2xf32>
      %349 = vector.broadcast %348 : vector<1x2xf32> to vector<16x2xf32>
      %350 = arith.mulf %343, %349 : vector<16x2xf32>
      %351 = arith.truncf %350 : vector<16x2xf32> to vector<16x2xbf16>
      %cst_151 = arith.constant dense<0.000000e+00> : vector<2x32xf32>
      %352 = tpu.matmul %351, %314, %cst_151 {dimension_numbers = #tpu.dot_dimension_numbers<[0], [0], [1], [1], [0, 1, 1, 1], [], []>} : vector<16x2xbf16>, vector<16x32xbf16>, vector<2x32xf32> -> vector<2x32xf32>
      %353 = arith.truncf %352 : vector<2x32xf32> to vector<2x32xbf16>
      %c0_152 = arith.constant 0 : index
      %c0_153 = arith.constant 0 : index
      %354 = vector.load %arg28[%c0_152, %c0_153] : memref<32x32xbf16, #tpu.memory_space<vmem>>, vector<32x32xbf16>
      %cst_154 = arith.constant dense<0.000000e+00> : vector<2x32xf32>
      %355 = tpu.matmul %353, %354, %cst_154 {dimension_numbers = #tpu.dot_dimension_numbers<[1], [0], [0], [1], [0, 0, 1, 1], [], []>} : vector<2x32xbf16>, vector<32x32xbf16>, vector<2x32xf32> -> vector<2x32xf32>
      %c0_155 = arith.constant 0 : index
      %c0_156 = arith.constant 0 : index
      %356 = vector.load %arg29[%c0_155, %c0_156] : memref<1x32xf32, #tpu.memory_space<vmem>>, vector<1x32xf32>
      %357 = vector.broadcast %356 : vector<1x32xf32> to vector<2x32xf32>
      %358 = arith.addf %355, %357 : vector<2x32xf32>
      %cst_157 = arith.constant 5.000000e-01 : f32
      %359 = vector.broadcast %cst_157 : f32 to vector<2x32xf32>
      %360 = arith.mulf %359, %358 : vector<2x32xf32>
      %cst_158 = arith.constant 0.707106769 : f32
      %361 = vector.broadcast %cst_158 : f32 to vector<2x32xf32>
      %362 = arith.mulf %358, %361 : vector<2x32xf32>
      %363 = math.absf %362 : vector<2x32xf32>
      %cst_159 = arith.constant 0.327591091 : f32
      %364 = vector.broadcast %cst_159 : f32 to vector<2x32xf32>
      %365 = arith.mulf %364, %363 : vector<2x32xf32>
      %cst_160 = arith.constant 1.000000e+00 : f32
      %366 = vector.broadcast %cst_160 : f32 to vector<2x32xf32>
      %367 = arith.addf %366, %365 : vector<2x32xf32>
      %cst_161 = arith.constant 1.000000e+00 : f32
      %368 = vector.broadcast %cst_161 : f32 to vector<2x32xf32>
      %369 = arith.divf %368, %367 : vector<2x32xf32>
      %cst_162 = arith.constant 1.06140542 : f32
      %370 = vector.broadcast %cst_162 : f32 to vector<2x32xf32>
      %371 = arith.mulf %370, %369 : vector<2x32xf32>
      %cst_163 = arith.constant -1.45315206 : f32
      %372 = vector.broadcast %cst_163 : f32 to vector<2x32xf32>
      %373 = arith.addf %371, %372 : vector<2x32xf32>
      %374 = arith.mulf %373, %369 : vector<2x32xf32>
      %cst_164 = arith.constant 1.42141378 : f32
      %375 = vector.broadcast %cst_164 : f32 to vector<2x32xf32>
      %376 = arith.addf %374, %375 : vector<2x32xf32>
      %377 = arith.mulf %376, %369 : vector<2x32xf32>
      %cst_165 = arith.constant -0.284496725 : f32
      %378 = vector.broadcast %cst_165 : f32 to vector<2x32xf32>
      %379 = arith.addf %377, %378 : vector<2x32xf32>
      %380 = arith.mulf %379, %369 : vector<2x32xf32>
      %cst_166 = arith.constant 0.254829586 : f32
      %381 = vector.broadcast %cst_166 : f32 to vector<2x32xf32>
      %382 = arith.addf %380, %381 : vector<2x32xf32>
      %383 = arith.mulf %382, %369 : vector<2x32xf32>
      %cst_167 = arith.constant 0.000000e+00 : f32
      %384 = vector.broadcast %cst_167 : f32 to vector<2x32xf32>
      %385 = arith.subf %384, %363 : vector<2x32xf32>
      %386 = arith.mulf %385, %363 : vector<2x32xf32>
      %387 = math.exp %386 : vector<2x32xf32>
      %388 = arith.mulf %383, %387 : vector<2x32xf32>
      %cst_168 = arith.constant 1.000000e+00 : f32
      %389 = vector.broadcast %cst_168 : f32 to vector<2x32xf32>
      %390 = arith.subf %389, %388 : vector<2x32xf32>
      %cst_169 = arith.constant 0.000000e+00 : f32
      %391 = vector.broadcast %cst_169 : f32 to vector<2x32xf32>
      %392 = arith.cmpf oge, %362, %391 : vector<2x32xf32>
      %cst_170 = arith.constant 0.000000e+00 : f32
      %393 = vector.broadcast %cst_170 : f32 to vector<2x32xf32>
      %394 = arith.subf %393, %390 : vector<2x32xf32>
      %395 = arith.select %392, %390, %394 : vector<2x32xi1>, vector<2x32xf32>
      %cst_171 = arith.constant 1.000000e+00 : f32
      %396 = vector.broadcast %cst_171 : f32 to vector<2x32xf32>
      %397 = arith.addf %396, %395 : vector<2x32xf32>
      %398 = arith.mulf %360, %397 : vector<2x32xf32>
      %399 = arith.truncf %398 : vector<2x32xf32> to vector<2x32xbf16>
      %c0_172 = arith.constant 0 : index
      %c0_173 = arith.constant 0 : index
      %400 = vector.load %arg30[%c0_172, %c0_173] : memref<32x2xbf16, #tpu.memory_space<vmem>>, vector<32x2xbf16>
      %cst_174 = arith.constant dense<0.000000e+00> : vector<2x2xf32>
      %401 = tpu.matmul %399, %400, %cst_174 {dimension_numbers = #tpu.dot_dimension_numbers<[1], [0], [0], [1], [0, 0, 1, 1], [], []>} : vector<2x32xbf16>, vector<32x2xbf16>, vector<2x2xf32> -> vector<2x2xf32>
      %c0_175 = arith.constant 0 : index
      %c0_176 = arith.constant 0 : index
      %402 = vector.load %arg31[%c0_175, %c0_176] : memref<1x2xf32, #tpu.memory_space<vmem>>, vector<1x2xf32>
      %403 = vector.broadcast %402 : vector<1x2xf32> to vector<2x2xf32>
      %404 = arith.addf %401, %403 : vector<2x2xf32>
      %c0_177 = arith.constant 0 : index
      %c0_178 = arith.constant 0 : index
      %405 = vector.load %arg32[%c0_177, %c0_178] : memref<2x2xf32, #tpu.memory_space<vmem>>, vector<2x2xf32>
      tpu.vector_store %arg32[%c0_177, %c0_178], %404 {strides = array<i32>} : memref<2x2xf32, #tpu.memory_space<vmem>>, vector<2x2xf32>,
    } else {
    }
    return
  }
  func.func @transform_0(%arg0: i32) -> (i32, i32) {
    %c0_i32 = arith.constant 0 : i32
    %c0_i32_0 = arith.constant 0 : i32
    %c0_i32_1 = arith.constant 0 : i32
    return %c0_i32, %c0_i32_0 : i32, i32
  }
  func.func @transform_1(%arg0: i32) -> (i32, i32) {
    %c0_i32 = arith.constant 0 : i32
    %c0_i32_0 = arith.constant 0 : i32
    %c0_i32_1 = arith.constant 0 : i32
    return %c0_i32, %c0_i32_0 : i32, i32
  }
  func.func @transform_2(%arg0: i32) -> (i32, i32) {
    %c0_i32 = arith.constant 0 : i32
    %c0_i32_0 = arith.constant 0 : i32
    %c0_i32_1 = arith.constant 0 : i32
    return %c0_i32, %c0_i32_0 : i32, i32
  }
  func.func @transform_3(%arg0: i32) -> (i32, i32) {
    %c0_i32 = arith.constant 0 : i32
    %c0_i32_0 = arith.constant 0 : i32
    %c0_i32_1 = arith.constant 0 : i32
    return %c0_i32, %c0_i32_0 : i32, i32
  }
  func.func @transform_4(%arg0: i32) -> (i32, i32) {
    %c0_i32 = arith.constant 0 : i32
    %c0_i32_0 = arith.constant 0 : i32
    %c0_i32_1 = arith.constant 0 : i32
    return %c0_i32, %c0_i32_0 : i32, i32
  }
  func.func @transform_5(%arg0: i32) -> (i32, i32, i32) {
    %c0_i32 = arith.constant 0 : i32
    %c0_i32_0 = arith.constant 0 : i32
    %c0_i32_1 = arith.constant 0 : i32
    return %arg0, %c0_i32, %c0_i32_0 : i32, i32, i32
  }
  func.func @transform_6(%arg0: i32) -> (i32, i32, i32) {
    %c0_i32 = arith.constant 0 : i32
    %c0_i32_0 = arith.constant 0 : i32
    %c0_i32_1 = arith.constant 0 : i32
    return %arg0, %c0_i32, %c0_i32_0 : i32, i32, i32
  }
  func.func @transform_7(%arg0: i32) -> (i32, i32, i32) {
    %c0_i32 = arith.constant 0 : i32
    %c0_i32_0 = arith.constant 0 : i32
    %c0_i32_1 = arith.constant 0 : i32
    return %arg0, %c0_i32, %c0_i32_0 : i32, i32, i32
  }
  func.func @transform_8(%arg0: i32) -> (i32, i32, i32) {
    %c0_i32 = arith.constant 0 : i32
    %c0_i32_0 = arith.constant 0 : i32
    %c0_i32_1 = arith.constant 0 : i32
    return %arg0, %c0_i32, %c0_i32_0 : i32, i32, i32
  }
  func.func @transform_9(%arg0: i32) -> (i32, i32, i32) {
    %c0_i32 = arith.constant 0 : i32
    %c0_i32_0 = arith.constant 0 : i32
    %c0_i32_1 = arith.constant 0 : i32
    return %arg0, %c0_i32, %c0_i32_0 : i32, i32, i32
  }
  func.func @transform_10(%arg0: i32) -> (i32, i32, i32) {
    %c0_i32 = arith.constant 0 : i32
    %c0_i32_0 = arith.constant 0 : i32
    %c0_i32_1 = arith.constant 0 : i32
    return %arg0, %c0_i32, %c0_i32_0 : i32, i32, i32
  }
  func.func @transform_11(%arg0: i32) -> (i32, i32, i32) {
    %c0_i32 = arith.constant 0 : i32
    %c0_i32_0 = arith.constant 0 : i32
    %c0_i32_1 = arith.constant 0 : i32
    return %arg0, %c0_i32, %c0_i32_0 : i32, i32, i32
  }
  func.func @transform_12(%arg0: i32) -> (i32, i32, i32) {
    %c0_i32 = arith.constant 0 : i32
    %c0_i32_0 = arith.constant 0 : i32
    %c0_i32_1 = arith.constant 0 : i32
    return %arg0, %c0_i32, %c0_i32_0 : i32, i32, i32
  }
  func.func @transform_13(%arg0: i32) -> (i32, i32, i32) {
    %c0_i32 = arith.constant 0 : i32
    %c0_i32_0 = arith.constant 0 : i32
    %c0_i32_1 = arith.constant 0 : i32
    return %arg0, %c0_i32, %c0_i32_0 : i32, i32, i32
  }
  func.func @transform_14(%arg0: i32) -> (i32, i32, i32) {
    %c0_i32 = arith.constant 0 : i32
    %c0_i32_0 = arith.constant 0 : i32
    %c0_i32_1 = arith.constant 0 : i32
    return %arg0, %c0_i32, %c0_i32_0 : i32, i32, i32
  }
  func.func @transform_15(%arg0: i32) -> (i32, i32, i32) {
    %c0_i32 = arith.constant 0 : i32
    %c0_i32_0 = arith.constant 0 : i32
    %c0_i32_1 = arith.constant 0 : i32
    return %arg0, %c0_i32, %c0_i32_0 : i32, i32, i32
  }
  func.func @transform_16(%arg0: i32) -> (i32, i32, i32) {
    %c0_i32 = arith.constant 0 : i32
    %c0_i32_0 = arith.constant 0 : i32
    %c0_i32_1 = arith.constant 0 : i32
    return %arg0, %c0_i32, %c0_i32_0 : i32, i32, i32
  }
  func.func @transform_17(%arg0: i32) -> (i32, i32, i32) {
    %c0_i32 = arith.constant 0 : i32
    %c0_i32_0 = arith.constant 0 : i32
    %c0_i32_1 = arith.constant 0 : i32
    return %arg0, %c0_i32, %c0_i32_0 : i32, i32, i32
  }
  func.func @transform_18(%arg0: i32) -> (i32, i32, i32) {
    %c0_i32 = arith.constant 0 : i32
    %c0_i32_0 = arith.constant 0 : i32
    %c0_i32_1 = arith.constant 0 : i32
    return %arg0, %c0_i32, %c0_i32_0 : i32, i32, i32
  }
  func.func @transform_19(%arg0: i32) -> (i32, i32, i32) {
    %c0_i32 = arith.constant 0 : i32
    %c0_i32_0 = arith.constant 0 : i32
    %c0_i32_1 = arith.constant 0 : i32
    return %arg0, %c0_i32, %c0_i32_0 : i32, i32, i32
  }
  func.func @transform_20(%arg0: i32) -> (i32, i32, i32) {
    %c0_i32 = arith.constant 0 : i32
    %c0_i32_0 = arith.constant 0 : i32
    %c0_i32_1 = arith.constant 0 : i32
    return %arg0, %c0_i32, %c0_i32_0 : i32, i32, i32
  }
  func.func @transform_21(%arg0: i32) -> (i32, i32, i32) {
    %c0_i32 = arith.constant 0 : i32
    %c0_i32_0 = arith.constant 0 : i32
    %c0_i32_1 = arith.constant 0 : i32
    return %arg0, %c0_i32, %c0_i32_0 : i32, i32, i32
  }
  func.func @transform_22(%arg0: i32) -> (i32, i32, i32) {
    %c0_i32 = arith.constant 0 : i32
    %c0_i32_0 = arith.constant 0 : i32
    %c0_i32_1 = arith.constant 0 : i32
    return %arg0, %c0_i32, %c0_i32_0 : i32, i32, i32
  }
  func.func @transform_23(%arg0: i32) -> (i32, i32) {
    %c0_i32 = arith.constant 0 : i32
    %c0_i32_0 = arith.constant 0 : i32
    %c0_i32_1 = arith.constant 0 : i32
    return %c0_i32, %c0_i32_0 : i32, i32
  }
  func.func @transform_24(%arg0: i32) -> (i32, i32) {
    %c0_i32 = arith.constant 0 : i32
    %c0_i32_0 = arith.constant 0 : i32
    %c0_i32_1 = arith.constant 0 : i32
    return %c0_i32, %c0_i32_0 : i32, i32
  }
  func.func @transform_25(%arg0: i32) -> (i32, i32) {
    %c0_i32 = arith.constant 0 : i32
    %c0_i32_0 = arith.constant 0 : i32
    %c0_i32_1 = arith.constant 0 : i32
    return %c0_i32, %c0_i32_0 : i32, i32
  }
  func.func @transform_26(%arg0: i32) -> (i32, i32) {
    %c0_i32 = arith.constant 0 : i32
    %c0_i32_0 = arith.constant 0 : i32
    %c0_i32_1 = arith.constant 0 : i32
    return %c0_i32, %c0_i32_0 : i32, i32
  }
  func.func @transform_27(%arg0: i32) -> (i32, i32) {
    %c0_i32 = arith.constant 0 : i32
    %c0_i32_0 = arith.constant 0 : i32
    %c0_i32_1 = arith.constant 0 : i32
    return %c0_i32, %c0_i32_0 : i32, i32
  }
  func.func @transform_28(%arg0: i32) -> (i32, i32) {
    %c0_i32 = arith.constant 0 : i32
    %c0_i32_0 = arith.constant 0 : i32
    %c0_i32_1 = arith.constant 0 : i32
    return %c0_i32, %c0_i32_0 : i32, i32
  }
  func.func @transform_29(%arg0: i32) -> (i32, i32) {
    %c0_i32 = arith.constant 0 : i32
    %c0_i32_0 = arith.constant 0 : i32
    %c0_i32_1 = arith.constant 0 : i32
    return %c0_i32, %c0_i32_0 : i32, i32
  }
  func.func @transform_30(%arg0: i32) -> (i32, i32) {
    %c0_i32 = arith.constant 0 : i32
    %c0_i32_0 = arith.constant 0 : i32
    %c0_i32_1 = arith.constant 0 : i32
    return %c0_i32, %c0_i32_0 : i32, i32
  }
  func.func @transform_31(%arg0: i32) -> (i32, i32) {
    %c0_i32 = arith.constant 0 : i32
    %c0_i32_0 = arith.constant 0 : i32
    %c0_i32_1 = arith.constant 0 : i32
    return %c0_i32, %c0_i32_0 : i32, i32
  }
}

</mosaic_0001>

<bundles_post_ra>
// kernel: tpu_custom_call.1
= control target key start
LH: loop header
LB: loop body
LE: loop exit
PB: predicated region body
PF: predicated region fallthrough
CT: control target
= control target key end

     0   :  { %s4546_s6 = smov 1   ;;  %s4547_s10 = smov 2   ;;  %s5461_s0 = inlined_call_operand.smem [shape: u32[32], index: -1, kind: input, shape index: {}] }
   0x1   :  { %s4612_s5 = sld [smem:[%s5461_s0]]   ;;  %s4548_s14 = smov 3  }
   0x2   :  { %s4617_s9 = sld [smem:[%s5461_s0 + %s4546_s6]]   ;;  %s4549_s18 = smov 4  }
   0x3   :  { %s4622_s13 = sld [smem:[%s5461_s0 + %s4547_s10]]   ;;  %s4550_s22 = smov 5  }
   0x4   :  { %s4627_s17 = sld [smem:[%s5461_s0 + %s4548_s14]]   ;;  %s4551_s26 = smov 6  }
   0x5   :  { %s4632_s21 = sld [smem:[%s5461_s0 + %s4549_s18]]   ;;  %s4552_s30 = smov 7  }
   0x6   :  { %s4637_s25 = sld [smem:[%s5461_s0 + %s4550_s22]]   ;;  %s4553_s4 = smov 8  }
   0x7   :  { %5490 = sst [smem:[#allocation37_spill]] %s4612_s5  ;;  %s4554_s10 = smov 9  }
   0x8   :  { %s4642_s29 = sld [smem:[%s5461_s0 + %s4551_s26]]   ;;  %s4555_s15 = smov 10  }
   0x9   :  { %5491 = sst [smem:[#allocation38_spill]] %s4622_s13  ;;  %s4556_s20 = smov 11  }
   0xa   :  { %5492 = sst [smem:[#allocation39_spill]] %s4627_s17  ;;  %s4557_s26 = smov 12  }
   0xb   :  { %s4647_s3 = sld [smem:[%s5461_s0 + %s4552_s30]]   ;;  %s4558_s1 = smov 13  }
   0xc   :  { %5493 = sst [smem:[#allocation40_spill]] %s4637_s25  ;;  %s4559_s7 = smov 14  }
   0xd   :  { %s4652_s8 = sld [smem:[%s5461_s0 + %s4553_s4]]   ;;  %s4561_s22 = smov 16  }
   0xe   :  { %5494 = sst [smem:[#allocation41_spill]] %s4642_s29  ;;  %s4562_s28 = smov 17  }
   0xf   :  { %s4657_s14 = sld [smem:[%s5461_s0 + %s4554_s10]]   ;;  %s4572_s16 = smov 27  }
  0x10   :  { %s4662_s19 = sld [smem:[%s5461_s0 + %s4555_s15]]   ;;  %s4560_s15 = smov 15  }
  0x11   :  { %5495 = sst [smem:[#allocation42_spill]] %s4647_s3  ;;  %s4573_s23 = smov 28  }
  0x12   :  { %s4667_s24 = sld [smem:[%s5461_s0 + %s4556_s20]]   ;;  %s4575_s10 = smov 30  }
  0x13   :  { %5496 = sst [smem:[#allocation43_spill]] %s4652_s8 }
  0x14   :  { %s4672_s30 = sld [smem:[%s5461_s0 + %s4557_s26]]  }
  0x15   :  { %5497 = sst [smem:[#allocation44_spill]] %s4657_s14 }
  0x16   :  { %s4677_s6 = sld [smem:[%s5461_s0 + %s4558_s1]]   ;;  %s4574_s1 = smov 29  }
  0x17   :  { %s4682_s12 = sld [smem:[%s5461_s0 + %s4559_s7]]   ;;  %s4563_s7 = smov 18  }
  0x18   :  { %5498 = sst [smem:[#allocation45_spill]] %s4667_s24 }
  0x19   :  { %s4687_s20 = sld [smem:[%s5461_s0 + %s4560_s15]]   ;;  %s4564_s15 = smov 19  }
  0x1a   :  { %s4692_s27 = sld [smem:[%s5461_s0 + %s4561_s22]]   ;;  %s4565_s22 = smov 20  }
  0x1b   :  { %s4697_s4 = sld [smem:[%s5461_s0 + %s4562_s28]]   ;;  %s4566_s28 = smov 21  }
  0x1c   :  { %5499 = sst [smem:[#allocation46_spill]] %s4677_s6 }
  0x1d   :  { %s4702_s13 = sld [smem:[%s5461_s0 + %s4563_s7]]   ;;  %s4567_s7 = smov 22  }
  0x1e   :  { %s4707_s5 = sld [smem:[%s5461_s0 + %s4564_s15]]   ;;  %s4568_s15 = smov 23  }
  0x1f   :  { %s4712_s24 = sld [smem:[%s5461_s0 + %s4565_s22]]   ;;  %s4569_s22 = smov 24  }
  0x20   :  { %s4722_s14 = sld [smem:[%s5461_s0 + %s4567_s7]]   ;;  %s4571_s7 = smov 26  }
  0x21   :  { %5500 = sst [smem:[#allocation47_spill]] %s4697_s4 }
  0x22   :  { %s4717_s4 = sld [smem:[%s5461_s0 + %s4566_s28]]   ;;  %s4570_s28 = smov 25  }
  0x23   :  { %s4732_s3 = sld [smem:[%s5461_s0 + %s4569_s22]]  }
  0x24   :  { %5501 = sst [smem:[#allocation48_spill]] %s4707_s5 }
  0x25   :  { %s4727_s5 = sld [smem:[%s5461_s0 + %s4568_s15]]  }
  0x26   :  { %5503 = sst [smem:[#allocation50_spill]] %s4722_s14 }
  0x27   :  { %s4737_s25 = sld [smem:[%s5461_s0 + %s4570_s28]]  }
  0x28   :  { %5502 = sst [smem:[#allocation49_spill]] %s4717_s4 }
  0x29   :  { %5505 = sst [smem:[#allocation52_spill]] %s4732_s3 }
  0x2a   :  { %s3457_s14 = sld [smem:[%s5461_s0 + %s4571_s7]]  }
  0x2b   :  { %5504 = sst [smem:[#allocation51_spill]] %s4727_s5 }
  0x2c   :  { %s4745_s5 = sld [smem:[%s5461_s0 + %s4572_s16]]   ;;  %s4576_s16 = smov 31  }
  0x2d   :  { %5506 = sst [smem:[#allocation53_spill]] %s4737_s25 }
  0x2e   :  { %s4750_s3 = sld [smem:[%s5461_s0 + %s4573_s23]]  }
  0x2f   :  { %s4755_s25 = sld [smem:[%s5461_s0 + %s4574_s1]]  }
  0x30   :  { %s4760_s4 = sld [smem:[%s5461_s0 + %s4575_s10]]   ;;  %v68_v0 = vstv %s3457_s14 }
  0x31   :  { %69 = vst [vmem:[#allocation3] sm:$0x1] %v68_v0 }
  0x32   :  { %5507 = sst [smem:[#allocation54_spill]] %s4745_s5 }
  0x33   :  { %s4765_s5 = sld [smem:[%s5461_s0 + %s4576_s16]]  }
  0x34   :  { %5508 = sst [smem:[#allocation55_spill]] %s4750_s3 }
  0x35   :  { %5509 = sst [smem:[#allocation56_spill]] %s4755_s25 }
  0x36   :  { %5510 = sst [smem:[#allocation57_spill]] %s4760_s4 }
  0x39   :  { %5511 = sst [smem:[#allocation58_spill]] %s4765_s5 }
  0x3a   :  { %70 = vsyncpa [#allocation5], 0 }
  0x3b   :  { %71 = vsyncpa [#allocation8], 0 }
  0x3c   :  { %72 = vsyncpa [#allocation11], 0 }
  0x3d   :  { %74 = vsyncpa [#allocation11 + $0x1], 0 }
  0x3e   :  { %75 = vsyncpa [#allocation14], 0 }
  0x3f   :  { %77 = vsyncpa [#allocation14 + $0x1], 0 }
  0x40   :  { %78 = vsyncpa [#allocation17], 0 }
  0x41   :  { %80 = vsyncpa [#allocation17 + $0x1], 0 }
  0x42   :  { %81 = vsyncpa [#allocation20], 0 }
  0x43   :  { %83 = vsyncpa [#allocation20 + $0x1], 0 }
  0x44   :  { %84 = vsyncpa [#allocation23], 0 }
  0x45   :  { %86 = vsyncpa [#allocation23 + $0x1], 0 }
  0x46   :  { %87 = vsyncpa [#allocation26], 0 }
  0x47   :  { %89 = vsyncpa [#allocation26 + $0x1], 0 }
  0x48   :  { %90 = vsyncpa [#allocation6], 0  ;;  %s4767_s23 = smov 0   ;;  %s4769_s0 = smov 0  }
  0x49   :  { %s4771_s14 = smov 0   ;;  %s4773_s22 = smov 0  }
  0x4a LB: > { %s5512_s8 = sld [smem:[#allocation43_spill]]  ;;  %s5513_s6 = sld [smem:[#allocation46_spill]]  ;;  %s4544_s22 = sphi %s4773_s22, %s5583_s22   ;;  %s4540_s14 = sphi %s4771_s14, %s5585_s14   ;;  %s4536_s0 = sphi %s4769_s0, %s5587_s0   ;;  %s4532_s23 = sphi %s4767_s23, %s5586_s23  }
  0x4b   : > { %s5514_s29 = sld [smem:[#allocation41_spill]]  ;;  %s5515_s17 = sld [smem:[#allocation39_spill]] }
  0x4c   : > { %5516 = sst [smem:[#allocation59_spill]] %s4540_s14  ;;  %s4786_s26 = sadd.s32 4294967295, %s4544_s22  }
  0x4d   : > { %s4789_s1 = sadd.s32 1, %s4544_s22   ;;  %s234_s2 = sadd.s32 1, %s4540_s14 }
  0x4e   : > { %5517 = sst [smem:[#allocation60_spill]] %s4789_s1  ;;  %s231_s28 = ssub.s32 %s4544_s22, %s4789_s1 }
  0x4f   : > { %p232_p0 = scmp.eq.s32.totalorder %s231_s28, 0  ;;  %p241_p1 = scmp.ne.s32.totalorder %s4540_s14, %s4536_s0 }
  0x50   : > { %p242_p2 = scmp.eq.s32.totalorder %s4544_s22, 0  ;;  %p247_p3 = scmp.ne.s32.totalorder %s4536_s0, %s4532_s23 }
  0x51   : > { %s4799_s10 = scalar_select %p232_p0, %s4540_s14, %s234_s2  }
  0x52   : > { %p4801_p4 = por %p242_p2, %p241_p1  ;;  %p5469_p5 = scmp.eq.s32.totalorder %s4786_s26, 0 }
  0x53   : > { %5518 = sst [smem:[#allocation61_spill]] %s4799_s10  ;;  %p3464_p6 = scmp.ge.s32.totalorder %s4544_s22, 1 }
  0x54   : > { %p863_p7 = scmp.lt.s32.totalorder %s4544_s22, 3  ;;  %p4810_p8 = por %p5469_p5, %p247_p3 }
  0x55   : > { %s4577_s15 = smov [#allocation7]   ;;  %p3857_p12 = scmp.lt.s32.totalorder %s4544_s22, 2 }
  0x56   : > { %s5520_s11 = scalar_select %p4810_p8, 1, 0 }
  0x57   : > { %p4815_p10 = pnand %p3464_p6, %p863_p7  ;;  %s895_s18 = sshll.u32 %s4577_s15, 4  ;;  %s896_s18 = int_to_ptr.vmem [resolvable:$true] %s895_s18 }
  0x58   : > { %s4823_s23 = sand.u32 1, %s4540_s14   ;;  %s4832_s2 = sand.u32 1, %s4544_s22  }
  0x59   : > { %s5521_s16 = scalar_select %p4815_p10, 1, 0 }
  0x5a   : > { %p3810_p11 = pneg %p4815_p10  ;;  %p4836_p0 = pnand %p3857_p12, %p4801_p4 }
  0x5b   : > { %s4038_s15 = scalar_lea.hbm %s5515_s17, 32 }
  0x5c   : > { %p4827_p13 = pnand %p3810_p11, %p5469_p5  ;;  %p4039_p1 = scmp.ne.s32.totalorder %s5515_s17, %s4038_s15 }
  0x5d   : > { %s5523_s10 = scalar_select %p4836_p0, 1, 0 }
  0x5e   : > { %s5522_s28 = scalar_select %p4827_p13, 1, 0 }
  0x5f   : > { %p4844_p2 = pneg %p4827_p13  ;;  %p4045_p7 = scmp.lt.u32.totalorder %s4038_s15, %s5515_s17 }
  0x61   : > { %s5524_s1 = scalar_select %p4844_p2, 1, 0 }
  0x62   : > { %p4041_p3 = pnand %p4844_p2, %p4039_p1 }
  0x64   : > { %p4042_p6 = pneg %p4041_p3 }
  0x66   : > { %p4047_p11 = pnand %p4045_p7, %p4042_p6 }
  0x68   : > { %4050 = shalt.err (!%p4047_p11)
}
  0x69   : > { %s4051_s14 = scalar_lea.vmem %s896_s18, 32  ;;  %p4059_p5 = scmp.lt.s32.totalorder %s896_s18, %s896_s18 }
  0x6a   : > { %p4052_p4 = scmp.ne.s32.totalorder %s896_s18, %s4051_s14  ;;  %p4060_p8 = scmp.lt.s32.totalorder %s4051_s14, %s4051_s14 }
  0x6c   : > { %p4054_p12 = pnand %p4052_p4, %p4844_p2  ;;  %p4061_p10 = por %p4060_p8, %p4059_p5 }
  0x6e   : > { %p4055_p9 = pneg %p4054_p12 }
  0x70   : > { %p4062_p0 = pnand %p4061_p10, %p4055_p9 }
  0x72   : > { %4065 = shalt.err (!%p4062_p0)
}
  0x73   : > { %3816 = dma.hbm_to_vmem [thread:$0]  (!%p4827_p13), %s5515_s17, 32, %s896_s18, [#allocation8]  }
  0x74   : > { %s4857_s7 = sshll.u32 %s4544_s22, 4  ;;  %s952_s14 = scalar_lea.vmem [#allocation10], %s4823_s23 }
  0x75   : > { %s4861_s15 = scalar_lea.hbm %s5514_s29, %s4857_s7  ;;  %s959_s5 = sshll.u32 %s952_s14, 4  ;;  %s4864_s5 = int_to_ptr.vmem [resolvable:$true] %s959_s5 }
  0x76   : > { %s4066_s3 = scalar_lea.hbm %s4861_s15, 16  ;;  %p5525_p8 = scmp.ne.s32.totalorder %s5523_s10, 0 }
  0x77   : > { %p4067_p5 = scmp.ne.s32.totalorder %s4861_s15, %s4066_s3  ;;  %s4071_s22 = scalar_lea.hbm %s5514_s29, 32 }
  0x78   : > { %p4871_p9 = pneg %p5525_p8  ;;  %p4072_p1 = scmp.lt.u32.totalorder %s4861_s15, %s5514_s29 }
  0x79   : > { %p4073_p3 = scmp.lt.u32.totalorder %s4071_s22, %s4066_s3  ;;  %p4075_p7 = scmp.lt.u32.totalorder %s4066_s3, %s4861_s15 }
  0x7a   : > { %s5526_s25 = scalar_select %p4871_p9, 1, 0 }
  0x7b   : > { %p4069_p10 = pnand %p4871_p9, %p4067_p5  ;;  %p4074_p6 = por %p4073_p3, %p4072_p1 }
  0x7d   : > { %p4070_p0 = pneg %p4069_p10  ;;  %p4076_p11 = por %p4075_p7, %p4074_p6 }
  0x7f   : > { %p4077_p4 = pnand %p4076_p11, %p4070_p0 }
  0x81   : > { %4080 = shalt.err (!%p4077_p4)
}
  0x82   : > { %s4081_s18 = scalar_lea.vmem %s4864_s5, 16  ;;  %s4578_s14 = smov [#allocation10]  }
  0x83   : > { %p4082_p12 = scmp.ne.s32.totalorder %s4864_s5, %s4081_s18  ;;  %s4086_s4 = sshll.u32 %s4578_s14, 4  ;;  %s4087_s4 = int_to_ptr.vmem [resolvable:$false] %s4086_s4 }
  0x84   : > { %s4088_s17 = scalar_lea.vmem %s4087_s4, 32  ;;  %p4089_p5 = scmp.lt.s32.totalorder %s4864_s5, %s4087_s4 }
  0x85   : > { %p4084_p13 = pnand %p4082_p12, %p4871_p9  ;;  %p4090_p10 = scmp.lt.s32.totalorder %s4088_s17, %s4081_s18 }
  0x87   : > { %p4085_p2 = pneg %p4084_p13  ;;  %p4091_p1 = por %p4090_p10, %p4089_p5 }
  0x89   : > { %p4092_p3 = pnand %p4091_p1, %p4085_p2 }
  0x8b   : > { %4095 = shalt.err (!%p4092_p3)
}
  0x8c   : > { %s5527_s3 = scalar_lea.sflag [#allocation11], %s4832_s2  ;;  %s4894_s22 = scalar_lea.hbm %s4662_s19, %s4857_s7 }
  0x8d   : > { %3823 = dma.hbm_to_vmem [thread:$0]  (!%p5525_p8), %s4861_s15, 16, %s4864_s5, %s5527_s3  }
  0x8e   : > { %s1002_s17 = scalar_lea.vmem [#allocation13], %s4823_s23  ;;  %s5482_s18 = scalar_lea.sflag [#allocation14], %s4832_s2 }
  0x8f   : > { %s1009_s4 = sshll.u32 %s1002_s17, 4  ;;  %s4096_s14 = scalar_lea.hbm %s4894_s22, 16  ;;  %s1010_s4 = int_to_ptr.vmem [resolvable:$true] %s1009_s4 }
  0x90   : > { %p4097_p13 = scmp.ne.s32.totalorder %s4894_s22, %s4096_s14  ;;  %s4101_s29 = scalar_lea.hbm %s4662_s19, 32 }
  0x91   : > { %p4102_p6 = scmp.lt.u32.totalorder %s4894_s22, %s4662_s19  ;;  %p4103_p7 = scmp.lt.u32.totalorder %s4101_s29, %s4096_s14 }
  0x92   : > { %p4099_p2 = pnand %p4097_p13, %p4871_p9  ;;  %p4105_p4 = scmp.lt.u32.totalorder %s4096_s14, %s4894_s22 }
  0x93   : > { %p4104_p11 = por %p4103_p7, %p4102_p6 }
  0x94   : > { %p4100_p0 = pneg %p4099_p2 }
  0x95   : > { %p4106_p12 = por %p4105_p4, %p4104_p11 }
  0x97   : > { %p4107_p5 = pnand %p4106_p12, %p4100_p0 }
  0x99   : > { %4110 = shalt.err (!%p4107_p5)
}
  0x9a   : > { %s4111_s5 = scalar_lea.vmem %s1010_s4, 16  ;;  %s4579_s15 = smov [#allocation13]  }
  0x9b   : > { %p4112_p10 = scmp.ne.s32.totalorder %s1010_s4, %s4111_s5  ;;  %s4116_s3 = sshll.u32 %s4579_s15, 4  ;;  %s4117_s3 = int_to_ptr.vmem [resolvable:$false] %s4116_s3 }
  0x9c   : > { %s4118_s17 = scalar_lea.vmem %s4117_s3, 32  ;;  %p4119_p13 = scmp.lt.s32.totalorder %s1010_s4, %s4117_s3 }
  0x9d   : > { %p4114_p1 = pnand %p4112_p10, %p4871_p9  ;;  %p4120_p2 = scmp.lt.s32.totalorder %s4118_s17, %s4111_s5 }
  0x9f   : > { %p4115_p3 = pneg %p4114_p1  ;;  %p4121_p8 = por %p4120_p2, %p4119_p13 }
  0xa1   : > { %p4122_p6 = pnand %p4121_p8, %p4115_p3 }
  0xa3   : > { %4125 = shalt.err (!%p4122_p6)
}
  0xa4   : > { %p5528_p7 = scmp.ne.s32.totalorder %s5523_s10, 0  ;;  %s4915_s29 = scalar_lea.hbm %s5513_s6, %s4857_s7 }
  0xa5   : > { %s1044_s14 = scalar_lea.vmem [#allocation16], %s4823_s23  ;;  %s5483_s15 = scalar_lea.sflag [#allocation17], %s4832_s2 }
  0xa6   : > { %3829 = dma.hbm_to_vmem [thread:$0]  (!%p5528_p7), %s4894_s22, 16, %s1010_s4, %s5482_s18  }
  0xa7   : > { %s1051_s5 = sshll.u32 %s1044_s14, 4  ;;  %s4126_s3 = scalar_lea.hbm %s4915_s29, 16  ;;  %s1052_s5 = int_to_ptr.vmem [resolvable:$true] %s1051_s5 }
  0xa8   : > { %p4127_p8 = scmp.ne.s32.totalorder %s4915_s29, %s4126_s3  ;;  %s4131_s17 = scalar_lea.hbm %s5513_s6, 32 }
  0xa9   : > { %p4132_p4 = scmp.lt.u32.totalorder %s4915_s29, %s5513_s6  ;;  %p4133_p12 = scmp.lt.u32.totalorder %s4131_s17, %s4126_s3 }
  0xaa   : > { %p4129_p0 = pnand %p4127_p8, %p4871_p9  ;;  %p4135_p10 = scmp.lt.u32.totalorder %s4126_s3, %s4915_s29 }
  0xab   : > { %p4134_p5 = por %p4133_p12, %p4132_p4 }
  0xac   : > { %p4130_p11 = pneg %p4129_p0 }
  0xad   : > { %p4136_p1 = por %p4135_p10, %p4134_p5 }
  0xaf   : > { %p4137_p3 = pnand %p4136_p1, %p4130_p11 }
  0xb1   : > { %4140 = shalt.err (!%p4137_p3)
}
  0xb2   : > { %s4141_s22 = scalar_lea.vmem %s1052_s5, 16  ;;  %s4580_s4 = smov [#allocation16]  }
  0xb3   : > { %p4142_p13 = scmp.ne.s32.totalorder %s1052_s5, %s4141_s22  ;;  %s4146_s14 = sshll.u32 %s4580_s4, 4  ;;  %s4147_s14 = int_to_ptr.vmem [resolvable:$false] %s4146_s14 }
  0xb4   : > { %s4148_s18 = scalar_lea.vmem %s4147_s14, 32  ;;  %p4149_p8 = scmp.lt.s32.totalorder %s1052_s5, %s4147_s14 }
  0xb5   : > { %p4144_p2 = pnand %p4142_p13, %p4871_p9  ;;  %p4150_p0 = scmp.lt.s32.totalorder %s4148_s18, %s4141_s22 }
  0xb7   : > { %p4145_p6 = pneg %p4144_p2  ;;  %p4151_p7 = por %p4150_p0, %p4149_p8 }
  0xb9   : > { %p4152_p4 = pnand %p4151_p7, %p4145_p6 }
  0xbb   : > { %4155 = shalt.err (!%p4152_p4)
}
  0xbc   : > { %p5529_p12 = scmp.ne.s32.totalorder %s5523_s10, 0  ;;  %s4936_s3 = scalar_lea.hbm %s4687_s20, %s4857_s7 }
  0xbd   : > { %s1078_s18 = scalar_lea.vmem [#allocation19], %s4823_s23  ;;  %s5484_s22 = scalar_lea.sflag [#allocation20], %s4832_s2 }
  0xbe   : > { %3835 = dma.hbm_to_vmem [thread:$0]  (!%p5529_p12), %s4915_s29, 16, %s1052_s5, %s5483_s15  }
  0xbf   : > { %s1085_s17 = sshll.u32 %s1078_s18, 4  ;;  %s4156_s4 = scalar_lea.hbm %s4936_s3, 16  ;;  %s1086_s17 = int_to_ptr.vmem [resolvable:$true] %s1085_s17 }
  0xc0   : > { %p4157_p7 = scmp.ne.s32.totalorder %s4936_s3, %s4156_s4  ;;  %s4161_s14 = scalar_lea.hbm %s4687_s20, 32 }
  0xc1   : > { %p4162_p10 = scmp.lt.u32.totalorder %s4936_s3, %s4687_s20  ;;  %p4163_p1 = scmp.lt.u32.totalorder %s4161_s14, %s4156_s4 }
  0xc2   : > { %p4159_p11 = pnand %p4157_p7, %p4871_p9  ;;  %p4165_p13 = scmp.lt.u32.totalorder %s4156_s4, %s4936_s3 }
  0xc3   : > { %p4164_p3 = por %p4163_p1, %p4162_p10 }
  0xc4   : > { %p4160_p5 = pneg %p4159_p11 }
  0xc5   : > { %p4166_p2 = por %p4165_p13, %p4164_p3 }
  0xc7   : > { %p4167_p6 = pnand %p4166_p2, %p4160_p5 }
  0xc9   : > { %4170 = shalt.err (!%p4167_p6)
}
  0xca   : > { %s4171_s29 = scalar_lea.vmem %s1086_s17, 16  ;;  %s4581_s5 = smov [#allocation19]  }
  0xcb   : > { %p4172_p8 = scmp.ne.s32.totalorder %s1086_s17, %s4171_s29  ;;  %s4176_s18 = sshll.u32 %s4581_s5, 4  ;;  %s4177_s18 = int_to_ptr.vmem [resolvable:$false] %s4176_s18 }
  0xcc   : > { %s4178_s15 = scalar_lea.vmem %s4177_s18, 32  ;;  %p4179_p7 = scmp.lt.s32.totalorder %s1086_s17, %s4177_s18 }
  0xcd   : > { %p4174_p0 = pnand %p4172_p8, %p4871_p9  ;;  %p4180_p11 = scmp.lt.s32.totalorder %s4178_s15, %s4171_s29 }
  0xcf   : > { %p4175_p4 = pneg %p4174_p0  ;;  %p4181_p12 = por %p4180_p11, %p4179_p7 }
  0xd1   : > { %p4182_p1 = pnand %p4181_p12, %p4175_p4 }
  0xd3   : > { %4185 = shalt.err (!%p4182_p1)
}
  0xd4   : > { %p5530_p10 = scmp.ne.s32.totalorder %s5523_s10, 0  ;;  %s4957_s4 = scalar_lea.hbm %s4702_s13, %s4857_s7 }
  0xd5   : > { %s1120_s15 = scalar_lea.vmem [#allocation22], %s4823_s23  ;;  %s5485_s29 = scalar_lea.sflag [#allocation23], %s4832_s2 }
  0xd6   : > { %3841 = dma.hbm_to_vmem [thread:$0]  (!%p5530_p10), %s4936_s3, 16, %s1086_s17, %s5484_s22  }
  0xd7   : > { %s1127_s14 = sshll.u32 %s1120_s15, 4  ;;  %s4186_s5 = scalar_lea.hbm %s4957_s4, 16  ;;  %s1128_s14 = int_to_ptr.vmem [resolvable:$true] %s1127_s14 }
  0xd8   : > { %p4187_p12 = scmp.ne.s32.totalorder %s4957_s4, %s4186_s5  ;;  %s4191_s18 = scalar_lea.hbm %s4702_s13, 32 }
  0xd9   : > { %p4192_p13 = scmp.lt.u32.totalorder %s4957_s4, %s4702_s13  ;;  %p4193_p2 = scmp.lt.u32.totalorder %s4191_s18, %s4186_s5 }
  0xda   : > { %p4189_p5 = pnand %p4187_p12, %p4871_p9  ;;  %p4195_p8 = scmp.lt.u32.totalorder %s4186_s5, %s4957_s4 }
  0xdb   : > { %p4194_p6 = por %p4193_p2, %p4192_p13 }
  0xdc   : > { %p4190_p3 = pneg %p4189_p5 }
  0xdd   : > { %p4196_p0 = por %p4195_p8, %p4194_p6 }
  0xdf   : > { %p4197_p4 = pnand %p4196_p0, %p4190_p3 }
  0xe1   : > { %4200 = shalt.err (!%p4197_p4)
}
  0xe2   : > { %s4201_s3 = scalar_lea.vmem %s1128_s14, 16  ;;  %s4582_s17 = smov [#allocation22]  }
  0xe3   : > { %p4202_p7 = scmp.ne.s32.totalorder %s1128_s14, %s4201_s3  ;;  %s4206_s15 = sshll.u32 %s4582_s17, 4  ;;  %s4207_s15 = int_to_ptr.vmem [resolvable:$false] %s4206_s15 }
  0xe4   : > { %s4208_s22 = scalar_lea.vmem %s4207_s15, 32  ;;  %p4209_p12 = scmp.lt.s32.totalorder %s1128_s14, %s4207_s15 }
  0xe5   : > { %p4204_p11 = pnand %p4202_p7, %p4871_p9  ;;  %p4210_p5 = scmp.lt.s32.totalorder %s4208_s22, %s4201_s3 }
  0xe7   : > { %p4205_p1 = pneg %p4204_p11  ;;  %p4211_p10 = por %p4210_p5, %p4209_p12 }
  0xe9   : > { %p4212_p2 = pnand %p4211_p10, %p4205_p1 }
  0xeb   : > { %4215 = shalt.err (!%p4212_p2)
}
  0xec   : > { %p5531_p13 = scmp.ne.s32.totalorder %s5523_s10, 0  ;;  %s4583_s5 = smov [#allocation4]  }
  0xed   : > { %s878_s18 = sshll.u32 %s4583_s5, 4  ;;  %s4216_s17 = scalar_lea.hbm %s4617_s9, 128  ;;  %s879_s18 = int_to_ptr.vmem [resolvable:$true] %s878_s18 }
  0xee   : > { %3847 = dma.hbm_to_vmem [thread:$0]  (!%p5531_p13), %s4957_s4, 16, %s1128_s14, %s5485_s29  }
  0xef   : > { %p4217_p3 = scmp.ne.s32.totalorder %s4617_s9, %s4216_s17  ;;  %p5532_p6 = scmp.ne.s32.totalorder %s5524_s1, 0 }
  0xf0   : > { %p4223_p10 = scmp.lt.u32.totalorder %s4216_s17, %s4617_s9 }
  0xf1   : > { %p4219_p8 = pnand %p4217_p3, %p5532_p6 }
  0xf3   : > { %p4220_p0 = pneg %p4219_p8 }
  0xf5   : > { %p4225_p4 = pnand %p4223_p10, %p4220_p0 }
  0xf7   : > { %4228 = shalt.err (!%p4225_p4)
}
  0xf8   : > { %s4229_s22 = scalar_lea.vmem %s879_s18, 128  ;;  %p4237_p12 = scmp.lt.s32.totalorder %s879_s18, %s879_s18 }
  0xf9   : > { %p4230_p7 = scmp.ne.s32.totalorder %s879_s18, %s4229_s22  ;;  %p4238_p5 = scmp.lt.s32.totalorder %s4229_s22, %s4229_s22 }
  0xfb   : > { %p4232_p11 = pnand %p4230_p7, %p5532_p6  ;;  %p4239_p2 = por %p4238_p5, %p4237_p12 }
  0xfd   : > { %p4233_p1 = pneg %p4232_p11 }
  0xff   : > { %p4240_p13 = pnand %p4239_p2, %p4233_p1 }
 0x101   : > { %4243 = shalt.err (!%p4240_p13)
}
 0x102   : > { %s4584_s4 = smov 64   ;;  %s4585_s14 = smov 4  }
 0x103   : > { %p5533_p3 = scmp.ne.s32.totalorder %s5522_s28, 0  ;;  %s4586_s3 = smov [#allocation9]  }
 0x104   : > { %s906_s15 = sshll.u32 %s4586_s3, 4  ;;  %s4988_s5 = scalar_lea.hbm %s5512_s8, %s4857_s7  ;;  %s907_s15 = int_to_ptr.vmem [resolvable:$true] %s906_s15 }
 0x105   : > { %3813 = dma.hbm_to_vmem [thread:$0]  (!%p5533_p3), %s4617_s9, 128, %s879_s18, [#allocation5], %s4584_s4, %s4584_s4, %s4585_s14  }
 0x106   : > { %s977_s17 = scalar_lea.vmem [#allocation12], %s4823_s23  ;;  %s4244_s29 = scalar_lea.hbm %s4632_s21, 16 }
 0x107   : > { %s984_s22 = sshll.u32 %s977_s17, 4  ;;  %p4245_p13 = scmp.ne.s32.totalorder %s4632_s21, %s4244_s29  ;;  %s985_s22 = int_to_ptr.vmem [resolvable:$true] %s984_s22 }
 0x108   : > { %p4251_p10 = scmp.lt.u32.totalorder %s4244_s29, %s4632_s21 }
 0x109   : > { %p4247_p8 = pnand %p4245_p13, %p5532_p6 }
 0x10b   : > { %p4248_p0 = pneg %p4247_p8 }
 0x10d   : > { %p4253_p4 = pnand %p4251_p10, %p4248_p0 }
 0x10f   : > { %4256 = shalt.err (!%p4253_p4)
}
 0x110   : > { %s4257_s6 = scalar_lea.vmem %s907_s15, 16  ;;  %s4264_s18 = scalar_lea.vmem %s907_s15, 32 }
 0x111   : > { %p4258_p7 = scmp.ne.s32.totalorder %s907_s15, %s4257_s6  ;;  %p4265_p12 = scmp.lt.s32.totalorder %s907_s15, %s907_s15 }
 0x112   : > { %p4266_p5 = scmp.lt.s32.totalorder %s4264_s18, %s4257_s6 }
 0x113   : > { %p4260_p11 = pnand %p4258_p7, %p5532_p6 }
 0x114   : > { %p4267_p2 = por %p4266_p5, %p4265_p12 }
 0x115   : > { %p4261_p1 = pneg %p4260_p11 }
 0x117   : > { %p4268_p9 = pnand %p4267_p2, %p4261_p1 }
 0x119   : > { %4271 = shalt.err (!%p4268_p9)
}
 0x11a   : > { %3819 = dma.hbm_to_vmem [thread:$0]  (!%p5533_p3), %s4632_s21, 16, %s907_s15, [#allocation8]  }
 0x11b   : > { %s4272_s1 = scalar_lea.hbm %s4988_s5, 16  ;;  %p5534_p13 = scmp.ne.s32.totalorder %s5526_s25, 0 }
 0x11c   : > { %p4273_p6 = scmp.ne.s32.totalorder %s4988_s5, %s4272_s1  ;;  %s4277_s6 = scalar_lea.hbm %s5512_s8, 32 }
 0x11d   : > { %p4278_p10 = scmp.lt.u32.totalorder %s4988_s5, %s5512_s8  ;;  %p4279_p9 = scmp.lt.u32.totalorder %s4277_s6, %s4272_s1 }
 0x11e   : > { %p4275_p8 = pnand %p4273_p6, %p5534_p13  ;;  %p4281_p7 = scmp.lt.u32.totalorder %s4272_s1, %s4988_s5 }
 0x11f   : > { %p4280_p4 = por %p4279_p9, %p4278_p10 }
 0x120   : > { %p4276_p0 = pneg %p4275_p8 }
 0x121   : > { %p4282_p11 = por %p4281_p7, %p4280_p4 }
 0x123   : > { %p4283_p1 = pnand %p4282_p11, %p4276_p0 }
 0x125   : > { %4286 = shalt.err (!%p4283_p1)
}
 0x126   : > { %s4287_s28 = scalar_lea.vmem %s985_s22, 16  ;;  %s4587_s29 = smov [#allocation12]  }
 0x127   : > { %p4288_p12 = scmp.ne.s32.totalorder %s985_s22, %s4287_s28  ;;  %s4292_s4 = sshll.u32 %s4587_s29, 4  ;;  %s4293_s4 = int_to_ptr.vmem [resolvable:$false] %s4292_s4 }
 0x128   : > { %s4294_s14 = scalar_lea.vmem %s4293_s4, 32  ;;  %p4295_p2 = scmp.lt.s32.totalorder %s985_s22, %s4293_s4 }
 0x129   : > { %p4290_p5 = pnand %p4288_p12, %p5534_p13  ;;  %p4296_p6 = scmp.lt.s32.totalorder %s4294_s14, %s4287_s28 }
 0x12b   : > { %p4291_p3 = pneg %p4290_p5  ;;  %p4297_p8 = por %p4296_p6, %p4295_p2 }
 0x12d   : > { %p4298_p9 = pnand %p4297_p8, %p4291_p3 }
 0x12f   : > { %4301 = shalt.err (!%p4298_p9)
}
 0x130   : > { %p5535_p10 = scmp.ne.s32.totalorder %s5523_s10, 0  ;;  %s5536_s3 = scalar_lea.sflag [#allocation11], %s4832_s2 }
 0x131   : > { %s5018_s15 = scalar_lea.hbm %s4672_s30, %s4857_s7  ;;  %s1027_s17 = scalar_lea.vmem [#allocation15], %s4823_s23 }
 0x132   : > { %3826 = dma.hbm_to_vmem [thread:$0]  (!%p5535_p10), %s4988_s5, 16, %s985_s22, %s5536_s3  }
 0x133   : > { %s1034_s18 = sshll.u32 %s1027_s17, 4  ;;  %s4302_s1 = scalar_lea.hbm %s5018_s15, 16  ;;  %s1035_s18 = int_to_ptr.vmem [resolvable:$true] %s1034_s18 }
 0x134   : > { %p4303_p0 = scmp.ne.s32.totalorder %s5018_s15, %s4302_s1  ;;  %s4307_s6 = scalar_lea.hbm %s4672_s30, 32 }
 0x135   : > { %p4308_p11 = scmp.lt.u32.totalorder %s5018_s15, %s4672_s30  ;;  %p4309_p1 = scmp.lt.u32.totalorder %s4307_s6, %s4302_s1 }
 0x136   : > { %p4305_p4 = pnand %p4303_p0, %p5534_p13  ;;  %p4311_p5 = scmp.lt.u32.totalorder %s4302_s1, %s5018_s15 }
 0x137   : > { %p4310_p12 = por %p4309_p1, %p4308_p11 }
 0x138   : > { %p4306_p7 = pneg %p4305_p4 }
 0x139   : > { %p4312_p3 = por %p4311_p5, %p4310_p12 }
 0x13b   : > { %p4313_p2 = pnand %p4312_p3, %p4306_p7 }
 0x13d   : > { %4316 = shalt.err (!%p4313_p2)
}
 0x13e   : > { %s4317_s5 = scalar_lea.vmem %s1035_s18, 16  ;;  %s4588_s22 = smov [#allocation15]  }
 0x13f   : > { %p4318_p6 = scmp.ne.s32.totalorder %s1035_s18, %s4317_s5  ;;  %s4322_s28 = sshll.u32 %s4588_s22, 4  ;;  %s4323_s28 = int_to_ptr.vmem [resolvable:$false] %s4322_s28 }
 0x140   : > { %s4324_s29 = scalar_lea.vmem %s4323_s28, 32  ;;  %p4325_p0 = scmp.lt.s32.totalorder %s1035_s18, %s4323_s28 }
 0x141   : > { %p4320_p8 = pnand %p4318_p6, %p5534_p13  ;;  %p4326_p4 = scmp.lt.s32.totalorder %s4324_s29, %s4317_s5 }
 0x143   : > { %p4321_p9 = pneg %p4320_p8  ;;  %p4327_p10 = por %p4326_p4, %p4325_p0 }
 0x145   : > { %p4328_p1 = pnand %p4327_p10, %p4321_p9 }
 0x147   : > { %4331 = shalt.err (!%p4328_p1)
}
 0x148   : > { %p5537_p11 = scmp.ne.s32.totalorder %s5523_s10, 0  ;;  %s5538_s4 = scalar_lea.sflag [#allocation14], %s4832_s2 }
 0x149   : > { %s5038_s14 = scalar_lea.hbm %s4682_s12, %s4857_s7  ;;  %s1061_s3 = scalar_lea.vmem [#allocation18], %s4823_s23 }
 0x14a   : > { %3832 = dma.hbm_to_vmem [thread:$0]  (!%p5537_p11), %s5018_s15, 16, %s1035_s18, %s5538_s4  }
 0x14b   : > { %s1068_s17 = sshll.u32 %s1061_s3, 4  ;;  %s4332_s1 = scalar_lea.hbm %s5038_s14, 16  ;;  %s1069_s17 = int_to_ptr.vmem [resolvable:$true] %s1068_s17 }
 0x14c   : > { %p4333_p10 = scmp.ne.s32.totalorder %s5038_s14, %s4332_s1  ;;  %s4337_s6 = scalar_lea.hbm %s4682_s12, 32 }
 0x14d   : > { %p4338_p5 = scmp.lt.u32.totalorder %s5038_s14, %s4682_s12  ;;  %p4339_p3 = scmp.lt.u32.totalorder %s4337_s6, %s4332_s1 }
 0x14e   : > { %p4335_p7 = pnand %p4333_p10, %p5534_p13  ;;  %p4341_p6 = scmp.lt.u32.totalorder %s4332_s1, %s5038_s14 }
 0x14f   : > { %p4340_p2 = por %p4339_p3, %p4338_p5 }
 0x150   : > { %p4336_p12 = pneg %p4335_p7 }
 0x151   : > { %p4342_p8 = por %p4341_p6, %p4340_p2 }
 0x153   : > { %p4343_p9 = pnand %p4342_p8, %p4336_p12 }
 0x155   : > { %4346 = shalt.err (!%p4343_p9)
}
 0x156   : > { %s4347_s15 = scalar_lea.vmem %s1069_s17, 16  ;;  %s4589_s18 = smov [#allocation18]  }
 0x157   : > { %p4348_p0 = scmp.ne.s32.totalorder %s1069_s17, %s4347_s15  ;;  %s4352_s5 = sshll.u32 %s4589_s18, 4  ;;  %s4353_s5 = int_to_ptr.vmem [resolvable:$false] %s4352_s5 }
 0x158   : > { %s4354_s22 = scalar_lea.vmem %s4353_s5, 32  ;;  %p4355_p10 = scmp.lt.s32.totalorder %s1069_s17, %s4353_s5 }
 0x159   : > { %p4350_p4 = pnand %p4348_p0, %p5534_p13  ;;  %p4356_p7 = scmp.lt.s32.totalorder %s4354_s22, %s4347_s15 }
 0x15b   : > { %p4351_p1 = pneg %p4350_p4  ;;  %p4357_p11 = por %p4356_p7, %p4355_p10 }
 0x15d   : > { %p4358_p3 = pnand %p4357_p11, %p4351_p1 }
 0x15f   : > { %4361 = shalt.err (!%p4358_p3)
}
 0x160   : > { %p5539_p5 = scmp.ne.s32.totalorder %s5523_s10, 0  ;;  %s5540_s28 = scalar_lea.sflag [#allocation17], %s4832_s2 }
 0x161   : > { %s5058_s29 = scalar_lea.hbm %s4692_s27, %s4857_s7  ;;  %s1095_s4 = scalar_lea.vmem [#allocation21], %s4823_s23 }
 0x162   : > { %3838 = dma.hbm_to_vmem [thread:$0]  (!%p5539_p5), %s5038_s14, 16, %s1069_s17, %s5540_s28  }
 0x163   : > { %s1102_s3 = sshll.u32 %s1095_s4, 4  ;;  %s4362_s1 = scalar_lea.hbm %s5058_s29, 16  ;;  %s1103_s3 = int_to_ptr.vmem [resolvable:$true] %s1102_s3 }
 0x164   : > { %p4363_p11 = scmp.ne.s32.totalorder %s5058_s29, %s4362_s1  ;;  %s4367_s6 = scalar_lea.hbm %s4692_s27, 32 }
 0x165   : > { %p4368_p6 = scmp.lt.u32.totalorder %s5058_s29, %s4692_s27  ;;  %p4369_p8 = scmp.lt.u32.totalorder %s4367_s6, %s4362_s1 }
 0x166   : > { %p4365_p12 = pnand %p4363_p11, %p5534_p13  ;;  %p4371_p0 = scmp.lt.u32.totalorder %s4362_s1, %s5058_s29 }
 0x167   : > { %p4370_p9 = por %p4369_p8, %p4368_p6 }
 0x168   : > { %p4366_p2 = pneg %p4365_p12 }
 0x169   : > { %p4372_p4 = por %p4371_p0, %p4370_p9 }
 0x16b   : > { %p4373_p1 = pnand %p4372_p4, %p4366_p2 }
 0x16d   : > { %4376 = shalt.err (!%p4373_p1)
}
 0x16e   : > { %s4377_s14 = scalar_lea.vmem %s1103_s3, 16  ;;  %s4590_s17 = smov [#allocation21]  }
 0x16f   : > { %p4378_p10 = scmp.ne.s32.totalorder %s1103_s3, %s4377_s14  ;;  %s4382_s15 = sshll.u32 %s4590_s17, 4  ;;  %s4383_s15 = int_to_ptr.vmem [resolvable:$false] %s4382_s15 }
 0x170   : > { %s4384_s18 = scalar_lea.vmem %s4383_s15, 32  ;;  %p4385_p11 = scmp.lt.s32.totalorder %s1103_s3, %s4383_s15 }
 0x171   : > { %p4380_p7 = pnand %p4378_p10, %p5534_p13  ;;  %p4386_p12 = scmp.lt.s32.totalorder %s4384_s18, %s4377_s14 }
 0x173   : > { %p4381_p3 = pneg %p4380_p7  ;;  %p4387_p5 = por %p4386_p12, %p4385_p11 }
 0x175   : > { %p4388_p6 = pnand %p4387_p5, %p4381_p3 }
 0x177   : > { %4391 = shalt.err (!%p4388_p6)
}
 0x178   : > { %p5541_p8 = scmp.ne.s32.totalorder %s5523_s10, 0  ;;  %s5542_s5 = scalar_lea.sflag [#allocation20], %s4832_s2 }
 0x179   : > { %s5078_s22 = scalar_lea.hbm %s4712_s24, %s4857_s7  ;;  %s1145_s28 = scalar_lea.vmem [#allocation24], %s4823_s23 }
 0x17a   : > { %3844 = dma.hbm_to_vmem [thread:$0]  (!%p5541_p8), %s5058_s29, 16, %s1103_s3, %s5542_s5  }
 0x17b   : > { %s1152_s4 = sshll.u32 %s1145_s28, 4  ;;  %s4392_s1 = scalar_lea.hbm %s5078_s22, 16  ;;  %s1153_s4 = int_to_ptr.vmem [resolvable:$true] %s1152_s4 }
 0x17c   : > { %p4393_p5 = scmp.ne.s32.totalorder %s5078_s22, %s4392_s1  ;;  %s4397_s6 = scalar_lea.hbm %s4712_s24, 32 }
 0x17d   : > { %p4398_p0 = scmp.lt.u32.totalorder %s5078_s22, %s4712_s24  ;;  %p4399_p4 = scmp.lt.u32.totalorder %s4397_s6, %s4392_s1 }
 0x17e   : > { %p4395_p2 = pnand %p4393_p5, %p5534_p13  ;;  %p4401_p10 = scmp.lt.u32.totalorder %s4392_s1, %s5078_s22 }
 0x17f   : > { %p4400_p1 = por %p4399_p4, %p4398_p0 }
 0x180   : > { %p4396_p9 = pneg %p4395_p2 }
 0x181   : > { %p4402_p7 = por %p4401_p10, %p4400_p1 }
 0x183   : > { %p4403_p3 = pnand %p4402_p7, %p4396_p9 }
 0x185   : > { %4406 = shalt.err (!%p4403_p3)
}
 0x186   : > { %s4407_s29 = scalar_lea.vmem %s1153_s4, 16  ;;  %s4591_s3 = smov [#allocation24]  }
 0x187   : > { %p4408_p11 = scmp.ne.s32.totalorder %s1153_s4, %s4407_s29  ;;  %s4412_s14 = sshll.u32 %s4591_s3, 4  ;;  %s4413_s14 = int_to_ptr.vmem [resolvable:$false] %s4412_s14 }
 0x188   : > { %s4414_s17 = scalar_lea.vmem %s4413_s14, 32  ;;  %p4415_p5 = scmp.lt.s32.totalorder %s1153_s4, %s4413_s14 }
 0x189   : > { %p4410_p12 = pnand %p4408_p11, %p5534_p13  ;;  %p4416_p2 = scmp.lt.s32.totalorder %s4414_s17, %s4407_s29 }
 0x18b   : > { %p4411_p6 = pneg %p4410_p12  ;;  %p4417_p8 = por %p4416_p2, %p4415_p5 }
 0x18d   : > { %p4418_p0 = pnand %p4417_p8, %p4411_p6 }
 0x18f   : > { %4421 = shalt.err (!%p4418_p0)
}
 0x190   : > { %p5543_p4 = scmp.ne.s32.totalorder %s5523_s10, 0  ;;  %s5544_s15 = scalar_lea.sflag [#allocation23], %s4832_s2 }
 0x191   : > { %s5545_s18 = sld [smem:[#allocation49_spill]]  ;;  %s1162_s28 = scalar_lea.vmem [#allocation25], %s4823_s23 }
 0x192   : > { %3850 = dma.hbm_to_vmem [thread:$0]  (!%p5543_p4), %s5078_s22, 16, %s1153_s4, %s5544_s15  }
 0x193   : > { %s1169_s1 = sshll.u32 %s1162_s28, 4  ;;  %s1160_s6 = scalar_lea.sflag [#allocation26], %s4823_s23  ;;  %s1170_s1 = int_to_ptr.vmem [resolvable:$true] %s1169_s1 }
 0x197   : > { %s5098_s5 = scalar_lea.hbm %s5545_s18, %s4857_s7  ;;  %s4427_s29 = scalar_lea.hbm %s5545_s18, 32 }
 0x198   : > { %s4422_s2 = scalar_lea.hbm %s5098_s5, 16  ;;  %p4428_p10 = scmp.lt.u32.totalorder %s5098_s5, %s5545_s18 }
 0x199   : > { %p4423_p8 = scmp.ne.s32.totalorder %s5098_s5, %s4422_s2  ;;  %p4429_p7 = scmp.lt.u32.totalorder %s4427_s29, %s4422_s2 }
 0x19a   : > { %p4431_p11 = scmp.lt.u32.totalorder %s4422_s2, %s5098_s5 }
 0x19b   : > { %p4425_p9 = pnand %p4423_p8, %p5534_p13  ;;  %p4430_p3 = por %p4429_p7, %p4428_p10 }
 0x19d   : > { %p4426_p1 = pneg %p4425_p9  ;;  %p4432_p12 = por %p4431_p11, %p4430_p3 }
 0x19f   : > { %p4433_p6 = pnand %p4432_p12, %p4426_p1 }
 0x1a1   : > { %4436 = shalt.err (!%p4433_p6)
}
 0x1a2   : > { %s4437_s7 = scalar_lea.vmem %s1170_s1, 16  ;;  %s4592_s23 = smov [#allocation25]  }
 0x1a3   : > { %p4438_p5 = scmp.ne.s32.totalorder %s1170_s1, %s4437_s7  ;;  %s4442_s22 = sshll.u32 %s4592_s23, 4  ;;  %s4443_s22 = int_to_ptr.vmem [resolvable:$false] %s4442_s22 }
 0x1a4   : > { %s4444_s4 = scalar_lea.vmem %s4443_s22, 32  ;;  %p4445_p8 = scmp.lt.s32.totalorder %s1170_s1, %s4443_s22 }
 0x1a5   : > { %p4440_p2 = pnand %p4438_p5, %p5534_p13  ;;  %p4446_p9 = scmp.lt.s32.totalorder %s4444_s4, %s4437_s7 }
 0x1a7   : > { %p4441_p0 = pneg %p4440_p2  ;;  %p4447_p4 = por %p4446_p9, %p4445_p8 }
 0x1a9   : > { %p4448_p7 = pnand %p4447_p4, %p4441_p0 }
 0x1ab   : > { %4451 = shalt.err (!%p4448_p7)
}
 0x1ac   : > { %p5546_p10 = scmp.ne.s32.totalorder %s5523_s10, 0  ;;  %p5547_p1 = scmp.ne.s32.totalorder %s5521_s16, 0 }
 0x1ad   : > { %p5548_p3 = scmp.eq.s32.totalorder (!%p5547_p1), %s4786_s26, 0 }
 0x1ae   : > { %3853 = dma.hbm_to_vmem [thread:$0]  (!%p5546_p10), %s5098_s5, 16, %s1170_s1, %s1160_s6  }
 0x1af   : > { %1184 = sbr.rel (%p5547_p1) target bundleno = 4561 (0x11d1), region = 144 }
 0x1b6   : > { %4495 = dma.done.wait (%p5548_p3), [#allocation5], 128   ;;  %p5549_p13 = pmov %p5548_p3 }
 0x1b7   : > { %p5550_p11 = pmov %p5548_p3 }
 0x1b8   : > { %4497 = vsyncadd (%p5549_p13), [#allocation5], 4294967168 }
 0x1b9   : > { %4499 = dma.done.wait (%p5550_p11), [#allocation8], 48   ;;  %p5551_p12 = pmov %p5548_p3 }
 0x1ba   : > { %s1198_s25 = sand.u32 1, %s4786_s26   ;;  %s5127_s10 = sand.u32 1, %s4536_s0  }
 0x1bb   : > { %4501 = vsyncadd (%p5551_p12), [#allocation8], 4294967248  ;;  %s1199_s16 = scalar_lea.sflag [#allocation11], %s1198_s25  ;;  %p5552_p4 = scmp.ne.s32.totalorder %s5520_s11, 0 }
 0x1bd   : > { %4503 = dma.done.wait (%p5552_p4), %s1199_s16, 32  }
 0x1be   : > { %4505 = vsyncadd (%p5552_p4), %s1199_s16, 4294967264  ;;  %s1215_s17 = scalar_lea.sflag [#allocation14], %s1198_s25 }
 0x1bf   : > { %4507 = dma.done.wait (%p5552_p4), %s1215_s17, 32  }
 0x1c0   : > { %4509 = vsyncadd (%p5552_p4), %s1215_s17, 4294967264  ;;  %s1231_s28 = scalar_lea.sflag [#allocation17], %s1198_s25 }
 0x1c1   : > { %4511 = dma.done.wait (%p5552_p4), %s1231_s28, 32  }
 0x1c2   : > { %4513 = vsyncadd (%p5552_p4), %s1231_s28, 4294967264  ;;  %s1247_s2 = scalar_lea.sflag [#allocation20], %s1198_s25 }
 0x1c3   : > { %4515 = dma.done.wait (%p5552_p4), %s1247_s2, 32  }
 0x1c4   : > { %4517 = vsyncadd (%p5552_p4), %s1247_s2, 4294967264  ;;  %s1263_s23 = scalar_lea.sflag [#allocation23], %s1198_s25 }
 0x1c5   : > { %4519 = dma.done.wait (%p5552_p4), %s1263_s23, 32  }
 0x1c6   : > { %4521 = vsyncadd (%p5552_p4), %s1263_s23, 4294967264  ;;  %s1279_s16 = scalar_lea.sflag [#allocation26], %s5127_s10 }
 0x1c7   : > { %4523 = dma.done.wait (%p5552_p4), %s1279_s16, 16  }
 0x1c8   : > { %4525 = vsyncadd (%p5552_p4), %s1279_s16, 4294967280  ;;  %s5553_s25 = sld [smem:[#allocation40_spill]]  ;;  %s5554_s28 = sld [smem:[#allocation42_spill]] }
 0x1c9   : > { %s5555_s2 = sld [smem:[#allocation44_spill]]  ;;  %s5556_s22 = sld [smem:[#allocation45_spill]] }
 0x1ca   : > { %s5557_s7 = sld [smem:[#allocation47_spill]]  ;;  %s5558_s23 = sld [smem:[#allocation48_spill]] }
 0x1cb   : > { %s5559_s29 = sld [smem:[#allocation50_spill]]  ;;  %p1427_p6 = scmp.lt.s32.totalorder %s4786_s26, 1 }
 0x1cc   : > { %p5560_p5 = scmp.ne.s32.totalorder %s4786_s26, 0 }
 0x1cd   : > { %s5167_s6 = scalar_select %p1427_p6, %s4786_s26, 1 }
 0x1ce   : > { %1464 = sbr.rel (%p5560_p5) target bundleno = 688 (0x2b0), region = 204  ;;  %v1468_v1 = vld [vmem:[#allocation7] sm:$0x3] (!%p5560_p5)  ;;  %s5561_s8 = sld [smem:[#allocation37_spill]] (!%p5560_p5)  ;;  %vm1480_vm0 = vcmask (!%p5560_p5), 1041408   ;;  %v4593_v3 = vmov (!%p5560_p5), 0.0  }
 0x1cf   : > { %s3561_s17 = sshll.u32 %s5167_s6, 4  ;;  %s3566_s4 = sshll.u32 %s5167_s6, 5  ;;  %3624 = vmatprep.subr.bf16.mxu0 (!%p5560_p5), %v4593_v3  ;;  %v1482_v4 = vsel (!%p5560_p5), %vm1480_vm0, %v1468_v1, 0  ;;  %vm4594_vm1 = vmmov (!%p5560_p5), 0   ;;  %vm1476_vm2 = vcmask (!%p5560_p5), 31744   ;;  %vm1525_vm3 = vcmask (!%p5560_p5), 261120  }
 0x1d0   : > { %s5172_s1 = scalar_lea.vmem %s5553_s25, %s3561_s17  ;;  %s5175_s11 = scalar_lea.vmem %s5554_s28, %s3561_s17  ;;  %3626 = vmatprep.mubr.msk.bf16.mxu0 (!%p5560_p5), %vm4594_vm1, %v4593_v3  ;;  %3625 = vmatpush3.bf16.msra.mxu0 (!%p5560_p5), %v1482_v4  ;;  %v3497_v7 = vld [vmem:[#allocation9] ss:$0 sm:$0xff] (!%p5560_p5) }
 0x1d1   : > { %s5178_s16 = scalar_lea.vmem %s5555_s2, %s3561_s17  ;;  %s5181_s5 = scalar_lea.vmem %s5556_s22, %s3561_s17 }
 0x1d2   : > { %s5184_s15 = scalar_lea.vmem %s5557_s7, %s3561_s17  ;;  %s5187_s14 = scalar_lea.vmem %s5558_s23, %s3566_s4 }
 0x1d3   : > { %s1459_s3 = scalar_lea.vmem %s5559_s29, %s5167_s6 }
 0x1d4   : > { %v1465_v2 = vld [vmem:[%s5561_s8] sm:$0xff] (!%p5560_p5)  ;;  %v1466_v5 = vld [vmem:[%s5561_s8 + $0x8] sm:$0xff] (!%p5560_p5) }
 0x1d5   : > { %v1467_v6 = vpack.c.bf16 %v1466_v5, %v1465_v2 }
 0x1d7   : > { %3627 = vmatmul.mubr.msk.bf16.vlgmr.msra.gmra.mrb[0].mxu0 %vm1476_vm2, %v1467_v6 }
 0x2aa   : > { %v1518_v8 = vpop.f32.mrb[0].mxu0 }
 0x2ab   : > { %v1519_v9 = vadd.f32 %v3497_v7, %v1518_v8  ;;  %v3628_v10 = vpop.f32.mrb[1].mxu0 }
 0x2ac   : > { %v1521_v11 = vpop.f32.mrb[2].mxu0 }
 0x2ad   : > { %1526 = vst.msk [vmem:[#allocation2] sm:$0xff] %vm1525_vm3, %v1519_v9  ;;  %v1522_v12 = vadd.f32 %v3497_v7, %v1521_v11  ;;  %v3629_v13 = vpop.f32.mrb[3].mxu0 }
 0x2af   : > { %1527 = vst.msk [vmem:[#allocation2 + $0x8] sm:$0xff] %vm1525_vm3, %v1522_v12 }
 0x2b0 PF: > { %v3942_v14 = vld [vmem:[%s5175_s11] sm:$0xff]   ;;  %v4595_v15 = vmov 0.0   ;;  %v3944_v17 = vld [vmem:[%s5175_s11 + $0x8] sm:$0xff]   ;;  %vm4596_vm4 = vmmov 0   ;;  %vm1556_vm5 = vcmask 261120   ;;  %s5563_s29 = scalar_lea.vmem [#allocation12], %s5127_s10 }
 0x2b1   : > { %3638 = vmatprep.subr.bf16.mxu1 %v4595_v15  ;;  %3630 = vmatprep.subr.bf16.mxu0 %v4595_v15  ;;  %v3943_v16 = vld [vmem:[%s5172_s1] sm:$0xff]   ;;  %v3945_v18 = vld [vmem:[%s5172_s1 + $0x8] sm:$0xff]   ;;  %s5562_s1 = scalar_lea.vmem [#allocation10], %s5127_s10  ;;  %s4597_s7 = smov 64   ;;  %vm1780_vm6 = vcmask 130048   ;;  %vm2618_vm11 = vcmask 523264  }
 0x2b2   : > { %3639 = vmatpush3.bf16.msra.mxu1 %v3942_v14  ;;  %3642 = vmatprep.mubr.msk.bf16.mxu1 %vm4596_vm4, %v4595_v15  ;;  %v3946_v22 = vld [vmem:[%s5178_s16] sm:$0xff]   ;;  %v3947_v23 = vld [vmem:[%s5178_s16 + $0x8] sm:$0xff]   ;;  %s4598_s22 = smov 96   ;;  %s4599_s4 = smov 32  }
 0x2b3   : > { %3631 = vmatpush3.bf16.msra.mxu0 %v3943_v16  ;;  %3640 = vmatprep.subr.bf16.mxu1 %v4595_v15  ;;  %v3499_v24 = vld [vmem:[%s5562_s1] ss:$0 sm:$0xff]  ;;  %s5564_s17 = scalar_lea.vmem [#allocation13], %s5127_s10  ;;  %s5566_s25 = scalar_lea.vmem [#allocation16], %s5127_s10 }
 0x2b4   : > { %3632 = vmatprep.subr.bf16.mxu0 %v4595_v15  ;;  %v5205_v19 = vld [vmem:[#allocation2] sm:$0xff]  ;;  %3634 = vmatprep.mubr.msk.bf16.mxu0 %vm4596_vm4, %v4595_v15  ;;  %s5567_s28 = scalar_lea.vmem [#allocation18], %s5127_s10  ;;  %s5568_s2 = scalar_lea.vmem [#allocation19], %s5127_s10 }
 0x2b5   : > { %v3503_v25 = vld [vmem:[%s5563_s29] ss:$0 sm:$0xff]  ;;  %s5570_s23 = scalar_lea.vmem [#allocation22], %s5127_s10  ;;  %s5573_s16 = scalar_lea.vmem [#allocation25], %s5127_s10 }
 0x2b6   : > { %v5207_v20 = vld [vmem:[#allocation2 + $0x8] sm:$0xff]  ;;  %3641 = vmatpush3.bf16.msra.mxu1 %v3944_v17  ;;  %v3507_v43 = vld [vmem:[%s5564_s17] ss:$0 sm:$0xff]  ;;  %p3541_p2 = scmp.ne.s32.totalorder %s4786_s26, 1 }
 0x2b7   : > { %v5213_v21 = vpack.c.bf16 %v5207_v20, %v5205_v19  ;;  %3633 = vmatpush3.bf16.msra.mxu0 %v3945_v18  ;;  %3654 = vmatprep.subr.bf16.mxu1 %v4595_v15  ;;  %s5574_s1 = sld [smem:[#allocation51_spill]] (!%p3541_p2)  ;;  %vm4601_vm12 = vmmov (!%p3541_p2), 0   ;;  %s5577_s6 = sld [smem:[#allocation38_spill]] (!%p3541_p2)  ;;  %vm2827_vm15 = vcmask (!%p3541_p2), 15360   ;;  %vm3079_vm1 = vcmask (!%p3541_p2), 9216  }
 0x2b8   : > { %3646 = vmatprep.subr.bf16.mxu0 %v4595_v15  ;;  %s5578_s29 = sld [smem:[#allocation54_spill]] (!%p3541_p2) }
 0x2b9   : > { %3643 = vmatmul.mubr.msk.bf16.vlgmr.msra.gmra.mrb[0].mxu1 %vm1556_vm5, %v5213_v21 }
 0x2ba   : > { %3635 = vmatmul.mubr.msk.bf16.vlgmr.msra.gmra.mrb[0].mxu0 %vm1556_vm5, %v5213_v21  ;;  %3656 = vmatprep.mubr.msk.bf16.mxu1 %vm4596_vm4, %v4595_v15 }
 0x2bb   : > { %3650 = vmatprep.mubr.msk.bf16.mxu0 %vm4596_vm4, %v4595_v15  ;;  %3647 = vmatpush3.bf16.msra.mxu0 %v3946_v22 }
 0x2bc   : > { %3648 = vmatprep.subr.bf16.mxu0 %v4595_v15 }
 0x2bf   : > { %3649 = vmatpush3.bf16.msra.mxu0 %v3947_v23 }
 0x2c0   : > { %3660 = vmatprep.subr.bf16.mxu0 %v4595_v15 }
 0x2c2   : > { %3651 = vmatmul.mubr.msk.bf16.vlgmr.msra.gmra.mrb[4].mxu0 %vm1556_vm5, %v5213_v21 }
 0x2c3   : > { %3662 = vmatprep.mubr.msk.bf16.mxu0 %vm4596_vm4, %v4595_v15 }
 0x38c   : > { %v1660_v26 = vpop.f32.mrb[0].mxu1 }
 0x38d   : > { %v3644_v27 = vpop.f32.mrb[1].mxu1  ;;  %v1594_v28 = vpop.f32.mrb[0].mxu0  ;;  %v1661_v32 = vadd.f32 %v3503_v25, %v1660_v26 }
 0x38e   : > { %v1595_v29 = vadd.f32 %v3499_v24, %v1594_v28  ;;  %v1663_v30 = vpop.f32.mrb[2].mxu1  ;;  %v3636_v31 = vpop.f32.mrb[1].mxu0 }
 0x38f   : > { %v1664_v33 = vadd.f32 %v3503_v25, %v1663_v30  ;;  %v3645_v34 = vpop.f32.mrb[3].mxu1  ;;  %v1597_v35 = vpop.f32.mrb[2].mxu0 }
 0x390   : > { %v1601_v36 = vmul.f32 0.17677669, %v1595_v29  ;;  %v1598_v37 = vadd.f32 %v3499_v24, %v1597_v35  ;;  %v3637_v38 = vpop.f32.mrb[3].mxu0 }
 0x391   : > { %v1732_v39 = vpack.c.bf16 %v1664_v33, %v1661_v32 }
 0x392   : > { %v1602_v40 = vmul.f32 0.17677669, %v1598_v37  ;;  %v3568_v37 = vld [vmem:[#allocation4] sm:$0xff]  }
 0x393   : > { %1985 = vrot.lane.b32.xlu1 %v1732_v39, %s4597_s7  ;;  %1815 = vrot.lane.b32.xlu0 %v1732_v39, %s4598_s22  ;;  %v1737_v41 = vsel %vm1556_vm5, %v1732_v39, 0 }
 0x394   : > { %v1731_v42 = vpack.c.bf16 %v1602_v40, %v1601_v36  ;;  %3655 = vmatpush3.bf16.xpose.msra.mxu1 %v1737_v41  ;;  %v3569_v41 = vunpack.c.l.bf16 %v3568_v37 }
 0x395   : > { %3666 = vmatprep.subr.bf16.mxu1 %v4595_v15  ;;  %v1724_v44 = vpop.f32.mrb[4].mxu0 }
 0x396   : > { %v1725_v45 = vadd.f32 %v3507_v43, %v1724_v44  ;;  %v3652_v46 = vpop.f32.mrb[5].mxu0 }
 0x397   : > { %1983 = vrot.lane.b32.xlu1 %v1731_v42, %s4597_s7  ;;  %1812 = vrot.lane.b32.xlu0 %v1731_v42, %s4598_s22  ;;  %v1727_v47 = vpop.f32.mrb[6].mxu0 }
 0x398   : > { %v1728_v48 = vadd.f32 %v3507_v43, %v1727_v47  ;;  %v3653_v49 = vpop.f32.mrb[7].mxu0  ;;  %v3570_v43 = vunpack.c.h.bf16 %v3568_v37 }
 0x39a   : > { %v5250_v50 = vpack.c.bf16 %v1728_v48, %v1725_v45 }
 0x39b   : > { %2110 = vrot.lane.b32.xlu1 %v1731_v42, %s4599_s4  ;;  %2112 = vrot.lane.b32.xlu0 %v1732_v39, %s4599_s4 }
 0x39c   : > { %3657 = vmatmul.mubr.msk.bf16.vlgmr.msra.gmra.mrb[4].mxu1 %vm1556_vm5, %v1731_v42 }
 0x39d   : > { %3668 = vmatprep.mubr.msk.bf16.mxu1 %vm4596_vm4, %v4595_v15 }
 0x405   : > { %v1816_v51 = vpop.permute.xlu0 %1815  ;;  %v1986_v53 = vpop.permute.xlu1 %1985 }
 0x406   : > { %v1821_v52 = vsel %vm1556_vm5, %v1816_v51, 0  ;;  %v1991_v55 = vsel %vm1556_vm5, %v1986_v53, 0 }
 0x407   : > { %3661 = vmatpush3.bf16.xpose.msra.mxu0 %v1821_v52 }
 0x408   : > { %3678 = vmatprep.subr.bf16.mxu0 %v4595_v15 }
 0x409   : > { %v1813_v54 = vpop.permute.xlu0 %1812  ;;  %v1984_v57 = vpop.permute.xlu1 %1983 }
 0x40d   : > { %v2113_v56 = vpop.permute.xlu0 %2112  ;;  %v2111_v59 = vpop.permute.xlu1 %2110 }
 0x40e   : > { %3663 = vmatmul.mubr.msk.bf16.vlgmr.msra.gmra.mrb[8].mxu0 %vm1556_vm5, %v1813_v54  ;;  %v2118_v58 = vsel %vm1556_vm5, %v2113_v56, 0 }
 0x40f   : > { %3679 = vmatpush3.bf16.xpose.msra.mxu0 %v1991_v55  ;;  %3680 = vmatprep.mubr.msk.bf16.mxu0 %vm4596_vm4, %v4595_v15 }
 0x410   : > { %3690 = vmatprep.subr.bf16.mxu0 %v4595_v15 }
 0x416   : > { %3681 = vmatmul.mubr.msk.bf16.vlgmr.msra.gmra.mrb[12].mxu0 %vm1556_vm5, %v1984_v57 }
 0x417   : > { %3691 = vmatpush3.bf16.xpose.msra.mxu0 %v2118_v58  ;;  %3692 = vmatprep.mubr.msk.bf16.mxu0 %vm4596_vm4, %v4595_v15 }
 0x418   : > { %3702 = vmatprep.subr.bf16.mxu0 %v4595_v15 }
 0x41e   : > { %3693 = vmatmul.mubr.msk.bf16.vlgmr.msra.gmra.mrb[16].mxu0 %vm1556_vm5, %v2111_v59 }
 0x41f   : > { %3706 = vmatprep.mubr.msk.bf16.mxu0 %vm4596_vm4, %v4595_v15 }
 0x46f   : > { %v1773_v60 = vpop.f32.mrb[4].mxu1 }
 0x470   : > { %v3658_v61 = vpop.f32.mrb[5].mxu1  ;;  %v1781_v6 = vsel %vm1780_vm6, %v1773_v60, -inf }
 0x471   : > { %v1776_v62 = vpop.f32.mrb[6].mxu1 }
 0x472   : > { %v3659_v63 = vpop.f32.mrb[7].mxu1  ;;  %v1784_v9 = vsel %vm1780_vm6, %v1776_v62, -inf }
 0x4e1   : > { %v1857_v0 = vpop.f32.mrb[8].mxu0 }
 0x4e2   : > { %v3664_v1 = vpop.f32.mrb[9].mxu0  ;;  %v1864_v2 = vsel %vm1780_vm6, %v1857_v0, -inf }
 0x4e3   : > { %1865 = vmax.xlane.f32.xlu0 %v1864_v2  ;;  %v1860_v3 = vpop.f32.mrb[10].mxu0 }
 0x4e4   : > { %v3665_v4 = vpop.f32.mrb[11].mxu0  ;;  %v1867_v5 = vsel %vm1780_vm6, %v1860_v3, -inf }
 0x4e5   : > { %1868 = vmax.xlane.f32.xlu1 %v1867_v5 }
 0x4e7   : > { %1782 = vmax.xlane.f32.xlu0 %v1781_v6 }
 0x4e9   : > { %v2027_v7 = vpop.f32.mrb[12].mxu0 }
 0x4ea   : > { %v3682_v8 = vpop.f32.mrb[13].mxu0  ;;  %v2034_v10 = vsel %vm1780_vm6, %v2027_v7, -inf }
 0x4eb   : > { %1785 = vmax.xlane.f32.xlu0 %v1784_v9  ;;  %2035 = vmax.xlane.f32.xlu1 %v2034_v10  ;;  %v2030_v11 = vpop.f32.mrb[14].mxu0 }
 0x4ec   : > { %v3683_v12 = vpop.f32.mrb[15].mxu0  ;;  %v2037_v13 = vsel %vm1780_vm6, %v2030_v11, -inf }
 0x4ed   : > { %v3948_v12 = vld [vmem:[%s5181_s5] sm:$0xff]  }
 0x4ee   : > { %3703 = vmatpush3.bf16.msra.mxu0 %v3948_v12 }
 0x4ef   : > { %2038 = vmax.xlane.f32.xlu0 %v2037_v13  ;;  %v3949_v13 = vld [vmem:[%s5181_s5 + $0x8] sm:$0xff]   ;;  %3704 = vmatprep.subr.bf16.mxu0 %v4595_v15  ;;  %s5565_s5 = scalar_lea.vmem [#allocation15], %s5127_s10 }
 0x4f1   : > { %v2154_v14 = vpop.f32.mrb[16].mxu0 }
 0x4f2   : > { %v3694_v16 = vpop.f32.mrb[17].mxu0  ;;  %v2161_v17 = vsel %vm1780_vm6, %v2154_v14, -inf  ;;  %3705 = vmatpush3.bf16.msra.mxu0 %v3949_v13 }
 0x4f3   : > { %2162 = vmax.xlane.f32.xlu1 %v2161_v17  ;;  %v2157_v18 = vpop.f32.mrb[18].mxu0  ;;  %3710 = vmatprep.subr.bf16.mxu0 %v4595_v15 }
 0x4f4   : > { %v3695_v22 = vpop.f32.mrb[19].mxu0  ;;  %v2164_v23 = vsel %vm1780_vm6, %v2157_v18, -inf }
 0x4f5   : > { %2165 = vmax.xlane.f32.xlu0 %v2164_v23  ;;  %3707 = vmatmul.mubr.msk.bf16.vlgmr.msra.gmra.mrb[20].mxu0 %vm1556_vm5, %v5213_v21 }
 0x4f6   : > { %3714 = vmatprep.mubr.msk.bf16.mxu0 %vm4596_vm4, %v4595_v15 }
 0x570   : > { %v1866_v24 = vpop.xlane.xlu0 %1865 }
 0x571   : > { %v1870_v25 = vsub.f32 %v1857_v0, %v1866_v24 }
 0x572   : > { %v1869_v26 = vpop.xlane.xlu1 %1868 }
 0x573   : > { %v1872_v27 = vmul.f32 1.442695, %v1870_v25  ;;  %v1871_v28 = vsub.f32 %v1860_v3, %v1869_v26 }
 0x574   : > { %v1783_v29 = vpop.xlane.xlu0 %1782 }
 0x575   : > { %3956 = vpow2.f32 %v1872_v27  ;;  %v1874_v30 = vmul.f32 1.442695, %v1871_v28  ;;  %v1787_v31 = vsub.f32 %v1773_v60, %v1783_v29 }
 0x577   : > { %3958 = vpow2.f32 %v1874_v30  ;;  %v1789_v32 = vmul.f32 1.442695, %v1787_v31 }
 0x578   : > { %v1786_v33 = vpop.xlane.xlu0 %1785  ;;  %v2036_v34 = vpop.xlane.xlu1 %2035 }
 0x579   : > { %3960 = vpow2.f32 %v1789_v32  ;;  %v1788_v35 = vsub.f32 %v1776_v62, %v1786_v33  ;;  %v2040_v36 = vsub.f32 %v2027_v7, %v2036_v34 }
 0x57b   : > { %v1791_v38 = vmul.f32 1.442695, %v1788_v35  ;;  %v2042_v39 = vmul.f32 1.442695, %v2040_v36 }
 0x57c   : > { %v2039_v40 = vpop.xlane.xlu0 %2038 }
 0x57d   : > { %3962 = vpow2.f32 %v1791_v38  ;;  %v2041_v42 = vsub.f32 %v2030_v11, %v2039_v40 }
 0x57e   : > { %3964 = vpow2.f32 %v2042_v39 }
 0x57f   : > { %v3957_v44 = vpop.eup %3956  ;;  %v2044_v45 = vmul.f32 1.442695, %v2041_v42 }
 0x580   : > { %v2163_v46 = vpop.xlane.xlu1 %2162  ;;  %v5275_v47 = vmul.f32 %v3957_v44, %v3569_v41 }
 0x581   : > { %v3959_v48 = vpop.eup %3958  ;;  %3966 = vpow2.f32 %v2044_v45  ;;  %v2167_v49 = vsub.f32 %v2154_v14, %v2163_v46 }
 0x582   : > { %v2166_v51 = vpop.xlane.xlu0 %2165  ;;  %v1878_v52 = vsel %vm1780_vm6, %v5275_v47, 0.0  ;;  %v5279_v53 = vmul.f32 %v3959_v48, %v3570_v43 }
 0x583   : > { %v3961_v54 = vpop.eup %3960  ;;  %v2169_v55 = vmul.f32 1.442695, %v2167_v49  ;;  %v2168_v56 = vsub.f32 %v2157_v18, %v2166_v51  ;;  %1879 = vadd.xlane.f32.xlu1 %v1878_v52 }
 0x584   : > { %v1881_v57 = vsel %vm1780_vm6, %v5279_v53, 0.0  ;;  %v5283_v58 = vmul.f32 %v3961_v54, %v3569_v41 }
 0x585   : > { %3968 = vpow2.f32 %v2169_v55  ;;  %v2171_v59 = vmul.f32 1.442695, %v2168_v56  ;;  %1882 = vadd.xlane.f32.xlu0 %v1881_v57 }
 0x586   : > { %v1797_v60 = vsel %vm1780_vm6, %v5283_v58, 0.0 }
 0x587   : > { %v3963_v61 = vpop.eup %3962  ;;  %3970 = vpow2.f32 %v2171_v59  ;;  %1798 = vadd.xlane.f32.xlu1 %v1797_v60  ;;  %v3519_v60 = vld [vmem:[%s5565_s5] ss:$0 sm:$0xff] }
 0x588   : > { %v3965_v62 = vpop.eup %3964  ;;  %v1796_v63 = vmul.f32 %v3963_v61, %v3570_v43 }
 0x589   : > { %v5287_v0 = vmul.f32 %v3965_v62, %v3569_v41 }
 0x58a   : > { %v1800_v1 = vsel %vm1780_vm6, %v1796_v63, 0.0 }
 0x58b   : > { %v3967_v2 = vpop.eup %3966  ;;  %v2048_v3 = vsel %vm1780_vm6, %v5287_v0, 0.0  ;;  %1801 = vadd.xlane.f32.xlu0 %v1800_v1 }
 0x58c   : > { %2049 = vadd.xlane.f32.xlu1 %v2048_v3  ;;  %v5292_v4 = vmul.f32 %v3967_v2, %v3570_v43 }
 0x58e   : > { %v2051_v5 = vsel %vm1780_vm6, %v5292_v4, 0.0 }
 0x58f   : > { %v3969_v6 = vpop.eup %3968  ;;  %2052 = vadd.xlane.f32.xlu0 %v2051_v5 }
 0x590   : > { %v5296_v7 = vmul.f32 %v3969_v6, %v3569_v41 }
 0x591   : > { %v3971_v8 = vpop.eup %3970 }
 0x592   : > { %v2175_v9 = vsel %vm1780_vm6, %v5296_v7, 0.0  ;;  %v5300_v10 = vmul.f32 %v3971_v8, %v3570_v43 }
 0x593   : > { %2176 = vadd.xlane.f32.xlu0 %v2175_v9 }
 0x594   : > { %v2178_v11 = vsel %vm1780_vm6, %v5300_v10, 0.0 }
 0x597   : > { %2179 = vadd.xlane.f32.xlu0 %v2178_v11 }
 0x59d   : > { %1892 = vrot.lane.b32.xlu1 %v5250_v50, %s4598_s22  ;;  %s5580_s22 = sld [smem:[#allocation55_spill]] (!%p3541_p2) }
 0x5a1   : > { %2188 = vrot.lane.b32.xlu1 %v5250_v50, %s4599_s4  ;;  %s5581_s4 = sld [smem:[#allocation57_spill]] (!%p3541_p2) }
 0x5ad   : > { %2061 = vrot.lane.b32.xlu0 %v5250_v50, %s4597_s7  ;;  %s5579_s7 = sld [smem:[#allocation56_spill]] (!%p3541_p2) }
 0x5c8   : > { %v2296_v56 = vpop.f32.mrb[20].mxu0 }
 0x5c9   : > { %v3708_v57 = vpop.f32.mrb[21].mxu0  ;;  %v2297_v61 = vadd.f32 %v3519_v60, %v2296_v56 }
 0x610   : > { %v1880_v14 = vpop.xlane.xlu1 %1879 }
 0x611   : > { %v1884_v16 = vmax.f32 %v1880_v14, 1e-30 }
 0x612   : > { %v1883_v17 = vpop.xlane.xlu0 %1882 }
 0x613   : > { %3972 = vrcp.f32 %v1884_v16  ;;  %v1885_v18 = vmax.f32 %v1883_v17, 1e-30 }
 0x614   : > { %v1799_v22 = vpop.xlane.xlu1 %1798 }
 0x615   : > { %3974 = vrcp.f32 %v1885_v18  ;;  %v1803_v26 = vmax.f32 %v1799_v22, 1e-30 }
 0x618   : > { %v1802_v23 = vpop.xlane.xlu0 %1801 }
 0x619   : > { %v2050_v24 = vpop.xlane.xlu1 %2049  ;;  %v1804_v25 = vmax.f32 %v1802_v23, 1e-30 }
 0x61a   : > { %v2054_v36 = vmax.f32 %v2050_v24, 1e-30 }
 0x61b   : > { %3976 = vrcp.f32 %v1804_v25 }
 0x61c   : > { %v2053_v29 = vpop.xlane.xlu0 %2052  ;;  %3978 = vrcp.f32 %v1803_v26 }
 0x61d   : > { %v3973_v27 = vpop.eup %3972  ;;  %v1893_v28 = vpop.permute.xlu1 %1892  ;;  %v2055_v34 = vmax.f32 %v2053_v29, 1e-30 }
 0x61e   : > { %3667 = vmatpush3.bf16.msra.mxu1 %v1893_v28  ;;  %v1888_v30 = vmul.f32 %v3973_v27, %v5275_v47 }
 0x61f   : > { %v3975_v21 = vpop.eup %3974  ;;  %3672 = vmatprep.subr.bf16.mxu1 %v4595_v15  ;;  %3980 = vrcp.f32 %v2055_v34 }
 0x620   : > { %v1889_v31 = vmul.f32 %v3975_v21, %v5279_v53  ;;  %v2177_v33 = vpop.xlane.xlu0 %2176  ;;  %3982 = vrcp.f32 %v2054_v36 }
 0x621   : > { %v2181_v44 = vmax.f32 %v2177_v33, 1e-30  ;;  %v2189_v49 = vpop.permute.xlu1 %2188 }
 0x622   : > { %v1890_v32 = vpack.c.bf16 %v1889_v31, %v1888_v30 }
 0x624   : > { %3669 = vmatmul.mubr.msk.bf16.vlgmr.msra.gmra.mrb[8].mxu1 %vm1780_vm6, %v1890_v32  ;;  %v2180_v39 = vpop.xlane.xlu0 %2179 }
 0x625   : > { %3673 = vmatpush3.bf16.msra.mxu1 %v5250_v50  ;;  %3674 = vmatprep.mubr.msk.bf16.mxu1 %vm4596_vm4, %v4595_v15  ;;  %v3977_v35 = vpop.eup %3976  ;;  %v2182_v43 = vmax.f32 %v2180_v39, 1e-30 }
 0x626   : > { %3684 = vmatprep.subr.bf16.mxu1 %v4595_v15  ;;  %v3979_v37 = vpop.eup %3978  ;;  %v1808_v38 = vmul.f32 %v3977_v35, %v1796_v63  ;;  %v3523_v63 = vld [vmem:[%s5566_s25] ss:$0 sm:$0xff] }
 0x627   : > { %v1807_v40 = vmul.f32 %v3979_v37, %v5283_v58  ;;  %3984 = vrcp.f32 %v2182_v43  ;;  %v2299_v58 = vpop.f32.mrb[22].mxu0 }
 0x628   : > { %v2062_v42 = vpop.permute.xlu0 %2061  ;;  %3986 = vrcp.f32 %v2181_v44  ;;  %v3709_v59 = vpop.f32.mrb[23].mxu0  ;;  %v2300_v8 = vadd.f32 %v3519_v60, %v2299_v58 }
 0x629   : > { %v1809_v41 = vpack.c.bf16 %v1808_v38, %v1807_v40  ;;  %v3981_v50 = vpop.eup %3980 }
 0x62a   : > { %v3983_v45 = vpop.eup %3982  ;;  %v2059_v46 = vmul.f32 %v3981_v50, %v5292_v4 }
 0x62b   : > { %v2058_v47 = vmul.f32 %v3983_v45, %v5287_v0  ;;  %v3524_v0 = vld [vmem:[%s5567_s28] ss:$0 sm:$0xff] }
 0x62c   : > { %v2326_v13 = vmul.f32 %v3524_v0, %v2300_v8 }
 0x62d   : > { %v2060_v48 = vpack.c.bf16 %v2059_v46, %v2058_v47 }
 0x62e   : > { %v2330_v14 = vsel %vm1556_vm5, %v2326_v13, 0.0 }
 0x630   : > { %3675 = vmatmul.mubr.msk.bf16.vlgmr.msra.gmra.mrb[8].mxu1 %vm1780_vm6, %v1809_v41 }
 0x631   : > { %3685 = vmatpush3.bf16.msra.mxu1 %v2062_v42  ;;  %3686 = vmatprep.mubr.msk.bf16.mxu1 %vm4596_vm4, %v4595_v15  ;;  %v3985_v51 = vpop.eup %3984 }
 0x632   : > { %3696 = vmatprep.subr.bf16.mxu1 %v4595_v15  ;;  %v3987_v52 = vpop.eup %3986  ;;  %v2186_v53 = vmul.f32 %v3985_v51, %v5300_v10 }
 0x633   : > { %v2185_v54 = vmul.f32 %v3987_v52, %v5296_v7  ;;  %v2325_v7 = vmul.f32 %v3524_v0, %v2297_v61 }
 0x635   : > { %v2187_v55 = vpack.c.bf16 %v2186_v53, %v2185_v54  ;;  %v2327_v12 = vsel %vm1556_vm5, %v2325_v7, 0.0 }
 0x63c   : > { %3687 = vmatmul.mubr.msk.bf16.vlgmr.msra.gmra.mrb[8].mxu1 %vm1780_vm6, %v2060_v48 }
 0x63d   : > { %3697 = vmatpush3.bf16.msra.mxu1 %v2189_v49  ;;  %3698 = vmatprep.mubr.msk.bf16.mxu1 %vm4596_vm4, %v4595_v15 }
 0x63e   : > { %3718 = vmatprep.subr.bf16.mxu1 %v4595_v15 }
 0x648   : > { %3699 = vmatmul.mubr.msk.bf16.vlgmr.msra.gmra.mrb[8].mxu1 %vm1780_vm6, %v2187_v55 }
 0x649   : > { %3726 = vmatprep.mubr.msk.bf16.mxu1 %vm4596_vm4, %v4595_v15 }
 0x71b   : > { %v2228_v62 = vpop.f32.mrb[8].mxu1 }
 0x71c   : > { %v2237_v1 = vmul.f32 0.25, %v2228_v62  ;;  %v3700_v2 = vpop.f32.mrb[9].mxu1 }
 0x71d   : > { %v2231_v3 = vpop.f32.mrb[10].mxu1 }
 0x71e   : > { %v2238_v4 = vmul.f32 0.25, %v2231_v3  ;;  %v3701_v5 = vpop.f32.mrb[11].mxu1  ;;  %v2310_v6 = vmul.f32 %v3523_v63, %v2237_v1 }
 0x720   : > { %v2312_v9 = vsel %vm1556_vm5, %v2310_v6, 0.0  ;;  %v2311_v10 = vmul.f32 %v3523_v63, %v2238_v4 }
 0x721   : > { %2313 = vadd.xlane.f32.xlu1 %v2312_v9 }
 0x722   : > { %v2315_v11 = vsel %vm1556_vm5, %v2311_v10, 0.0 }
 0x723   : > { %2316 = vadd.xlane.f32.xlu0 %v2315_v11 }
 0x725   : > { %2328 = vadd.xlane.f32.xlu1 %v2327_v12 }
 0x729   : > { %2331 = vadd.xlane.f32.xlu1 %v2330_v14 }
 0x7ae   : > { %v2314_v16 = vpop.xlane.xlu1 %2313 }
 0x7b0   : > { %v2317_v23 = vpop.xlane.xlu0 %2316 }
 0x7b2   : > { %v2329_v17 = vpop.xlane.xlu1 %2328 }
 0x7b3   : > { %v2333_v18 = vadd.f32 %v2329_v17, %v2314_v16 }
 0x7b5   : > { %v3525_v22 = vmul.f32 -1.442695, %v2333_v18 }
 0x7b6   : > { %v2332_v24 = vpop.xlane.xlu1 %2331 }
 0x7b7   : > { %3988 = vpow2.f32 %v3525_v22  ;;  %v2334_v25 = vadd.f32 %v2332_v24, %v2317_v23 }
 0x7b9   : > { %v3526_v26 = vmul.f32 -1.442695, %v2334_v25 }
 0x7bb   : > { %3990 = vpow2.f32 %v3526_v26 }
 0x7c1   : > { %v3989_v27 = vpop.eup %3988 }
 0x7c2   : > { %v2341_v28 = vadd.f32 1.0, %v3989_v27 }
 0x7c4   : > { %3992 = vrcp.f32 %v2341_v28 }
 0x7c5   : > { %v3991_v29 = vpop.eup %3990 }
 0x7c6   : > { %v2342_v21 = vadd.f32 1.0, %v3991_v29 }
 0x7c8   : > { %3994 = vrcp.f32 %v2342_v21 }
 0x7ce   : > { %v3993_v30 = vpop.eup %3992 }
 0x7cf   : > { %v2349_v31 = vsub.f32 1.0, %v3993_v30  ;;  %v2347_v32 = vmul.f32 %v3993_v30, %v2297_v61 }
 0x7d1   : > { %v2351_v33 = vmul.f32 %v2349_v31, %v2237_v1 }
 0x7d2   : > { %v3995_v34 = vpop.eup %3994 }
 0x7d3   : > { %v2353_v35 = vadd.f32 %v2351_v33, %v2347_v32  ;;  %v2350_v36 = vsub.f32 1.0, %v3995_v34  ;;  %v2348_v38 = vmul.f32 %v3995_v34, %v2300_v8 }
 0x7d5   : > { %v2357_v37 = vmul.f32 0.70710677, %v2353_v35  ;;  %v2352_v39 = vmul.f32 %v2350_v36, %v2238_v4  ;;  %v2355_v22 = vmul.f32 0.5, %v2353_v35 }
 0x7d7   : > { %v2359_v40 = vand.u32 2147483647, %v2357_v37  ;;  %v2354_v41 = vadd.f32 %v2352_v39, %v2348_v38  ;;  %vm2399_vm7 = vcmp.ge.f32.partialorder %v2357_v37, 0.0 }
 0x7d9   : > { %v2361_v42 = vmul.f32 0.3275911, %v2359_v40  ;;  %v2358_v43 = vmul.f32 0.70710677, %v2354_v41  ;;  %v2387_v47 = vsub.f32 0.0, %v2359_v40  ;;  %v2356_v28 = vmul.f32 0.5, %v2354_v41 }
 0x7db   : > { %v2363_v50 = vadd.f32 1.0, %v2361_v42  ;;  %v2360_v44 = vand.u32 2147483647, %v2358_v43  ;;  %v2389_v49 = vmul.f32 %v2387_v47, %v2359_v40  ;;  %vm2400_vm8 = vcmp.ge.f32.partialorder %v2358_v43, 0.0  ;;  %v3951_v42 = vld [vmem:[%s5184_s15 + $0x8] sm:$0xff]  }
 0x7dd   : > { %3996 = vrcp.f32 %v2363_v50  ;;  %v2362_v45 = vmul.f32 0.3275911, %v2360_v44  ;;  %v2388_v51 = vsub.f32 0.0, %v2360_v44  ;;  %v2391_v55 = vmul.f32 1.442695, %v2389_v49 }
 0x7df   : > { %v2364_v46 = vadd.f32 1.0, %v2362_v45  ;;  %v2390_v56 = vmul.f32 %v2388_v51, %v2360_v44  ;;  %v3527_v51 = vld [vmem:[%s5568_s2] ss:$0 sm:$0xff] }
 0x7e1   : > { %3998 = vrcp.f32 %v2364_v46  ;;  %v2393_v61 = vmul.f32 1.442695, %v2390_v56 }
 0x7e2   : > { %4000 = vpow2.f32 %v2391_v55 }
 0x7e3   : > { %4002 = vpow2.f32 %v2393_v61  ;;  %v3953_v61 = vld [vmem:[%s5187_s14 + $0x8] sm:$0xff]  }
 0x7e7   : > { %v3997_v48 = vpop.eup %3996 }
 0x7e8   : > { %v2369_v52 = vmul.f32 1.0614054, %v3997_v48 }
 0x7ea   : > { %v2371_v53 = vadd.f32 -1.4531521, %v2369_v52 }
 0x7eb   : > { %v3999_v54 = vpop.eup %3998 }
 0x7ec   : > { %v2373_v57 = vmul.f32 %v3997_v48, %v2371_v53  ;;  %v2370_v58 = vmul.f32 1.0614054, %v3999_v54  ;;  %v4001_v8 = vpop.eup %4000 }
 0x7ed   : > { %v4003_v13 = vpop.eup %4002 }
 0x7ee   : > { %v2375_v59 = vadd.f32 1.4214138, %v2373_v57  ;;  %v2372_v60 = vadd.f32 -1.4531521, %v2370_v58 }
 0x7f0   : > { %v2377_v62 = vmul.f32 %v3997_v48, %v2375_v59  ;;  %v2374_v63 = vmul.f32 %v3999_v54, %v2372_v60  ;;  %v3952_v60 = vld [vmem:[%s5187_s14] sm:$0xff]  }
 0x7f1   : > { %3719 = vmatpush3.bf16.msra.mxu1 %v3952_v60 }
 0x7f2   : > { %v2379_v0 = vadd.f32 -0.28449672, %v2377_v62  ;;  %v2376_v1 = vadd.f32 1.4214138, %v2374_v63  ;;  %3720 = vmatprep.subr.bf16.mxu1 %v4595_v15  ;;  %v3954_v62 = vld [vmem:[%s5187_s14 + $0x10] sm:$0xff]   ;;  %v3955_v63 = vld [vmem:[%s5187_s14 + $0x18] sm:$0xff]  }
 0x7f3   : > { %s5571_s14 = scalar_lea.vmem [#allocation24], %s5127_s10 }
 0x7f4   : > { %v2381_v2 = vmul.f32 %v3997_v48, %v2379_v0  ;;  %v2378_v3 = vmul.f32 %v3999_v54, %v2376_v1  ;;  %v3529_v0 = vld [vmem:[%s5570_s23] ss:$0 sm:$0xff] }
 0x7f5   : > { %3721 = vmatpush3.bf16.msra.mxu1 %v3953_v61  ;;  %v3533_v60 = vld [vmem:[%s5571_s14] ss:$0 sm:$0xff] }
 0x7f6   : > { %v2383_v4 = vadd.f32 0.2548296, %v2381_v2  ;;  %v2380_v5 = vadd.f32 -0.28449672, %v2378_v3  ;;  %3722 = vmatprep.subr.bf16.mxu1 %v4595_v15 }
 0x7f8   : > { %v2385_v6 = vmul.f32 %v3997_v48, %v2383_v4  ;;  %v2382_v7 = vmul.f32 %v3999_v54, %v2380_v5 }
 0x7f9   : > { %3723 = vmatpush3.bf16.msra.mxu1 %v3954_v62 }
 0x7fa   : > { %v2395_v9 = vmul.f32 %v4001_v8, %v2385_v6  ;;  %v2384_v10 = vadd.f32 0.2548296, %v2382_v7  ;;  %3724 = vmatprep.subr.bf16.mxu1 %v4595_v15 }
 0x7fc   : > { %v2397_v11 = vsub.f32 1.0, %v2395_v9  ;;  %v2386_v12 = vmul.f32 %v3999_v54, %v2384_v10 }
 0x7fd   : > { %3725 = vmatpush3.bf16.msra.mxu1 %v3955_v63 }
 0x7fe   : > { %v2401_v14 = vsub.f32 0.0, %v2397_v11  ;;  %v2396_v16 = vmul.f32 %v4003_v13, %v2386_v12 }
 0x800   : > { %v2403_v17 = vsel %vm2399_vm7, %v2397_v11, %v2401_v14  ;;  %v2398_v18 = vsub.f32 1.0, %v2396_v16 }
 0x801   : > { %v2405_v23 = vadd.f32 1.0, %v2403_v17 }
 0x802   : > { %v2402_v24 = vsub.f32 0.0, %v2398_v18 }
 0x803   : > { %v2407_v25 = vmul.f32 %v2405_v23, %v2355_v22 }
 0x804   : > { %v2404_v26 = vsel %vm2400_vm8, %v2398_v18, %v2402_v24 }
 0x805   : > { %v2409_v27 = vadd.f32 %v2407_v25, %v5205_v19  ;;  %v2406_v29 = vadd.f32 1.0, %v2404_v26 }
 0x807   : > { %v2413_v21 = vsel %vm1556_vm5, %v2409_v27, 0.0  ;;  %v2408_v30 = vmul.f32 %v2406_v29, %v2356_v28 }
 0x808   : > { %2414 = vadd.xlane.f32.xlu0 %v2413_v21 }
 0x809   : > { %v2410_v31 = vadd.f32 %v2408_v30, %v5207_v20  ;;  %v3950_v20 = vld [vmem:[%s5184_s15] sm:$0xff]   ;;  %s5569_s15 = scalar_lea.vmem [#allocation21], %s5127_s10  ;;  %s5575_s10 = sld [smem:[#allocation52_spill]] (!%p3541_p2) }
 0x80a   : > { %3711 = vmatpush3.bf16.msra.mxu0 %v3950_v20  ;;  %v3528_v55 = vld [vmem:[%s5569_s15] ss:$0 sm:$0xff] }
 0x80b   : > { %v2416_v32 = vsel %vm1556_vm5, %v2410_v31, 0.0  ;;  %3712 = vmatprep.subr.bf16.mxu0 %v4595_v15 }
 0x80c   : > { %2417 = vadd.xlane.f32.xlu1 %v2416_v32 }
 0x80e   : > { %3713 = vmatpush3.bf16.msra.mxu0 %v3951_v42 }
 0x895   : > { %v2415_v33 = vpop.xlane.xlu0 %2414 }
 0x896   : > { %v2420_v34 = vmul.f32 0.03125, %v2415_v33 }
 0x898   : > { %v2422_v35 = vsub.f32 %v2409_v27, %v2420_v34 }
 0x899   : > { %v2418_v36 = vpop.xlane.xlu1 %2417 }
 0x89a   : > { %v2421_v37 = vmul.f32 0.03125, %v2418_v36  ;;  %v2424_v38 = vmul.f32 %v2422_v35, %v2422_v35 }
 0x89c   : > { %v2423_v19 = vsub.f32 %v2410_v31, %v2421_v37  ;;  %v2426_v39 = vsel %vm1556_vm5, %v2424_v38, 0.0 }
 0x89d   : > { %2427 = vadd.xlane.f32.xlu0 %v2426_v39 }
 0x89e   : > { %v2425_v40 = vmul.f32 %v2423_v19, %v2423_v19 }
 0x8a0   : > { %v2429_v41 = vsel %vm1556_vm5, %v2425_v40, 0.0 }
 0x8a1   : > { %2430 = vadd.xlane.f32.xlu1 %v2429_v41 }
 0x92a   : > { %v2428_v43 = vpop.xlane.xlu0 %2427 }
 0x92b   : > { %v2432_v50 = vmul.f32 0.03125, %v2428_v43 }
 0x92d   : > { %v2434_v44 = vadd.f32 1e-05, %v2432_v50 }
 0x92e   : > { %v2431_v45 = vpop.xlane.xlu1 %2430 }
 0x92f   : > { %4004 = vrsqrt.f32 %v2434_v44  ;;  %v2433_v46 = vmul.f32 0.03125, %v2431_v45 }
 0x931   : > { %v2435_v47 = vadd.f32 1e-05, %v2433_v46 }
 0x933   : > { %4006 = vrsqrt.f32 %v2435_v47 }
 0x939   : > { %v4005_v48 = vpop.eup %4004 }
 0x93a   : > { %v2438_v49 = vmul.f32 %v4005_v48, %v2422_v35 }
 0x93c   : > { %v2446_v53 = vmul.f32 %v3527_v51, %v2438_v49 }
 0x93d   : > { %v4007_v52 = vpop.eup %4006 }
 0x93e   : > { %v2439_v54 = vmul.f32 %v4007_v52, %v2423_v19  ;;  %v5365_v57 = vadd.f32 %v3528_v55, %v2446_v53 }
 0x940   : > { %v2447_v56 = vmul.f32 %v3527_v51, %v2439_v54 }
 0x942   : > { %v5367_v58 = vadd.f32 %v3528_v55, %v2447_v56 }
 0x944   : > { %v2456_v59 = vpack.c.bf16 %v5367_v58, %v5365_v57 }
 0x946   : > { %3715 = vmatmul.mubr.msk.bf16.vlgmr.msra.gmra.mrb[24].mxu0 %vm1556_vm5, %v2456_v59 }
 0xa19   : > { %v2517_v1 = vpop.f32.mrb[24].mxu0 }
 0xa1a   : > { %v2518_v2 = vadd.f32 %v3529_v0, %v2517_v1  ;;  %v3716_v3 = vpop.f32.mrb[25].mxu0 }
 0xa1b   : > { %v2520_v4 = vpop.f32.mrb[26].mxu0 }
 0xa1c   : > { %v2526_v5 = vmul.f32 0.70710677, %v2518_v2  ;;  %v2521_v6 = vadd.f32 %v3529_v0, %v2520_v4  ;;  %v3717_v7 = vpop.f32.mrb[27].mxu0  ;;  %v2524_v52 = vmul.f32 0.5, %v2518_v2 }
 0xa1e   : > { %v2528_v8 = vand.u32 2147483647, %v2526_v5  ;;  %v2527_v9 = vmul.f32 0.70710677, %v2521_v6  ;;  %vm2568_vm9 = vcmp.ge.f32.partialorder %v2526_v5, 0.0  ;;  %v2525_v53 = vmul.f32 0.5, %v2521_v6 }
 0xa20   : > { %v2530_v10 = vmul.f32 0.3275911, %v2528_v8  ;;  %v2529_v11 = vand.u32 2147483647, %v2527_v9  ;;  %v2556_v15 = vsub.f32 0.0, %v2528_v8  ;;  %vm2569_vm10 = vcmp.ge.f32.partialorder %v2527_v9, 0.0 }
 0xa22   : > { %v2532_v12 = vadd.f32 1.0, %v2530_v10  ;;  %v2531_v13 = vmul.f32 0.3275911, %v2529_v11  ;;  %v2557_v16 = vsub.f32 0.0, %v2529_v11  ;;  %v2558_v18 = vmul.f32 %v2556_v15, %v2528_v8 }
 0xa24   : > { %4008 = vrcp.f32 %v2532_v12  ;;  %v2533_v14 = vadd.f32 1.0, %v2531_v13  ;;  %v2559_v25 = vmul.f32 %v2557_v16, %v2529_v11  ;;  %v2560_v26 = vmul.f32 1.442695, %v2558_v18 }
 0xa26   : > { %4010 = vrcp.f32 %v2533_v14  ;;  %v2562_v30 = vmul.f32 1.442695, %v2559_v25  ;;  %v3539_v25 = vld [vmem:[%s5573_s16] ss:$0 sm:$0xff] }
 0xa27   : > { %4012 = vpow2.f32 %v2560_v26 }
 0xa28   : > { %4014 = vpow2.f32 %v2562_v30 }
 0xa2e   : > { %v4009_v17 = vpop.eup %4008 }
 0xa2f   : > { %v2538_v22 = vmul.f32 1.0614054, %v4009_v17 }
 0xa30   : > { %v4011_v23 = vpop.eup %4010 }
 0xa31   : > { %v2540_v24 = vadd.f32 -1.4531521, %v2538_v22  ;;  %v2539_v27 = vmul.f32 1.0614054, %v4011_v23  ;;  %v4013_v40 = vpop.eup %4012 }
 0xa32   : > { %v4015_v43 = vpop.eup %4014 }
 0xa33   : > { %v2542_v28 = vmul.f32 %v4009_v17, %v2540_v24  ;;  %v2541_v29 = vadd.f32 -1.4531521, %v2539_v27 }
 0xa35   : > { %v2544_v21 = vadd.f32 1.4214138, %v2542_v28  ;;  %v2543_v31 = vmul.f32 %v4011_v23, %v2541_v29  ;;  %v3540_v28 = vld [vmem:[%s1459_s3] ss:$0 sm:$0xff]  ;;  %s5576_s3 = sld [smem:[#allocation53_spill]] (!%p3541_p2) }
 0xa37   : > { %v2546_v32 = vmul.f32 %v4009_v17, %v2544_v21  ;;  %v2545_v33 = vadd.f32 1.4214138, %v2543_v31 }
 0xa39   : > { %v2548_v34 = vadd.f32 -0.28449672, %v2546_v32  ;;  %v2547_v35 = vmul.f32 %v4011_v23, %v2545_v33  ;;  %v4022_v33 = vld [vmem:[%s5574_s1] sm:$0xff] (!%p3541_p2)  }
 0xa3b   : > { %v2550_v36 = vmul.f32 %v4009_v17, %v2548_v34  ;;  %v2549_v37 = vadd.f32 -0.28449672, %v2547_v35  ;;  %v4600_v34 = vmov (!%p3541_p2), 0.0  }
 0xa3c   : > { %3730 = vmatprep.subr.bf16.mxu0 (!%p3541_p2), %v4600_v34  ;;  %3738 = vmatprep.subr.bf16.mxu1 (!%p3541_p2), %v4600_v34 }
 0xa3d   : > { %v2552_v38 = vadd.f32 0.2548296, %v2550_v36  ;;  %v2551_v19 = vmul.f32 %v4011_v23, %v2549_v37  ;;  %3731 = vmatpush3.bf16.msra.mxu0 (!%p3541_p2), %v4022_v33  ;;  %v4023_v36 = vld [vmem:[%s5574_s1 + $0x8] sm:$0xff] (!%p3541_p2)   ;;  %3734 = vmatprep.mubr.msk.bf16.mxu0 (!%p3541_p2), %vm4601_vm12, %v4600_v34  ;;  %v3542_v37 = vld [vmem:[%s5575_s10] ss:$0 sm:$0xff] (!%p3541_p2) }
 0xa3e   : > { %3732 = vmatprep.subr.bf16.mxu0 (!%p3541_p2), %v4600_v34  ;;  %v4025_v33 = vld [vmem:[%s5578_s29 + $0x8] sm:$0xff] (!%p3541_p2)  }
 0xa3f   : > { %v2554_v39 = vmul.f32 %v4009_v17, %v2552_v38  ;;  %v2553_v41 = vadd.f32 0.2548296, %v2551_v19 }
 0xa41   : > { %v2564_v20 = vmul.f32 %v4013_v40, %v2554_v39  ;;  %v2555_v42 = vmul.f32 %v4011_v23, %v2553_v41  ;;  %3733 = vmatpush3.bf16.msra.mxu0 (!%p3541_p2), %v4023_v36  ;;  %v3546_v41 = vld [vmem:[%s5576_s3] ss:$0 sm:$0xff] (!%p3541_p2) }
 0xa42   : > { %3752 = vmatprep.subr.bf16.mxu0 (!%p3541_p2), %v4600_v34 }
 0xa43   : > { %v2566_v50 = vsub.f32 1.0, %v2564_v20  ;;  %v2565_v44 = vmul.f32 %v4015_v43, %v2555_v42 }
 0xa45   : > { %v2570_v45 = vsub.f32 0.0, %v2566_v50  ;;  %v2567_v46 = vsub.f32 1.0, %v2565_v44 }
 0xa47   : > { %v2572_v47 = vsel %vm2568_vm9, %v2566_v50, %v2570_v45  ;;  %v2571_v48 = vsub.f32 0.0, %v2567_v46 }
 0xa48   : > { %v2574_v49 = vadd.f32 1.0, %v2572_v47 }
 0xa49   : > { %v2573_v51 = vsel %vm2569_vm10, %v2567_v46, %v2571_v48  ;;  %v4602_v48 = vmov (!%p3541_p2), 0  }
 0xa4a   : > { %v2575_v54 = vadd.f32 1.0, %v2573_v51  ;;  %v2576_v55 = vmul.f32 %v2574_v49, %v2524_v52  ;;  %4020 = vset.pattern.permute.xlu1 (!%p3541_p2), %v4602_v48  ;;  %v3547_v49 = vld [vmem:[#allocation3] ss:$0 sm:$0xff] (!%p3541_p2) }
 0xa4c   : > { %v2577_v56 = vmul.f32 %v2575_v54, %v2525_v53 }
 0xa4e   : > { %v2578_v59 = vpack.c.bf16 %v2577_v56, %v2576_v55  ;;  %v3572_v55 = vld [vmem:[%s5577_s6] sm:$0xff] (!%p3541_p2)  }
 0xa4f   : > { %v3573_v56 = vunpack.c.l.bf16 (!%p3541_p2), %v3572_v55 }
 0xa50   : > { %3727 = vmatmul.mubr.msk.bf16.vlgmr.msra.gmra.mrb[12].mxu1 %vm2618_vm11, %v2578_v59  ;;  %v3574_v59 = vunpack.c.h.bf16 (!%p3541_p2), %v3572_v55 }
 0xa51   : > { %3740 = vmatprep.mubr.msk.bf16.mxu1 (!%p3541_p2), %vm4601_vm12, %v4600_v34  ;;  %vm2813_vm13 = vcmp.gt.f32.partialorder (!%p3541_p2), %v3573_v56, 0.0 }
 0xa52   : > { %vm2814_vm14 = vcmp.gt.f32.partialorder (!%p3541_p2), %v3574_v59, 0.0 }
 0xb23   : > { %v2656_v61 = vpop.f32.mrb[12].mxu1 }
 0xb24   : > { %v2657_v62 = vadd.f32 %v3533_v60, %v2656_v61  ;;  %v3728_v63 = vpop.f32.mrb[13].mxu1 }
 0xb25   : > { %v2659_v0 = vpop.f32.mrb[14].mxu1 }
 0xb26   : > { %v2660_v1 = vadd.f32 %v3533_v60, %v2659_v0  ;;  %v3729_v3 = vpop.f32.mrb[15].mxu1  ;;  %v2663_v4 = vadd.f32 %v2657_v62, %v5365_v57 }
 0xb28   : > { %v2667_v5 = vsel %vm1556_vm5, %v2663_v4, 0.0  ;;  %v2664_v2 = vadd.f32 %v2660_v1, %v5367_v58 }
 0xb29   : > { %2668 = vadd.xlane.f32.xlu0 %v2667_v5 }
 0xb2a   : > { %v2670_v6 = vsel %vm1556_vm5, %v2664_v2, 0.0 }
 0xb2b   : > { %2671 = vadd.xlane.f32.xlu1 %v2670_v6 }
 0xbb6   : > { %v2669_v7 = vpop.xlane.xlu0 %2668 }
 0xbb7   : > { %v2673_v8 = vmul.f32 0.03125, %v2669_v7 }
 0xbb8   : > { %v2672_v9 = vpop.xlane.xlu1 %2671 }
 0xbb9   : > { %v2675_v10 = vsub.f32 %v2663_v4, %v2673_v8  ;;  %v2674_v11 = vmul.f32 0.03125, %v2672_v9 }
 0xbbb   : > { %v2676_v12 = vsub.f32 %v2664_v2, %v2674_v11  ;;  %v2677_v13 = vmul.f32 %v2675_v10, %v2675_v10 }
 0xbbd   : > { %v2679_v14 = vsel %vm1556_vm5, %v2677_v13, 0.0  ;;  %v2678_v15 = vmul.f32 %v2676_v12, %v2676_v12 }
 0xbbe   : > { %2680 = vadd.xlane.f32.xlu0 %v2679_v14 }
 0xbbf   : > { %v2682_v57 = vsel %vm1556_vm5, %v2678_v15, 0.0 }
 0xbc0   : > { %2683 = vadd.xlane.f32.xlu1 %v2682_v57 }
 0xc4b   : > { %v2681_v58 = vpop.xlane.xlu0 %2680 }
 0xc4c   : > { %v2685_v16 = vmul.f32 0.03125, %v2681_v58 }
 0xc4d   : > { %v2684_v17 = vpop.xlane.xlu1 %2683 }
 0xc4e   : > { %v2687_v18 = vadd.f32 1e-05, %v2685_v16  ;;  %v2686_v22 = vmul.f32 0.03125, %v2684_v17 }
 0xc50   : > { %4016 = vrsqrt.f32 %v2687_v18  ;;  %v2688_v23 = vadd.f32 1e-05, %v2686_v22 }
 0xc52   : > { %4018 = vrsqrt.f32 %v2688_v23 }
 0xc5a   : > { %v4017_v24 = vpop.eup %4016 }
 0xc5b   : > { %v2691_v26 = vmul.f32 %v4017_v24, %v2675_v10 }
 0xc5c   : > { %v4019_v27 = vpop.eup %4018 }
 0xc5d   : > { %v2699_v29 = vmul.f32 %v3539_v25, %v2691_v26  ;;  %v2692_v21 = vmul.f32 %v4019_v27, %v2676_v12  ;;  %2714 = sbr.rel (%p3541_p2) target bundleno = 4530 (0x11b2), region = 208 }
 0xc5f   : > { %v2707_v30 = vadd.f32 %v3540_v28, %v2699_v29  ;;  %v2700_v31 = vmul.f32 %v3539_v25, %v2692_v21 }
 0xc61   : > { %2709 = vst.msk [vmem:[#allocation2] sm:$0xff] %vm1556_vm5, %v2707_v30  ;;  %v2708_v32 = vadd.f32 %v3540_v28, %v2700_v31  ;;  %v4024_v31 = vld [vmem:[%s5578_s29] sm:$0xff] (!%p3541_p2)  }
 0xc63   : > { %2710 = vst.msk [vmem:[#allocation2 + $0x8] sm:$0xff] %vm1556_vm5, %v2708_v32  ;;  %v2715_v35 = vpack.c.bf16 (!%p3541_p2), %v2708_v32, %v2707_v30 }
 0xc65   : > { %3739 = vmatpush3.bf16.msra.mxu1 %v2715_v35  ;;  %3735 = vmatmul.mubr.msk.bf16.vlgmr.msra.gmra.mrb[0].mxu0 %vm1556_vm5, %v2715_v35 }
 0xc66   : > { %3744 = vmatprep.subr.bf16.mxu1 %v4600_v34  ;;  %3756 = vmatprep.mubr.msk.bf16.mxu0 %vm4601_vm12, %v4600_v34 }
 0xd38   : > { %v2776_v38 = vpop.f32.mrb[0].mxu0 }
 0xd39   : > { %v2777_v19 = vadd.f32 %v3542_v37, %v2776_v38  ;;  %v3736_v39 = vpop.f32.mrb[1].mxu0 }
 0xd3a   : > { %v2779_v40 = vpop.f32.mrb[2].mxu0  ;;  %v4026_v39 = vld [vmem:[%s5579_s7] sm:$0xff]  }
 0xd3b   : > { %v2783_v20 = vmax.f32 %v2777_v19, 0.0  ;;  %v2780_v42 = vadd.f32 %v3542_v37, %v2779_v40  ;;  %v3737_v43 = vpop.f32.mrb[3].mxu0  ;;  %3753 = vmatpush3.bf16.msra.mxu0 %v4026_v39  ;;  %v4027_v40 = vld [vmem:[%s5579_s7 + $0x8] sm:$0xff]  }
 0xd3c   : > { %3754 = vmatprep.subr.bf16.mxu0 %v4600_v34 }
 0xd3d   : > { %v2784_v50 = vmax.f32 %v2780_v42, 0.0  ;;  %v2792_v44 = vmul.f32 %v3546_v41, %v2783_v20 }
 0xd3f   : > { %v2794_v45 = vsel %vm1556_vm5, %v2792_v44, 0.0  ;;  %v2793_v46 = vmul.f32 %v3546_v41, %v2784_v50  ;;  %3755 = vmatpush3.bf16.msra.mxu0 %v4027_v40  ;;  %v3549_v41 = vld [vmem:[%s5580_s22] ss:$0 sm:$0xff] }
 0xd40   : > { %2795 = vadd.xlane.f32.xlu0 %v2794_v45 }
 0xd41   : > { %v2797_v47 = vsel %vm1556_vm5, %v2793_v46, 0.0 }
 0xd44   : > { %2798 = vadd.xlane.f32.xlu0 %v2797_v47 }
 0xdcd   : > { %v2796_v51 = vpop.xlane.xlu0 %2795 }
 0xdce   : > { %v2807_v52 = vadd.f32 %v3547_v49, %v2796_v51 }
 0xdd0   : > { %2817 = vperm.xlu1 %4020, %v2807_v52  }
 0xdd1   : > { %v2799_v53 = vpop.xlane.xlu0 %2798 }
 0xdd2   : > { %v2808_v54 = vadd.f32 %v3547_v49, %v2799_v53 }
 0xdd4   : > { %2822 = vperm.xlu1 %4020, %v2808_v54  }
 0xe4f   : > { %v2818_v60 = vpop.permute.xlu1 %2817 }
 0xe50   : > { %v2825_v61 = vsel %vm2813_vm13, %v2818_v60, -1e+30 }
 0xe51   : > { %v2828_v0 = vsel %vm2827_vm15, %v2825_v61, -inf }
 0xe53   : > { %v2823_v62 = vpop.permute.xlu1 %2822 }
 0xe54   : > { %v2826_v63 = vsel %vm2814_vm14, %v2823_v62, -1e+30 }
 0xe55   : > { %v2829_v1 = vsel %vm2827_vm15, %v2826_v63, -inf }
 0xe56   : > { %v2830_v3 = vmax.f32 %v2828_v0, %v2829_v1 }
 0xe58   : > { %v2831_v4 = vrot.slane %v2830_v3, 4 }
 0xe5a   : > { %v2832_v5 = vmax.f32 %v2830_v3, %v2831_v4 }
 0xe5c   : > { %v2833_v2 = vrot.slane %v2832_v5, 2 }
 0xe5e   : > { %v2834_v6 = vmax.f32 %v2832_v5, %v2833_v2 }
 0xe60   : > { %v2835_v7 = vrot.slane %v2834_v6, 1 }
 0xe62   : > { %v2836_v8 = vmax.f32 %v2834_v6, %v2835_v7 }
 0xe64   : > { %v2837_v9 = vsub.f32 %v2825_v61, %v2836_v8  ;;  %v2838_v10 = vsub.f32 %v2826_v63, %v2836_v8 }
 0xe66   : > { %v2839_v11 = vmul.f32 1.442695, %v2837_v9  ;;  %v2841_v12 = vmul.f32 1.442695, %v2838_v10  ;;  %v3553_v9 = vld [vmem:[%s5581_s4] ss:$0 sm:$0xff] }
 0xe68   : > { %4028 = vpow2.f32 %v2839_v11 }
 0xe69   : > { %4030 = vpow2.f32 %v2841_v12 }
 0xe72   : > { %v4029_v13 = vpop.eup %4028 }
 0xe73   : > { %v4031_v14 = vpop.eup %4030  ;;  %v2843_v15 = vmul.f32 %v4029_v13, %v3573_v56 }
 0xe74   : > { %v2844_v57 = vmul.f32 %v4031_v14, %v3574_v59 }
 0xe75   : > { %v2845_v58 = vsel %vm2827_vm15, %v2843_v15, 0.0 }
 0xe76   : > { %v2846_v16 = vsel %vm2827_vm15, %v2844_v57, 0.0 }
 0xe77   : > { %v2847_v17 = vadd.f32 %v2846_v16, %v2845_v58 }
 0xe79   : > { %v2848_v18 = vrot.slane %v2847_v17, 4 }
 0xe7b   : > { %v2849_v22 = vadd.f32 %v2848_v18, %v2847_v17 }
 0xe7d   : > { %v2850_v23 = vrot.slane %v2849_v22, 2 }
 0xe7f   : > { %v2851_v24 = vadd.f32 %v2850_v23, %v2849_v22 }
 0xe81   : > { %v2852_v25 = vrot.slane %v2851_v24, 1 }
 0xe83   : > { %v2853_v26 = vadd.f32 %v2852_v25, %v2851_v24 }
 0xe85   : > { %v2854_v27 = vmax.f32 %v2853_v26, 1e-30 }
 0xe87   : > { %4032 = vrcp.f32 %v2854_v27 }
 0xe91   : > { %v4033_v28 = vpop.eup %4032 }
 0xe92   : > { %v2856_v29 = vmul.f32 %v4033_v28, %v2843_v15  ;;  %v2857_v21 = vmul.f32 %v4033_v28, %v2844_v57 }
 0xe94   : > { %v2858_v30 = vpack.c.bf16 %v2857_v21, %v2856_v29 }
 0xe96   : > { %2859 = vxpose.xlu0.c.b16.start.end [1/1] (short) (narrow) %v2858_v30, 16 }
 0xe9f   : > { %4021 = vset.pattern.permute.xlu0 %v4602_v48 }
 0xefc   : > { %v2867_v32 = vpop.trf.xlu0 }
 0xefd   : > { %3741 = vmatmul.mubr.msk.bf16.vlgmr.msra.gmra.mrb[0].mxu1 %vm1780_vm6, %v2867_v32 }
 0xefe   : > { %3745 = vmatpush3.bf16.msra.mxu1 %v4024_v31  ;;  %3748 = vmatprep.mubr.msk.bf16.mxu1 %vm4601_vm12, %v4600_v34 }
 0xeff   : > { %3746 = vmatprep.subr.bf16.mxu1 %v4600_v34 }
 0xf02   : > { %3747 = vmatpush3.bf16.msra.mxu1 %v4025_v33 }
 0xfd0   : > { %v2912_v35 = vpop.f32.mrb[0].mxu1 }
 0xfd1   : > { %v2918_v36 = vpack.c.bf16 %v2912_v35, %v2912_v35  ;;  %v3742_v37 = vpop.f32.mrb[1].mxu1 }
 0xfd2   : > { %v2915_v38 = vpop.f32.mrb[2].mxu1 }
 0xfd3   : > { %v3743_v19 = vpop.f32.mrb[3].mxu1  ;;  %3749 = vmatmul.mubr.msk.bf16.vlgmr.msra.gmra.mrb[4].mxu1 %vm1556_vm5, %v2918_v36 }
0x10a6   : > { %v2979_v20 = vpop.f32.mrb[4].mxu1 }
0x10a7   : > { %v2980_v42 = vadd.f32 %v3549_v41, %v2979_v20  ;;  %v3750_v43 = vpop.f32.mrb[5].mxu1 }
0x10a8   : > { %v2982_v50 = vpop.f32.mrb[6].mxu1 }
0x10a9   : > { %v2986_v44 = vmul.f32 0.70710677, %v2980_v42  ;;  %v3751_v45 = vpop.f32.mrb[7].mxu1  ;;  %v2985_v2 = vmul.f32 0.5, %v2980_v42 }
0x10ab   : > { %v2987_v46 = vand.u32 2147483647, %v2986_v44  ;;  %vm3007_vm0 = vcmp.ge.f32.partialorder %v2986_v44, 0.0 }
0x10ad   : > { %v2988_v47 = vmul.f32 0.3275911, %v2987_v46  ;;  %v3001_v49 = vsub.f32 0.0, %v2987_v46 }
0x10af   : > { %v2989_v48 = vadd.f32 1.0, %v2988_v47  ;;  %v3002_v52 = vmul.f32 %v3001_v49, %v2987_v46 }
0x10b1   : > { %4034 = vrcp.f32 %v2989_v48  ;;  %v3003_v55 = vmul.f32 1.442695, %v3002_v52 }
0x10b3   : > { %4036 = vpow2.f32 %v3003_v55 }
0x10bb   : > { %v4035_v51 = vpop.eup %4034 }
0x10bc   : > { %v2992_v53 = vmul.f32 1.0614054, %v4035_v51 }
0x10bd   : > { %v4037_v0 = vpop.eup %4036 }
0x10be   : > { %v2993_v54 = vadd.f32 -1.4531521, %v2992_v53 }
0x10c0   : > { %v2994_v34 = vmul.f32 %v4035_v51, %v2993_v54 }
0x10c2   : > { %v2995_v56 = vadd.f32 1.4214138, %v2994_v34 }
0x10c4   : > { %v2996_v59 = vmul.f32 %v4035_v51, %v2995_v56 }
0x10c6   : > { %v2997_v60 = vadd.f32 -0.28449672, %v2996_v59 }
0x10c8   : > { %v2998_v61 = vmul.f32 %v4035_v51, %v2997_v60 }
0x10ca   : > { %v2999_v62 = vadd.f32 0.2548296, %v2998_v61 }
0x10cc   : > { %v3000_v63 = vmul.f32 %v4035_v51, %v2999_v62 }
0x10ce   : > { %v3005_v1 = vmul.f32 %v4037_v0, %v3000_v63 }
0x10d0   : > { %v3006_v3 = vsub.f32 1.0, %v3005_v1 }
0x10d2   : > { %v3008_v4 = vsub.f32 0.0, %v3006_v3 }
0x10d4   : > { %v3009_v5 = vsel %vm3007_vm0, %v3006_v3, %v3008_v4 }
0x10d5   : > { %v3010_v6 = vadd.f32 1.0, %v3009_v5 }
0x10d7   : > { %v3011_v7 = vmul.f32 %v3010_v6, %v2985_v2 }
0x10d9   : > { %v3012_v8 = vpack.c.bf16 %v3011_v7, %v3011_v7 }
0x10db   : > { %3757 = vmatmul.mubr.msk.bf16.vlgmr.msra.gmra.mrb[4].mxu0 %vm1556_vm5, %v3012_v8 }
0x11ae   : > { %v3073_v10 = vpop.f32.mrb[4].mxu0 }
0x11af   : > { %v3074_v11 = vadd.f32 %v3553_v9, %v3073_v10  ;;  %v3758_v12 = vpop.f32.mrb[5].mxu0 }
0x11b0   : > { %v3076_v13 = vpop.f32.mrb[6].mxu0 }
0x11b1   : > { %3080 = vst.msk [vmem:[#allocation27] sm:$0x3] %vm3079_vm1, %v3074_v11  ;;  %v3759_v14 = vpop.f32.mrb[7].mxu0 }
0x11b2 PF: > { %p3861_p0 = scmp.eq.s32.totalorder %s4786_s26, 1  ;;  %s4603_s17 = smov [#allocation27]  }
0x11b3   : > { %s3088_s5 = sshll.u32 %s4603_s17, 4  ;;  %s3089_s5 = int_to_ptr.vmem [resolvable:$true] %s3088_s5 }
0x11b4   : > { %s4452_s25 = scalar_lea.vmem %s3089_s5, 32  ;;  %p4459_p10 = scmp.lt.s32.totalorder %s3089_s5, %s3089_s5 }
0x11b5   : > { %p4453_p8 = scmp.ne.s32.totalorder %s3089_s5, %s4452_s25  ;;  %p4460_p1 = scmp.lt.s32.totalorder %s4452_s25, %s4452_s25 }
0x11b7   : > { %p4454_p9 = pnand %p4453_p8, %p3861_p0  ;;  %p4461_p3 = por %p4460_p1, %p4459_p10 }
0x11b9   : > { %p4455_p7 = pneg %p4454_p9 }
0x11bb   : > { %p4462_p13 = pnand %p4461_p3, %p4455_p7 }
0x11bd   : > { %4465 = shalt.err (!%p4462_p13)
}
0x11be   : > { %s5582_s28 = sld [smem:[#allocation58_spill]] }
0x11c4   : > { %s4466_s2 = scalar_lea.hbm %s5582_s28, 32 }
0x11c5   : > { %p4467_p11 = scmp.ne.s32.totalorder %s5582_s28, %s4466_s2  ;;  %p4472_p6 = scmp.lt.u32.totalorder %s4466_s2, %s5582_s28 }
0x11c7   : > { %p4468_p12 = pnand %p4467_p11, %p3861_p0 }
0x11c9   : > { %p4469_p4 = pneg %p4468_p12 }
0x11cb   : > { %p4474_p5 = pnand %p4472_p6, %p4469_p4 }
0x11cd   : > { %4477 = shalt.err (!%p4474_p5)
}
0x11ce   : > { %3807 = dma.vmem_to_hbm [thread:$0]  (%p3861_p0), %s3089_s5, 32, %s5582_s28, [#allocation6]  }
0x11cf   : > { %4527 = dma.done.wait (%p3861_p0), [#allocation6], 32  }
0x11d0   : > { %4529 = vsyncadd (%p3861_p0), [#allocation6], 4294967264 }
0x11d1 PF: > { %s5583_s22 = sld [smem:[#allocation60_spill]]  ;;  %s5584_s15 = sld [smem:[#allocation59_spill]] }
0x11d2   : > { %s5585_s14 = sld [smem:[#allocation61_spill]]  ;;  %s5586_s23 = smov %s4536_s0 }
0x11d7   : > { %p93_p2 = scmp.ge.s32.totalorder %s5583_s22, 4   ;;  %s5587_s0 = smov %s5584_s15 }
0x11d9   :  { %95 = sbr.rel (!%p93_p2) target bundleno = 74 (0x4a), region = 374 }
0x11e0   :  { %3101 = vsyncpa [#allocation5], 1 }
0x11e1   :  { %3103 = vsyncpa [#allocation5 + $0x1], 1 }
0x11e2   :  { %3104 = vsyncpa [#allocation8], 1 }
0x11e3   :  { %3105 = vsyncpa [#allocation11], 1 }
0x11e4   :  { %3107 = vsyncpa [#allocation11 + $0x1], 1 }
0x11e5   :  { %3108 = vsyncpa [#allocation14], 1 }
0x11e6   :  { %3110 = vsyncpa [#allocation14 + $0x1], 1 }
0x11e7   :  { %3111 = vsyncpa [#allocation17], 1 }
0x11e8   :  { %3113 = vsyncpa [#allocation17 + $0x1], 1 }
0x11e9   :  { %3114 = vsyncpa [#allocation20], 1 }
0x11ea   :  { %3116 = vsyncpa [#allocation20 + $0x1], 1 }
0x11eb   :  { %3117 = vsyncpa [#allocation23], 1 }
0x11ec   :  { %3119 = vsyncpa [#allocation23 + $0x1], 1 }
0x11ed   :  { %3120 = vsyncpa [#allocation26], 1 }
0x11ee   :  { %3122 = vsyncpa [#allocation26 + $0x1], 1 }
0x11ef   :  { %3123 = vsyncpa [#allocation6], 1 }
0x11f0   :  { %3125 = vsyncpa [#allocation6 + $0x1], 1 }

// kernel: tpu_custom_call.1
= control target key start
LH: loop header
LB: loop body
LE: loop exit
PB: predicated region body
PF: predicated region fallthrough
CT: control target
= control target key end

     0   :  { %s4546_s6 = smov 1   ;;  %s4547_s10 = smov 2   ;;  %s5461_s0 = inlined_call_operand.smem [shape: u32[32], index: -1, kind: input, shape index: {}] }
   0x1   :  { %s4612_s5 = sld [smem:[%s5461_s0]]   ;;  %s4548_s14 = smov 3  }
   0x2   :  { %s4617_s9 = sld [smem:[%s5461_s0 + %s4546_s6]]   ;;  %s4549_s18 = smov 4  }
   0x3   :  { %s4622_s13 = sld [smem:[%s5461_s0 + %s4547_s10]]   ;;  %s4550_s22 = smov 5  }
   0x4   :  { %s4627_s17 = sld [smem:[%s5461_s0 + %s4548_s14]]   ;;  %s4551_s26 = smov 6  }
   0x5   :  { %s4632_s21 = sld [smem:[%s5461_s0 + %s4549_s18]]   ;;  %s4552_s30 = smov 7  }
   0x6   :  { %s4637_s25 = sld [smem:[%s5461_s0 + %s4550_s22]]   ;;  %s4553_s4 = smov 8  }
   0x7   :  { %5490 = sst [smem:[#allocation37_spill]] %s4612_s5  ;;  %s4554_s10 = smov 9  }
   0x8   :  { %s4642_s29 = sld [smem:[%s5461_s0 + %s4551_s26]]   ;;  %s4555_s15 = smov 10  }
   0x9   :  { %5491 = sst [smem:[#allocation38_spill]] %s4622_s13  ;;  %s4556_s20 = smov 11  }
   0xa   :  { %5492 = sst [smem:[#allocation39_spill]] %s4627_s17  ;;  %s4557_s26 = smov 12  }
   0xb   :  { %s4647_s3 = sld [smem:[%s5461_s0 + %s4552_s30]]   ;;  %s4558_s1 = smov 13  }
   0xc   :  { %5493 = sst [smem:[#allocation40_spill]] %s4637_s25  ;;  %s4559_s7 = smov 14  }
   0xd   :  { %s4652_s8 = sld [smem:[%s5461_s0 + %s4553_s4]]   ;;  %s4561_s22 = smov 16  }
   0xe   :  { %5494 = sst [smem:[#allocation41_spill]] %s4642_s29  ;;  %s4562_s28 = smov 17  }
   0xf   :  { %s4657_s14 = sld [smem:[%s5461_s0 + %s4554_s10]]   ;;  %s4572_s16 = smov 27  }
  0x10   :  { %s4662_s19 = sld [smem:[%s5461_s0 + %s4555_s15]]   ;;  %s4560_s15 = smov 15  }
  0x11   :  { %5495 = sst [smem:[#allocation42_spill]] %s4647_s3  ;;  %s4573_s23 = smov 28  }
  0x12   :  { %s4667_s24 = sld [smem:[%s5461_s0 + %s4556_s20]]   ;;  %s4575_s10 = smov 30  }
  0x13   :  { %5496 = sst [smem:[#allocation43_spill]] %s4652_s8 }
  0x14   :  { %s4672_s30 = sld [smem:[%s5461_s0 + %s4557_s26]]  }
  0x15   :  { %5497 = sst [smem:[#allocation44_spill]] %s4657_s14 }
  0x16   :  { %s4677_s6 = sld [smem:[%s5461_s0 + %s4558_s1]]   ;;  %s4574_s1 = smov 29  }
  0x17   :  { %s4682_s12 = sld [smem:[%s5461_s0 + %s4559_s7]]   ;;  %s4563_s7 = smov 18  }
  0x18   :  { %5498 = sst [smem:[#allocation45_spill]] %s4667_s24 }
  0x19   :  { %s4687_s20 = sld [smem:[%s5461_s0 + %s4560_s15]]   ;;  %s4564_s15 = smov 19  }
  0x1a   :  { %s4692_s27 = sld [smem:[%s5461_s0 + %s4561_s22]]   ;;  %s4565_s22 = smov 20  }
  0x1b   :  { %s4697_s4 = sld [smem:[%s5461_s0 + %s4562_s28]]   ;;  %s4566_s28 = smov 21  }
  0x1c   :  { %5499 = sst [smem:[#allocation46_spill]] %s4677_s6 }
  0x1d   :  { %s4702_s13 = sld [smem:[%s5461_s0 + %s4563_s7]]   ;;  %s4567_s7 = smov 22  }
  0x1e   :  { %s4707_s5 = sld [smem:[%s5461_s0 + %s4564_s15]]   ;;  %s4568_s15 = smov 23  }
  0x1f   :  { %s4712_s24 = sld [smem:[%s5461_s0 + %s4565_s22]]   ;;  %s4569_s22 = smov 24  }
  0x20   :  { %s4722_s14 = sld [smem:[%s5461_s0 + %s4567_s7]]   ;;  %s4571_s7 = smov 26  }
  0x21   :  { %5500 = sst [smem:[#allocation47_spill]] %s4697_s4 }
  0x22   :  { %s4717_s4 = sld [smem:[%s5461_s0 + %s4566_s28]]   ;;  %s4570_s28 = smov 25  }
  0x23   :  { %s4732_s3 = sld [smem:[%s5461_s0 + %s4569_s22]]  }
  0x24   :  { %5501 = sst [smem:[#allocation48_spill]] %s4707_s5 }
  0x25   :  { %s4727_s5 = sld [smem:[%s5461_s0 + %s4568_s15]]  }
  0x26   :  { %5503 = sst [smem:[#allocation50_spill]] %s4722_s14 }
  0x27   :  { %s4737_s25 = sld [smem:[%s5461_s0 + %s4570_s28]]  }
  0x28   :  { %5502 = sst [smem:[#allocation49_spill]] %s4717_s4 }
  0x29   :  { %5505 = sst [smem:[#allocation52_spill]] %s4732_s3 }
  0x2a   :  { %s3457_s14 = sld [smem:[%s5461_s0 + %s4571_s7]]  }
  0x2b   :  { %5504 = sst [smem:[#allocation51_spill]] %s4727_s5 }
  0x2c   :  { %s4745_s5 = sld [smem:[%s5461_s0 + %s4572_s16]]   ;;  %s4576_s16 = smov 31  }
  0x2d   :  { %5506 = sst [smem:[#allocation53_spill]] %s4737_s25 }
  0x2e   :  { %s4750_s3 = sld [smem:[%s5461_s0 + %s4573_s23]]  }
  0x2f   :  { %s4755_s25 = sld [smem:[%s5461_s0 + %s4574_s1]]  }
  0x30   :  { %s4760_s4 = sld [smem:[%s5461_s0 + %s4575_s10]]   ;;  %v68_v0 = vstv %s3457_s14 }
  0x31   :  { %69 = vst [vmem:[#allocation3] sm:$0x1] %v68_v0 }
  0x32   :  { %5507 = sst [smem:[#allocation54_spill]] %s4745_s5 }
  0x33   :  { %s4765_s5 = sld [smem:[%s5461_s0 + %s4576_s16]]  }
  0x34   :  { %5508 = sst [smem:[#allocation55_spill]] %s4750_s3 }
  0x35   :  { %5509 = sst [smem:[#allocation56_spill]] %s4755_s25 }
  0x36   :  { %5510 = sst [smem:[#allocation57_spill]] %s4760_s4 }
  0x39   :  { %5511 = sst [smem:[#allocation58_spill]] %s4765_s5 }
  0x3a   :  { %70 = vsyncpa [#allocation5], 0 }
  0x3b   :  { %71 = vsyncpa [#allocation8], 0 }
  0x3c   :  { %72 = vsyncpa [#allocation11], 0 }
  0x3d   :  { %74 = vsyncpa [#allocation11 + $0x1], 0 }
  0x3e   :  { %75 = vsyncpa [#allocation14], 0 }
  0x3f   :  { %77 = vsyncpa [#allocation14 + $0x1], 0 }
  0x40   :  { %78 = vsyncpa [#allocation17], 0 }
  0x41   :  { %80 = vsyncpa [#allocation17 + $0x1], 0 }
  0x42   :  { %81 = vsyncpa [#allocation20], 0 }
  0x43   :  { %83 = vsyncpa [#allocation20 + $0x1], 0 }
  0x44   :  { %84 = vsyncpa [#allocation23], 0 }
  0x45   :  { %86 = vsyncpa [#allocation23 + $0x1], 0 }
  0x46   :  { %87 = vsyncpa [#allocation26], 0 }
  0x47   :  { %89 = vsyncpa [#allocation26 + $0x1], 0 }
  0x48   :  { %90 = vsyncpa [#allocation6], 0  ;;  %s4767_s23 = smov 0   ;;  %s4769_s0 = smov 0  }
  0x49   :  { %s4771_s14 = smov 0   ;;  %s4773_s22 = smov 0  }
  0x4a LB: > { %s5512_s8 = sld [smem:[#allocation43_spill]]  ;;  %s5513_s6 = sld [smem:[#allocation46_spill]]  ;;  %s4544_s22 = sphi %s4773_s22, %s5583_s22   ;;  %s4540_s14 = sphi %s4771_s14, %s5585_s14   ;;  %s4536_s0 = sphi %s4769_s0, %s5587_s0   ;;  %s4532_s23 = sphi %s4767_s23, %s5586_s23  }
  0x4b   : > { %s5514_s29 = sld [smem:[#allocation41_spill]]  ;;  %s5515_s17 = sld [smem:[#allocation39_spill]] }
  0x4c   : > { %5516 = sst [smem:[#allocation59_spill]] %s4540_s14  ;;  %s4786_s26 = sadd.s32 4294967295, %s4544_s22  }
  0x4d   : > { %s4789_s1 = sadd.s32 1, %s4544_s22   ;;  %s234_s2 = sadd.s32 1, %s4540_s14 }
  0x4e   : > { %5517 = sst [smem:[#allocation60_spill]] %s4789_s1  ;;  %s231_s28 = ssub.s32 %s4544_s22, %s4789_s1 }
  0x4f   : > { %p232_p0 = scmp.eq.s32.totalorder %s231_s28, 0  ;;  %p241_p1 = scmp.ne.s32.totalorder %s4540_s14, %s4536_s0 }
  0x50   : > { %p242_p2 = scmp.eq.s32.totalorder %s4544_s22, 0  ;;  %p247_p3 = scmp.ne.s32.totalorder %s4536_s0, %s4532_s23 }
  0x51   : > { %s4799_s10 = scalar_select %p232_p0, %s4540_s14, %s234_s2  }
  0x52   : > { %p4801_p4 = por %p242_p2, %p241_p1  ;;  %p5469_p5 = scmp.eq.s32.totalorder %s4786_s26, 0 }
  0x53   : > { %5518 = sst [smem:[#allocation61_spill]] %s4799_s10  ;;  %p3464_p6 = scmp.ge.s32.totalorder %s4544_s22, 1 }
  0x54   : > { %p863_p7 = scmp.lt.s32.totalorder %s4544_s22, 3  ;;  %p4810_p8 = por %p5469_p5, %p247_p3 }
  0x55   : > { %s4577_s15 = smov [#allocation7]   ;;  %p3857_p12 = scmp.lt.s32.totalorder %s4544_s22, 2 }
  0x56   : > { %s5520_s11 = scalar_select %p4810_p8, 1, 0 }
  0x57   : > { %p4815_p10 = pnand %p3464_p6, %p863_p7  ;;  %s895_s18 = sshll.u32 %s4577_s15, 4  ;;  %s896_s18 = int_to_ptr.vmem [resolvable:$true] %s895_s18 }
  0x58   : > { %s4823_s23 = sand.u32 1, %s4540_s14   ;;  %s4832_s2 = sand.u32 1, %s4544_s22  }
  0x59   : > { %s5521_s16 = scalar_select %p4815_p10, 1, 0 }
  0x5a   : > { %p3810_p11 = pneg %p4815_p10  ;;  %p4836_p0 = pnand %p3857_p12, %p4801_p4 }
  0x5b   : > { %s4038_s15 = scalar_lea.hbm %s5515_s17, 32 }
  0x5c   : > { %p4827_p13 = pnand %p3810_p11, %p5469_p5  ;;  %p4039_p1 = scmp.ne.s32.totalorder %s5515_s17, %s4038_s15 }
  0x5d   : > { %s5523_s10 = scalar_select %p4836_p0, 1, 0 }
  0x5e   : > { %s5522_s28 = scalar_select %p4827_p13, 1, 0 }
  0x5f   : > { %p4844_p2 = pneg %p4827_p13  ;;  %p4045_p7 = scmp.lt.u32.totalorder %s4038_s15, %s5515_s17 }
  0x61   : > { %s5524_s1 = scalar_select %p4844_p2, 1, 0 }
  0x62   : > { %p4041_p3 = pnand %p4844_p2, %p4039_p1 }
  0x64   : > { %p4042_p6 = pneg %p4041_p3 }
  0x66   : > { %p4047_p11 = pnand %p4045_p7, %p4042_p6 }
  0x68   : > { %4050 = shalt.err (!%p4047_p11)
}
  0x69   : > { %s4051_s14 = scalar_lea.vmem %s896_s18, 32  ;;  %p4059_p5 = scmp.lt.s32.totalorder %s896_s18, %s896_s18 }
  0x6a   : > { %p4052_p4 = scmp.ne.s32.totalorder %s896_s18, %s4051_s14  ;;  %p4060_p8 = scmp.lt.s32.totalorder %s4051_s14, %s4051_s14 }
  0x6c   : > { %p4054_p12 = pnand %p4052_p4, %p4844_p2  ;;  %p4061_p10 = por %p4060_p8, %p4059_p5 }
  0x6e   : > { %p4055_p9 = pneg %p4054_p12 }
  0x70   : > { %p4062_p0 = pnand %p4061_p10, %p4055_p9 }
  0x72   : > { %4065 = shalt.err (!%p4062_p0)
}
  0x73   : > { %3816 = dma.hbm_to_vmem [thread:$0]  (!%p4827_p13), %s5515_s17, 32, %s896_s18, [#allocation8]  }
  0x74   : > { %s4857_s7 = sshll.u32 %s4544_s22, 4  ;;  %s952_s14 = scalar_lea.vmem [#allocation10], %s4823_s23 }
  0x75   : > { %s4861_s15 = scalar_lea.hbm %s5514_s29, %s4857_s7  ;;  %s959_s5 = sshll.u32 %s952_s14, 4  ;;  %s4864_s5 = int_to_ptr.vmem [resolvable:$true] %s959_s5 }
  0x76   : > { %s4066_s3 = scalar_lea.hbm %s4861_s15, 16  ;;  %p5525_p8 = scmp.ne.s32.totalorder %s5523_s10, 0 }
  0x77   : > { %p4067_p5 = scmp.ne.s32.totalorder %s4861_s15, %s4066_s3  ;;  %s4071_s22 = scalar_lea.hbm %s5514_s29, 32 }
  0x78   : > { %p4871_p9 = pneg %p5525_p8  ;;  %p4072_p1 = scmp.lt.u32.totalorder %s4861_s15, %s5514_s29 }
  0x79   : > { %p4073_p3 = scmp.lt.u32.totalorder %s4071_s22, %s4066_s3  ;;  %p4075_p7 = scmp.lt.u32.totalorder %s4066_s3, %s4861_s15 }
  0x7a   : > { %s5526_s25 = scalar_select %p4871_p9, 1, 0 }
  0x7b   : > { %p4069_p10 = pnand %p4871_p9, %p4067_p5  ;;  %p4074_p6 = por %p4073_p3, %p4072_p1 }
  0x7d   : > { %p4070_p0 = pneg %p4069_p10  ;;  %p4076_p11 = por %p4075_p7, %p4074_p6 }
  0x7f   : > { %p4077_p4 = pnand %p4076_p11, %p4070_p0 }
  0x81   : > { %4080 = shalt.err (!%p4077_p4)
}
  0x82   : > { %s4081_s18 = scalar_lea.vmem %s4864_s5, 16  ;;  %s4578_s14 = smov [#allocation10]  }
  0x83   : > { %p4082_p12 = scmp.ne.s32.totalorder %s4864_s5, %s4081_s18  ;;  %s4086_s4 = sshll.u32 %s4578_s14, 4  ;;  %s4087_s4 = int_to_ptr.vmem [resolvable:$false] %s4086_s4 }
  0x84   : > { %s4088_s17 = scalar_lea.vmem %s4087_s4, 32  ;;  %p4089_p5 = scmp.lt.s32.totalorder %s4864_s5, %s4087_s4 }
  0x85   : > { %p4084_p13 = pnand %p4082_p12, %p4871_p9  ;;  %p4090_p10 = scmp.lt.s32.totalorder %s4088_s17, %s4081_s18 }
  0x87   : > { %p4085_p2 = pneg %p4084_p13  ;;  %p4091_p1 = por %p4090_p10, %p4089_p5 }
  0x89   : > { %p4092_p3 = pnand %p4091_p1, %p4085_p2 }
  0x8b   : > { %4095 = shalt.err (!%p4092_p3)
}
  0x8c   : > { %s5527_s3 = scalar_lea.sflag [#allocation11], %s4832_s2  ;;  %s4894_s22 = scalar_lea.hbm %s4662_s19, %s4857_s7 }
  0x8d   : > { %3823 = dma.hbm_to_vmem [thread:$0]  (!%p5525_p8), %s4861_s15, 16, %s4864_s5, %s5527_s3  }
  0x8e   : > { %s1002_s17 = scalar_lea.vmem [#allocation13], %s4823_s23  ;;  %s5482_s18 = scalar_lea.sflag [#allocation14], %s4832_s2 }
  0x8f   : > { %s1009_s4 = sshll.u32 %s1002_s17, 4  ;;  %s4096_s14 = scalar_lea.hbm %s4894_s22, 16  ;;  %s1010_s4 = int_to_ptr.vmem [resolvable:$true] %s1009_s4 }
  0x90   : > { %p4097_p13 = scmp.ne.s32.totalorder %s4894_s22, %s4096_s14  ;;  %s4101_s29 = scalar_lea.hbm %s4662_s19, 32 }
  0x91   : > { %p4102_p6 = scmp.lt.u32.totalorder %s4894_s22, %s4662_s19  ;;  %p4103_p7 = scmp.lt.u32.totalorder %s4101_s29, %s4096_s14 }
  0x92   : > { %p4099_p2 = pnand %p4097_p13, %p4871_p9  ;;  %p4105_p4 = scmp.lt.u32.totalorder %s4096_s14, %s4894_s22 }
  0x93   : > { %p4104_p11 = por %p4103_p7, %p4102_p6 }
  0x94   : > { %p4100_p0 = pneg %p4099_p2 }
  0x95   : > { %p4106_p12 = por %p4105_p4, %p4104_p11 }
  0x97   : > { %p4107_p5 = pnand %p4106_p12, %p4100_p0 }
  0x99   : > { %4110 = shalt.err (!%p4107_p5)
}
  0x9a   : > { %s4111_s5 = scalar_lea.vmem %s1010_s4, 16  ;;  %s4579_s15 = smov [#allocation13]  }
  0x9b   : > { %p4112_p10 = scmp.ne.s32.totalorder %s1010_s4, %s4111_s5  ;;  %s4116_s3 = sshll.u32 %s4579_s15, 4  ;;  %s4117_s3 = int_to_ptr.vmem [resolvable:$false] %s4116_s3 }
  0x9c   : > { %s4118_s17 = scalar_lea.vmem %s4117_s3, 32  ;;  %p4119_p13 = scmp.lt.s32.totalorder %s1010_s4, %s4117_s3 }
  0x9d   : > { %p4114_p1 = pnand %p4112_p10, %p4871_p9  ;;  %p4120_p2 = scmp.lt.s32.totalorder %s4118_s17, %s4111_s5 }
  0x9f   : > { %p4115_p3 = pneg %p4114_p1  ;;  %p4121_p8 = por %p4120_p2, %p4119_p13 }
  0xa1   : > { %p4122_p6 = pnand %p4121_p8, %p4115_p3 }
  0xa3   : > { %4125 = shalt.err (!%p4122_p6)
}
  0xa4   : > { %p5528_p7 = scmp.ne.s32.totalorder %s5523_s10, 0  ;;  %s4915_s29 = scalar_lea.hbm %s5513_s6, %s4857_s7 }
  0xa5   : > { %s1044_s14 = scalar_lea.vmem [#allocation16], %s4823_s23  ;;  %s5483_s15 = scalar_lea.sflag [#allocation17], %s4832_s2 }
  0xa6   : > { %3829 = dma.hbm_to_vmem [thread:$0]  (!%p5528_p7), %s4894_s22, 16, %s1010_s4, %s5482_s18  }
  0xa7   : > { %s1051_s5 = sshll.u32 %s1044_s14, 4  ;;  %s4126_s3 = scalar_lea.hbm %s4915_s29, 16  ;;  %s1052_s5 = int_to_ptr.vmem [resolvable:$true] %s1051_s5 }
  0xa8   : > { %p4127_p8 = scmp.ne.s32.totalorder %s4915_s29, %s4126_s3  ;;  %s4131_s17 = scalar_lea.hbm %s5513_s6, 32 }
  0xa9   : > { %p4132_p4 = scmp.lt.u32.totalorder %s4915_s29, %s5513_s6  ;;  %p4133_p12 = scmp.lt.u32.totalorder %s4131_s17, %s4126_s3 }
  0xaa   : > { %p4129_p0 = pnand %p4127_p8, %p4871_p9  ;;  %p4135_p10 = scmp.lt.u32.totalorder %s4126_s3, %s4915_s29 }
  0xab   : > { %p4134_p5 = por %p4133_p12, %p4132_p4 }
  0xac   : > { %p4130_p11 = pneg %p4129_p0 }
  0xad   : > { %p4136_p1 = por %p4135_p10, %p4134_p5 }
  0xaf   : > { %p4137_p3 = pnand %p4136_p1, %p4130_p11 }
  0xb1   : > { %4140 = shalt.err (!%p4137_p3)
}
  0xb2   : > { %s4141_s22 = scalar_lea.vmem %s1052_s5, 16  ;;  %s4580_s4 = smov [#allocation16]  }
  0xb3   : > { %p4142_p13 = scmp.ne.s32.totalorder %s1052_s5, %s4141_s22  ;;  %s4146_s14 = sshll.u32 %s4580_s4, 4  ;;  %s4147_s14 = int_to_ptr.vmem [resolvable:$false] %s4146_s14 }
  0xb4   : > { %s4148_s18 = scalar_lea.vmem %s4147_s14, 32  ;;  %p4149_p8 = scmp.lt.s32.totalorder %s1052_s5, %s4147_s14 }
  0xb5   : > { %p4144_p2 = pnand %p4142_p13, %p4871_p9  ;;  %p4150_p0 = scmp.lt.s32.totalorder %s4148_s18, %s4141_s22 }
  0xb7   : > { %p4145_p6 = pneg %p4144_p2  ;;  %p4151_p7 = por %p4150_p0, %p4149_p8 }
  0xb9   : > { %p4152_p4 = pnand %p4151_p7, %p4145_p6 }
  0xbb   : > { %4155 = shalt.err (!%p4152_p4)
}
  0xbc   : > { %p5529_p12 = scmp.ne.s32.totalorder %s5523_s10, 0  ;;  %s4936_s3 = scalar_lea.hbm %s4687_s20, %s4857_s7 }
  0xbd   : > { %s1078_s18 = scalar_lea.vmem [#allocation19], %s4823_s23  ;;  %s5484_s22 = scalar_lea.sflag [#allocation20], %s4832_s2 }
  0xbe   : > { %3835 = dma.hbm_to_vmem [thread:$0]  (!%p5529_p12), %s4915_s29, 16, %s1052_s5, %s5483_s15  }
  0xbf   : > { %s1085_s17 = sshll.u32 %s1078_s18, 4  ;;  %s4156_s4 = scalar_lea.hbm %s4936_s3, 16  ;;  %s1086_s17 = int_to_ptr.vmem [resolvable:$true] %s1085_s17 }
  0xc0   : > { %p4157_p7 = scmp.ne.s32.totalorder %s4936_s3, %s4156_s4  ;;  %s4161_s14 = scalar_lea.hbm %s4687_s20, 32 }
  0xc1   : > { %p4162_p10 = scmp.lt.u32.totalorder %s4936_s3, %s4687_s20  ;;  %p4163_p1 = scmp.lt.u32.totalorder %s4161_s14, %s4156_s4 }
  0xc2   : > { %p4159_p11 = pnand %p4157_p7, %p4871_p9  ;;  %p4165_p13 = scmp.lt.u32.totalorder %s4156_s4, %s4936_s3 }
  0xc3   : > { %p4164_p3 = por %p4163_p1, %p4162_p10 }
  0xc4   : > { %p4160_p5 = pneg %p4159_p11 }
  0xc5   : > { %p4166_p2 = por %p4165_p13, %p4164_p3 }
  0xc7   : > { %p4167_p6 = pnand %p4166_p2, %p4160_p5 }
  0xc9   : > { %4170 = shalt.err (!%p4167_p6)
}
  0xca   : > { %s4171_s29 = scalar_lea.vmem %s1086_s17, 16  ;;  %s4581_s5 = smov [#allocation19]  }
  0xcb   : > { %p4172_p8 = scmp.ne.s32.totalorder %s1086_s17, %s4171_s29  ;;  %s4176_s18 = sshll.u32 %s4581_s5, 4  ;;  %s4177_s18 = int_to_ptr.vmem [resolvable:$false] %s4176_s18 }
  0xcc   : > { %s4178_s15 = scalar_lea.vmem %s4177_s18, 32  ;;  %p4179_p7 = scmp.lt.s32.totalorder %s1086_s17, %s4177_s18 }
  0xcd   : > { %p4174_p0 = pnand %p4172_p8, %p4871_p9  ;;  %p4180_p11 = scmp.lt.s32.totalorder %s4178_s15, %s4171_s29 }
  0xcf   : > { %p4175_p4 = pneg %p4174_p0  ;;  %p4181_p12 = por %p4180_p11, %p4179_p7 }
  0xd1   : > { %p4182_p1 = pnand %p4181_p12, %p4175_p4 }
  0xd3   : > { %4185 = shalt.err (!%p4182_p1)
}
  0xd4   : > { %p5530_p10 = scmp.ne.s32.totalorder %s5523_s10, 0  ;;  %s4957_s4 = scalar_lea.hbm %s4702_s13, %s4857_s7 }
  0xd5   : > { %s1120_s15 = scalar_lea.vmem [#allocation22], %s4823_s23  ;;  %s5485_s29 = scalar_lea.sflag [#allocation23], %s4832_s2 }
  0xd6   : > { %3841 = dma.hbm_to_vmem [thread:$0]  (!%p5530_p10), %s4936_s3, 16, %s1086_s17, %s5484_s22  }
  0xd7   : > { %s1127_s14 = sshll.u32 %s1120_s15, 4  ;;  %s4186_s5 = scalar_lea.hbm %s4957_s4, 16  ;;  %s1128_s14 = int_to_ptr.vmem [resolvable:$true] %s1127_s14 }
  0xd8   : > { %p4187_p12 = scmp.ne.s32.totalorder %s4957_s4, %s4186_s5  ;;  %s4191_s18 = scalar_lea.hbm %s4702_s13, 32 }
  0xd9   : > { %p4192_p13 = scmp.lt.u32.totalorder %s4957_s4, %s4702_s13  ;;  %p4193_p2 = scmp.lt.u32.totalorder %s4191_s18, %s4186_s5 }
  0xda   : > { %p4189_p5 = pnand %p4187_p12, %p4871_p9  ;;  %p4195_p8 = scmp.lt.u32.totalorder %s4186_s5, %s4957_s4 }
  0xdb   : > { %p4194_p6 = por %p4193_p2, %p4192_p13 }
  0xdc   : > { %p4190_p3 = pneg %p4189_p5 }
  0xdd   : > { %p4196_p0 = por %p4195_p8, %p4194_p6 }
  0xdf   : > { %p4197_p4 = pnand %p4196_p0, %p4190_p3 }
  0xe1   : > { %4200 = shalt.err (!%p4197_p4)
}
  0xe2   : > { %s4201_s3 = scalar_lea.vmem %s1128_s14, 16  ;;  %s4582_s17 = smov [#allocation22]  }
  0xe3   : > { %p4202_p7 = scmp.ne.s32.totalorder %s1128_s14, %s4201_s3  ;;  %s4206_s15 = sshll.u32 %s4582_s17, 4  ;;  %s4207_s15 = int_to_ptr.vmem [resolvable:$false] %s4206_s15 }
  0xe4   : > { %s4208_s22 = scalar_lea.vmem %s4207_s15, 32  ;;  %p4209_p12 = scmp.lt.s32.totalorder %s1128_s14, %s4207_s15 }
  0xe5   : > { %p4204_p11 = pnand %p4202_p7, %p4871_p9  ;;  %p4210_p5 = scmp.lt.s32.totalorder %s4208_s22, %s4201_s3 }
  0xe7   : > { %p4205_p1 = pneg %p4204_p11  ;;  %p4211_p10 = por %p4210_p5, %p4209_p12 }
  0xe9   : > { %p4212_p2 = pnand %p4211_p10, %p4205_p1 }
  0xeb   : > { %4215 = shalt.err (!%p4212_p2)
}
  0xec   : > { %p5531_p13 = scmp.ne.s32.totalorder %s5523_s10, 0  ;;  %s4583_s5 = smov [#allocation4]  }
  0xed   : > { %s878_s18 = sshll.u32 %s4583_s5, 4  ;;  %s4216_s17 = scalar_lea.hbm %s4617_s9, 128  ;;  %s879_s18 = int_to_ptr.vmem [resolvable:$true] %s878_s18 }
  0xee   : > { %3847 = dma.hbm_to_vmem [thread:$0]  (!%p5531_p13), %s4957_s4, 16, %s1128_s14, %s5485_s29  }
  0xef   : > { %p4217_p3 = scmp.ne.s32.totalorder %s4617_s9, %s4216_s17  ;;  %p5532_p6 = scmp.ne.s32.totalorder %s5524_s1, 0 }
  0xf0   : > { %p4223_p10 = scmp.lt.u32.totalorder %s4216_s17, %s4617_s9 }
  0xf1   : > { %p4219_p8 = pnand %p4217_p3, %p5532_p6 }
  0xf3   : > { %p4220_p0 = pneg %p4219_p8 }
  0xf5   : > { %p4225_p4 = pnand %p4223_p10, %p4220_p0 }
  0xf7   : > { %4228 = shalt.err (!%p4225_p4)
}
  0xf8   : > { %s4229_s22 = scalar_lea.vmem %s879_s18, 128  ;;  %p4237_p12 = scmp.lt.s32.totalorder %s879_s18, %s879_s18 }
  0xf9   : > { %p4230_p7 = scmp.ne.s32.totalorder %s879_s18, %s4229_s22  ;;  %p4238_p5 = scmp.lt.s32.totalorder %s4229_s22, %s4229_s22 }
  0xfb   : > { %p4232_p11 = pnand %p4230_p7, %p5532_p6  ;;  %p4239_p2 = por %p4238_p5, %p4237_p12 }
  0xfd   : > { %p4233_p1 = pneg %p4232_p11 }
  0xff   : > { %p4240_p13 = pnand %p4239_p2, %p4233_p1 }
 0x101   : > { %4243 = shalt.err (!%p4240_p13)
}
 0x102   : > { %s4584_s4 = smov 64   ;;  %s4585_s14 = smov 4  }
 0x103   : > { %p5533_p3 = scmp.ne.s32.totalorder %s5522_s28, 0  ;;  %s4586_s3 = smov [#allocation9]  }
 0x104   : > { %s906_s15 = sshll.u32 %s4586_s3, 4  ;;  %s4988_s5 = scalar_lea.hbm %s5512_s8, %s4857_s7  ;;  %s907_s15 = int_to_ptr.vmem [resolvable:$true] %s906_s15 }
 0x105   : > { %3813 = dma.hbm_to_vmem [thread:$0]  (!%p5533_p3), %s4617_s9, 128, %s879_s18, [#allocation5], %s4584_s4, %s4584_s4, %s4585_s14  }
 0x106   : > { %s977_s17 = scalar_lea.vmem [#allocation12], %s4823_s23  ;;  %s4244_s29 = scalar_lea.hbm %s4632_s21, 16 }
 0x107   : > { %s984_s22 = sshll.u32 %s977_s17, 4  ;;  %p4245_p13 = scmp.ne.s32.totalorder %s4632_s21, %s4244_s29  ;;  %s985_s22 = int_to_ptr.vmem [resolvable:$true] %s984_s22 }
 0x108   : > { %p4251_p10 = scmp.lt.u32.totalorder %s4244_s29, %s4632_s21 }
 0x109   : > { %p4247_p8 = pnand %p4245_p13, %p5532_p6 }
 0x10b   : > { %p4248_p0 = pneg %p4247_p8 }
 0x10d   : > { %p4253_p4 = pnand %p4251_p10, %p4248_p0 }
 0x10f   : > { %4256 = shalt.err (!%p4253_p4)
}
 0x110   : > { %s4257_s6 = scalar_lea.vmem %s907_s15, 16  ;;  %s4264_s18 = scalar_lea.vmem %s907_s15, 32 }
 0x111   : > { %p4258_p7 = scmp.ne.s32.totalorder %s907_s15, %s4257_s6  ;;  %p4265_p12 = scmp.lt.s32.totalorder %s907_s15, %s907_s15 }
 0x112   : > { %p4266_p5 = scmp.lt.s32.totalorder %s4264_s18, %s4257_s6 }
 0x113   : > { %p4260_p11 = pnand %p4258_p7, %p5532_p6 }
 0x114   : > { %p4267_p2 = por %p4266_p5, %p4265_p12 }
 0x115   : > { %p4261_p1 = pneg %p4260_p11 }
 0x117   : > { %p4268_p9 = pnand %p4267_p2, %p4261_p1 }
 0x119   : > { %4271 = shalt.err (!%p4268_p9)
}
 0x11a   : > { %3819 = dma.hbm_to_vmem [thread:$0]  (!%p5533_p3), %s4632_s21, 16, %s907_s15, [#allocation8]  }
 0x11b   : > { %s4272_s1 = scalar_lea.hbm %s4988_s5, 16  ;;  %p5534_p13 = scmp.ne.s32.totalorder %s5526_s25, 0 }
 0x11c   : > { %p4273_p6 = scmp.ne.s32.totalorder %s4988_s5, %s4272_s1  ;;  %s4277_s6 = scalar_lea.hbm %s5512_s8, 32 }
 0x11d   : > { %p4278_p10 = scmp.lt.u32.totalorder %s4988_s5, %s5512_s8  ;;  %p4279_p9 = scmp.lt.u32.totalorder %s4277_s6, %s4272_s1 }
 0x11e   : > { %p4275_p8 = pnand %p4273_p6, %p5534_p13  ;;  %p4281_p7 = scmp.lt.u32.totalorder %s4272_s1, %s4988_s5 }
 0x11f   : > { %p4280_p4 = por %p4279_p9, %p4278_p10 }
 0x120   : > { %p4276_p0 = pneg %p4275_p8 }
 0x121   : > { %p4282_p11 = por %p4281_p7, %p4280_p4 }
 0x123   : > { %p4283_p1 = pnand %p4282_p11, %p4276_p0 }
 0x125   : > { %4286 = shalt.err (!%p4283_p1)
}
 0x126   : > { %s4287_s28 = scalar_lea.vmem %s985_s22, 16  ;;  %s4587_s29 = smov [#allocation12]  }
 0x127   : > { %p4288_p12 = scmp.ne.s32.totalorder %s985_s22, %s4287_s28  ;;  %s4292_s4 = sshll.u32 %s4587_s29, 4  ;;  %s4293_s4 = int_to_ptr.vmem [resolvable:$false] %s4292_s4 }
 0x128   : > { %s4294_s14 = scalar_lea.vmem %s4293_s4, 32  ;;  %p4295_p2 = scmp.lt.s32.totalorder %s985_s22, %s4293_s4 }
 0x129   : > { %p4290_p5 = pnand %p4288_p12, %p5534_p13  ;;  %p4296_p6 = scmp.lt.s32.totalorder %s4294_s14, %s4287_s28 }
 0x12b   : > { %p4291_p3 = pneg %p4290_p5  ;;  %p4297_p8 = por %p4296_p6, %p4295_p2 }
 0x12d   : > { %p4298_p9 = pnand %p4297_p8, %p4291_p3 }
 0x12f   : > { %4301 = shalt.err (!%p4298_p9)
}
 0x130   : > { %p5535_p10 = scmp.ne.s32.totalorder %s5523_s10, 0  ;;  %s5536_s3 = scalar_lea.sflag [#allocation11], %s4832_s2 }
 0x131   : > { %s5018_s15 = scalar_lea.hbm %s4672_s30, %s4857_s7  ;;  %s1027_s17 = scalar_lea.vmem [#allocation15], %s4823_s23 }
 0x132   : > { %3826 = dma.hbm_to_vmem [thread:$0]  (!%p5535_p10), %s4988_s5, 16, %s985_s22, %s5536_s3  }
 0x133   : > { %s1034_s18 = sshll.u32 %s1027_s17, 4  ;;  %s4302_s1 = scalar_lea.hbm %s5018_s15, 16  ;;  %s1035_s18 = int_to_ptr.vmem [resolvable:$true] %s1034_s18 }
 0x134   : > { %p4303_p0 = scmp.ne.s32.totalorder %s5018_s15, %s4302_s1  ;;  %s4307_s6 = scalar_lea.hbm %s4672_s30, 32 }
 0x135   : > { %p4308_p11 = scmp.lt.u32.totalorder %s5018_s15, %s4672_s30  ;;  %p4309_p1 = scmp.lt.u32.totalorder %s4307_s6, %s4302_s1 }
 0x136   : > { %p4305_p4 = pnand %p4303_p0, %p5534_p13  ;;  %p4311_p5 = scmp.lt.u32.totalorder %s4302_s1, %s5018_s15 }
 0x137   : > { %p4310_p12 = por %p4309_p1, %p4308_p11 }
 0x138   : > { %p4306_p7 = pneg %p4305_p4 }
 0x139   : > { %p4312_p3 = por %p4311_p5, %p4310_p12 }
 0x13b   : > { %p4313_p2 = pnand %p4312_p3, %p4306_p7 }
 0x13d   : > { %4316 = shalt.err (!%p4313_p2)
}
 0x13e   : > { %s4317_s5 = scalar_lea.vmem %s1035_s18, 16  ;;  %s4588_s22 = smov [#allocation15]  }
 0x13f   : > { %p4318_p6 = scmp.ne.s32.totalorder %s1035_s18, %s4317_s5  ;;  %s4322_s28 = sshll.u32 %s4588_s22, 4  ;;  %s4323_s28 = int_to_ptr.vmem [resolvable:$false] %s4322_s28 }
 0x140   : > { %s4324_s29 = scalar_lea.vmem %s4323_s28, 32  ;;  %p4325_p0 = scmp.lt.s32.totalorder %s1035_s18, %s4323_s28 }
 0x141   : > { %p4320_p8 = pnand %p4318_p6, %p5534_p13  ;;  %p4326_p4 = scmp.lt.s32.totalorder %s4324_s29, %s4317_s5 }
 0x143   : > { %p4321_p9 = pneg %p4320_p8  ;;  %p4327_p10 = por %p4326_p4, %p4325_p0 }
 0x145   : > { %p4328_p1 = pnand %p4327_p10, %p4321_p9 }
 0x147   : > { %4331 = shalt.err (!%p4328_p1)
}
 0x148   : > { %p5537_p11 = scmp.ne.s32.totalorder %s5523_s10, 0  ;;  %s5538_s4 = scalar_lea.sflag [#allocation14], %s4832_s2 }
 0x149   : > { %s5038_s14 = scalar_lea.hbm %s4682_s12, %s4857_s7  ;;  %s1061_s3 = scalar_lea.vmem [#allocation18], %s4823_s23 }
 0x14a   : > { %3832 = dma.hbm_to_vmem [thread:$0]  (!%p5537_p11), %s5018_s15, 16, %s1035_s18, %s5538_s4  }
 0x14b   : > { %s1068_s17 = sshll.u32 %s1061_s3, 4  ;;  %s4332_s1 = scalar_lea.hbm %s5038_s14, 16  ;;  %s1069_s17 = int_to_ptr.vmem [resolvable:$true] %s1068_s17 }
 0x14c   : > { %p4333_p10 = scmp.ne.s32.totalorder %s5038_s14, %s4332_s1  ;;  %s4337_s6 = scalar_lea.hbm %s4682_s12, 32 }
 0x14d   : > { %p4338_p5 = scmp.lt.u32.totalorder %s5038_s14, %s4682_s12  ;;  %p4339_p3 = scmp.lt.u32.totalorder %s4337_s6, %s4332_s1 }
 0x14e   : > { %p4335_p7 = pnand %p4333_p10, %p5534_p13  ;;  %p4341_p6 = scmp.lt.u32.totalorder %s4332_s1, %s5038_s14 }
 0x14f   : > { %p4340_p2 = por %p4339_p3, %p4338_p5 }
 0x150   : > { %p4336_p12 = pneg %p4335_p7 }
 0x151   : > { %p4342_p8 = por %p4341_p6, %p4340_p2 }
 0x153   : > { %p4343_p9 = pnand %p4342_p8, %p4336_p12 }
 0x155   : > { %4346 = shalt.err (!%p4343_p9)
}
 0x156   : > { %s4347_s15 = scalar_lea.vmem %s1069_s17, 16  ;;  %s4589_s18 = smov [#allocation18]  }
 0x157   : > { %p4348_p0 = scmp.ne.s32.totalorder %s1069_s17, %s4347_s15  ;;  %s4352_s5 = sshll.u32 %s4589_s18, 4  ;;  %s4353_s5 = int_to_ptr.vmem [resolvable:$false] %s4352_s5 }
 0x158   : > { %s4354_s22 = scalar_lea.vmem %s4353_s5, 32  ;;  %p4355_p10 = scmp.lt.s32.totalorder %s1069_s17, %s4353_s5 }
 0x159   : > { %p4350_p4 = pnand %p4348_p0, %p5534_p13  ;;  %p4356_p7 = scmp.lt.s32.totalorder %s4354_s22, %s4347_s15 }
 0x15b   : > { %p4351_p1 = pneg %p4350_p4  ;;  %p4357_p11 = por %p4356_p7, %p4355_p10 }
 0x15d   : > { %p4358_p3 = pnand %p4357_p11, %p4351_p1 }
 0x15f   : > { %4361 = shalt.err (!%p4358_p3)
}
 0x160   : > { %p5539_p5 = scmp.ne.s32.totalorder %s5523_s10, 0  ;;  %s5540_s28 = scalar_lea.sflag [#allocation17], %s4832_s2 }
 0x161   : > { %s5058_s29 = scalar_lea.hbm %s4692_s27, %s4857_s7  ;;  %s1095_s4 = scalar_lea.vmem [#allocation21], %s4823_s23 }
 0x162   : > { %3838 = dma.hbm_to_vmem [thread:$0]  (!%p5539_p5), %s5038_s14, 16, %s1069_s17, %s5540_s28  }
 0x163   : > { %s1102_s3 = sshll.u32 %s1095_s4, 4  ;;  %s4362_s1 = scalar_lea.hbm %s5058_s29, 16  ;;  %s1103_s3 = int_to_ptr.vmem [resolvable:$true] %s1102_s3 }
 0x164   : > { %p4363_p11 = scmp.ne.s32.totalorder %s5058_s29, %s4362_s1  ;;  %s4367_s6 = scalar_lea.hbm %s4692_s27, 32 }
 0x165   : > { %p4368_p6 = scmp.lt.u32.totalorder %s5058_s29, %s4692_s27  ;;  %p4369_p8 = scmp.lt.u32.totalorder %s4367_s6, %s4362_s1 }
 0x166   : > { %p4365_p12 = pnand %p4363_p11, %p5534_p13  ;;  %p4371_p0 = scmp.lt.u32.totalorder %s4362_s1, %s5058_s29 }
 0x167   : > { %p4370_p9 = por %p4369_p8, %p4368_p6 }
 0x168   : > { %p4366_p2 = pneg %p4365_p12 }
 0x169   : > { %p4372_p4 = por %p4371_p0, %p4370_p9 }
 0x16b   : > { %p4373_p1 = pnand %p4372_p4, %p4366_p2 }
 0x16d   : > { %4376 = shalt.err (!%p4373_p1)
}
 0x16e   : > { %s4377_s14 = scalar_lea.vmem %s1103_s3, 16  ;;  %s4590_s17 = smov [#allocation21]  }
 0x16f   : > { %p4378_p10 = scmp.ne.s32.totalorder %s1103_s3, %s4377_s14  ;;  %s4382_s15 = sshll.u32 %s4590_s17, 4  ;;  %s4383_s15 = int_to_ptr.vmem [resolvable:$false] %s4382_s15 }
 0x170   : > { %s4384_s18 = scalar_lea.vmem %s4383_s15, 32  ;;  %p4385_p11 = scmp.lt.s32.totalorder %s1103_s3, %s4383_s15 }
 0x171   : > { %p4380_p7 = pnand %p4378_p10, %p5534_p13  ;;  %p4386_p12 = scmp.lt.s32.totalorder %s4384_s18, %s4377_s14 }
 0x173   : > { %p4381_p3 = pneg %p4380_p7  ;;  %p4387_p5 = por %p4386_p12, %p4385_p11 }
 0x175   : > { %p4388_p6 = pnand %p4387_p5, %p4381_p3 }
 0x177   : > { %4391 = shalt.err (!%p4388_p6)
}
 0x178   : > { %p5541_p8 = scmp.ne.s32.totalorder %s5523_s10, 0  ;;  %s5542_s5 = scalar_lea.sflag [#allocation20], %s4832_s2 }
 0x179   : > { %s5078_s22 = scalar_lea.hbm %s4712_s24, %s4857_s7  ;;  %s1145_s28 = scalar_lea.vmem [#allocation24], %s4823_s23 }
 0x17a   : > { %3844 = dma.hbm_to_vmem [thread:$0]  (!%p5541_p8), %s5058_s29, 16, %s1103_s3, %s5542_s5  }
 0x17b   : > { %s1152_s4 = sshll.u32 %s1145_s28, 4  ;;  %s4392_s1 = scalar_lea.hbm %s5078_s22, 16  ;;  %s1153_s4 = int_to_ptr.vmem [resolvable:$true] %s1152_s4 }
 0x17c   : > { %p4393_p5 = scmp.ne.s32.totalorder %s5078_s22, %s4392_s1  ;;  %s4397_s6 = scalar_lea.hbm %s4712_s24, 32 }
 0x17d   : > { %p4398_p0 = scmp.lt.u32.totalorder %s5078_s22, %s4712_s24  ;;  %p4399_p4 = scmp.lt.u32.totalorder %s4397_s6, %s4392_s1 }
 0x17e   : > { %p4395_p2 = pnand %p4393_p5, %p5534_p13  ;;  %p4401_p10 = scmp.lt.u32.totalorder %s4392_s1, %s5078_s22 }
 0x17f   : > { %p4400_p1 = por %p4399_p4, %p4398_p0 }
 0x180   : > { %p4396_p9 = pneg %p4395_p2 }
 0x181   : > { %p4402_p7 = por %p4401_p10, %p4400_p1 }
 0x183   : > { %p4403_p3 = pnand %p4402_p7, %p4396_p9 }
 0x185   : > { %4406 = shalt.err (!%p4403_p3)
}
 0x186   : > { %s4407_s29 = scalar_lea.vmem %s1153_s4, 16  ;;  %s4591_s3 = smov [#allocation24]  }
 0x187   : > { %p4408_p11 = scmp.ne.s32.totalorder %s1153_s4, %s4407_s29  ;;  %s4412_s14 = sshll.u32 %s4591_s3, 4  ;;  %s4413_s14 = int_to_ptr.vmem [resolvable:$false] %s4412_s14 }
 0x188   : > { %s4414_s17 = scalar_lea.vmem %s4413_s14, 32  ;;  %p4415_p5 = scmp.lt.s32.totalorder %s1153_s4, %s4413_s14 }
 0x189   : > { %p4410_p12 = pnand %p4408_p11, %p5534_p13  ;;  %p4416_p2 = scmp.lt.s32.totalorder %s4414_s17, %s4407_s29 }
 0x18b   : > { %p4411_p6 = pneg %p4410_p12  ;;  %p4417_p8 = por %p4416_p2, %p4415_p5 }
 0x18d   : > { %p4418_p0 = pnand %p4417_p8, %p4411_p6 }
 0x18f   : > { %4421 = shalt.err (!%p4418_p0)
}
 0x190   : > { %p5543_p4 = scmp.ne.s32.totalorder %s5523_s10, 0  ;;  %s5544_s15 = scalar_lea.sflag [#allocation23], %s4832_s2 }
 0x191   : > { %s5545_s18 = sld [smem:[#allocation49_spill]]  ;;  %s1162_s28 = scalar_lea.vmem [#allocation25], %s4823_s23 }
 0x192   : > { %3850 = dma.hbm_to_vmem [thread:$0]  (!%p5543_p4), %s5078_s22, 16, %s1153_s4, %s5544_s15  }
 0x193   : > { %s1169_s1 = sshll.u32 %s1162_s28, 4  ;;  %s1160_s6 = scalar_lea.sflag [#allocation26], %s4823_s23  ;;  %s1170_s1 = int_to_ptr.vmem [resolvable:$true] %s1169_s1 }
 0x197   : > { %s5098_s5 = scalar_lea.hbm %s5545_s18, %s4857_s7  ;;  %s4427_s29 = scalar_lea.hbm %s5545_s18, 32 }
 0x198   : > { %s4422_s2 = scalar_lea.hbm %s5098_s5, 16  ;;  %p4428_p10 = scmp.lt.u32.totalorder %s5098_s5, %s5545_s18 }
 0x199   : > { %p4423_p8 = scmp.ne.s32.totalorder %s5098_s5, %s4422_s2  ;;  %p4429_p7 = scmp.lt.u32.totalorder %s4427_s29, %s4422_s2 }
 0x19a   : > { %p4431_p11 = scmp.lt.u32.totalorder %s4422_s2, %s5098_s5 }
 0x19b   : > { %p4425_p9 = pnand %p4423_p8, %p5534_p13  ;;  %p4430_p3 = por %p4429_p7, %p4428_p10 }
 0x19d   : > { %p4426_p1 = pneg %p4425_p9  ;;  %p4432_p12 = por %p4431_p11, %p4430_p3 }
 0x19f   : > { %p4433_p6 = pnand %p4432_p12, %p4426_p1 }
 0x1a1   : > { %4436 = shalt.err (!%p4433_p6)
}
 0x1a2   : > { %s4437_s7 = scalar_lea.vmem %s1170_s1, 16  ;;  %s4592_s23 = smov [#allocation25]  }
 0x1a3   : > { %p4438_p5 = scmp.ne.s32.totalorder %s1170_s1, %s4437_s7  ;;  %s4442_s22 = sshll.u32 %s4592_s23, 4  ;;  %s4443_s22 = int_to_ptr.vmem [resolvable:$false] %s4442_s22 }
 0x1a4   : > { %s4444_s4 = scalar_lea.vmem %s4443_s22, 32  ;;  %p4445_p8 = scmp.lt.s32.totalorder %s1170_s1, %s4443_s22 }
 0x1a5   : > { %p4440_p2 = pnand %p4438_p5, %p5534_p13  ;;  %p4446_p9 = scmp.lt.s32.totalorder %s4444_s4, %s4437_s7 }
 0x1a7   : > { %p4441_p0 = pneg %p4440_p2  ;;  %p4447_p4 = por %p4446_p9, %p4445_p8 }
 0x1a9   : > { %p4448_p7 = pnand %p4447_p4, %p4441_p0 }
 0x1ab   : > { %4451 = shalt.err (!%p4448_p7)
}
 0x1ac   : > { %p5546_p10 = scmp.ne.s32.totalorder %s5523_s10, 0  ;;  %p5547_p1 = scmp.ne.s32.totalorder %s5521_s16, 0 }
 0x1ad   : > { %p5548_p3 = scmp.eq.s32.totalorder (!%p5547_p1), %s4786_s26, 0 }
 0x1ae   : > { %3853 = dma.hbm_to_vmem [thread:$0]  (!%p5546_p10), %s5098_s5, 16, %s1170_s1, %s1160_s6  }
 0x1af   : > { %1184 = sbr.rel (%p5547_p1) target bundleno = 4561 (0x11d1), region = 144 }
 0x1b6   : > { %4495 = dma.done.wait (%p5548_p3), [#allocation5], 128   ;;  %p5549_p13 = pmov %p5548_p3 }
 0x1b7   : > { %p5550_p11 = pmov %p5548_p3 }
 0x1b8   : > { %4497 = vsyncadd (%p5549_p13), [#allocation5], 4294967168 }
 0x1b9   : > { %4499 = dma.done.wait (%p5550_p11), [#allocation8], 48   ;;  %p5551_p12 = pmov %p5548_p3 }
 0x1ba   : > { %s1198_s25 = sand.u32 1, %s4786_s26   ;;  %s5127_s10 = sand.u32 1, %s4536_s0  }
 0x1bb   : > { %4501 = vsyncadd (%p5551_p12), [#allocation8], 4294967248  ;;  %s1199_s16 = scalar_lea.sflag [#allocation11], %s1198_s25  ;;  %p5552_p4 = scmp.ne.s32.totalorder %s5520_s11, 0 }
 0x1bd   : > { %4503 = dma.done.wait (%p5552_p4), %s1199_s16, 32  }
 0x1be   : > { %4505 = vsyncadd (%p5552_p4), %s1199_s16, 4294967264  ;;  %s1215_s17 = scalar_lea.sflag [#allocation14], %s1198_s25 }
 0x1bf   : > { %4507 = dma.done.wait (%p5552_p4), %s1215_s17, 32  }
 0x1c0   : > { %4509 = vsyncadd (%p5552_p4), %s1215_s17, 4294967264  ;;  %s1231_s28 = scalar_lea.sflag [#allocation17], %s1198_s25 }
 0x1c1   : > { %4511 = dma.done.wait (%p5552_p4), %s1231_s28, 32  }
 0x1c2   : > { %4513 = vsyncadd (%p5552_p4), %s1231_s28, 4294967264  ;;  %s1247_s2 = scalar_lea.sflag [#allocation20], %s1198_s25 }
 0x1c3   : > { %4515 = dma.done.wait (%p5552_p4), %s1247_s2, 32  }
 0x1c4   : > { %4517 = vsyncadd (%p5552_p4), %s1247_s2, 4294967264  ;;  %s1263_s23 = scalar_lea.sflag [#allocation23], %s1198_s25 }
 0x1c5   : > { %4519 = dma.done.wait (%p5552_p4), %s1263_s23, 32  }
 0x1c6   : > { %4521 = vsyncadd (%p5552_p4), %s1263_s23, 4294967264  ;;  %s1279_s16 = scalar_lea.sflag [#allocation26], %s5127_s10 }
 0x1c7   : > { %4523 = dma.done.wait (%p5552_p4), %s1279_s16, 16  }
 0x1c8   : > { %4525 = vsyncadd (%p5552_p4), %s1279_s16, 4294967280  ;;  %s5553_s25 = sld [smem:[#allocation40_spill]]  ;;  %s5554_s28 = sld [smem:[#allocation42_spill]] }
 0x1c9   : > { %s5555_s2 = sld [smem:[#allocation44_spill]]  ;;  %s5556_s22 = sld [smem:[#allocation45_spill]] }
 0x1ca   : > { %s5557_s7 = sld [smem:[#allocation47_spill]]  ;;  %s5558_s23 = sld [smem:[#allocation48_spill]] }
 0x1cb   : > { %s5559_s29 = sld [smem:[#allocation50_spill]]  ;;  %p1427_p6 = scmp.lt.s32.totalorder %s4786_s26, 1 }
 0x1cc   : > { %p5560_p5 = scmp.ne.s32.totalorder %s4786_s26, 0 }
 0x1cd   : > { %s5167_s6 = scalar_select %p1427_p6, %s4786_s26, 1 }
 0x1ce   : > { %1464 = sbr.rel (%p5560_p5) target bundleno = 688 (0x2b0), region = 204  ;;  %v1468_v1 = vld [vmem:[#allocation7] sm:$0x3] (!%p5560_p5)  ;;  %s5561_s8 = sld [smem:[#allocation37_spill]] (!%p5560_p5)  ;;  %vm1480_vm0 = vcmask (!%p5560_p5), 1041408   ;;  %v4593_v3 = vmov (!%p5560_p5), 0.0  }
 0x1cf   : > { %s3561_s17 = sshll.u32 %s5167_s6, 4  ;;  %s3566_s4 = sshll.u32 %s5167_s6, 5  ;;  %3624 = vmatprep.subr.bf16.mxu0 (!%p5560_p5), %v4593_v3  ;;  %v1482_v4 = vsel (!%p5560_p5), %vm1480_vm0, %v1468_v1, 0  ;;  %vm4594_vm1 = vmmov (!%p5560_p5), 0   ;;  %vm1476_vm2 = vcmask (!%p5560_p5), 31744   ;;  %vm1525_vm3 = vcmask (!%p5560_p5), 261120  }
 0x1d0   : > { %s5172_s1 = scalar_lea.vmem %s5553_s25, %s3561_s17  ;;  %s5175_s11 = scalar_lea.vmem %s5554_s28, %s3561_s17  ;;  %3626 = vmatprep.mubr.msk.bf16.mxu0 (!%p5560_p5), %vm4594_vm1, %v4593_v3  ;;  %3625 = vmatpush3.bf16.msra.mxu0 (!%p5560_p5), %v1482_v4  ;;  %v3497_v7 = vld [vmem:[#allocation9] ss:$0 sm:$0xff] (!%p5560_p5) }
 0x1d1   : > { %s5178_s16 = scalar_lea.vmem %s5555_s2, %s3561_s17  ;;  %s5181_s5 = scalar_lea.vmem %s5556_s22, %s3561_s17 }
 0x1d2   : > { %s5184_s15 = scalar_lea.vmem %s5557_s7, %s3561_s17  ;;  %s5187_s14 = scalar_lea.vmem %s5558_s23, %s3566_s4 }
 0x1d3   : > { %s1459_s3 = scalar_lea.vmem %s5559_s29, %s5167_s6 }
 0x1d4   : > { %v1465_v2 = vld [vmem:[%s5561_s8] sm:$0xff] (!%p5560_p5)  ;;  %v1466_v5 = vld [vmem:[%s5561_s8 + $0x8] sm:$0xff] (!%p5560_p5) }
 0x1d5   : > { %v1467_v6 = vpack.c.bf16 %v1466_v5, %v1465_v2 }
 0x1d7   : > { %3627 = vmatmul.mubr.msk.bf16.vlgmr.msra.gmra.mrb[0].mxu0 %vm1476_vm2, %v1467_v6 }
 0x2aa   : > { %v1518_v8 = vpop.f32.mrb[0].mxu0 }
 0x2ab   : > { %v1519_v9 = vadd.f32 %v3497_v7, %v1518_v8  ;;  %v3628_v10 = vpop.f32.mrb[1].mxu0 }
 0x2ac   : > { %v1521_v11 = vpop.f32.mrb[2].mxu0 }
 0x2ad   : > { %1526 = vst.msk [vmem:[#allocation2] sm:$0xff] %vm1525_vm3, %v1519_v9  ;;  %v1522_v12 = vadd.f32 %v3497_v7, %v1521_v11  ;;  %v3629_v13 = vpop.f32.mrb[3].mxu0 }
 0x2af   : > { %1527 = vst.msk [vmem:[#allocation2 + $0x8] sm:$0xff] %vm1525_vm3, %v1522_v12 }
 0x2b0 PF: > { %v3942_v14 = vld [vmem:[%s5175_s11] sm:$0xff]   ;;  %v4595_v15 = vmov 0.0   ;;  %v3944_v17 = vld [vmem:[%s5175_s11 + $0x8] sm:$0xff]   ;;  %vm4596_vm4 = vmmov 0   ;;  %vm1556_vm5 = vcmask 261120   ;;  %s5563_s29 = scalar_lea.vmem [#allocation12], %s5127_s10 }
 0x2b1   : > { %3638 = vmatprep.subr.bf16.mxu1 %v4595_v15  ;;  %3630 = vmatprep.subr.bf16.mxu0 %v4595_v15  ;;  %v3943_v16 = vld [vmem:[%s5172_s1] sm:$0xff]   ;;  %v3945_v18 = vld [vmem:[%s5172_s1 + $0x8] sm:$0xff]   ;;  %s5562_s1 = scalar_lea.vmem [#allocation10], %s5127_s10  ;;  %s4597_s7 = smov 64   ;;  %vm1780_vm6 = vcmask 130048   ;;  %vm2618_vm11 = vcmask 523264  }
 0x2b2   : > { %3639 = vmatpush3.bf16.msra.mxu1 %v3942_v14  ;;  %3642 = vmatprep.mubr.msk.bf16.mxu1 %vm4596_vm4, %v4595_v15  ;;  %v3946_v22 = vld [vmem:[%s5178_s16] sm:$0xff]   ;;  %v3947_v23 = vld [vmem:[%s5178_s16 + $0x8] sm:$0xff]   ;;  %s4598_s22 = smov 96   ;;  %s4599_s4 = smov 32  }
 0x2b3   : > { %3631 = vmatpush3.bf16.msra.mxu0 %v3943_v16  ;;  %3640 = vmatprep.subr.bf16.mxu1 %v4595_v15  ;;  %v3499_v24 = vld [vmem:[%s5562_s1] ss:$0 sm:$0xff]  ;;  %s5564_s17 = scalar_lea.vmem [#allocation13], %s5127_s10  ;;  %s5566_s25 = scalar_lea.vmem [#allocation16], %s5127_s10 }
 0x2b4   : > { %3632 = vmatprep.subr.bf16.mxu0 %v4595_v15  ;;  %v5205_v19 = vld [vmem:[#allocation2] sm:$0xff]  ;;  %3634 = vmatprep.mubr.msk.bf16.mxu0 %vm4596_vm4, %v4595_v15  ;;  %s5567_s28 = scalar_lea.vmem [#allocation18], %s5127_s10  ;;  %s5568_s2 = scalar_lea.vmem [#allocation19], %s5127_s10 }
 0x2b5   : > { %v3503_v25 = vld [vmem:[%s5563_s29] ss:$0 sm:$0xff]  ;;  %s5570_s23 = scalar_lea.vmem [#allocation22], %s5127_s10  ;;  %s5573_s16 = scalar_lea.vmem [#allocation25], %s5127_s10 }
 0x2b6   : > { %v5207_v20 = vld [vmem:[#allocation2 + $0x8] sm:$0xff]  ;;  %3641 = vmatpush3.bf16.msra.mxu1 %v3944_v17  ;;  %v3507_v43 = vld [vmem:[%s5564_s17] ss:$0 sm:$0xff]  ;;  %p3541_p2 = scmp.ne.s32.totalorder %s4786_s26, 1 }
 0x2b7   : > { %v5213_v21 = vpack.c.bf16 %v5207_v20, %v5205_v19  ;;  %3633 = vmatpush3.bf16.msra.mxu0 %v3945_v18  ;;  %3654 = vmatprep.subr.bf16.mxu1 %v4595_v15  ;;  %s5574_s1 = sld [smem:[#allocation51_spill]] (!%p3541_p2)  ;;  %vm4601_vm12 = vmmov (!%p3541_p2), 0   ;;  %s5577_s6 = sld [smem:[#allocation38_spill]] (!%p3541_p2)  ;;  %vm2827_vm15 = vcmask (!%p3541_p2), 15360   ;;  %vm3079_vm1 = vcmask (!%p3541_p2), 9216  }
 0x2b8   : > { %3646 = vmatprep.subr.bf16.mxu0 %v4595_v15  ;;  %s5578_s29 = sld [smem:[#allocation54_spill]] (!%p3541_p2) }
 0x2b9   : > { %3643 = vmatmul.mubr.msk.bf16.vlgmr.msra.gmra.mrb[0].mxu1 %vm1556_vm5, %v5213_v21 }
 0x2ba   : > { %3635 = vmatmul.mubr.msk.bf16.vlgmr.msra.gmra.mrb[0].mxu0 %vm1556_vm5, %v5213_v21  ;;  %3656 = vmatprep.mubr.msk.bf16.mxu1 %vm4596_vm4, %v4595_v15 }
 0x2bb   : > { %3650 = vmatprep.mubr.msk.bf16.mxu0 %vm4596_vm4, %v4595_v15  ;;  %3647 = vmatpush3.bf16.msra.mxu0 %v3946_v22 }
 0x2bc   : > { %3648 = vmatprep.subr.bf16.mxu0 %v4595_v15 }
 0x2bf   : > { %3649 = vmatpush3.bf16.msra.mxu0 %v3947_v23 }
 0x2c0   : > { %3660 = vmatprep.subr.bf16.mxu0 %v4595_v15 }
 0x2c2   : > { %3651 = vmatmul.mubr.msk.bf16.vlgmr.msra.gmra.mrb[4].mxu0 %vm1556_vm5, %v5213_v21 }
 0x2c3   : > { %3662 = vmatprep.mubr.msk.bf16.mxu0 %vm4596_vm4, %v4595_v15 }
 0x38c   : > { %v1660_v26 = vpop.f32.mrb[0].mxu1 }
 0x38d   : > { %v3644_v27 = vpop.f32.mrb[1].mxu1  ;;  %v1594_v28 = vpop.f32.mrb[0].mxu0  ;;  %v1661_v32 = vadd.f32 %v3503_v25, %v1660_v26 }
 0x38e   : > { %v1595_v29 = vadd.f32 %v3499_v24, %v1594_v28  ;;  %v1663_v30 = vpop.f32.mrb[2].mxu1  ;;  %v3636_v31 = vpop.f32.mrb[1].mxu0 }
 0x38f   : > { %v1664_v33 = vadd.f32 %v3503_v25, %v1663_v30  ;;  %v3645_v34 = vpop.f32.mrb[3].mxu1  ;;  %v1597_v35 = vpop.f32.mrb[2].mxu0 }
 0x390   : > { %v1601_v36 = vmul.f32 0.17677669, %v1595_v29  ;;  %v1598_v37 = vadd.f32 %v3499_v24, %v1597_v35  ;;  %v3637_v38 = vpop.f32.mrb[3].mxu0 }
 0x391   : > { %v1732_v39 = vpack.c.bf16 %v1664_v33, %v1661_v32 }
 0x392   : > { %v1602_v40 = vmul.f32 0.17677669, %v1598_v37  ;;  %v3568_v37 = vld [vmem:[#allocation4] sm:$0xff]  }
 0x393   : > { %1985 = vrot.lane.b32.xlu1 %v1732_v39, %s4597_s7  ;;  %1815 = vrot.lane.b32.xlu0 %v1732_v39, %s4598_s22  ;;  %v1737_v41 = vsel %vm1556_vm5, %v1732_v39, 0 }
 0x394   : > { %v1731_v42 = vpack.c.bf16 %v1602_v40, %v1601_v36  ;;  %3655 = vmatpush3.bf16.xpose.msra.mxu1 %v1737_v41  ;;  %v3569_v41 = vunpack.c.l.bf16 %v3568_v37 }
 0x395   : > { %3666 = vmatprep.subr.bf16.mxu1 %v4595_v15  ;;  %v1724_v44 = vpop.f32.mrb[4].mxu0 }
 0x396   : > { %v1725_v45 = vadd.f32 %v3507_v43, %v1724_v44  ;;  %v3652_v46 = vpop.f32.mrb[5].mxu0 }
 0x397   : > { %1983 = vrot.lane.b32.xlu1 %v1731_v42, %s4597_s7  ;;  %1812 = vrot.lane.b32.xlu0 %v1731_v42, %s4598_s22  ;;  %v1727_v47 = vpop.f32.mrb[6].mxu0 }
 0x398   : > { %v1728_v48 = vadd.f32 %v3507_v43, %v1727_v47  ;;  %v3653_v49 = vpop.f32.mrb[7].mxu0  ;;  %v3570_v43 = vunpack.c.h.bf16 %v3568_v37 }
 0x39a   : > { %v5250_v50 = vpack.c.bf16 %v1728_v48, %v1725_v45 }
 0x39b   : > { %2110 = vrot.lane.b32.xlu1 %v1731_v42, %s4599_s4  ;;  %2112 = vrot.lane.b32.xlu0 %v1732_v39, %s4599_s4 }
 0x39c   : > { %3657 = vmatmul.mubr.msk.bf16.vlgmr.msra.gmra.mrb[4].mxu1 %vm1556_vm5, %v1731_v42 }
 0x39d   : > { %3668 = vmatprep.mubr.msk.bf16.mxu1 %vm4596_vm4, %v4595_v15 }
 0x405   : > { %v1816_v51 = vpop.permute.xlu0 %1815  ;;  %v1986_v53 = vpop.permute.xlu1 %1985 }
 0x406   : > { %v1821_v52 = vsel %vm1556_vm5, %v1816_v51, 0  ;;  %v1991_v55 = vsel %vm1556_vm5, %v1986_v53, 0 }
 0x407   : > { %3661 = vmatpush3.bf16.xpose.msra.mxu0 %v1821_v52 }
 0x408   : > { %3678 = vmatprep.subr.bf16.mxu0 %v4595_v15 }
 0x409   : > { %v1813_v54 = vpop.permute.xlu0 %1812  ;;  %v1984_v57 = vpop.permute.xlu1 %1983 }
 0x40d   : > { %v2113_v56 = vpop.permute.xlu0 %2112  ;;  %v2111_v59 = vpop.permute.xlu1 %2110 }
 0x40e   : > { %3663 = vmatmul.mubr.msk.bf16.vlgmr.msra.gmra.mrb[8].mxu0 %vm1556_vm5, %v1813_v54  ;;  %v2118_v58 = vsel %vm1556_vm5, %v2113_v56, 0 }
 0x40f   : > { %3679 = vmatpush3.bf16.xpose.msra.mxu0 %v1991_v55  ;;  %3680 = vmatprep.mubr.msk.bf16.mxu0 %vm4596_vm4, %v4595_v15 }
 0x410   : > { %3690 = vmatprep.subr.bf16.mxu0 %v4595_v15 }
 0x416   : > { %3681 = vmatmul.mubr.msk.bf16.vlgmr.msra.gmra.mrb[12].mxu0 %vm1556_vm5, %v1984_v57 }
 0x417   : > { %3691 = vmatpush3.bf16.xpose.msra.mxu0 %v2118_v58  ;;  %3692 = vmatprep.mubr.msk.bf16.mxu0 %vm4596_vm4, %v4595_v15 }
 0x418   : > { %3702 = vmatprep.subr.bf16.mxu0 %v4595_v15 }
 0x41e   : > { %3693 = vmatmul.mubr.msk.bf16.vlgmr.msra.gmra.mrb[16].mxu0 %vm1556_vm5, %v2111_v59 }
 0x41f   : > { %3706 = vmatprep.mubr.msk.bf16.mxu0 %vm4596_vm4, %v4595_v15 }
 0x46f   : > { %v1773_v60 = vpop.f32.mrb[4].mxu1 }
 0x470   : > { %v3658_v61 = vpop.f32.mrb[5].mxu1  ;;  %v1781_v6 = vsel %vm1780_vm6, %v1773_v60, -inf }
 0x471   : > { %v1776_v62 = vpop.f32.mrb[6].mxu1 }
 0x472   : > { %v3659_v63 = vpop.f32.mrb[7].mxu1  ;;  %v1784_v9 = vsel %vm1780_vm6, %v1776_v62, -inf }
 0x4e1   : > { %v1857_v0 = vpop.f32.mrb[8].mxu0 }
 0x4e2   : > { %v3664_v1 = vpop.f32.mrb[9].mxu0  ;;  %v1864_v2 = vsel %vm1780_vm6, %v1857_v0, -inf }
 0x4e3   : > { %1865 = vmax.xlane.f32.xlu0 %v1864_v2  ;;  %v1860_v3 = vpop.f32.mrb[10].mxu0 }
 0x4e4   : > { %v3665_v4 = vpop.f32.mrb[11].mxu0  ;;  %v1867_v5 = vsel %vm1780_vm6, %v1860_v3, -inf }
 0x4e5   : > { %1868 = vmax.xlane.f32.xlu1 %v1867_v5 }
 0x4e7   : > { %1782 = vmax.xlane.f32.xlu0 %v1781_v6 }
 0x4e9   : > { %v2027_v7 = vpop.f32.mrb[12].mxu0 }
 0x4ea   : > { %v3682_v8 = vpop.f32.mrb[13].mxu0  ;;  %v2034_v10 = vsel %vm1780_vm6, %v2027_v7, -inf }
 0x4eb   : > { %1785 = vmax.xlane.f32.xlu0 %v1784_v9  ;;  %2035 = vmax.xlane.f32.xlu1 %v2034_v10  ;;  %v2030_v11 = vpop.f32.mrb[14].mxu0 }
 0x4ec   : > { %v3683_v12 = vpop.f32.mrb[15].mxu0  ;;  %v2037_v13 = vsel %vm1780_vm6, %v2030_v11, -inf }
 0x4ed   : > { %v3948_v12 = vld [vmem:[%s5181_s5] sm:$0xff]  }
 0x4ee   : > { %3703 = vmatpush3.bf16.msra.mxu0 %v3948_v12 }
 0x4ef   : > { %2038 = vmax.xlane.f32.xlu0 %v2037_v13  ;;  %v3949_v13 = vld [vmem:[%s5181_s5 + $0x8] sm:$0xff]   ;;  %3704 = vmatprep.subr.bf16.mxu0 %v4595_v15  ;;  %s5565_s5 = scalar_lea.vmem [#allocation15], %s5127_s10 }
 0x4f1   : > { %v2154_v14 = vpop.f32.mrb[16].mxu0 }
 0x4f2   : > { %v3694_v16 = vpop.f32.mrb[17].mxu0  ;;  %v2161_v17 = vsel %vm1780_vm6, %v2154_v14, -inf  ;;  %3705 = vmatpush3.bf16.msra.mxu0 %v3949_v13 }
 0x4f3   : > { %2162 = vmax.xlane.f32.xlu1 %v2161_v17  ;;  %v2157_v18 = vpop.f32.mrb[18].mxu0  ;;  %3710 = vmatprep.subr.bf16.mxu0 %v4595_v15 }
 0x4f4   : > { %v3695_v22 = vpop.f32.mrb[19].mxu0  ;;  %v2164_v23 = vsel %vm1780_vm6, %v2157_v18, -inf }
 0x4f5   : > { %2165 = vmax.xlane.f32.xlu0 %v2164_v23  ;;  %3707 = vmatmul.mubr.msk.bf16.vlgmr.msra.gmra.mrb[20].mxu0 %vm1556_vm5, %v5213_v21 }
 0x4f6   : > { %3714 = vmatprep.mubr.msk.bf16.mxu0 %vm4596_vm4, %v4595_v15 }
 0x570   : > { %v1866_v24 = vpop.xlane.xlu0 %1865 }
 0x571   : > { %v1870_v25 = vsub.f32 %v1857_v0, %v1866_v24 }
 0x572   : > { %v1869_v26 = vpop.xlane.xlu1 %1868 }
 0x573   : > { %v1872_v27 = vmul.f32 1.442695, %v1870_v25  ;;  %v1871_v28 = vsub.f32 %v1860_v3, %v1869_v26 }
 0x574   : > { %v1783_v29 = vpop.xlane.xlu0 %1782 }
 0x575   : > { %3956 = vpow2.f32 %v1872_v27  ;;  %v1874_v30 = vmul.f32 1.442695, %v1871_v28  ;;  %v1787_v31 = vsub.f32 %v1773_v60, %v1783_v29 }
 0x577   : > { %3958 = vpow2.f32 %v1874_v30  ;;  %v1789_v32 = vmul.f32 1.442695, %v1787_v31 }
 0x578   : > { %v1786_v33 = vpop.xlane.xlu0 %1785  ;;  %v2036_v34 = vpop.xlane.xlu1 %2035 }
 0x579   : > { %3960 = vpow2.f32 %v1789_v32  ;;  %v1788_v35 = vsub.f32 %v1776_v62, %v1786_v33  ;;  %v2040_v36 = vsub.f32 %v2027_v7, %v2036_v34 }
 0x57b   : > { %v1791_v38 = vmul.f32 1.442695, %v1788_v35  ;;  %v2042_v39 = vmul.f32 1.442695, %v2040_v36 }
 0x57c   : > { %v2039_v40 = vpop.xlane.xlu0 %2038 }
 0x57d   : > { %3962 = vpow2.f32 %v1791_v38  ;;  %v2041_v42 = vsub.f32 %v2030_v11, %v2039_v40 }
 0x57e   : > { %3964 = vpow2.f32 %v2042_v39 }
 0x57f   : > { %v3957_v44 = vpop.eup %3956  ;;  %v2044_v45 = vmul.f32 1.442695, %v2041_v42 }
 0x580   : > { %v2163_v46 = vpop.xlane.xlu1 %2162  ;;  %v5275_v47 = vmul.f32 %v3957_v44, %v3569_v41 }
 0x581   : > { %v3959_v48 = vpop.eup %3958  ;;  %3966 = vpow2.f32 %v2044_v45  ;;  %v2167_v49 = vsub.f32 %v2154_v14, %v2163_v46 }
 0x582   : > { %v2166_v51 = vpop.xlane.xlu0 %2165  ;;  %v1878_v52 = vsel %vm1780_vm6, %v5275_v47, 0.0  ;;  %v5279_v53 = vmul.f32 %v3959_v48, %v3570_v43 }
 0x583   : > { %v3961_v54 = vpop.eup %3960  ;;  %v2169_v55 = vmul.f32 1.442695, %v2167_v49  ;;  %v2168_v56 = vsub.f32 %v2157_v18, %v2166_v51  ;;  %1879 = vadd.xlane.f32.xlu1 %v1878_v52 }
 0x584   : > { %v1881_v57 = vsel %vm1780_vm6, %v5279_v53, 0.0  ;;  %v5283_v58 = vmul.f32 %v3961_v54, %v3569_v41 }
 0x585   : > { %3968 = vpow2.f32 %v2169_v55  ;;  %v2171_v59 = vmul.f32 1.442695, %v2168_v56  ;;  %1882 = vadd.xlane.f32.xlu0 %v1881_v57 }
 0x586   : > { %v1797_v60 = vsel %vm1780_vm6, %v5283_v58, 0.0 }
 0x587   : > { %v3963_v61 = vpop.eup %3962  ;;  %3970 = vpow2.f32 %v2171_v59  ;;  %1798 = vadd.xlane.f32.xlu1 %v1797_v60  ;;  %v3519_v60 = vld [vmem:[%s5565_s5] ss:$0 sm:$0xff] }
 0x588   : > { %v3965_v62 = vpop.eup %3964  ;;  %v1796_v63 = vmul.f32 %v3963_v61, %v3570_v43 }
 0x589   : > { %v5287_v0 = vmul.f32 %v3965_v62, %v3569_v41 }
 0x58a   : > { %v1800_v1 = vsel %vm1780_vm6, %v1796_v63, 0.0 }
 0x58b   : > { %v3967_v2 = vpop.eup %3966  ;;  %v2048_v3 = vsel %vm1780_vm6, %v5287_v0, 0.0  ;;  %1801 = vadd.xlane.f32.xlu0 %v1800_v1 }
 0x58c   : > { %2049 = vadd.xlane.f32.xlu1 %v2048_v3  ;;  %v5292_v4 = vmul.f32 %v3967_v2, %v3570_v43 }
 0x58e   : > { %v2051_v5 = vsel %vm1780_vm6, %v5292_v4, 0.0 }
 0x58f   : > { %v3969_v6 = vpop.eup %3968  ;;  %2052 = vadd.xlane.f32.xlu0 %v2051_v5 }
 0x590   : > { %v5296_v7 = vmul.f32 %v3969_v6, %v3569_v41 }
 0x591   : > { %v3971_v8 = vpop.eup %3970 }
 0x592   : > { %v2175_v9 = vsel %vm1780_vm6, %v5296_v7, 0.0  ;;  %v5300_v10 = vmul.f32 %v3971_v8, %v3570_v43 }
 0x593   : > { %2176 = vadd.xlane.f32.xlu0 %v2175_v9 }
 0x594   : > { %v2178_v11 = vsel %vm1780_vm6, %v5300_v10, 0.0 }
 0x597   : > { %2179 = vadd.xlane.f32.xlu0 %v2178_v11 }
 0x59d   : > { %1892 = vrot.lane.b32.xlu1 %v5250_v50, %s4598_s22  ;;  %s5580_s22 = sld [smem:[#allocation55_spill]] (!%p3541_p2) }
 0x5a1   : > { %2188 = vrot.lane.b32.xlu1 %v5250_v50, %s4599_s4  ;;  %s5581_s4 = sld [smem:[#allocation57_spill]] (!%p3541_p2) }
 0x5ad   : > { %2061 = vrot.lane.b32.xlu0 %v5250_v50, %s4597_s7  ;;  %s5579_s7 = sld [smem:[#allocation56_spill]] (!%p3541_p2) }
 0x5c8   : > { %v2296_v56 = vpop.f32.mrb[20].mxu0 }
 0x5c9   : > { %v3708_v57 = vpop.f32.mrb[21].mxu0  ;;  %v2297_v61 = vadd.f32 %v3519_v60, %v2296_v56 }
 0x610   : > { %v1880_v14 = vpop.xlane.xlu1 %1879 }
 0x611   : > { %v1884_v16 = vmax.f32 %v1880_v14, 1e-30 }
 0x612   : > { %v1883_v17 = vpop.xlane.xlu0 %1882 }
 0x613   : > { %3972 = vrcp.f32 %v1884_v16  ;;  %v1885_v18 = vmax.f32 %v1883_v17, 1e-30 }
 0x614   : > { %v1799_v22 = vpop.xlane.xlu1 %1798 }
 0x615   : > { %3974 = vrcp.f32 %v1885_v18  ;;  %v1803_v26 = vmax.f32 %v1799_v22, 1e-30 }
 0x618   : > { %v1802_v23 = vpop.xlane.xlu0 %1801 }
 0x619   : > { %v2050_v24 = vpop.xlane.xlu1 %2049  ;;  %v1804_v25 = vmax.f32 %v1802_v23, 1e-30 }
 0x61a   : > { %v2054_v36 = vmax.f32 %v2050_v24, 1e-30 }
 0x61b   : > { %3976 = vrcp.f32 %v1804_v25 }
 0x61c   : > { %v2053_v29 = vpop.xlane.xlu0 %2052  ;;  %3978 = vrcp.f32 %v1803_v26 }
 0x61d   : > { %v3973_v27 = vpop.eup %3972  ;;  %v1893_v28 = vpop.permute.xlu1 %1892  ;;  %v2055_v34 = vmax.f32 %v2053_v29, 1e-30 }
 0x61e   : > { %3667 = vmatpush3.bf16.msra.mxu1 %v1893_v28  ;;  %v1888_v30 = vmul.f32 %v3973_v27, %v5275_v47 }
 0x61f   : > { %v3975_v21 = vpop.eup %3974  ;;  %3672 = vmatprep.subr.bf16.mxu1 %v4595_v15  ;;  %3980 = vrcp.f32 %v2055_v34 }
 0x620   : > { %v1889_v31 = vmul.f32 %v3975_v21, %v5279_v53  ;;  %v2177_v33 = vpop.xlane.xlu0 %2176  ;;  %3982 = vrcp.f32 %v2054_v36 }
 0x621   : > { %v2181_v44 = vmax.f32 %v2177_v33, 1e-30  ;;  %v2189_v49 = vpop.permute.xlu1 %2188 }
 0x622   : > { %v1890_v32 = vpack.c.bf16 %v1889_v31, %v1888_v30 }
 0x624   : > { %3669 = vmatmul.mubr.msk.bf16.vlgmr.msra.gmra.mrb[8].mxu1 %vm1780_vm6, %v1890_v32  ;;  %v2180_v39 = vpop.xlane.xlu0 %2179 }
 0x625   : > { %3673 = vmatpush3.bf16.msra.mxu1 %v5250_v50  ;;  %3674 = vmatprep.mubr.msk.bf16.mxu1 %vm4596_vm4, %v4595_v15  ;;  %v3977_v35 = vpop.eup %3976  ;;  %v2182_v43 = vmax.f32 %v2180_v39, 1e-30 }
 0x626   : > { %3684 = vmatprep.subr.bf16.mxu1 %v4595_v15  ;;  %v3979_v37 = vpop.eup %3978  ;;  %v1808_v38 = vmul.f32 %v3977_v35, %v1796_v63  ;;  %v3523_v63 = vld [vmem:[%s5566_s25] ss:$0 sm:$0xff] }
 0x627   : > { %v1807_v40 = vmul.f32 %v3979_v37, %v5283_v58  ;;  %3984 = vrcp.f32 %v2182_v43  ;;  %v2299_v58 = vpop.f32.mrb[22].mxu0 }
 0x628   : > { %v2062_v42 = vpop.permute.xlu0 %2061  ;;  %3986 = vrcp.f32 %v2181_v44  ;;  %v3709_v59 = vpop.f32.mrb[23].mxu0  ;;  %v2300_v8 = vadd.f32 %v3519_v60, %v2299_v58 }
 0x629   : > { %v1809_v41 = vpack.c.bf16 %v1808_v38, %v1807_v40  ;;  %v3981_v50 = vpop.eup %3980 }
 0x62a   : > { %v3983_v45 = vpop.eup %3982  ;;  %v2059_v46 = vmul.f32 %v3981_v50, %v5292_v4 }
 0x62b   : > { %v2058_v47 = vmul.f32 %v3983_v45, %v5287_v0  ;;  %v3524_v0 = vld [vmem:[%s5567_s28] ss:$0 sm:$0xff] }
 0x62c   : > { %v2326_v13 = vmul.f32 %v3524_v0, %v2300_v8 }
 0x62d   : > { %v2060_v48 = vpack.c.bf16 %v2059_v46, %v2058_v47 }
 0x62e   : > { %v2330_v14 = vsel %vm1556_vm5, %v2326_v13, 0.0 }
 0x630   : > { %3675 = vmatmul.mubr.msk.bf16.vlgmr.msra.gmra.mrb[8].mxu1 %vm1780_vm6, %v1809_v41 }
 0x631   : > { %3685 = vmatpush3.bf16.msra.mxu1 %v2062_v42  ;;  %3686 = vmatprep.mubr.msk.bf16.mxu1 %vm4596_vm4, %v4595_v15  ;;  %v3985_v51 = vpop.eup %3984 }
 0x632   : > { %3696 = vmatprep.subr.bf16.mxu1 %v4595_v15  ;;  %v3987_v52 = vpop.eup %3986  ;;  %v2186_v53 = vmul.f32 %v3985_v51, %v5300_v10 }
 0x633   : > { %v2185_v54 = vmul.f32 %v3987_v52, %v5296_v7  ;;  %v2325_v7 = vmul.f32 %v3524_v0, %v2297_v61 }
 0x635   : > { %v2187_v55 = vpack.c.bf16 %v2186_v53, %v2185_v54  ;;  %v2327_v12 = vsel %vm1556_vm5, %v2325_v7, 0.0 }
 0x63c   : > { %3687 = vmatmul.mubr.msk.bf16.vlgmr.msra.gmra.mrb[8].mxu1 %vm1780_vm6, %v2060_v48 }
 0x63d   : > { %3697 = vmatpush3.bf16.msra.mxu1 %v2189_v49  ;;  %3698 = vmatprep.mubr.msk.bf16.mxu1 %vm4596_vm4, %v4595_v15 }
 0x63e   : > { %3718 = vmatprep.subr.bf16.mxu1 %v4595_v15 }
 0x648   : > { %3699 = vmatmul.mubr.msk.bf16.vlgmr.msra.gmra.mrb[8].mxu1 %vm1780_vm6, %v2187_v55 }
 0x649   : > { %3726 = vmatprep.mubr.msk.bf16.mxu1 %vm4596_vm4, %v4595_v15 }
 0x71b   : > { %v2228_v62 = vpop.f32.mrb[8].mxu1 }
 0x71c   : > { %v2237_v1 = vmul.f32 0.25, %v2228_v62  ;;  %v3700_v2 = vpop.f32.mrb[9].mxu1 }
 0x71d   : > { %v2231_v3 = vpop.f32.mrb[10].mxu1 }
 0x71e   : > { %v2238_v4 = vmul.f32 0.25, %v2231_v3  ;;  %v3701_v5 = vpop.f32.mrb[11].mxu1  ;;  %v2310_v6 = vmul.f32 %v3523_v63, %v2237_v1 }
 0x720   : > { %v2312_v9 = vsel %vm1556_vm5, %v2310_v6, 0.0  ;;  %v2311_v10 = vmul.f32 %v3523_v63, %v2238_v4 }
 0x721   : > { %2313 = vadd.xlane.f32.xlu1 %v2312_v9 }
 0x722   : > { %v2315_v11 = vsel %vm1556_vm5, %v2311_v10, 0.0 }
 0x723   : > { %2316 = vadd.xlane.f32.xlu0 %v2315_v11 }
 0x725   : > { %2328 = vadd.xlane.f32.xlu1 %v2327_v12 }
 0x729   : > { %2331 = vadd.xlane.f32.xlu1 %v2330_v14 }
 0x7ae   : > { %v2314_v16 = vpop.xlane.xlu1 %2313 }
 0x7b0   : > { %v2317_v23 = vpop.xlane.xlu0 %2316 }
 0x7b2   : > { %v2329_v17 = vpop.xlane.xlu1 %2328 }
 0x7b3   : > { %v2333_v18 = vadd.f32 %v2329_v17, %v2314_v16 }
 0x7b5   : > { %v3525_v22 = vmul.f32 -1.442695, %v2333_v18 }
 0x7b6   : > { %v2332_v24 = vpop.xlane.xlu1 %2331 }
 0x7b7   : > { %3988 = vpow2.f32 %v3525_v22  ;;  %v2334_v25 = vadd.f32 %v2332_v24, %v2317_v23 }
 0x7b9   : > { %v3526_v26 = vmul.f32 -1.442695, %v2334_v25 }
 0x7bb   : > { %3990 = vpow2.f32 %v3526_v26 }
 0x7c1   : > { %v3989_v27 = vpop.eup %3988 }
 0x7c2   : > { %v2341_v28 = vadd.f32 1.0, %v3989_v27 }
 0x7c4   : > { %3992 = vrcp.f32 %v2341_v28 }
 0x7c5   : > { %v3991_v29 = vpop.eup %3990 }
 0x7c6   : > { %v2342_v21 = vadd.f32 1.0, %v3991_v29 }
 0x7c8   : > { %3994 = vrcp.f32 %v2342_v21 }
 0x7ce   : > { %v3993_v30 = vpop.eup %3992 }
 0x7cf   : > { %v2349_v31 = vsub.f32 1.0, %v3993_v30  ;;  %v2347_v32 = vmul.f32 %v3993_v30, %v2297_v61 }
 0x7d1   : > { %v2351_v33 = vmul.f32 %v2349_v31, %v2237_v1 }
 0x7d2   : > { %v3995_v34 = vpop.eup %3994 }
 0x7d3   : > { %v2353_v35 = vadd.f32 %v2351_v33, %v2347_v32  ;;  %v2350_v36 = vsub.f32 1.0, %v3995_v34  ;;  %v2348_v38 = vmul.f32 %v3995_v34, %v2300_v8 }
 0x7d5   : > { %v2357_v37 = vmul.f32 0.70710677, %v2353_v35  ;;  %v2352_v39 = vmul.f32 %v2350_v36, %v2238_v4  ;;  %v2355_v22 = vmul.f32 0.5, %v2353_v35 }
 0x7d7   : > { %v2359_v40 = vand.u32 2147483647, %v2357_v37  ;;  %v2354_v41 = vadd.f32 %v2352_v39, %v2348_v38  ;;  %vm2399_vm7 = vcmp.ge.f32.partialorder %v2357_v37, 0.0 }
 0x7d9   : > { %v2361_v42 = vmul.f32 0.3275911, %v2359_v40  ;;  %v2358_v43 = vmul.f32 0.70710677, %v2354_v41  ;;  %v2387_v47 = vsub.f32 0.0, %v2359_v40  ;;  %v2356_v28 = vmul.f32 0.5, %v2354_v41 }
 0x7db   : > { %v2363_v50 = vadd.f32 1.0, %v2361_v42  ;;  %v2360_v44 = vand.u32 2147483647, %v2358_v43  ;;  %v2389_v49 = vmul.f32 %v2387_v47, %v2359_v40  ;;  %vm2400_vm8 = vcmp.ge.f32.partialorder %v2358_v43, 0.0  ;;  %v3951_v42 = vld [vmem:[%s5184_s15 + $0x8] sm:$0xff]  }
 0x7dd   : > { %3996 = vrcp.f32 %v2363_v50  ;;  %v2362_v45 = vmul.f32 0.3275911, %v2360_v44  ;;  %v2388_v51 = vsub.f32 0.0, %v2360_v44  ;;  %v2391_v55 = vmul.f32 1.442695, %v2389_v49 }
 0x7df   : > { %v2364_v46 = vadd.f32 1.0, %v2362_v45  ;;  %v2390_v56 = vmul.f32 %v2388_v51, %v2360_v44  ;;  %v3527_v51 = vld [vmem:[%s5568_s2] ss:$0 sm:$0xff] }
 0x7e1   : > { %3998 = vrcp.f32 %v2364_v46  ;;  %v2393_v61 = vmul.f32 1.442695, %v2390_v56 }
 0x7e2   : > { %4000 = vpow2.f32 %v2391_v55 }
 0x7e3   : > { %4002 = vpow2.f32 %v2393_v61  ;;  %v3953_v61 = vld [vmem:[%s5187_s14 + $0x8] sm:$0xff]  }
 0x7e7   : > { %v3997_v48 = vpop.eup %3996 }
 0x7e8   : > { %v2369_v52 = vmul.f32 1.0614054, %v3997_v48 }
 0x7ea   : > { %v2371_v53 = vadd.f32 -1.4531521, %v2369_v52 }
 0x7eb   : > { %v3999_v54 = vpop.eup %3998 }
 0x7ec   : > { %v2373_v57 = vmul.f32 %v3997_v48, %v2371_v53  ;;  %v2370_v58 = vmul.f32 1.0614054, %v3999_v54  ;;  %v4001_v8 = vpop.eup %4000 }
 0x7ed   : > { %v4003_v13 = vpop.eup %4002 }
 0x7ee   : > { %v2375_v59 = vadd.f32 1.4214138, %v2373_v57  ;;  %v2372_v60 = vadd.f32 -1.4531521, %v2370_v58 }
 0x7f0   : > { %v2377_v62 = vmul.f32 %v3997_v48, %v2375_v59  ;;  %v2374_v63 = vmul.f32 %v3999_v54, %v2372_v60  ;;  %v3952_v60 = vld [vmem:[%s5187_s14] sm:$0xff]  }
 0x7f1   : > { %3719 = vmatpush3.bf16.msra.mxu1 %v3952_v60 }
 0x7f2   : > { %v2379_v0 = vadd.f32 -0.28449672, %v2377_v62  ;;  %v2376_v1 = vadd.f32 1.4214138, %v2374_v63  ;;  %3720 = vmatprep.subr.bf16.mxu1 %v4595_v15  ;;  %v3954_v62 = vld [vmem:[%s5187_s14 + $0x10] sm:$0xff]   ;;  %v3955_v63 = vld [vmem:[%s5187_s14 + $0x18] sm:$0xff]  }
 0x7f3   : > { %s5571_s14 = scalar_lea.vmem [#allocation24], %s5127_s10 }
 0x7f4   : > { %v2381_v2 = vmul.f32 %v3997_v48, %v2379_v0  ;;  %v2378_v3 = vmul.f32 %v3999_v54, %v2376_v1  ;;  %v3529_v0 = vld [vmem:[%s5570_s23] ss:$0 sm:$0xff] }
 0x7f5   : > { %3721 = vmatpush3.bf16.msra.mxu1 %v3953_v61  ;;  %v3533_v60 = vld [vmem:[%s5571_s14] ss:$0 sm:$0xff] }
 0x7f6   : > { %v2383_v4 = vadd.f32 0.2548296, %v2381_v2  ;;  %v2380_v5 = vadd.f32 -0.28449672, %v2378_v3  ;;  %3722 = vmatprep.subr.bf16.mxu1 %v4595_v15 }
 0x7f8   : > { %v2385_v6 = vmul.f32 %v3997_v48, %v2383_v4  ;;  %v2382_v7 = vmul.f32 %v3999_v54, %v2380_v5 }
 0x7f9   : > { %3723 = vmatpush3.bf16.msra.mxu1 %v3954_v62 }
 0x7fa   : > { %v2395_v9 = vmul.f32 %v4001_v8, %v2385_v6  ;;  %v2384_v10 = vadd.f32 0.2548296, %v2382_v7  ;;  %3724 = vmatprep.subr.bf16.mxu1 %v4595_v15 }
 0x7fc   : > { %v2397_v11 = vsub.f32 1.0, %v2395_v9  ;;  %v2386_v12 = vmul.f32 %v3999_v54, %v2384_v10 }
 0x7fd   : > { %3725 = vmatpush3.bf16.msra.mxu1 %v3955_v63 }
 0x7fe   : > { %v2401_v14 = vsub.f32 0.0, %v2397_v11  ;;  %v2396_v16 = vmul.f32 %v4003_v13, %v2386_v12 }
 0x800   : > { %v2403_v17 = vsel %vm2399_vm7, %v2397_v11, %v2401_v14  ;;  %v2398_v18 = vsub.f32 1.0, %v2396_v16 }
 0x801   : > { %v2405_v23 = vadd.f32 1.0, %v2403_v17 }
 0x802   : > { %v2402_v24 = vsub.f32 0.0, %v2398_v18 }
 0x803   : > { %v2407_v25 = vmul.f32 %v2405_v23, %v2355_v22 }
 0x804   : > { %v2404_v26 = vsel %vm2400_vm8, %v2398_v18, %v2402_v24 }
 0x805   : > { %v2409_v27 = vadd.f32 %v2407_v25, %v5205_v19  ;;  %v2406_v29 = vadd.f32 1.0, %v2404_v26 }
 0x807   : > { %v2413_v21 = vsel %vm1556_vm5, %v2409_v27, 0.0  ;;  %v2408_v30 = vmul.f32 %v2406_v29, %v2356_v28 }
 0x808   : > { %2414 = vadd.xlane.f32.xlu0 %v2413_v21 }
 0x809   : > { %v2410_v31 = vadd.f32 %v2408_v30, %v5207_v20  ;;  %v3950_v20 = vld [vmem:[%s5184_s15] sm:$0xff]   ;;  %s5569_s15 = scalar_lea.vmem [#allocation21], %s5127_s10  ;;  %s5575_s10 = sld [smem:[#allocation52_spill]] (!%p3541_p2) }
 0x80a   : > { %3711 = vmatpush3.bf16.msra.mxu0 %v3950_v20  ;;  %v3528_v55 = vld [vmem:[%s5569_s15] ss:$0 sm:$0xff] }
 0x80b   : > { %v2416_v32 = vsel %vm1556_vm5, %v2410_v31, 0.0  ;;  %3712 = vmatprep.subr.bf16.mxu0 %v4595_v15 }
 0x80c   : > { %2417 = vadd.xlane.f32.xlu1 %v2416_v32 }
 0x80e   : > { %3713 = vmatpush3.bf16.msra.mxu0 %v3951_v42 }
 0x895   : > { %v2415_v33 = vpop.xlane.xlu0 %2414 }
 0x896   : > { %v2420_v34 = vmul.f32 0.03125, %v2415_v33 }
 0x898   : > { %v2422_v35 = vsub.f32 %v2409_v27, %v2420_v34 }
 0x899   : > { %v2418_v36 = vpop.xlane.xlu1 %2417 }
 0x89a   : > { %v2421_v37 = vmul.f32 0.03125, %v2418_v36  ;;  %v2424_v38 = vmul.f32 %v2422_v35, %v2422_v35 }
 0x89c   : > { %v2423_v19 = vsub.f32 %v2410_v31, %v2421_v37  ;;  %v2426_v39 = vsel %vm1556_vm5, %v2424_v38, 0.0 }
 0x89d   : > { %2427 = vadd.xlane.f32.xlu0 %v2426_v39 }
 0x89e   : > { %v2425_v40 = vmul.f32 %v2423_v19, %v2423_v19 }
 0x8a0   : > { %v2429_v41 = vsel %vm1556_vm5, %v2425_v40, 0.0 }
 0x8a1   : > { %2430 = vadd.xlane.f32.xlu1 %v2429_v41 }
 0x92a   : > { %v2428_v43 = vpop.xlane.xlu0 %2427 }
 0x92b   : > { %v2432_v50 = vmul.f32 0.03125, %v2428_v43 }
 0x92d   : > { %v2434_v44 = vadd.f32 1e-05, %v2432_v50 }
 0x92e   : > { %v2431_v45 = vpop.xlane.xlu1 %2430 }
 0x92f   : > { %4004 = vrsqrt.f32 %v2434_v44  ;;  %v2433_v46 = vmul.f32 0.03125, %v2431_v45 }
 0x931   : > { %v2435_v47 = vadd.f32 1e-05, %v2433_v46 }
 0x933   : > { %4006 = vrsqrt.f32 %v2435_v47 }
 0x939   : > { %v4005_v48 = vpop.eup %4004 }
 0x93a   : > { %v2438_v49 = vmul.f32 %v4005_v48, %v2422_v35 }
 0x93c   : > { %v2446_v53 = vmul.f32 %v3527_v51, %v2438_v49 }
 0x93d   : > { %v4007_v52 = vpop.eup %4006 }
 0x93e   : > { %v2439_v54 = vmul.f32 %v4007_v52, %v2423_v19  ;;  %v5365_v57 = vadd.f32 %v3528_v55, %v2446_v53 }
 0x940   : > { %v2447_v56 = vmul.f32 %v3527_v51, %v2439_v54 }
 0x942   : > { %v5367_v58 = vadd.f32 %v3528_v55, %v2447_v56 }
 0x944   : > { %v2456_v59 = vpack.c.bf16 %v5367_v58, %v5365_v57 }
 0x946   : > { %3715 = vmatmul.mubr.msk.bf16.vlgmr.msra.gmra.mrb[24].mxu0 %vm1556_vm5, %v2456_v59 }
 0xa19   : > { %v2517_v1 = vpop.f32.mrb[24].mxu0 }
 0xa1a   : > { %v2518_v2 = vadd.f32 %v3529_v0, %v2517_v1  ;;  %v3716_v3 = vpop.f32.mrb[25].mxu0 }
 0xa1b   : > { %v2520_v4 = vpop.f32.mrb[26].mxu0 }
 0xa1c   : > { %v2526_v5 = vmul.f32 0.70710677, %v2518_v2  ;;  %v2521_v6 = vadd.f32 %v3529_v0, %v2520_v4  ;;  %v3717_v7 = vpop.f32.mrb[27].mxu0  ;;  %v2524_v52 = vmul.f32 0.5, %v2518_v2 }
 0xa1e   : > { %v2528_v8 = vand.u32 2147483647, %v2526_v5  ;;  %v2527_v9 = vmul.f32 0.70710677, %v2521_v6  ;;  %vm2568_vm9 = vcmp.ge.f32.partialorder %v2526_v5, 0.0  ;;  %v2525_v53 = vmul.f32 0.5, %v2521_v6 }
 0xa20   : > { %v2530_v10 = vmul.f32 0.3275911, %v2528_v8  ;;  %v2529_v11 = vand.u32 2147483647, %v2527_v9  ;;  %v2556_v15 = vsub.f32 0.0, %v2528_v8  ;;  %vm2569_vm10 = vcmp.ge.f32.partialorder %v2527_v9, 0.0 }
 0xa22   : > { %v2532_v12 = vadd.f32 1.0, %v2530_v10  ;;  %v2531_v13 = vmul.f32 0.3275911, %v2529_v11  ;;  %v2557_v16 = vsub.f32 0.0, %v2529_v11  ;;  %v2558_v18 = vmul.f32 %v2556_v15, %v2528_v8 }
 0xa24   : > { %4008 = vrcp.f32 %v2532_v12  ;;  %v2533_v14 = vadd.f32 1.0, %v2531_v13  ;;  %v2559_v25 = vmul.f32 %v2557_v16, %v2529_v11  ;;  %v2560_v26 = vmul.f32 1.442695, %v2558_v18 }
 0xa26   : > { %4010 = vrcp.f32 %v2533_v14  ;;  %v2562_v30 = vmul.f32 1.442695, %v2559_v25  ;;  %v3539_v25 = vld [vmem:[%s5573_s16] ss:$0 sm:$0xff] }
 0xa27   : > { %4012 = vpow2.f32 %v2560_v26 }
 0xa28   : > { %4014 = vpow2.f32 %v2562_v30 }
 0xa2e   : > { %v4009_v17 = vpop.eup %4008 }
 0xa2f   : > { %v2538_v22 = vmul.f32 1.0614054, %v4009_v17 }
 0xa30   : > { %v4011_v23 = vpop.eup %4010 }
 0xa31   : > { %v2540_v24 = vadd.f32 -1.4531521, %v2538_v22  ;;  %v2539_v27 = vmul.f32 1.0614054, %v4011_v23  ;;  %v4013_v40 = vpop.eup %4012 }
 0xa32   : > { %v4015_v43 = vpop.eup %4014 }
 0xa33   : > { %v2542_v28 = vmul.f32 %v4009_v17, %v2540_v24  ;;  %v2541_v29 = vadd.f32 -1.4531521, %v2539_v27 }
 0xa35   : > { %v2544_v21 = vadd.f32 1.4214138, %v2542_v28  ;;  %v2543_v31 = vmul.f32 %v4011_v23, %v2541_v29  ;;  %v3540_v28 = vld [vmem:[%s1459_s3] ss:$0 sm:$0xff]  ;;  %s5576_s3 = sld [smem:[#allocation53_spill]] (!%p3541_p2) }
 0xa37   : > { %v2546_v32 = vmul.f32 %v4009_v17, %v2544_v21  ;;  %v2545_v33 = vadd.f32 1.4214138, %v2543_v31 }
 0xa39   : > { %v2548_v34 = vadd.f32 -0.28449672, %v2546_v32  ;;  %v2547_v35 = vmul.f32 %v4011_v23, %v2545_v33  ;;  %v4022_v33 = vld [vmem:[%s5574_s1] sm:$0xff] (!%p3541_p2)  }
 0xa3b   : > { %v2550_v36 = vmul.f32 %v4009_v17, %v2548_v34  ;;  %v2549_v37 = vadd.f32 -0.28449672, %v2547_v35  ;;  %v4600_v34 = vmov (!%p3541_p2), 0.0  }
 0xa3c   : > { %3730 = vmatprep.subr.bf16.mxu0 (!%p3541_p2), %v4600_v34  ;;  %3738 = vmatprep.subr.bf16.mxu1 (!%p3541_p2), %v4600_v34 }
 0xa3d   : > { %v2552_v38 = vadd.f32 0.2548296, %v2550_v36  ;;  %v2551_v19 = vmul.f32 %v4011_v23, %v2549_v37  ;;  %3731 = vmatpush3.bf16.msra.mxu0 (!%p3541_p2), %v4022_v33  ;;  %v4023_v36 = vld [vmem:[%s5574_s1 + $0x8] sm:$0xff] (!%p3541_p2)   ;;  %3734 = vmatprep.mubr.msk.bf16.mxu0 (!%p3541_p2), %vm4601_vm12, %v4600_v34  ;;  %v3542_v37 = vld [vmem:[%s5575_s10] ss:$0 sm:$0xff] (!%p3541_p2) }
 0xa3e   : > { %3732 = vmatprep.subr.bf16.mxu0 (!%p3541_p2), %v4600_v34  ;;  %v4025_v33 = vld [vmem:[%s5578_s29 + $0x8] sm:$0xff] (!%p3541_p2)  }
 0xa3f   : > { %v2554_v39 = vmul.f32 %v4009_v17, %v2552_v38  ;;  %v2553_v41 = vadd.f32 0.2548296, %v2551_v19 }
 0xa41   : > { %v2564_v20 = vmul.f32 %v4013_v40, %v2554_v39  ;;  %v2555_v42 = vmul.f32 %v4011_v23, %v2553_v41  ;;  %3733 = vmatpush3.bf16.msra.mxu0 (!%p3541_p2), %v4023_v36  ;;  %v3546_v41 = vld [vmem:[%s5576_s3] ss:$0 sm:$0xff] (!%p3541_p2) }
 0xa42   : > { %3752 = vmatprep.subr.bf16.mxu0 (!%p3541_p2), %v4600_v34 }
 0xa43   : > { %v2566_v50 = vsub.f32 1.0, %v2564_v20  ;;  %v2565_v44 = vmul.f32 %v4015_v43, %v2555_v42 }
 0xa45   : > { %v2570_v45 = vsub.f32 0.0, %v2566_v50  ;;  %v2567_v46 = vsub.f32 1.0, %v2565_v44 }
 0xa47   : > { %v2572_v47 = vsel %vm2568_vm9, %v2566_v50, %v2570_v45  ;;  %v2571_v48 = vsub.f32 0.0, %v2567_v46 }
 0xa48   : > { %v2574_v49 = vadd.f32 1.0, %v2572_v47 }
 0xa49   : > { %v2573_v51 = vsel %vm2569_vm10, %v2567_v46, %v2571_v48  ;;  %v4602_v48 = vmov (!%p3541_p2), 0  }
 0xa4a   : > { %v2575_v54 = vadd.f32 1.0, %v2573_v51  ;;  %v2576_v55 = vmul.f32 %v2574_v49, %v2524_v52  ;;  %4020 = vset.pattern.permute.xlu1 (!%p3541_p2), %v4602_v48  ;;  %v3547_v49 = vld [vmem:[#allocation3] ss:$0 sm:$0xff] (!%p3541_p2) }
 0xa4c   : > { %v2577_v56 = vmul.f32 %v2575_v54, %v2525_v53 }
 0xa4e   : > { %v2578_v59 = vpack.c.bf16 %v2577_v56, %v2576_v55  ;;  %v3572_v55 = vld [vmem:[%s5577_s6] sm:$0xff] (!%p3541_p2)  }
 0xa4f   : > { %v3573_v56 = vunpack.c.l.bf16 (!%p3541_p2), %v3572_v55 }
 0xa50   : > { %3727 = vmatmul.mubr.msk.bf16.vlgmr.msra.gmra.mrb[12].mxu1 %vm2618_vm11, %v2578_v59  ;;  %v3574_v59 = vunpack.c.h.bf16 (!%p3541_p2), %v3572_v55 }
 0xa51   : > { %3740 = vmatprep.mubr.msk.bf16.mxu1 (!%p3541_p2), %vm4601_vm12, %v4600_v34  ;;  %vm2813_vm13 = vcmp.gt.f32.partialorder (!%p3541_p2), %v3573_v56, 0.0 }
 0xa52   : > { %vm2814_vm14 = vcmp.gt.f32.partialorder (!%p3541_p2), %v3574_v59, 0.0 }
 0xb23   : > { %v2656_v61 = vpop.f32.mrb[12].mxu1 }
 0xb24   : > { %v2657_v62 = vadd.f32 %v3533_v60, %v2656_v61  ;;  %v3728_v63 = vpop.f32.mrb[13].mxu1 }
 0xb25   : > { %v2659_v0 = vpop.f32.mrb[14].mxu1 }
 0xb26   : > { %v2660_v1 = vadd.f32 %v3533_v60, %v2659_v0  ;;  %v3729_v3 = vpop.f32.mrb[15].mxu1  ;;  %v2663_v4 = vadd.f32 %v2657_v62, %v5365_v57 }
 0xb28   : > { %v2667_v5 = vsel %vm1556_vm5, %v2663_v4, 0.0  ;;  %v2664_v2 = vadd.f32 %v2660_v1, %v5367_v58 }
 0xb29   : > { %2668 = vadd.xlane.f32.xlu0 %v2667_v5 }
 0xb2a   : > { %v2670_v6 = vsel %vm1556_vm5, %v2664_v2, 0.0 }
 0xb2b   : > { %2671 = vadd.xlane.f32.xlu1 %v2670_v6 }
 0xbb6   : > { %v2669_v7 = vpop.xlane.xlu0 %2668 }
 0xbb7   : > { %v2673_v8 = vmul.f32 0.03125, %v2669_v7 }
 0xbb8   : > { %v2672_v9 = vpop.xlane.xlu1 %2671 }
 0xbb9   : > { %v2675_v10 = vsub.f32 %v2663_v4, %v2673_v8  ;;  %v2674_v11 = vmul.f32 0.03125, %v2672_v9 }
 0xbbb   : > { %v2676_v12 = vsub.f32 %v2664_v2, %v2674_v11  ;;  %v2677_v13 = vmul.f32 %v2675_v10, %v2675_v10 }
 0xbbd   : > { %v2679_v14 = vsel %vm1556_vm5, %v2677_v13, 0.0  ;;  %v2678_v15 = vmul.f32 %v2676_v12, %v2676_v12 }
 0xbbe   : > { %2680 = vadd.xlane.f32.xlu0 %v2679_v14 }
 0xbbf   : > { %v2682_v57 = vsel %vm1556_vm5, %v2678_v15, 0.0 }
 0xbc0   : > { %2683 = vadd.xlane.f32.xlu1 %v2682_v57 }
 0xc4b   : > { %v2681_v58 = vpop.xlane.xlu0 %2680 }
 0xc4c   : > { %v2685_v16 = vmul.f32 0.03125, %v2681_v58 }
 0xc4d   : > { %v2684_v17 = vpop.xlane.xlu1 %2683 }
 0xc4e   : > { %v2687_v18 = vadd.f32 1e-05, %v2685_v16  ;;  %v2686_v22 = vmul.f32 0.03125, %v2684_v17 }
 0xc50   : > { %4016 = vrsqrt.f32 %v2687_v18  ;;  %v2688_v23 = vadd.f32 1e-05, %v2686_v22 }
 0xc52   : > { %4018 = vrsqrt.f32 %v2688_v23 }
 0xc5a   : > { %v4017_v24 = vpop.eup %4016 }
 0xc5b   : > { %v2691_v26 = vmul.f32 %v4017_v24, %v2675_v10 }
 0xc5c   : > { %v4019_v27 = vpop.eup %4018 }
 0xc5d   : > { %v2699_v29 = vmul.f32 %v3539_v25, %v2691_v26  ;;  %v2692_v21 = vmul.f32 %v4019_v27, %v2676_v12  ;;  %2714 = sbr.rel (%p3541_p2) target bundleno = 4530 (0x11b2), region = 208 }
 0xc5f   : > { %v2707_v30 = vadd.f32 %v3540_v28, %v2699_v29  ;;  %v2700_v31 = vmul.f32 %v3539_v25, %v2692_v21 }
 0xc61   : > { %2709 = vst.msk [vmem:[#allocation2] sm:$0xff] %vm1556_vm5, %v2707_v30  ;;  %v2708_v32 = vadd.f32 %v3540_v28, %v2700_v31  ;;  %v4024_v31 = vld [vmem:[%s5578_s29] sm:$0xff] (!%p3541_p2)  }
 0xc63   : > { %2710 = vst.msk [vmem:[#allocation2 + $0x8] sm:$0xff] %vm1556_vm5, %v2708_v32  ;;  %v2715_v35 = vpack.c.bf16 (!%p3541_p2), %v2708_v32, %v2707_v30 }
 0xc65   : > { %3739 = vmatpush3.bf16.msra.mxu1 %v2715_v35  ;;  %3735 = vmatmul.mubr.msk.bf16.vlgmr.msra.gmra.mrb[0].mxu0 %vm1556_vm5, %v2715_v35 }
 0xc66   : > { %3744 = vmatprep.subr.bf16.mxu1 %v4600_v34  ;;  %3756 = vmatprep.mubr.msk.bf16.mxu0 %vm4601_vm12, %v4600_v34 }
 0xd38   : > { %v2776_v38 = vpop.f32.mrb[0].mxu0 }
 0xd39   : > { %v2777_v19 = vadd.f32 %v3542_v37, %v2776_v38  ;;  %v3736_v39 = vpop.f32.mrb[1].mxu0 }
 0xd3a   : > { %v2779_v40 = vpop.f32.mrb[2].mxu0  ;;  %v4026_v39 = vld [vmem:[%s5579_s7] sm:$0xff]  }
 0xd3b   : > { %v2783_v20 = vmax.f32 %v2777_v19, 0.0  ;;  %v2780_v42 = vadd.f32 %v3542_v37, %v2779_v40  ;;  %v3737_v43 = vpop.f32.mrb[3].mxu0  ;;  %3753 = vmatpush3.bf16.msra.mxu0 %v4026_v39  ;;  %v4027_v40 = vld [vmem:[%s5579_s7 + $0x8] sm:$0xff]  }
 0xd3c   : > { %3754 = vmatprep.subr.bf16.mxu0 %v4600_v34 }
 0xd3d   : > { %v2784_v50 = vmax.f32 %v2780_v42, 0.0  ;;  %v2792_v44 = vmul.f32 %v3546_v41, %v2783_v20 }
 0xd3f   : > { %v2794_v45 = vsel %vm1556_vm5, %v2792_v44, 0.0  ;;  %v2793_v46 = vmul.f32 %v3546_v41, %v2784_v50  ;;  %3755 = vmatpush3.bf16.msra.mxu0 %v4027_v40  ;;  %v3549_v41 = vld [vmem:[%s5580_s22] ss:$0 sm:$0xff] }
 0xd40   : > { %2795 = vadd.xlane.f32.xlu0 %v2794_v45 }
 0xd41   : > { %v2797_v47 = vsel %vm1556_vm5, %v2793_v46, 0.0 }
 0xd44   : > { %2798 = vadd.xlane.f32.xlu0 %v2797_v47 }
 0xdcd   : > { %v2796_v51 = vpop.xlane.xlu0 %2795 }
 0xdce   : > { %v2807_v52 = vadd.f32 %v3547_v49, %v2796_v51 }
 0xdd0   : > { %2817 = vperm.xlu1 %4020, %v2807_v52  }
 0xdd1   : > { %v2799_v53 = vpop.xlane.xlu0 %2798 }
 0xdd2   : > { %v2808_v54 = vadd.f32 %v3547_v49, %v2799_v53 }
 0xdd4   : > { %2822 = vperm.xlu1 %4020, %v2808_v54  }
 0xe4f   : > { %v2818_v60 = vpop.permute.xlu1 %2817 }
 0xe50   : > { %v2825_v61 = vsel %vm2813_vm13, %v2818_v60, -1e+30 }
 0xe51   : > { %v2828_v0 = vsel %vm2827_vm15, %v2825_v61, -inf }
 0xe53   : > { %v2823_v62 = vpop.permute.xlu1 %2822 }
 0xe54   : > { %v2826_v63 = vsel %vm2814_vm14, %v2823_v62, -1e+30 }
 0xe55   : > { %v2829_v1 = vsel %vm2827_vm15, %v2826_v63, -inf }
 0xe56   : > { %v2830_v3 = vmax.f32 %v2828_v0, %v2829_v1 }
 0xe58   : > { %v2831_v4 = vrot.slane %v2830_v3, 4 }
 0xe5a   : > { %v2832_v5 = vmax.f32 %v2830_v3, %v2831_v4 }
 0xe5c   : > { %v2833_v2 = vrot.slane %v2832_v5, 2 }
 0xe5e   : > { %v2834_v6 = vmax.f32 %v2832_v5, %v2833_v2 }
 0xe60   : > { %v2835_v7 = vrot.slane %v2834_v6, 1 }
 0xe62   : > { %v2836_v8 = vmax.f32 %v2834_v6, %v2835_v7 }
 0xe64   : > { %v2837_v9 = vsub.f32 %v2825_v61, %v2836_v8  ;;  %v2838_v10 = vsub.f32 %v2826_v63, %v2836_v8 }
 0xe66   : > { %v2839_v11 = vmul.f32 1.442695, %v2837_v9  ;;  %v2841_v12 = vmul.f32 1.442695, %v2838_v10  ;;  %v3553_v9 = vld [vmem:[%s5581_s4] ss:$0 sm:$0xff] }
 0xe68   : > { %4028 = vpow2.f32 %v2839_v11 }
 0xe69   : > { %4030 = vpow2.f32 %v2841_v12 }
 0xe72   : > { %v4029_v13 = vpop.eup %4028 }
 0xe73   : > { %v4031_v14 = vpop.eup %4030  ;;  %v2843_v15 = vmul.f32 %v4029_v13, %v3573_v56 }
 0xe74   : > { %v2844_v57 = vmul.f32 %v4031_v14, %v3574_v59 }
 0xe75   : > { %v2845_v58 = vsel %vm2827_vm15, %v2843_v15, 0.0 }
 0xe76   : > { %v2846_v16 = vsel %vm2827_vm15, %v2844_v57, 0.0 }
 0xe77   : > { %v2847_v17 = vadd.f32 %v2846_v16, %v2845_v58 }
 0xe79   : > { %v2848_v18 = vrot.slane %v2847_v17, 4 }
 0xe7b   : > { %v2849_v22 = vadd.f32 %v2848_v18, %v2847_v17 }
 0xe7d   : > { %v2850_v23 = vrot.slane %v2849_v22, 2 }
 0xe7f   : > { %v2851_v24 = vadd.f32 %v2850_v23, %v2849_v22 }
 0xe81   : > { %v2852_v25 = vrot.slane %v2851_v24, 1 }
 0xe83   : > { %v2853_v26 = vadd.f32 %v2852_v25, %v2851_v24 }
 0xe85   : > { %v2854_v27 = vmax.f32 %v2853_v26, 1e-30 }
 0xe87   : > { %4032 = vrcp.f32 %v2854_v27 }
 0xe91   : > { %v4033_v28 = vpop.eup %4032 }
 0xe92   : > { %v2856_v29 = vmul.f32 %v4033_v28, %v2843_v15  ;;  %v2857_v21 = vmul.f32 %v4033_v28, %v2844_v57 }
 0xe94   : > { %v2858_v30 = vpack.c.bf16 %v2857_v21, %v2856_v29 }
 0xe96   : > { %2859 = vxpose.xlu0.c.b16.start.end [1/1] (short) (narrow) %v2858_v30, 16 }
 0xe9f   : > { %4021 = vset.pattern.permute.xlu0 %v4602_v48 }
 0xefc   : > { %v2867_v32 = vpop.trf.xlu0 }
 0xefd   : > { %3741 = vmatmul.mubr.msk.bf16.vlgmr.msra.gmra.mrb[0].mxu1 %vm1780_vm6, %v2867_v32 }
 0xefe   : > { %3745 = vmatpush3.bf16.msra.mxu1 %v4024_v31  ;;  %3748 = vmatprep.mubr.msk.bf16.mxu1 %vm4601_vm12, %v4600_v34 }
 0xeff   : > { %3746 = vmatprep.subr.bf16.mxu1 %v4600_v34 }
 0xf02   : > { %3747 = vmatpush3.bf16.msra.mxu1 %v4025_v33 }
 0xfd0   : > { %v2912_v35 = vpop.f32.mrb[0].mxu1 }
 0xfd1   : > { %v2918_v36 = vpack.c.bf16 %v2912_v35, %v2912_v35  ;;  %v3742_v37 = vpop.f32.mrb[1].mxu1 }
 0xfd2   : > { %v2915_v38 = vpop.f32.mrb[2].mxu1 }
 0xfd3   : > { %v3743_v19 = vpop.f32.mrb[3].mxu1  ;;  %3749 = vmatmul.mubr.msk.bf16.vlgmr.msra.gmra.mrb[4].mxu1 %vm1556_vm5, %v2918_v36 }
0x10a6   : > { %v2979_v20 = vpop.f32.mrb[4].mxu1 }
0x10a7   : > { %v2980_v42 = vadd.f32 %v3549_v41, %v2979_v20  ;;  %v3750_v43 = vpop.f32.mrb[5].mxu1 }
0x10a8   : > { %v2982_v50 = vpop.f32.mrb[6].mxu1 }
0x10a9   : > { %v2986_v44 = vmul.f32 0.70710677, %v2980_v42  ;;  %v3751_v45 = vpop.f32.mrb[7].mxu1  ;;  %v2985_v2 = vmul.f32 0.5, %v2980_v42 }
0x10ab   : > { %v2987_v46 = vand.u32 2147483647, %v2986_v44  ;;  %vm3007_vm0 = vcmp.ge.f32.partialorder %v2986_v44, 0.0 }
0x10ad   : > { %v2988_v47 = vmul.f32 0.3275911, %v2987_v46  ;;  %v3001_v49 = vsub.f32 0.0, %v2987_v46 }
0x10af   : > { %v2989_v48 = vadd.f32 1.0, %v2988_v47  ;;  %v3002_v52 = vmul.f32 %v3001_v49, %v2987_v46 }
0x10b1   : > { %4034 = vrcp.f32 %v2989_v48  ;;  %v3003_v55 = vmul.f32 1.442695, %v3002_v52 }
0x10b3   : > { %4036 = vpow2.f32 %v3003_v55 }
0x10bb   : > { %v4035_v51 = vpop.eup %4034 }
0x10bc   : > { %v2992_v53 = vmul.f32 1.0614054, %v4035_v51 }
0x10bd   : > { %v4037_v0 = vpop.eup %4036 }
0x10be   : > { %v2993_v54 = vadd.f32 -1.4531521, %v2992_v53 }
0x10c0   : > { %v2994_v34 = vmul.f32 %v4035_v51, %v2993_v54 }
0x10c2   : > { %v2995_v56 = vadd.f32 1.4214138, %v2994_v34 }
0x10c4   : > { %v2996_v59 = vmul.f32 %v4035_v51, %v2995_v56 }
0x10c6   : > { %v2997_v60 = vadd.f32 -0.28449672, %v2996_v59 }
0x10c8   : > { %v2998_v61 = vmul.f32 %v4035_v51, %v2997_v60 }
0x10ca   : > { %v2999_v62 = vadd.f32 0.2548296, %v2998_v61 }
0x10cc   : > { %v3000_v63 = vmul.f32 %v4035_v51, %v2999_v62 }
0x10ce   : > { %v3005_v1 = vmul.f32 %v4037_v0, %v3000_v63 }
0x10d0   : > { %v3006_v3 = vsub.f32 1.0, %v3005_v1 }
0x10d2   : > { %v3008_v4 = vsub.f32 0.0, %v3006_v3 }
0x10d4   : > { %v3009_v5 = vsel %vm3007_vm0, %v3006_v3, %v3008_v4 }
0x10d5   : > { %v3010_v6 = vadd.f32 1.0, %v3009_v5 }
0x10d7   : > { %v3011_v7 = vmul.f32 %v3010_v6, %v2985_v2 }
0x10d9   : > { %v3012_v8 = vpack.c.bf16 %v3011_v7, %v3011_v7 }
0x10db   : > { %3757 = vmatmul.mubr.msk.bf16.vlgmr.msra.gmra.mrb[4].mxu0 %vm1556_vm5, %v3012_v8 }
0x11ae   : > { %v3073_v10 = vpop.f32.mrb[4].mxu0 }
0x11af   : > { %v3074_v11 = vadd.f32 %v3553_v9, %v3073_v10  ;;  %v3758_v12 = vpop.f32.mrb[5].mxu0 }
0x11b0   : > { %v3076_v13 = vpop.f32.mrb[6].mxu0 }
0x11b1   : > { %3080 = vst.msk [vmem:[#allocation27] sm:$0x3] %vm3079_vm1, %v3074_v11  ;;  %v3759_v14 = vpop.f32.mrb[7].mxu0 }
0x11b2 PF: > { %p3861_p0 = scmp.eq.s32.totalorder %s4786_s26, 1  ;;  %s4603_s17 = smov [#allocation27]  }
0x11b3   : > { %s3088_s5 = sshll.u32 %s4603_s17, 4  ;;  %s3089_s5 = int_to_ptr.vmem [resolvable:$true] %s3088_s5 }
0x11b4   : > { %s4452_s25 = scalar_lea.vmem %s3089_s5, 32  ;;  %p4459_p10 = scmp.lt.s32.totalorder %s3089_s5, %s3089_s5 }
0x11b5   : > { %p4453_p8 = scmp.ne.s32.totalorder %s3089_s5, %s4452_s25  ;;  %p4460_p1 = scmp.lt.s32.totalorder %s4452_s25, %s4452_s25 }
0x11b7   : > { %p4454_p9 = pnand %p4453_p8, %p3861_p0  ;;  %p4461_p3 = por %p4460_p1, %p4459_p10 }
0x11b9   : > { %p4455_p7 = pneg %p4454_p9 }
0x11bb   : > { %p4462_p13 = pnand %p4461_p3, %p4455_p7 }
0x11bd   : > { %4465 = shalt.err (!%p4462_p13)
}
0x11be   : > { %s5582_s28 = sld [smem:[#allocation58_spill]] }
0x11c4   : > { %s4466_s2 = scalar_lea.hbm %s5582_s28, 32 }
0x11c5   : > { %p4467_p11 = scmp.ne.s32.totalorder %s5582_s28, %s4466_s2  ;;  %p4472_p6 = scmp.lt.u32.totalorder %s4466_s2, %s5582_s28 }
0x11c7   : > { %p4468_p12 = pnand %p4467_p11, %p3861_p0 }
0x11c9   : > { %p4469_p4 = pneg %p4468_p12 }
0x11cb   : > { %p4474_p5 = pnand %p4472_p6, %p4469_p4 }
0x11cd   : > { %4477 = shalt.err (!%p4474_p5)
}
0x11ce   : > { %3807 = dma.vmem_to_hbm [thread:$0]  (%p3861_p0), %s3089_s5, 32, %s5582_s28, [#allocation6]  }
0x11cf   : > { %4527 = dma.done.wait (%p3861_p0), [#allocation6], 32  }
0x11d0   : > { %4529 = vsyncadd (%p3861_p0), [#allocation6], 4294967264 }
0x11d1 PF: > { %s5583_s22 = sld [smem:[#allocation60_spill]]  ;;  %s5584_s15 = sld [smem:[#allocation59_spill]] }
0x11d2   : > { %s5585_s14 = sld [smem:[#allocation61_spill]]  ;;  %s5586_s23 = smov %s4536_s0 }
0x11d7   : > { %p93_p2 = scmp.ge.s32.totalorder %s5583_s22, 4   ;;  %s5587_s0 = smov %s5584_s15 }
0x11d9   :  { %95 = sbr.rel (!%p93_p2) target bundleno = 74 (0x4a), region = 374 }
0x11e0   :  { %3101 = vsyncpa [#allocation5], 1 }
0x11e1   :  { %3103 = vsyncpa [#allocation5 + $0x1], 1 }
0x11e2   :  { %3104 = vsyncpa [#allocation8], 1 }
0x11e3   :  { %3105 = vsyncpa [#allocation11], 1 }
0x11e4   :  { %3107 = vsyncpa [#allocation11 + $0x1], 1 }
0x11e5   :  { %3108 = vsyncpa [#allocation14], 1 }
0x11e6   :  { %3110 = vsyncpa [#allocation14 + $0x1], 1 }
0x11e7   :  { %3111 = vsyncpa [#allocation17], 1 }
0x11e8   :  { %3113 = vsyncpa [#allocation17 + $0x1], 1 }
0x11e9   :  { %3114 = vsyncpa [#allocation20], 1 }
0x11ea   :  { %3116 = vsyncpa [#allocation20 + $0x1], 1 }
0x11eb   :  { %3117 = vsyncpa [#allocation23], 1 }
0x11ec   :  { %3119 = vsyncpa [#allocation23 + $0x1], 1 }
0x11ed   :  { %3120 = vsyncpa [#allocation26], 1 }
0x11ee   :  { %3122 = vsyncpa [#allocation26 + $0x1], 1 }
0x11ef   :  { %3123 = vsyncpa [#allocation6], 1 }
0x11f0   :  { %3125 = vsyncpa [#allocation6 + $0x1], 1 }

</bundles_post_ra>
